<compile_context>
chip_gen: v7x
topology: tpu7x:2x2x1
jax: 0.10.0
libtpu: 0.0.40
codegen_flags: <defaults>
</compile_context>

<pallas_src>
import jax
import jax.numpy as jnp
from jax.experimental import pallas as pl
from jax.experimental.pallas import tpu as pltpu


# --------------------------------------------------------------------------
# Kernel
# --------------------------------------------------------------------------
def _make_kernel(gates_bf16: bool):
    f32, bf16 = jnp.float32, jnp.bfloat16

    def kernel(enc_x_ref, emb_ref, enc_w_ref, enc_b_ref,
               dec_w_ref, dec_b_ref, gen_w_ref, gen_b_ref, out_ref):
        T, Bt, E = enc_x_ref.shape
        L = out_ref.shape[0]
        V = emb_ref.shape[0]
        H = gen_w_ref.shape[0]

        def lstm_step(h, c, x_bf16, w_ref, b_ref):
            # Fused [x | h] @ [W_ih ; W_hh]: one K=E+H MXU pass per step.
            xh = jnp.concatenate([x_bf16, h.astype(bf16)], axis=-1)
            z = jnp.dot(xh, w_ref[...], preferred_element_type=f32) + b_ref[...]
            # bf16 gate inputs on v6e/v7x (EUP bf16 -> ~2x transcendental
            # throughput); cell state / c-update stay f32.
            zg = z.astype(bf16) if gates_bf16 else z
            i_g = jax.nn.sigmoid(zg[:, 0 * H:1 * H]).astype(f32)
            f_g = jax.nn.sigmoid(zg[:, 1 * H:2 * H]).astype(f32)
            g_g = jnp.tanh(zg[:, 2 * H:3 * H]).astype(f32)
            o_g = jax.nn.sigmoid(zg[:, 3 * H:4 * H]).astype(f32)
            c_new = f_g * c + i_g * g_g
            h_new = o_g * jnp.tanh(c_new)
            return h_new, c_new

        # ---------------- encoder ----------------
        def enc_body(t, carry):
            h, c = carry
            return lstm_step(h, c, enc_x_ref[t], enc_w_ref, enc_b_ref)

        h0 = jnp.zeros((Bt, H), f32)
        c0 = jnp.zeros((Bt, H), f32)
        h, c = jax.lax.fori_loop(0, T, enc_body, (h0, c0), unroll=T <= 8)

        # ---------------- greedy decoder ----------------
        # First decoder input: embedding of token 0 (torch.zeros(...).long()).
        x0 = jnp.broadcast_to(emb_ref[pl.ds(0, 1), :], (Bt, E))

        def dec_body(step, carry):
            h, c, x = carry
            h, c = lstm_step(h, c, x, dec_w_ref, dec_b_ref)
            logits = (jnp.dot(h.astype(bf16), gen_w_ref[...],
                              preferred_element_type=f32) + gen_b_ref[...])
            out_ref[step] = logits.astype(out_ref.dtype)

            # argmax (first maximal index) -> one-hot -> next input embedding.
            lane = jax.lax.broadcasted_iota(jnp.int32, (Bt, V), 1)
            m = jnp.max(logits, axis=-1, keepdims=True)
            idx = jnp.min(jnp.where(logits == m, lane, V),
                          axis=-1, keepdims=True)
            onehot = (lane == idx).astype(bf16)
            # TODO(synk): swap for a row gather / DMA at 10k vocab.
            x_next = jnp.dot(onehot, emb_ref[...],
                             preferred_element_type=f32).astype(bf16)
            return h, c, x_next

        _ = jax.lax.fori_loop(0, L, dec_body, (h, c, x0), unroll=L <= 8)

    return kernel


# --------------------------------------------------------------------------
# VMEM budgeting / tile selection
# --------------------------------------------------------------------------
def _device_kind():
    try:
        return jax.devices()[0].device_kind.lower()
    except Exception:
        return ""


def _is_v7(kind):
    return ("v7" in kind) or ("7x" in kind)


def _prefer_bf16_gates(kind):
    # EUP has bf16 on v6e/v7x only; on v5e bf16 gates would just add casts.
    return ("v6" in kind) or _is_v7(kind)


def _vmem_budget_bytes(kind):
    if _is_v7(kind):
        return 48 << 20          # v7x: 64 MiB physical per TC, keep headroom
    return 100 << 20             # v5e / v6e: 128 MiB physical


def _vmem_block_bytes(T, Bt, E, H, V, L, out_itemsize, weight_bufs):
    weights = (V * E * 2                                   # embedding (bf16)
               + 2 * ((E + H) * 4 * H * 2 + 4 * H * 4)     # enc/dec W + bias
               + H * V * 2 + V * 4)                        # generator W + bias
    inputs = 2 * (T * Bt * E * 2)                          # enc emb, dbl-buf
    outputs = 2 * (L * Bt * V * out_itemsize)              # logits, dbl-buf
    return weight_bufs * weights + inputs + outputs


def _choose_batch_tile(B, T, E, H, V, L, out_itemsize, budget):
    # TODO(synk): sweep batch_tile in {64,128,256} per TPU generation; the
    # binding unit (MXU vs EUP vs spill) differs between v5e and v6e/v7x.
    headroom = 8 << 20
    cands = [bt for bt in (256, 128, 64, 32, 16, 8) if bt <= B and B % bt == 0]
    if not cands:
        return B                 # tiny / odd batch: one full-batch block
    fits = [bt for bt in cands
            if _vmem_block_bytes(T, bt, E, H, V, L, out_itemsize, 1)
            + headroom <= budget]
    if not fits:
        return cands[-1]         # smallest tile; vmem_limit still caps usage
    bt = fits[0]
    if B // bt < 2:              # keep >=2 grid steps (both v7x TCs) if we can
        for smaller in fits[1:]:
            if B // smaller >= 2:
                return smaller
    return bt


# --------------------------------------------------------------------------
# Wrapper
# --------------------------------------------------------------------------
def fix_generator_forward(tokens, params, *, max_length=20, batch_tile=None,
                          out_dtype=jnp.float32, gates_bf16=None,
                          time_major=False):
    """tokens: (B, T) int32 -> logits.

    Returns (B, max_length, V) by default (PyTorch layout).  Perf-sensitive
    consumers should pass time_major=True to get the kernel's native
    lane-dense (max_length, B, V) layout and skip the extra HBM round-trip,
    and may pass out_dtype=jnp.bfloat16 to halve logits traffic."""
    (emb, enc_w, enc_b, dec_w, dec_b, gen_w, gen_b) = params
    B, T = tokens.shape
    V, E = emb.shape
    H = gen_w.shape[0]
    L = int(max_length)

    kind = _device_kind()
    if gates_bf16 is None:
        gates_bf16 = _prefer_bf16_gates(kind)
    budget = _vmem_budget_bytes(kind)
    out_itemsize = jnp.dtype(out_dtype).itemsize

    if batch_tile is None:
        batch_tile = _choose_batch_tile(B, T, E, H, V, L, out_itemsize, budget)
    assert B % batch_tile == 0
    assert batch_tile % 8 == 0 or batch_tile == B
    grid = (B // batch_tile,)

    # Encoder embeddings gathered by XLA (no in-kernel one-hot matmuls),
    # laid out time-major so each timestep is a leading-axis read in-kernel.
    enc_x = jnp.transpose(emb[tokens.astype(jnp.int32)], (1, 0, 2))  # (T,B,E)

    vmem_limit = int(min(budget,
                         max(_vmem_block_bytes(T, batch_tile, E, H, V, L,
                                               out_itemsize, 1) + (8 << 20),
                             32 << 20)))

    kernel = _make_kernel(bool(gates_bf16))

    def run(weight_pipeline_mode):
        kw = ({} if weight_pipeline_mode is None
              else {"pipeline_mode": weight_pipeline_mode})

        def rep(shape):  # replicated weights / tables (constant block index)
            return pl.BlockSpec(shape, lambda i, _s=shape: (0,) * len(_s), **kw)

        return pl.pallas_call(
            kernel,
            out_shape=jax.ShapeDtypeStruct((L, B, V), out_dtype),
            grid_spec=pltpu.PrefetchScalarGridSpec(
                num_scalar_prefetch=0,
                grid=grid,
                in_specs=[
                    pl.BlockSpec((T, batch_tile, E), lambda i: (0, i, 0)),
                    rep((V, E)),                               # embedding table
                    rep((E + H, 4 * H)), rep((1, 4 * H)),      # encoder LSTM
                    rep((E + H, 4 * H)), rep((1, 4 * H)),      # decoder LSTM
                    rep((H, V)), rep((1, V)),                  # generator
                ],
                out_specs=pl.BlockSpec((L, batch_tile, V),
                                       lambda i: (0, i, 0)),
            ),
            compiler_params=pltpu.CompilerParams(
                dimension_semantics=("parallel",),
                vmem_limit_bytes=vmem_limit,
            ),
        )(enc_x, emb, enc_w, enc_b, dec_w, dec_b, gen_w, gen_b)

    try:
        # Replicated weights fetched once -> single buffer saves VMEM.
        out = run(pl.Buffered(1))
    except Exception:
        # pipeline_mode support varies across jax versions; default buffering.
        out = run(None)

    if time_major:
        return out                               # (L, B, V), no extra HBM pass
    return jnp.transpose(out, (1, 0, 2))         # PyTorch-compatible (B, L, V)


# --------------------------------------------------------------------------
# Params + pure-JAX reference (mirrors kernel numerics exactly)
# --------------------------------------------------------------------------
def init_params(key, vocab, embed_dim, hidden_dim):
    """PyTorch defaults: Embedding ~ N(0,1); LSTM / Linear ~ U(+-1/sqrt(H)).
    LSTM W_ih / W_hh pre-concatenated into one (E+H, 4H) operand (fused MXU
    contraction); b_ih + b_hh folded.  Matmul operands stored in bf16."""
    ks = jax.random.split(key, 11)
    bound = 1.0 / float(jnp.sqrt(hidden_dim))
    bf16, f32 = jnp.bfloat16, jnp.float32

    def u(kk, shape):
        return jax.random.uniform(kk, shape, f32, -bound, bound)

    emb = jax.random.normal(ks[0], (vocab, embed_dim), f32).astype(bf16)

    enc_w = jnp.concatenate([u(ks[1], (embed_dim, 4 * hidden_dim)),
                             u(ks[2], (hidden_dim, 4 * hidden_dim))],
                            axis=0).astype(bf16)
    enc_b = u(ks[3], (1, 4 * hidden_dim)) + u(ks[4], (1, 4 * hidden_dim))

    dec_w = jnp.concatenate([u(ks[5], (embed_dim, 4 * hidden_dim)),
                             u(ks[6], (hidden_dim, 4 * hidden_dim))],
                            axis=0).astype(bf16)
    dec_b = u(ks[7], (1, 4 * hidden_dim)) + u(ks[8], (1, 4 * hidden_dim))

    gen_w = u(ks[9], (hidden_dim, vocab)).astype(bf16)
    gen_b = u(ks[10], (1, vocab))
    return (emb, enc_w, enc_b, dec_w, dec_b, gen_w, gen_b)


def reference_forward(tokens, params, max_length, *, gates_bf16=False):
    """Pure-JAX reference with identical numerics (bf16 operands, f32 accum,
    fused [x|h] contraction, optional bf16 gate inputs)."""
    (emb, enc_w, enc_b, dec_w, dec_b, gen_w, gen_b) = params
    B, T = tokens.shape
    V, E = emb.shape
    H = gen_w.shape[0]
    f32, bf16 = jnp.float32, jnp.bfloat16

    def lstm_step(h, c, x, w, b):
        xh = jnp.concatenate([x, h.astype(bf16)], axis=-1)
        z = jnp.dot(xh, w, preferred_element_type=f32) + b
        zg = z.astype(bf16) if gates_bf16 else z
        i = jax.nn.sigmoid(zg[:, :H]).astype(f32)
        f = jax.nn.sigmoid(zg[:, H:2 * H]).astype(f32)
        g = jnp.tanh(zg[:, 2 * H:3 * H]).astype(f32)
        o = jax.nn.sigmoid(zg[:, 3 * H:]).astype(f32)
        c = f * c + i * g
        h = o * jnp.tanh(c)
        return h, c

    h = jnp.zeros((B, H), f32)
    c = jnp.zeros((B, H), f32)
    x_seq = emb[tokens]
    for t in range(T):
        h, c = lstm_step(h, c, x_seq[:, t, :], enc_w, enc_b)

    x = jnp.broadcast_to(emb[0:1, :], (B, E))
    outs = []
    for _ in range(max_length):
        h, c = lstm_step(h, c, x, dec_w, dec_b)
        logits = jnp.dot(h.astype(bf16), gen_w, preferred_element_type=f32) + gen_b
        outs.append(logits)
        x = emb[jnp.argmax(logits, axis=-1)]
    return jnp.stack(outs, axis=1)


# --------------------------------------------------------------------------
if __name__ == "__main__":
    # Small shapes consistent with the module (scaled-down vocab/dims).
    VOCAB, EMBED, HIDDEN = 512, 128, 128
    BATCH, SEQ, MAX_LEN = 8, 8, 4

    key = jax.random.PRNGKey(0)
    k_param, k_tok = jax.random.split(key)
    params = init_params(k_param, VOCAB, EMBED, HIDDEN)
    tokens = jax.random.randint(k_tok, (BATCH, SEQ), 0, VOCAB, dtype=jnp.int32)

    # Strict numerical check vs. the pure-JAX reference.  Gates kept in f32
    # here so nonlinearity rounding cannot flip the greedy argmax feedback
    # between the two separately-compiled programs.
    out = fix_generator_forward(tokens, params, max_length=MAX_LEN,
                                gates_bf16=False)
    out = jax.block_until_ready(out)
    assert out.shape == (BATCH, MAX_LEN, VOCAB)

    ref = reference_forward(tokens, params, MAX_LEN, gates_bf16=False)
    max_err = jnp.max(jnp.abs(out - ref))
    assert jnp.allclose(out, ref, atol=2e-2, rtol=2e-2), \
        f"mismatch, max abs err={max_err}"

    # Exercise the hardware-tuned path (bf16 gates on v6e/v7x, transpose-free
    # time-major output) to make sure it also compiles and runs.
    out_tm = fix_generator_forward(tokens, params, max_length=MAX_LEN,
                                   time_major=True)
    out_tm = jax.block_until_ready(out_tm)
    assert out_tm.shape == (MAX_LEN, BATCH, VOCAB)
    assert bool(jnp.all(jnp.isfinite(out_tm)))

    print("KERNEL_OK")
</pallas_src>

<mosaic_0001>
module attributes {stable_mosaic.version = 11 : i64} {
  func.func @kernel(%arg0: i32, %arg1: memref<8x8x128xbf16, #tpu.memory_space<vmem>>, %arg2: memref<512x128xbf16, #tpu.memory_space<vmem>>, %arg3: memref<256x512xbf16, #tpu.memory_space<vmem>>, %arg4: memref<1x512xf32, #tpu.memory_space<vmem>>, %arg5: memref<256x512xbf16, #tpu.memory_space<vmem>>, %arg6: memref<1x512xf32, #tpu.memory_space<vmem>>, %arg7: memref<128x512xbf16, #tpu.memory_space<vmem>>, %arg8: memref<1x512xf32, #tpu.memory_space<vmem>>, %arg9: memref<4x8x512xf32, #tpu.memory_space<vmem>>) attributes {dimension_semantics = [#tpu.dimension_semantics<parallel>], iteration_bounds = array<i64: 1>, scalar_prefetch = 0 : i64, scratch_operands = 0 : i64, tpu.core_type = #tpu.core_type<tc>, window_params = [{transform_indices = @transform_0, window_bounds = array<i64: 8, 8, 128>}, {pipeline_mode = #tpu.pipeline_mode<synchronous>, transform_indices = @transform_1, window_bounds = array<i64: 512, 128>}, {pipeline_mode = #tpu.pipeline_mode<synchronous>, transform_indices = @transform_2, window_bounds = array<i64: 256, 512>}, {pipeline_mode = #tpu.pipeline_mode<synchronous>, transform_indices = @transform_3, window_bounds = array<i64: 1, 512>}, {pipeline_mode = #tpu.pipeline_mode<synchronous>, transform_indices = @transform_4, window_bounds = array<i64: 256, 512>}, {pipeline_mode = #tpu.pipeline_mode<synchronous>, transform_indices = @transform_5, window_bounds = array<i64: 1, 512>}, {pipeline_mode = #tpu.pipeline_mode<synchronous>, transform_indices = @transform_6, window_bounds = array<i64: 128, 512>}, {pipeline_mode = #tpu.pipeline_mode<synchronous>, transform_indices = @transform_7, window_bounds = array<i64: 1, 512>}, {transform_indices = @transform_8, window_bounds = array<i64: 4, 8, 512>}]} {
    %cst = arith.constant 0.000000e+00 : f32
    %0 = vector.broadcast %cst : f32 to vector<8x128xf32>
    %cst_0 = arith.constant 0.000000e+00 : f32
    %1 = vector.broadcast %cst_0 : f32 to vector<8x128xf32>
    %c0_i32 = arith.constant 0 : i32
    %2 = arith.index_cast %c0_i32 : i32 to index
    %c0 = arith.constant 0 : index
    %c0_1 = arith.constant 0 : index
    %3 = vector.load %arg1[%2, %c0, %c0_1] : memref<8x8x128xbf16, #tpu.memory_space<vmem>>, vector<1x8x128xbf16>
    %4 = vector.shape_cast %3 : vector<1x8x128xbf16> to vector<8x128xbf16>
    %5 = arith.truncf %0 : vector<8x128xf32> to vector<8x128xbf16>
    %6 = tpu.concatenate %4, %5 in 1 : vector<8x128xbf16>, vector<8x128xbf16> -> vector<8x256xbf16>
    %c0_2 = arith.constant 0 : index
    %c0_3 = arith.constant 0 : index
    %7 = vector.load %arg3[%c0_2, %c0_3] : memref<256x512xbf16, #tpu.memory_space<vmem>>, vector<256x512xbf16>
    %cst_4 = arith.constant dense<0.000000e+00> : vector<8x512xf32>
    %8 = tpu.matmul %6, %7, %cst_4 {dimension_numbers = #tpu.dot_dimension_numbers<[1], [0], [0], [1], [0, 0, 1, 1], [], []>} : vector<8x256xbf16>, vector<256x512xbf16>, vector<8x512xf32> -> vector<8x512xf32>
    %c0_5 = arith.constant 0 : index
    %c0_6 = arith.constant 0 : index
    %9 = vector.load %arg4[%c0_5, %c0_6] : memref<1x512xf32, #tpu.memory_space<vmem>>, vector<1x512xf32>
    %10 = vector.broadcast %9 : vector<1x512xf32> to vector<8x512xf32>
    %11 = arith.addf %8, %10 : vector<8x512xf32>
    %12 = vector.extract_strided_slice %11 {offsets = [0, 0], sizes = [8, 128], strides = [1, 1]} : vector<8x512xf32> to vector<8x128xf32>
    %13 = arith.negf %12 : vector<8x128xf32>
    %14 = math.exp %13 : vector<8x128xf32>
    %cst_7 = arith.constant 1.000000e+00 : f32
    %15 = vector.broadcast %cst_7 : f32 to vector<8x128xf32>
    %16 = arith.addf %15, %14 : vector<8x128xf32>
    %17 = arith.divf %15, %16 : vector<8x128xf32>
    %18 = vector.extract_strided_slice %11 {offsets = [0, 128], sizes = [8, 128], strides = [1, 1]} : vector<8x512xf32> to vector<8x128xf32>
    %19 = arith.negf %18 : vector<8x128xf32>
    %20 = math.exp %19 : vector<8x128xf32>
    %cst_8 = arith.constant 1.000000e+00 : f32
    %21 = vector.broadcast %cst_8 : f32 to vector<8x128xf32>
    %22 = arith.addf %21, %20 : vector<8x128xf32>
    %23 = arith.divf %21, %22 : vector<8x128xf32>
    %24 = vector.extract_strided_slice %11 {offsets = [0, 256], sizes = [8, 128], strides = [1, 1]} : vector<8x512xf32> to vector<8x128xf32>
    %25 = math.tanh %24 : vector<8x128xf32>
    %26 = vector.extract_strided_slice %11 {offsets = [0, 384], sizes = [8, 128], strides = [1, 1]} : vector<8x512xf32> to vector<8x128xf32>
    %27 = arith.negf %26 : vector<8x128xf32>
    %28 = math.exp %27 : vector<8x128xf32>
    %cst_9 = arith.constant 1.000000e+00 : f32
    %29 = vector.broadcast %cst_9 : f32 to vector<8x128xf32>
    %30 = arith.addf %29, %28 : vector<8x128xf32>
    %31 = arith.divf %29, %30 : vector<8x128xf32>
    %32 = arith.mulf %23, %1 : vector<8x128xf32>
    %33 = arith.mulf %17, %25 : vector<8x128xf32>
    %34 = arith.addf %32, %33 : vector<8x128xf32>
    %35 = math.tanh %34 : vector<8x128xf32>
    %36 = arith.mulf %31, %35 : vector<8x128xf32>
    %c1_i32 = arith.constant 1 : i32
    %37 = arith.index_cast %c1_i32 : i32 to index
    %c0_10 = arith.constant 0 : index
    %c0_11 = arith.constant 0 : index
    %38 = vector.load %arg1[%37, %c0_10, %c0_11] : memref<8x8x128xbf16, #tpu.memory_space<vmem>>, vector<1x8x128xbf16>
    %39 = vector.shape_cast %38 : vector<1x8x128xbf16> to vector<8x128xbf16>
    %40 = arith.truncf %36 : vector<8x128xf32> to vector<8x128xbf16>
    %41 = tpu.concatenate %39, %40 in 1 : vector<8x128xbf16>, vector<8x128xbf16> -> vector<8x256xbf16>
    %c0_12 = arith.constant 0 : index
    %c0_13 = arith.constant 0 : index
    %42 = vector.load %arg3[%c0_12, %c0_13] : memref<256x512xbf16, #tpu.memory_space<vmem>>, vector<256x512xbf16>
    %cst_14 = arith.constant dense<0.000000e+00> : vector<8x512xf32>
    %43 = tpu.matmul %41, %42, %cst_14 {dimension_numbers = #tpu.dot_dimension_numbers<[1], [0], [0], [1], [0, 0, 1, 1], [], []>} : vector<8x256xbf16>, vector<256x512xbf16>, vector<8x512xf32> -> vector<8x512xf32>
    %c0_15 = arith.constant 0 : index
    %c0_16 = arith.constant 0 : index
    %44 = vector.load %arg4[%c0_15, %c0_16] : memref<1x512xf32, #tpu.memory_space<vmem>>, vector<1x512xf32>
    %45 = vector.broadcast %44 : vector<1x512xf32> to vector<8x512xf32>
    %46 = arith.addf %43, %45 : vector<8x512xf32>
    %47 = vector.extract_strided_slice %46 {offsets = [0, 0], sizes = [8, 128], strides = [1, 1]} : vector<8x512xf32> to vector<8x128xf32>
    %48 = arith.negf %47 : vector<8x128xf32>
    %49 = math.exp %48 : vector<8x128xf32>
    %cst_17 = arith.constant 1.000000e+00 : f32
    %50 = vector.broadcast %cst_17 : f32 to vector<8x128xf32>
    %51 = arith.addf %50, %49 : vector<8x128xf32>
    %52 = arith.divf %50, %51 : vector<8x128xf32>
    %53 = vector.extract_strided_slice %46 {offsets = [0, 128], sizes = [8, 128], strides = [1, 1]} : vector<8x512xf32> to vector<8x128xf32>
    %54 = arith.negf %53 : vector<8x128xf32>
    %55 = math.exp %54 : vector<8x128xf32>
    %cst_18 = arith.constant 1.000000e+00 : f32
    %56 = vector.broadcast %cst_18 : f32 to vector<8x128xf32>
    %57 = arith.addf %56, %55 : vector<8x128xf32>
    %58 = arith.divf %56, %57 : vector<8x128xf32>
    %59 = vector.extract_strided_slice %46 {offsets = [0, 256], sizes = [8, 128], strides = [1, 1]} : vector<8x512xf32> to vector<8x128xf32>
    %60 = math.tanh %59 : vector<8x128xf32>
    %61 = vector.extract_strided_slice %46 {offsets = [0, 384], sizes = [8, 128], strides = [1, 1]} : vector<8x512xf32> to vector<8x128xf32>
    %62 = arith.negf %61 : vector<8x128xf32>
    %63 = math.exp %62 : vector<8x128xf32>
    %cst_19 = arith.constant 1.000000e+00 : f32
    %64 = vector.broadcast %cst_19 : f32 to vector<8x128xf32>
    %65 = arith.addf %64, %63 : vector<8x128xf32>
    %66 = arith.divf %64, %65 : vector<8x128xf32>
    %67 = arith.mulf %58, %34 : vector<8x128xf32>
    %68 = arith.mulf %52, %60 : vector<8x128xf32>
    %69 = arith.addf %67, %68 : vector<8x128xf32>
    %70 = math.tanh %69 : vector<8x128xf32>
    %71 = arith.mulf %66, %70 : vector<8x128xf32>
    %c2_i32 = arith.constant 2 : i32
    %72 = arith.index_cast %c2_i32 : i32 to index
    %c0_20 = arith.constant 0 : index
    %c0_21 = arith.constant 0 : index
    %73 = vector.load %arg1[%72, %c0_20, %c0_21] : memref<8x8x128xbf16, #tpu.memory_space<vmem>>, vector<1x8x128xbf16>
    %74 = vector.shape_cast %73 : vector<1x8x128xbf16> to vector<8x128xbf16>
    %75 = arith.truncf %71 : vector<8x128xf32> to vector<8x128xbf16>
    %76 = tpu.concatenate %74, %75 in 1 : vector<8x128xbf16>, vector<8x128xbf16> -> vector<8x256xbf16>
    %c0_22 = arith.constant 0 : index
    %c0_23 = arith.constant 0 : index
    %77 = vector.load %arg3[%c0_22, %c0_23] : memref<256x512xbf16, #tpu.memory_space<vmem>>, vector<256x512xbf16>
    %cst_24 = arith.constant dense<0.000000e+00> : vector<8x512xf32>
    %78 = tpu.matmul %76, %77, %cst_24 {dimension_numbers = #tpu.dot_dimension_numbers<[1], [0], [0], [1], [0, 0, 1, 1], [], []>} : vector<8x256xbf16>, vector<256x512xbf16>, vector<8x512xf32> -> vector<8x512xf32>
    %c0_25 = arith.constant 0 : index
    %c0_26 = arith.constant 0 : index
    %79 = vector.load %arg4[%c0_25, %c0_26] : memref<1x512xf32, #tpu.memory_space<vmem>>, vector<1x512xf32>
    %80 = vector.broadcast %79 : vector<1x512xf32> to vector<8x512xf32>
    %81 = arith.addf %78, %80 : vector<8x512xf32>
    %82 = vector.extract_strided_slice %81 {offsets = [0, 0], sizes = [8, 128], strides = [1, 1]} : vector<8x512xf32> to vector<8x128xf32>
    %83 = arith.negf %82 : vector<8x128xf32>
    %84 = math.exp %83 : vector<8x128xf32>
    %cst_27 = arith.constant 1.000000e+00 : f32
    %85 = vector.broadcast %cst_27 : f32 to vector<8x128xf32>
    %86 = arith.addf %85, %84 : vector<8x128xf32>
    %87 = arith.divf %85, %86 : vector<8x128xf32>
    %88 = vector.extract_strided_slice %81 {offsets = [0, 128], sizes = [8, 128], strides = [1, 1]} : vector<8x512xf32> to vector<8x128xf32>
    %89 = arith.negf %88 : vector<8x128xf32>
    %90 = math.exp %89 : vector<8x128xf32>
    %cst_28 = arith.constant 1.000000e+00 : f32
    %91 = vector.broadcast %cst_28 : f32 to vector<8x128xf32>
    %92 = arith.addf %91, %90 : vector<8x128xf32>
    %93 = arith.divf %91, %92 : vector<8x128xf32>
    %94 = vector.extract_strided_slice %81 {offsets = [0, 256], sizes = [8, 128], strides = [1, 1]} : vector<8x512xf32> to vector<8x128xf32>
    %95 = math.tanh %94 : vector<8x128xf32>
    %96 = vector.extract_strided_slice %81 {offsets = [0, 384], sizes = [8, 128], strides = [1, 1]} : vector<8x512xf32> to vector<8x128xf32>
    %97 = arith.negf %96 : vector<8x128xf32>
    %98 = math.exp %97 : vector<8x128xf32>
    %cst_29 = arith.constant 1.000000e+00 : f32
    %99 = vector.broadcast %cst_29 : f32 to vector<8x128xf32>
    %100 = arith.addf %99, %98 : vector<8x128xf32>
    %101 = arith.divf %99, %100 : vector<8x128xf32>
    %102 = arith.mulf %93, %69 : vector<8x128xf32>
    %103 = arith.mulf %87, %95 : vector<8x128xf32>
    %104 = arith.addf %102, %103 : vector<8x128xf32>
    %105 = math.tanh %104 : vector<8x128xf32>
    %106 = arith.mulf %101, %105 : vector<8x128xf32>
    %c3_i32 = arith.constant 3 : i32
    %107 = arith.index_cast %c3_i32 : i32 to index
    %c0_30 = arith.constant 0 : index
    %c0_31 = arith.constant 0 : index
    %108 = vector.load %arg1[%107, %c0_30, %c0_31] : memref<8x8x128xbf16, #tpu.memory_space<vmem>>, vector<1x8x128xbf16>
    %109 = vector.shape_cast %108 : vector<1x8x128xbf16> to vector<8x128xbf16>
    %110 = arith.truncf %106 : vector<8x128xf32> to vector<8x128xbf16>
    %111 = tpu.concatenate %109, %110 in 1 : vector<8x128xbf16>, vector<8x128xbf16> -> vector<8x256xbf16>
    %c0_32 = arith.constant 0 : index
    %c0_33 = arith.constant 0 : index
    %112 = vector.load %arg3[%c0_32, %c0_33] : memref<256x512xbf16, #tpu.memory_space<vmem>>, vector<256x512xbf16>
    %cst_34 = arith.constant dense<0.000000e+00> : vector<8x512xf32>
    %113 = tpu.matmul %111, %112, %cst_34 {dimension_numbers = #tpu.dot_dimension_numbers<[1], [0], [0], [1], [0, 0, 1, 1], [], []>} : vector<8x256xbf16>, vector<256x512xbf16>, vector<8x512xf32> -> vector<8x512xf32>
    %c0_35 = arith.constant 0 : index
    %c0_36 = arith.constant 0 : index
    %114 = vector.load %arg4[%c0_35, %c0_36] : memref<1x512xf32, #tpu.memory_space<vmem>>, vector<1x512xf32>
    %115 = vector.broadcast %114 : vector<1x512xf32> to vector<8x512xf32>
    %116 = arith.addf %113, %115 : vector<8x512xf32>
    %117 = vector.extract_strided_slice %116 {offsets = [0, 0], sizes = [8, 128], strides = [1, 1]} : vector<8x512xf32> to vector<8x128xf32>
    %118 = arith.negf %117 : vector<8x128xf32>
    %119 = math.exp %118 : vector<8x128xf32>
    %cst_37 = arith.constant 1.000000e+00 : f32
    %120 = vector.broadcast %cst_37 : f32 to vector<8x128xf32>
    %121 = arith.addf %120, %119 : vector<8x128xf32>
    %122 = arith.divf %120, %121 : vector<8x128xf32>
    %123 = vector.extract_strided_slice %116 {offsets = [0, 128], sizes = [8, 128], strides = [1, 1]} : vector<8x512xf32> to vector<8x128xf32>
    %124 = arith.negf %123 : vector<8x128xf32>
    %125 = math.exp %124 : vector<8x128xf32>
    %cst_38 = arith.constant 1.000000e+00 : f32
    %126 = vector.broadcast %cst_38 : f32 to vector<8x128xf32>
    %127 = arith.addf %126, %125 : vector<8x128xf32>
    %128 = arith.divf %126, %127 : vector<8x128xf32>
    %129 = vector.extract_strided_slice %116 {offsets = [0, 256], sizes = [8, 128], strides = [1, 1]} : vector<8x512xf32> to vector<8x128xf32>
    %130 = math.tanh %129 : vector<8x128xf32>
    %131 = vector.extract_strided_slice %116 {offsets = [0, 384], sizes = [8, 128], strides = [1, 1]} : vector<8x512xf32> to vector<8x128xf32>
    %132 = arith.negf %131 : vector<8x128xf32>
    %133 = math.exp %132 : vector<8x128xf32>
    %cst_39 = arith.constant 1.000000e+00 : f32
    %134 = vector.broadcast %cst_39 : f32 to vector<8x128xf32>
    %135 = arith.addf %134, %133 : vector<8x128xf32>
    %136 = arith.divf %134, %135 : vector<8x128xf32>
    %137 = arith.mulf %128, %104 : vector<8x128xf32>
    %138 = arith.mulf %122, %130 : vector<8x128xf32>
    %139 = arith.addf %137, %138 : vector<8x128xf32>
    %140 = math.tanh %139 : vector<8x128xf32>
    %141 = arith.mulf %136, %140 : vector<8x128xf32>
    %c4_i32 = arith.constant 4 : i32
    %142 = arith.index_cast %c4_i32 : i32 to index
    %c0_40 = arith.constant 0 : index
    %c0_41 = arith.constant 0 : index
    %143 = vector.load %arg1[%142, %c0_40, %c0_41] : memref<8x8x128xbf16, #tpu.memory_space<vmem>>, vector<1x8x128xbf16>
    %144 = vector.shape_cast %143 : vector<1x8x128xbf16> to vector<8x128xbf16>
    %145 = arith.truncf %141 : vector<8x128xf32> to vector<8x128xbf16>
    %146 = tpu.concatenate %144, %145 in 1 : vector<8x128xbf16>, vector<8x128xbf16> -> vector<8x256xbf16>
    %c0_42 = arith.constant 0 : index
    %c0_43 = arith.constant 0 : index
    %147 = vector.load %arg3[%c0_42, %c0_43] : memref<256x512xbf16, #tpu.memory_space<vmem>>, vector<256x512xbf16>
    %cst_44 = arith.constant dense<0.000000e+00> : vector<8x512xf32>
    %148 = tpu.matmul %146, %147, %cst_44 {dimension_numbers = #tpu.dot_dimension_numbers<[1], [0], [0], [1], [0, 0, 1, 1], [], []>} : vector<8x256xbf16>, vector<256x512xbf16>, vector<8x512xf32> -> vector<8x512xf32>
    %c0_45 = arith.constant 0 : index
    %c0_46 = arith.constant 0 : index
    %149 = vector.load %arg4[%c0_45, %c0_46] : memref<1x512xf32, #tpu.memory_space<vmem>>, vector<1x512xf32>
    %150 = vector.broadcast %149 : vector<1x512xf32> to vector<8x512xf32>
    %151 = arith.addf %148, %150 : vector<8x512xf32>
    %152 = vector.extract_strided_slice %151 {offsets = [0, 0], sizes = [8, 128], strides = [1, 1]} : vector<8x512xf32> to vector<8x128xf32>
    %153 = arith.negf %152 : vector<8x128xf32>
    %154 = math.exp %153 : vector<8x128xf32>
    %cst_47 = arith.constant 1.000000e+00 : f32
    %155 = vector.broadcast %cst_47 : f32 to vector<8x128xf32>
    %156 = arith.addf %155, %154 : vector<8x128xf32>
    %157 = arith.divf %155, %156 : vector<8x128xf32>
    %158 = vector.extract_strided_slice %151 {offsets = [0, 128], sizes = [8, 128], strides = [1, 1]} : vector<8x512xf32> to vector<8x128xf32>
    %159 = arith.negf %158 : vector<8x128xf32>
    %160 = math.exp %159 : vector<8x128xf32>
    %cst_48 = arith.constant 1.000000e+00 : f32
    %161 = vector.broadcast %cst_48 : f32 to vector<8x128xf32>
    %162 = arith.addf %161, %160 : vector<8x128xf32>
    %163 = arith.divf %161, %162 : vector<8x128xf32>
    %164 = vector.extract_strided_slice %151 {offsets = [0, 256], sizes = [8, 128], strides = [1, 1]} : vector<8x512xf32> to vector<8x128xf32>
    %165 = math.tanh %164 : vector<8x128xf32>
    %166 = vector.extract_strided_slice %151 {offsets = [0, 384], sizes = [8, 128], strides = [1, 1]} : vector<8x512xf32> to vector<8x128xf32>
    %167 = arith.negf %166 : vector<8x128xf32>
    %168 = math.exp %167 : vector<8x128xf32>
    %cst_49 = arith.constant 1.000000e+00 : f32
    %169 = vector.broadcast %cst_49 : f32 to vector<8x128xf32>
    %170 = arith.addf %169, %168 : vector<8x128xf32>
    %171 = arith.divf %169, %170 : vector<8x128xf32>
    %172 = arith.mulf %163, %139 : vector<8x128xf32>
    %173 = arith.mulf %157, %165 : vector<8x128xf32>
    %174 = arith.addf %172, %173 : vector<8x128xf32>
    %175 = math.tanh %174 : vector<8x128xf32>
    %176 = arith.mulf %171, %175 : vector<8x128xf32>
    %c5_i32 = arith.constant 5 : i32
    %177 = arith.index_cast %c5_i32 : i32 to index
    %c0_50 = arith.constant 0 : index
    %c0_51 = arith.constant 0 : index
    %178 = vector.load %arg1[%177, %c0_50, %c0_51] : memref<8x8x128xbf16, #tpu.memory_space<vmem>>, vector<1x8x128xbf16>
    %179 = vector.shape_cast %178 : vector<1x8x128xbf16> to vector<8x128xbf16>
    %180 = arith.truncf %176 : vector<8x128xf32> to vector<8x128xbf16>
    %181 = tpu.concatenate %179, %180 in 1 : vector<8x128xbf16>, vector<8x128xbf16> -> vector<8x256xbf16>
    %c0_52 = arith.constant 0 : index
    %c0_53 = arith.constant 0 : index
    %182 = vector.load %arg3[%c0_52, %c0_53] : memref<256x512xbf16, #tpu.memory_space<vmem>>, vector<256x512xbf16>
    %cst_54 = arith.constant dense<0.000000e+00> : vector<8x512xf32>
    %183 = tpu.matmul %181, %182, %cst_54 {dimension_numbers = #tpu.dot_dimension_numbers<[1], [0], [0], [1], [0, 0, 1, 1], [], []>} : vector<8x256xbf16>, vector<256x512xbf16>, vector<8x512xf32> -> vector<8x512xf32>
    %c0_55 = arith.constant 0 : index
    %c0_56 = arith.constant 0 : index
    %184 = vector.load %arg4[%c0_55, %c0_56] : memref<1x512xf32, #tpu.memory_space<vmem>>, vector<1x512xf32>
    %185 = vector.broadcast %184 : vector<1x512xf32> to vector<8x512xf32>
    %186 = arith.addf %183, %185 : vector<8x512xf32>
    %187 = vector.extract_strided_slice %186 {offsets = [0, 0], sizes = [8, 128], strides = [1, 1]} : vector<8x512xf32> to vector<8x128xf32>
    %188 = arith.negf %187 : vector<8x128xf32>
    %189 = math.exp %188 : vector<8x128xf32>
    %cst_57 = arith.constant 1.000000e+00 : f32
    %190 = vector.broadcast %cst_57 : f32 to vector<8x128xf32>
    %191 = arith.addf %190, %189 : vector<8x128xf32>
    %192 = arith.divf %190, %191 : vector<8x128xf32>
    %193 = vector.extract_strided_slice %186 {offsets = [0, 128], sizes = [8, 128], strides = [1, 1]} : vector<8x512xf32> to vector<8x128xf32>
    %194 = arith.negf %193 : vector<8x128xf32>
    %195 = math.exp %194 : vector<8x128xf32>
    %cst_58 = arith.constant 1.000000e+00 : f32
    %196 = vector.broadcast %cst_58 : f32 to vector<8x128xf32>
    %197 = arith.addf %196, %195 : vector<8x128xf32>
    %198 = arith.divf %196, %197 : vector<8x128xf32>
    %199 = vector.extract_strided_slice %186 {offsets = [0, 256], sizes = [8, 128], strides = [1, 1]} : vector<8x512xf32> to vector<8x128xf32>
    %200 = math.tanh %199 : vector<8x128xf32>
    %201 = vector.extract_strided_slice %186 {offsets = [0, 384], sizes = [8, 128], strides = [1, 1]} : vector<8x512xf32> to vector<8x128xf32>
    %202 = arith.negf %201 : vector<8x128xf32>
    %203 = math.exp %202 : vector<8x128xf32>
    %cst_59 = arith.constant 1.000000e+00 : f32
    %204 = vector.broadcast %cst_59 : f32 to vector<8x128xf32>
    %205 = arith.addf %204, %203 : vector<8x128xf32>
    %206 = arith.divf %204, %205 : vector<8x128xf32>
    %207 = arith.mulf %198, %174 : vector<8x128xf32>
    %208 = arith.mulf %192, %200 : vector<8x128xf32>
    %209 = arith.addf %207, %208 : vector<8x128xf32>
    %210 = math.tanh %209 : vector<8x128xf32>
    %211 = arith.mulf %206, %210 : vector<8x128xf32>
    %c6_i32 = arith.constant 6 : i32
    %212 = arith.index_cast %c6_i32 : i32 to index
    %c0_60 = arith.constant 0 : index
    %c0_61 = arith.constant 0 : index
    %213 = vector.load %arg1[%212, %c0_60, %c0_61] : memref<8x8x128xbf16, #tpu.memory_space<vmem>>, vector<1x8x128xbf16>
    %214 = vector.shape_cast %213 : vector<1x8x128xbf16> to vector<8x128xbf16>
    %215 = arith.truncf %211 : vector<8x128xf32> to vector<8x128xbf16>
    %216 = tpu.concatenate %214, %215 in 1 : vector<8x128xbf16>, vector<8x128xbf16> -> vector<8x256xbf16>
    %c0_62 = arith.constant 0 : index
    %c0_63 = arith.constant 0 : index
    %217 = vector.load %arg3[%c0_62, %c0_63] : memref<256x512xbf16, #tpu.memory_space<vmem>>, vector<256x512xbf16>
    %cst_64 = arith.constant dense<0.000000e+00> : vector<8x512xf32>
    %218 = tpu.matmul %216, %217, %cst_64 {dimension_numbers = #tpu.dot_dimension_numbers<[1], [0], [0], [1], [0, 0, 1, 1], [], []>} : vector<8x256xbf16>, vector<256x512xbf16>, vector<8x512xf32> -> vector<8x512xf32>
    %c0_65 = arith.constant 0 : index
    %c0_66 = arith.constant 0 : index
    %219 = vector.load %arg4[%c0_65, %c0_66] : memref<1x512xf32, #tpu.memory_space<vmem>>, vector<1x512xf32>
    %220 = vector.broadcast %219 : vector<1x512xf32> to vector<8x512xf32>
    %221 = arith.addf %218, %220 : vector<8x512xf32>
    %222 = vector.extract_strided_slice %221 {offsets = [0, 0], sizes = [8, 128], strides = [1, 1]} : vector<8x512xf32> to vector<8x128xf32>
    %223 = arith.negf %222 : vector<8x128xf32>
    %224 = math.exp %223 : vector<8x128xf32>
    %cst_67 = arith.constant 1.000000e+00 : f32
    %225 = vector.broadcast %cst_67 : f32 to vector<8x128xf32>
    %226 = arith.addf %225, %224 : vector<8x128xf32>
    %227 = arith.divf %225, %226 : vector<8x128xf32>
    %228 = vector.extract_strided_slice %221 {offsets = [0, 128], sizes = [8, 128], strides = [1, 1]} : vector<8x512xf32> to vector<8x128xf32>
    %229 = arith.negf %228 : vector<8x128xf32>
    %230 = math.exp %229 : vector<8x128xf32>
    %cst_68 = arith.constant 1.000000e+00 : f32
    %231 = vector.broadcast %cst_68 : f32 to vector<8x128xf32>
    %232 = arith.addf %231, %230 : vector<8x128xf32>
    %233 = arith.divf %231, %232 : vector<8x128xf32>
    %234 = vector.extract_strided_slice %221 {offsets = [0, 256], sizes = [8, 128], strides = [1, 1]} : vector<8x512xf32> to vector<8x128xf32>
    %235 = math.tanh %234 : vector<8x128xf32>
    %236 = vector.extract_strided_slice %221 {offsets = [0, 384], sizes = [8, 128], strides = [1, 1]} : vector<8x512xf32> to vector<8x128xf32>
    %237 = arith.negf %236 : vector<8x128xf32>
    %238 = math.exp %237 : vector<8x128xf32>
    %cst_69 = arith.constant 1.000000e+00 : f32
    %239 = vector.broadcast %cst_69 : f32 to vector<8x128xf32>
    %240 = arith.addf %239, %238 : vector<8x128xf32>
    %241 = arith.divf %239, %240 : vector<8x128xf32>
    %242 = arith.mulf %233, %209 : vector<8x128xf32>
    %243 = arith.mulf %227, %235 : vector<8x128xf32>
    %244 = arith.addf %242, %243 : vector<8x128xf32>
    %245 = math.tanh %244 : vector<8x128xf32>
    %246 = arith.mulf %241, %245 : vector<8x128xf32>
    %c7_i32 = arith.constant 7 : i32
    %247 = arith.index_cast %c7_i32 : i32 to index
    %c0_70 = arith.constant 0 : index
    %c0_71 = arith.constant 0 : index
    %248 = vector.load %arg1[%247, %c0_70, %c0_71] : memref<8x8x128xbf16, #tpu.memory_space<vmem>>, vector<1x8x128xbf16>
    %249 = vector.shape_cast %248 : vector<1x8x128xbf16> to vector<8x128xbf16>
    %250 = arith.truncf %246 : vector<8x128xf32> to vector<8x128xbf16>
    %251 = tpu.concatenate %249, %250 in 1 : vector<8x128xbf16>, vector<8x128xbf16> -> vector<8x256xbf16>
    %c0_72 = arith.constant 0 : index
    %c0_73 = arith.constant 0 : index
    %252 = vector.load %arg3[%c0_72, %c0_73] : memref<256x512xbf16, #tpu.memory_space<vmem>>, vector<256x512xbf16>
    %cst_74 = arith.constant dense<0.000000e+00> : vector<8x512xf32>
    %253 = tpu.matmul %251, %252, %cst_74 {dimension_numbers = #tpu.dot_dimension_numbers<[1], [0], [0], [1], [0, 0, 1, 1], [], []>} : vector<8x256xbf16>, vector<256x512xbf16>, vector<8x512xf32> -> vector<8x512xf32>
    %c0_75 = arith.constant 0 : index
    %c0_76 = arith.constant 0 : index
    %254 = vector.load %arg4[%c0_75, %c0_76] : memref<1x512xf32, #tpu.memory_space<vmem>>, vector<1x512xf32>
    %255 = vector.broadcast %254 : vector<1x512xf32> to vector<8x512xf32>
    %256 = arith.addf %253, %255 : vector<8x512xf32>
    %257 = vector.extract_strided_slice %256 {offsets = [0, 0], sizes = [8, 128], strides = [1, 1]} : vector<8x512xf32> to vector<8x128xf32>
    %258 = arith.negf %257 : vector<8x128xf32>
    %259 = math.exp %258 : vector<8x128xf32>
    %cst_77 = arith.constant 1.000000e+00 : f32
    %260 = vector.broadcast %cst_77 : f32 to vector<8x128xf32>
    %261 = arith.addf %260, %259 : vector<8x128xf32>
    %262 = arith.divf %260, %261 : vector<8x128xf32>
    %263 = vector.extract_strided_slice %256 {offsets = [0, 128], sizes = [8, 128], strides = [1, 1]} : vector<8x512xf32> to vector<8x128xf32>
    %264 = arith.negf %263 : vector<8x128xf32>
    %265 = math.exp %264 : vector<8x128xf32>
    %cst_78 = arith.constant 1.000000e+00 : f32
    %266 = vector.broadcast %cst_78 : f32 to vector<8x128xf32>
    %267 = arith.addf %266, %265 : vector<8x128xf32>
    %268 = arith.divf %266, %267 : vector<8x128xf32>
    %269 = vector.extract_strided_slice %256 {offsets = [0, 256], sizes = [8, 128], strides = [1, 1]} : vector<8x512xf32> to vector<8x128xf32>
    %270 = math.tanh %269 : vector<8x128xf32>
    %271 = vector.extract_strided_slice %256 {offsets = [0, 384], sizes = [8, 128], strides = [1, 1]} : vector<8x512xf32> to vector<8x128xf32>
    %272 = arith.negf %271 : vector<8x128xf32>
    %273 = math.exp %272 : vector<8x128xf32>
    %cst_79 = arith.constant 1.000000e+00 : f32
    %274 = vector.broadcast %cst_79 : f32 to vector<8x128xf32>
    %275 = arith.addf %274, %273 : vector<8x128xf32>
    %276 = arith.divf %274, %275 : vector<8x128xf32>
    %277 = arith.mulf %268, %244 : vector<8x128xf32>
    %278 = arith.mulf %262, %270 : vector<8x128xf32>
    %279 = arith.addf %277, %278 : vector<8x128xf32>
    %280 = math.tanh %279 : vector<8x128xf32>
    %281 = arith.mulf %276, %280 : vector<8x128xf32>
    %c8_i32 = arith.constant 8 : i32
    %c0_80 = arith.constant 0 : index
    %c0_81 = arith.constant 0 : index
    %282 = vector.load %arg2[%c0_80, %c0_81] : memref<512x128xbf16, #tpu.memory_space<vmem>>, vector<1x128xbf16>
    %283 = vector.shape_cast %282 : vector<1x128xbf16> to vector<1x128xbf16>
    %284 = vector.broadcast %283 : vector<1x128xbf16> to vector<8x128xbf16>
    %c0_i32_82 = arith.constant 0 : i32
    %285 = arith.truncf %281 : vector<8x128xf32> to vector<8x128xbf16>
    %286 = tpu.concatenate %284, %285 in 1 : vector<8x128xbf16>, vector<8x128xbf16> -> vector<8x256xbf16>
    %c0_83 = arith.constant 0 : index
    %c0_84 = arith.constant 0 : index
    %287 = vector.load %arg5[%c0_83, %c0_84] : memref<256x512xbf16, #tpu.memory_space<vmem>>, vector<256x512xbf16>
    %cst_85 = arith.constant dense<0.000000e+00> : vector<8x512xf32>
    %288 = tpu.matmul %286, %287, %cst_85 {dimension_numbers = #tpu.dot_dimension_numbers<[1], [0], [0], [1], [0, 0, 1, 1], [], []>} : vector<8x256xbf16>, vector<256x512xbf16>, vector<8x512xf32> -> vector<8x512xf32>
    %c0_86 = arith.constant 0 : index
    %c0_87 = arith.constant 0 : index
    %289 = vector.load %arg6[%c0_86, %c0_87] : memref<1x512xf32, #tpu.memory_space<vmem>>, vector<1x512xf32>
    %290 = vector.broadcast %289 : vector<1x512xf32> to vector<8x512xf32>
    %291 = arith.addf %288, %290 : vector<8x512xf32>
    %292 = vector.extract_strided_slice %291 {offsets = [0, 0], sizes = [8, 128], strides = [1, 1]} : vector<8x512xf32> to vector<8x128xf32>
    %293 = arith.negf %292 : vector<8x128xf32>
    %294 = math.exp %293 : vector<8x128xf32>
    %cst_88 = arith.constant 1.000000e+00 : f32
    %295 = vector.broadcast %cst_88 : f32 to vector<8x128xf32>
    %296 = arith.addf %295, %294 : vector<8x128xf32>
    %297 = arith.divf %295, %296 : vector<8x128xf32>
    %298 = vector.extract_strided_slice %291 {offsets = [0, 128], sizes = [8, 128], strides = [1, 1]} : vector<8x512xf32> to vector<8x128xf32>
    %299 = arith.negf %298 : vector<8x128xf32>
    %300 = math.exp %299 : vector<8x128xf32>
    %cst_89 = arith.constant 1.000000e+00 : f32
    %301 = vector.broadcast %cst_89 : f32 to vector<8x128xf32>
    %302 = arith.addf %301, %300 : vector<8x128xf32>
    %303 = arith.divf %301, %302 : vector<8x128xf32>
    %304 = vector.extract_strided_slice %291 {offsets = [0, 256], sizes = [8, 128], strides = [1, 1]} : vector<8x512xf32> to vector<8x128xf32>
    %305 = math.tanh %304 : vector<8x128xf32>
    %306 = vector.extract_strided_slice %291 {offsets = [0, 384], sizes = [8, 128], strides = [1, 1]} : vector<8x512xf32> to vector<8x128xf32>
    %307 = arith.negf %306 : vector<8x128xf32>
    %308 = math.exp %307 : vector<8x128xf32>
    %cst_90 = arith.constant 1.000000e+00 : f32
    %309 = vector.broadcast %cst_90 : f32 to vector<8x128xf32>
    %310 = arith.addf %309, %308 : vector<8x128xf32>
    %311 = arith.divf %309, %310 : vector<8x128xf32>
    %312 = arith.mulf %303, %279 : vector<8x128xf32>
    %313 = arith.mulf %297, %305 : vector<8x128xf32>
    %314 = arith.addf %312, %313 : vector<8x128xf32>
    %315 = math.tanh %314 : vector<8x128xf32>
    %316 = arith.mulf %311, %315 : vector<8x128xf32>
    %317 = arith.truncf %316 : vector<8x128xf32> to vector<8x128xbf16>
    %c0_91 = arith.constant 0 : index
    %c0_92 = arith.constant 0 : index
    %318 = vector.load %arg7[%c0_91, %c0_92] : memref<128x512xbf16, #tpu.memory_space<vmem>>, vector<128x512xbf16>
    %cst_93 = arith.constant dense<0.000000e+00> : vector<8x512xf32>
    %319 = tpu.matmul %317, %318, %cst_93 {dimension_numbers = #tpu.dot_dimension_numbers<[1], [0], [0], [1], [0, 0, 1, 1], [], []>} : vector<8x128xbf16>, vector<128x512xbf16>, vector<8x512xf32> -> vector<8x512xf32>
    %c0_94 = arith.constant 0 : index
    %c0_95 = arith.constant 0 : index
    %320 = vector.load %arg8[%c0_94, %c0_95] : memref<1x512xf32, #tpu.memory_space<vmem>>, vector<1x512xf32>
    %321 = vector.broadcast %320 : vector<1x512xf32> to vector<8x512xf32>
    %322 = arith.addf %319, %321 : vector<8x512xf32>
    %323 = arith.index_cast %c0_i32_82 : i32 to index
    %c0_96 = arith.constant 0 : index
    %c0_97 = arith.constant 0 : index
    %324 = vector.load %arg9[%323, %c0_96, %c0_97] : memref<4x8x512xf32, #tpu.memory_space<vmem>>, vector<1x8x512xf32>
    %325 = vector.shape_cast %324 : vector<1x8x512xf32> to vector<8x512xf32>
    %326 = vector.shape_cast %322 : vector<8x512xf32> to vector<1x8x512xf32>
    tpu.vector_store %arg9[%323, %c0_96, %c0_97], %326 {strides = array<i32>} : memref<4x8x512xf32, #tpu.memory_space<vmem>>, vector<1x8x512xf32>,
    %327 = tpu.iota {dimensions = array<i32: 1>} : vector<8x512xi32>
    %cst_98 = arith.constant dense<0xFF800000> : vector<8xf32>
    %328 = vector.multi_reduction <maximumf>, %322, %cst_98 [1] : vector<8x512xf32> to vector<8xf32>
    %329 = vector.shape_cast %328 : vector<8xf32> to vector<8x1xf32>
    %330 = vector.broadcast %329 : vector<8x1xf32> to vector<8x512xf32>
    %331 = arith.cmpf oeq, %322, %330 : vector<8x512xf32>
    %c512_i32 = arith.constant 512 : i32
    %332 = vector.broadcast %c512_i32 : i32 to vector<8x512xi32>
    %333 = arith.select %331, %327, %332 : vector<8x512xi1>, vector<8x512xi32>
    %cst_99 = arith.constant dense<2147483647> : vector<8xi32>
    %334 = vector.multi_reduction <minsi>, %333, %cst_99 [1] : vector<8x512xi32> to vector<8xi32>
    %335 = vector.shape_cast %334 : vector<8xi32> to vector<8x1xi32>
    %336 = vector.broadcast %335 : vector<8x1xi32> to vector<8x512xi32>
    %337 = arith.cmpi eq, %327, %336 : vector<8x512xi32>
    %338 = arith.extui %337 : vector<8x512xi1> to vector<8x512xi32>
    %339 = arith.sitofp %338 : vector<8x512xi32> to vector<8x512xf32>
    %340 = arith.truncf %339 : vector<8x512xf32> to vector<8x512xbf16>
    %c0_100 = arith.constant 0 : index
    %c0_101 = arith.constant 0 : index
    %341 = vector.load %arg2[%c0_100, %c0_101] : memref<512x128xbf16, #tpu.memory_space<vmem>>, vector<512x128xbf16>
    %cst_102 = arith.constant dense<0.000000e+00> : vector<8x128xf32>
    %342 = tpu.matmul %340, %341, %cst_102 {dimension_numbers = #tpu.dot_dimension_numbers<[1], [0], [0], [1], [0, 0, 1, 1], [], []>} : vector<8x512xbf16>, vector<512x128xbf16>, vector<8x128xf32> -> vector<8x128xf32>
    %343 = arith.truncf %342 : vector<8x128xf32> to vector<8x128xbf16>
    %c1_i32_103 = arith.constant 1 : i32
    %344 = arith.truncf %316 : vector<8x128xf32> to vector<8x128xbf16>
    %345 = tpu.concatenate %343, %344 in 1 : vector<8x128xbf16>, vector<8x128xbf16> -> vector<8x256xbf16>
    %c0_104 = arith.constant 0 : index
    %c0_105 = arith.constant 0 : index
    %346 = vector.load %arg5[%c0_104, %c0_105] : memref<256x512xbf16, #tpu.memory_space<vmem>>, vector<256x512xbf16>
    %cst_106 = arith.constant dense<0.000000e+00> : vector<8x512xf32>
    %347 = tpu.matmul %345, %346, %cst_106 {dimension_numbers = #tpu.dot_dimension_numbers<[1], [0], [0], [1], [0, 0, 1, 1], [], []>} : vector<8x256xbf16>, vector<256x512xbf16>, vector<8x512xf32> -> vector<8x512xf32>
    %c0_107 = arith.constant 0 : index
    %c0_108 = arith.constant 0 : index
    %348 = vector.load %arg6[%c0_107, %c0_108] : memref<1x512xf32, #tpu.memory_space<vmem>>, vector<1x512xf32>
    %349 = vector.broadcast %348 : vector<1x512xf32> to vector<8x512xf32>
    %350 = arith.addf %347, %349 : vector<8x512xf32>
    %351 = vector.extract_strided_slice %350 {offsets = [0, 0], sizes = [8, 128], strides = [1, 1]} : vector<8x512xf32> to vector<8x128xf32>
    %352 = arith.negf %351 : vector<8x128xf32>
    %353 = math.exp %352 : vector<8x128xf32>
    %cst_109 = arith.constant 1.000000e+00 : f32
    %354 = vector.broadcast %cst_109 : f32 to vector<8x128xf32>
    %355 = arith.addf %354, %353 : vector<8x128xf32>
    %356 = arith.divf %354, %355 : vector<8x128xf32>
    %357 = vector.extract_strided_slice %350 {offsets = [0, 128], sizes = [8, 128], strides = [1, 1]} : vector<8x512xf32> to vector<8x128xf32>
    %358 = arith.negf %357 : vector<8x128xf32>
    %359 = math.exp %358 : vector<8x128xf32>
    %cst_110 = arith.constant 1.000000e+00 : f32
    %360 = vector.broadcast %cst_110 : f32 to vector<8x128xf32>
    %361 = arith.addf %360, %359 : vector<8x128xf32>
    %362 = arith.divf %360, %361 : vector<8x128xf32>
    %363 = vector.extract_strided_slice %350 {offsets = [0, 256], sizes = [8, 128], strides = [1, 1]} : vector<8x512xf32> to vector<8x128xf32>
    %364 = math.tanh %363 : vector<8x128xf32>
    %365 = vector.extract_strided_slice %350 {offsets = [0, 384], sizes = [8, 128], strides = [1, 1]} : vector<8x512xf32> to vector<8x128xf32>
    %366 = arith.negf %365 : vector<8x128xf32>
    %367 = math.exp %366 : vector<8x128xf32>
    %cst_111 = arith.constant 1.000000e+00 : f32
    %368 = vector.broadcast %cst_111 : f32 to vector<8x128xf32>
    %369 = arith.addf %368, %367 : vector<8x128xf32>
    %370 = arith.divf %368, %369 : vector<8x128xf32>
    %371 = arith.mulf %362, %314 : vector<8x128xf32>
    %372 = arith.mulf %356, %364 : vector<8x128xf32>
    %373 = arith.addf %371, %372 : vector<8x128xf32>
    %374 = math.tanh %373 : vector<8x128xf32>
    %375 = arith.mulf %370, %374 : vector<8x128xf32>
    %376 = arith.truncf %375 : vector<8x128xf32> to vector<8x128xbf16>
    %c0_112 = arith.constant 0 : index
    %c0_113 = arith.constant 0 : index
    %377 = vector.load %arg7[%c0_112, %c0_113] : memref<128x512xbf16, #tpu.memory_space<vmem>>, vector<128x512xbf16>
    %cst_114 = arith.constant dense<0.000000e+00> : vector<8x512xf32>
    %378 = tpu.matmul %376, %377, %cst_114 {dimension_numbers = #tpu.dot_dimension_numbers<[1], [0], [0], [1], [0, 0, 1, 1], [], []>} : vector<8x128xbf16>, vector<128x512xbf16>, vector<8x512xf32> -> vector<8x512xf32>
    %c0_115 = arith.constant 0 : index
    %c0_116 = arith.constant 0 : index
    %379 = vector.load %arg8[%c0_115, %c0_116] : memref<1x512xf32, #tpu.memory_space<vmem>>, vector<1x512xf32>
    %380 = vector.broadcast %379 : vector<1x512xf32> to vector<8x512xf32>
    %381 = arith.addf %378, %380 : vector<8x512xf32>
    %382 = arith.index_cast %c1_i32_103 : i32 to index
    %c0_117 = arith.constant 0 : index
    %c0_118 = arith.constant 0 : index
    %383 = vector.load %arg9[%382, %c0_117, %c0_118] : memref<4x8x512xf32, #tpu.memory_space<vmem>>, vector<1x8x512xf32>
    %384 = vector.shape_cast %383 : vector<1x8x512xf32> to vector<8x512xf32>
    %385 = vector.shape_cast %381 : vector<8x512xf32> to vector<1x8x512xf32>
    tpu.vector_store %arg9[%382, %c0_117, %c0_118], %385 {strides = array<i32>} : memref<4x8x512xf32, #tpu.memory_space<vmem>>, vector<1x8x512xf32>,
    %386 = tpu.iota {dimensions = array<i32: 1>} : vector<8x512xi32>
    %cst_119 = arith.constant dense<0xFF800000> : vector<8xf32>
    %387 = vector.multi_reduction <maximumf>, %381, %cst_119 [1] : vector<8x512xf32> to vector<8xf32>
    %388 = vector.shape_cast %387 : vector<8xf32> to vector<8x1xf32>
    %389 = vector.broadcast %388 : vector<8x1xf32> to vector<8x512xf32>
    %390 = arith.cmpf oeq, %381, %389 : vector<8x512xf32>
    %c512_i32_120 = arith.constant 512 : i32
    %391 = vector.broadcast %c512_i32_120 : i32 to vector<8x512xi32>
    %392 = arith.select %390, %386, %391 : vector<8x512xi1>, vector<8x512xi32>
    %cst_121 = arith.constant dense<2147483647> : vector<8xi32>
    %393 = vector.multi_reduction <minsi>, %392, %cst_121 [1] : vector<8x512xi32> to vector<8xi32>
    %394 = vector.shape_cast %393 : vector<8xi32> to vector<8x1xi32>
    %395 = vector.broadcast %394 : vector<8x1xi32> to vector<8x512xi32>
    %396 = arith.cmpi eq, %386, %395 : vector<8x512xi32>
    %397 = arith.extui %396 : vector<8x512xi1> to vector<8x512xi32>
    %398 = arith.sitofp %397 : vector<8x512xi32> to vector<8x512xf32>
    %399 = arith.truncf %398 : vector<8x512xf32> to vector<8x512xbf16>
    %c0_122 = arith.constant 0 : index
    %c0_123 = arith.constant 0 : index
    %400 = vector.load %arg2[%c0_122, %c0_123] : memref<512x128xbf16, #tpu.memory_space<vmem>>, vector<512x128xbf16>
    %cst_124 = arith.constant dense<0.000000e+00> : vector<8x128xf32>
    %401 = tpu.matmul %399, %400, %cst_124 {dimension_numbers = #tpu.dot_dimension_numbers<[1], [0], [0], [1], [0, 0, 1, 1], [], []>} : vector<8x512xbf16>, vector<512x128xbf16>, vector<8x128xf32> -> vector<8x128xf32>
    %402 = arith.truncf %401 : vector<8x128xf32> to vector<8x128xbf16>
    %c2_i32_125 = arith.constant 2 : i32
    %403 = arith.truncf %375 : vector<8x128xf32> to vector<8x128xbf16>
    %404 = tpu.concatenate %402, %403 in 1 : vector<8x128xbf16>, vector<8x128xbf16> -> vector<8x256xbf16>
    %c0_126 = arith.constant 0 : index
    %c0_127 = arith.constant 0 : index
    %405 = vector.load %arg5[%c0_126, %c0_127] : memref<256x512xbf16, #tpu.memory_space<vmem>>, vector<256x512xbf16>
    %cst_128 = arith.constant dense<0.000000e+00> : vector<8x512xf32>
    %406 = tpu.matmul %404, %405, %cst_128 {dimension_numbers = #tpu.dot_dimension_numbers<[1], [0], [0], [1], [0, 0, 1, 1], [], []>} : vector<8x256xbf16>, vector<256x512xbf16>, vector<8x512xf32> -> vector<8x512xf32>
    %c0_129 = arith.constant 0 : index
    %c0_130 = arith.constant 0 : index
    %407 = vector.load %arg6[%c0_129, %c0_130] : memref<1x512xf32, #tpu.memory_space<vmem>>, vector<1x512xf32>
    %408 = vector.broadcast %407 : vector<1x512xf32> to vector<8x512xf32>
    %409 = arith.addf %406, %408 : vector<8x512xf32>
    %410 = vector.extract_strided_slice %409 {offsets = [0, 0], sizes = [8, 128], strides = [1, 1]} : vector<8x512xf32> to vector<8x128xf32>
    %411 = arith.negf %410 : vector<8x128xf32>
    %412 = math.exp %411 : vector<8x128xf32>
    %cst_131 = arith.constant 1.000000e+00 : f32
    %413 = vector.broadcast %cst_131 : f32 to vector<8x128xf32>
    %414 = arith.addf %413, %412 : vector<8x128xf32>
    %415 = arith.divf %413, %414 : vector<8x128xf32>
    %416 = vector.extract_strided_slice %409 {offsets = [0, 128], sizes = [8, 128], strides = [1, 1]} : vector<8x512xf32> to vector<8x128xf32>
    %417 = arith.negf %416 : vector<8x128xf32>
    %418 = math.exp %417 : vector<8x128xf32>
    %cst_132 = arith.constant 1.000000e+00 : f32
    %419 = vector.broadcast %cst_132 : f32 to vector<8x128xf32>
    %420 = arith.addf %419, %418 : vector<8x128xf32>
    %421 = arith.divf %419, %420 : vector<8x128xf32>
    %422 = vector.extract_strided_slice %409 {offsets = [0, 256], sizes = [8, 128], strides = [1, 1]} : vector<8x512xf32> to vector<8x128xf32>
    %423 = math.tanh %422 : vector<8x128xf32>
    %424 = vector.extract_strided_slice %409 {offsets = [0, 384], sizes = [8, 128], strides = [1, 1]} : vector<8x512xf32> to vector<8x128xf32>
    %425 = arith.negf %424 : vector<8x128xf32>
    %426 = math.exp %425 : vector<8x128xf32>
    %cst_133 = arith.constant 1.000000e+00 : f32
    %427 = vector.broadcast %cst_133 : f32 to vector<8x128xf32>
    %428 = arith.addf %427, %426 : vector<8x128xf32>
    %429 = arith.divf %427, %428 : vector<8x128xf32>
    %430 = arith.mulf %421, %373 : vector<8x128xf32>
    %431 = arith.mulf %415, %423 : vector<8x128xf32>
    %432 = arith.addf %430, %431 : vector<8x128xf32>
    %433 = math.tanh %432 : vector<8x128xf32>
    %434 = arith.mulf %429, %433 : vector<8x128xf32>
    %435 = arith.truncf %434 : vector<8x128xf32> to vector<8x128xbf16>
    %c0_134 = arith.constant 0 : index
    %c0_135 = arith.constant 0 : index
    %436 = vector.load %arg7[%c0_134, %c0_135] : memref<128x512xbf16, #tpu.memory_space<vmem>>, vector<128x512xbf16>
    %cst_136 = arith.constant dense<0.000000e+00> : vector<8x512xf32>
    %437 = tpu.matmul %435, %436, %cst_136 {dimension_numbers = #tpu.dot_dimension_numbers<[1], [0], [0], [1], [0, 0, 1, 1], [], []>} : vector<8x128xbf16>, vector<128x512xbf16>, vector<8x512xf32> -> vector<8x512xf32>
    %c0_137 = arith.constant 0 : index
    %c0_138 = arith.constant 0 : index
    %438 = vector.load %arg8[%c0_137, %c0_138] : memref<1x512xf32, #tpu.memory_space<vmem>>, vector<1x512xf32>
    %439 = vector.broadcast %438 : vector<1x512xf32> to vector<8x512xf32>
    %440 = arith.addf %437, %439 : vector<8x512xf32>
    %441 = arith.index_cast %c2_i32_125 : i32 to index
    %c0_139 = arith.constant 0 : index
    %c0_140 = arith.constant 0 : index
    %442 = vector.load %arg9[%441, %c0_139, %c0_140] : memref<4x8x512xf32, #tpu.memory_space<vmem>>, vector<1x8x512xf32>
    %443 = vector.shape_cast %442 : vector<1x8x512xf32> to vector<8x512xf32>
    %444 = vector.shape_cast %440 : vector<8x512xf32> to vector<1x8x512xf32>
    tpu.vector_store %arg9[%441, %c0_139, %c0_140], %444 {strides = array<i32>} : memref<4x8x512xf32, #tpu.memory_space<vmem>>, vector<1x8x512xf32>,
    %445 = tpu.iota {dimensions = array<i32: 1>} : vector<8x512xi32>
    %cst_141 = arith.constant dense<0xFF800000> : vector<8xf32>
    %446 = vector.multi_reduction <maximumf>, %440, %cst_141 [1] : vector<8x512xf32> to vector<8xf32>
    %447 = vector.shape_cast %446 : vector<8xf32> to vector<8x1xf32>
    %448 = vector.broadcast %447 : vector<8x1xf32> to vector<8x512xf32>
    %449 = arith.cmpf oeq, %440, %448 : vector<8x512xf32>
    %c512_i32_142 = arith.constant 512 : i32
    %450 = vector.broadcast %c512_i32_142 : i32 to vector<8x512xi32>
    %451 = arith.select %449, %445, %450 : vector<8x512xi1>, vector<8x512xi32>
    %cst_143 = arith.constant dense<2147483647> : vector<8xi32>
    %452 = vector.multi_reduction <minsi>, %451, %cst_143 [1] : vector<8x512xi32> to vector<8xi32>
    %453 = vector.shape_cast %452 : vector<8xi32> to vector<8x1xi32>
    %454 = vector.broadcast %453 : vector<8x1xi32> to vector<8x512xi32>
    %455 = arith.cmpi eq, %445, %454 : vector<8x512xi32>
    %456 = arith.extui %455 : vector<8x512xi1> to vector<8x512xi32>
    %457 = arith.sitofp %456 : vector<8x512xi32> to vector<8x512xf32>
    %458 = arith.truncf %457 : vector<8x512xf32> to vector<8x512xbf16>
    %c0_144 = arith.constant 0 : index
    %c0_145 = arith.constant 0 : index
    %459 = vector.load %arg2[%c0_144, %c0_145] : memref<512x128xbf16, #tpu.memory_space<vmem>>, vector<512x128xbf16>
    %cst_146 = arith.constant dense<0.000000e+00> : vector<8x128xf32>
    %460 = tpu.matmul %458, %459, %cst_146 {dimension_numbers = #tpu.dot_dimension_numbers<[1], [0], [0], [1], [0, 0, 1, 1], [], []>} : vector<8x512xbf16>, vector<512x128xbf16>, vector<8x128xf32> -> vector<8x128xf32>
    %461 = arith.truncf %460 : vector<8x128xf32> to vector<8x128xbf16>
    %c3_i32_147 = arith.constant 3 : i32
    %462 = arith.truncf %434 : vector<8x128xf32> to vector<8x128xbf16>
    %463 = tpu.concatenate %461, %462 in 1 : vector<8x128xbf16>, vector<8x128xbf16> -> vector<8x256xbf16>
    %c0_148 = arith.constant 0 : index
    %c0_149 = arith.constant 0 : index
    %464 = vector.load %arg5[%c0_148, %c0_149] : memref<256x512xbf16, #tpu.memory_space<vmem>>, vector<256x512xbf16>
    %cst_150 = arith.constant dense<0.000000e+00> : vector<8x512xf32>
    %465 = tpu.matmul %463, %464, %cst_150 {dimension_numbers = #tpu.dot_dimension_numbers<[1], [0], [0], [1], [0, 0, 1, 1], [], []>} : vector<8x256xbf16>, vector<256x512xbf16>, vector<8x512xf32> -> vector<8x512xf32>
    %c0_151 = arith.constant 0 : index
    %c0_152 = arith.constant 0 : index
    %466 = vector.load %arg6[%c0_151, %c0_152] : memref<1x512xf32, #tpu.memory_space<vmem>>, vector<1x512xf32>
    %467 = vector.broadcast %466 : vector<1x512xf32> to vector<8x512xf32>
    %468 = arith.addf %465, %467 : vector<8x512xf32>
    %469 = vector.extract_strided_slice %468 {offsets = [0, 0], sizes = [8, 128], strides = [1, 1]} : vector<8x512xf32> to vector<8x128xf32>
    %470 = arith.negf %469 : vector<8x128xf32>
    %471 = math.exp %470 : vector<8x128xf32>
    %cst_153 = arith.constant 1.000000e+00 : f32
    %472 = vector.broadcast %cst_153 : f32 to vector<8x128xf32>
    %473 = arith.addf %472, %471 : vector<8x128xf32>
    %474 = arith.divf %472, %473 : vector<8x128xf32>
    %475 = vector.extract_strided_slice %468 {offsets = [0, 128], sizes = [8, 128], strides = [1, 1]} : vector<8x512xf32> to vector<8x128xf32>
    %476 = arith.negf %475 : vector<8x128xf32>
    %477 = math.exp %476 : vector<8x128xf32>
    %cst_154 = arith.constant 1.000000e+00 : f32
    %478 = vector.broadcast %cst_154 : f32 to vector<8x128xf32>
    %479 = arith.addf %478, %477 : vector<8x128xf32>
    %480 = arith.divf %478, %479 : vector<8x128xf32>
    %481 = vector.extract_strided_slice %468 {offsets = [0, 256], sizes = [8, 128], strides = [1, 1]} : vector<8x512xf32> to vector<8x128xf32>
    %482 = math.tanh %481 : vector<8x128xf32>
    %483 = vector.extract_strided_slice %468 {offsets = [0, 384], sizes = [8, 128], strides = [1, 1]} : vector<8x512xf32> to vector<8x128xf32>
    %484 = arith.negf %483 : vector<8x128xf32>
    %485 = math.exp %484 : vector<8x128xf32>
    %cst_155 = arith.constant 1.000000e+00 : f32
    %486 = vector.broadcast %cst_155 : f32 to vector<8x128xf32>
    %487 = arith.addf %486, %485 : vector<8x128xf32>
    %488 = arith.divf %486, %487 : vector<8x128xf32>
    %489 = arith.mulf %480, %432 : vector<8x128xf32>
    %490 = arith.mulf %474, %482 : vector<8x128xf32>
    %491 = arith.addf %489, %490 : vector<8x128xf32>
    %492 = math.tanh %491 : vector<8x128xf32>
    %493 = arith.mulf %488, %492 : vector<8x128xf32>
    %494 = arith.truncf %493 : vector<8x128xf32> to vector<8x128xbf16>
    %c0_156 = arith.constant 0 : index
    %c0_157 = arith.constant 0 : index
    %495 = vector.load %arg7[%c0_156, %c0_157] : memref<128x512xbf16, #tpu.memory_space<vmem>>, vector<128x512xbf16>
    %cst_158 = arith.constant dense<0.000000e+00> : vector<8x512xf32>
    %496 = tpu.matmul %494, %495, %cst_158 {dimension_numbers = #tpu.dot_dimension_numbers<[1], [0], [0], [1], [0, 0, 1, 1], [], []>} : vector<8x128xbf16>, vector<128x512xbf16>, vector<8x512xf32> -> vector<8x512xf32>
    %c0_159 = arith.constant 0 : index
    %c0_160 = arith.constant 0 : index
    %497 = vector.load %arg8[%c0_159, %c0_160] : memref<1x512xf32, #tpu.memory_space<vmem>>, vector<1x512xf32>
    %498 = vector.broadcast %497 : vector<1x512xf32> to vector<8x512xf32>
    %499 = arith.addf %496, %498 : vector<8x512xf32>
    %500 = arith.index_cast %c3_i32_147 : i32 to index
    %c0_161 = arith.constant 0 : index
    %c0_162 = arith.constant 0 : index
    %501 = vector.load %arg9[%500, %c0_161, %c0_162] : memref<4x8x512xf32, #tpu.memory_space<vmem>>, vector<1x8x512xf32>
    %502 = vector.shape_cast %501 : vector<1x8x512xf32> to vector<8x512xf32>
    %503 = vector.shape_cast %499 : vector<8x512xf32> to vector<1x8x512xf32>
    tpu.vector_store %arg9[%500, %c0_161, %c0_162], %503 {strides = array<i32>} : memref<4x8x512xf32, #tpu.memory_space<vmem>>, vector<1x8x512xf32>,
    %504 = tpu.iota {dimensions = array<i32: 1>} : vector<8x512xi32>
    %cst_163 = arith.constant dense<0xFF800000> : vector<8xf32>
    %505 = vector.multi_reduction <maximumf>, %499, %cst_163 [1] : vector<8x512xf32> to vector<8xf32>
    %506 = vector.shape_cast %505 : vector<8xf32> to vector<8x1xf32>
    %507 = vector.broadcast %506 : vector<8x1xf32> to vector<8x512xf32>
    %508 = arith.cmpf oeq, %499, %507 : vector<8x512xf32>
    %c512_i32_164 = arith.constant 512 : i32
    %509 = vector.broadcast %c512_i32_164 : i32 to vector<8x512xi32>
    %510 = arith.select %508, %504, %509 : vector<8x512xi1>, vector<8x512xi32>
    %cst_165 = arith.constant dense<2147483647> : vector<8xi32>
    %511 = vector.multi_reduction <minsi>, %510, %cst_165 [1] : vector<8x512xi32> to vector<8xi32>
    %512 = vector.shape_cast %511 : vector<8xi32> to vector<8x1xi32>
    %513 = vector.broadcast %512 : vector<8x1xi32> to vector<8x512xi32>
    %514 = arith.cmpi eq, %504, %513 : vector<8x512xi32>
    %515 = arith.extui %514 : vector<8x512xi1> to vector<8x512xi32>
    %516 = arith.sitofp %515 : vector<8x512xi32> to vector<8x512xf32>
    %517 = arith.truncf %516 : vector<8x512xf32> to vector<8x512xbf16>
    %c0_166 = arith.constant 0 : index
    %c0_167 = arith.constant 0 : index
    %518 = vector.load %arg2[%c0_166, %c0_167] : memref<512x128xbf16, #tpu.memory_space<vmem>>, vector<512x128xbf16>
    %cst_168 = arith.constant dense<0.000000e+00> : vector<8x128xf32>
    %519 = tpu.matmul %517, %518, %cst_168 {dimension_numbers = #tpu.dot_dimension_numbers<[1], [0], [0], [1], [0, 0, 1, 1], [], []>} : vector<8x512xbf16>, vector<512x128xbf16>, vector<8x128xf32> -> vector<8x128xf32>
    %520 = arith.truncf %519 : vector<8x128xf32> to vector<8x128xbf16>
    %c4_i32_169 = arith.constant 4 : i32
    return
  }
  func.func @transform_0(%arg0: i32) -> (i32, i32, i32) {
    %c0_i32 = arith.constant 0 : i32
    %c0_i32_0 = arith.constant 0 : i32
    %c0_i32_1 = arith.constant 0 : i32
    return %c0_i32, %arg0, %c0_i32_0 : i32, i32, i32
  }
  func.func @transform_1(%arg0: i32) -> (i32, i32) {
    %c0_i32 = arith.constant 0 : i32
    %c0_i32_0 = arith.constant 0 : i32
    %c0_i32_1 = arith.constant 0 : i32
    return %c0_i32, %c0_i32_0 : i32, i32
  }
  func.func @transform_2(%arg0: i32) -> (i32, i32) {
    %c0_i32 = arith.constant 0 : i32
    %c0_i32_0 = arith.constant 0 : i32
    %c0_i32_1 = arith.constant 0 : i32
    return %c0_i32, %c0_i32_0 : i32, i32
  }
  func.func @transform_3(%arg0: i32) -> (i32, i32) {
    %c0_i32 = arith.constant 0 : i32
    %c0_i32_0 = arith.constant 0 : i32
    %c0_i32_1 = arith.constant 0 : i32
    return %c0_i32, %c0_i32_0 : i32, i32
  }
  func.func @transform_4(%arg0: i32) -> (i32, i32) {
    %c0_i32 = arith.constant 0 : i32
    %c0_i32_0 = arith.constant 0 : i32
    %c0_i32_1 = arith.constant 0 : i32
    return %c0_i32, %c0_i32_0 : i32, i32
  }
  func.func @transform_5(%arg0: i32) -> (i32, i32) {
    %c0_i32 = arith.constant 0 : i32
    %c0_i32_0 = arith.constant 0 : i32
    %c0_i32_1 = arith.constant 0 : i32
    return %c0_i32, %c0_i32_0 : i32, i32
  }
  func.func @transform_6(%arg0: i32) -> (i32, i32) {
    %c0_i32 = arith.constant 0 : i32
    %c0_i32_0 = arith.constant 0 : i32
    %c0_i32_1 = arith.constant 0 : i32
    return %c0_i32, %c0_i32_0 : i32, i32
  }
  func.func @transform_7(%arg0: i32) -> (i32, i32) {
    %c0_i32 = arith.constant 0 : i32
    %c0_i32_0 = arith.constant 0 : i32
    %c0_i32_1 = arith.constant 0 : i32
    return %c0_i32, %c0_i32_0 : i32, i32
  }
  func.func @transform_8(%arg0: i32) -> (i32, i32, i32) {
    %c0_i32 = arith.constant 0 : i32
    %c0_i32_0 = arith.constant 0 : i32
    %c0_i32_1 = arith.constant 0 : i32
    return %c0_i32, %arg0, %c0_i32_0 : i32, i32, i32
  }
}

module attributes {stable_mosaic.version = 11 : i64} {
  func.func @kernel(%arg0: i32, %arg1: memref<8x8x128xbf16, #tpu.memory_space<vmem>>, %arg2: memref<512x128xbf16, #tpu.memory_space<vmem>>, %arg3: memref<256x512xbf16, #tpu.memory_space<vmem>>, %arg4: memref<1x512xf32, #tpu.memory_space<vmem>>, %arg5: memref<256x512xbf16, #tpu.memory_space<vmem>>, %arg6: memref<1x512xf32, #tpu.memory_space<vmem>>, %arg7: memref<128x512xbf16, #tpu.memory_space<vmem>>, %arg8: memref<1x512xf32, #tpu.memory_space<vmem>>, %arg9: memref<4x8x512xf32, #tpu.memory_space<vmem>>) attributes {dimension_semantics = [#tpu.dimension_semantics<parallel>], iteration_bounds = array<i64: 1>, scalar_prefetch = 0 : i64, scratch_operands = 0 : i64, tpu.core_type = #tpu.core_type<tc>, window_params = [{transform_indices = @transform_0, window_bounds = array<i64: 8, 8, 128>}, {pipeline_mode = #tpu.pipeline_mode<synchronous>, transform_indices = @transform_1, window_bounds = array<i64: 512, 128>}, {pipeline_mode = #tpu.pipeline_mode<synchronous>, transform_indices = @transform_2, window_bounds = array<i64: 256, 512>}, {pipeline_mode = #tpu.pipeline_mode<synchronous>, transform_indices = @transform_3, window_bounds = array<i64: 1, 512>}, {pipeline_mode = #tpu.pipeline_mode<synchronous>, transform_indices = @transform_4, window_bounds = array<i64: 256, 512>}, {pipeline_mode = #tpu.pipeline_mode<synchronous>, transform_indices = @transform_5, window_bounds = array<i64: 1, 512>}, {pipeline_mode = #tpu.pipeline_mode<synchronous>, transform_indices = @transform_6, window_bounds = array<i64: 128, 512>}, {pipeline_mode = #tpu.pipeline_mode<synchronous>, transform_indices = @transform_7, window_bounds = array<i64: 1, 512>}, {transform_indices = @transform_8, window_bounds = array<i64: 4, 8, 512>}]} {
    %cst = arith.constant 0.000000e+00 : f32
    %0 = vector.broadcast %cst : f32 to vector<8x128xf32>
    %cst_0 = arith.constant 0.000000e+00 : f32
    %1 = vector.broadcast %cst_0 : f32 to vector<8x128xf32>
    %c0_i32 = arith.constant 0 : i32
    %2 = arith.index_cast %c0_i32 : i32 to index
    %c0 = arith.constant 0 : index
    %c0_1 = arith.constant 0 : index
    %3 = vector.load %arg1[%2, %c0, %c0_1] : memref<8x8x128xbf16, #tpu.memory_space<vmem>>, vector<1x8x128xbf16>
    %4 = vector.shape_cast %3 : vector<1x8x128xbf16> to vector<8x128xbf16>
    %5 = arith.truncf %0 : vector<8x128xf32> to vector<8x128xbf16>
    %6 = tpu.concatenate %4, %5 in 1 : vector<8x128xbf16>, vector<8x128xbf16> -> vector<8x256xbf16>
    %c0_2 = arith.constant 0 : index
    %c0_3 = arith.constant 0 : index
    %7 = vector.load %arg3[%c0_2, %c0_3] : memref<256x512xbf16, #tpu.memory_space<vmem>>, vector<256x512xbf16>
    %cst_4 = arith.constant dense<0.000000e+00> : vector<8x512xf32>
    %8 = tpu.matmul %6, %7, %cst_4 {dimension_numbers = #tpu.dot_dimension_numbers<[1], [0], [0], [1], [0, 0, 1, 1], [], []>} : vector<8x256xbf16>, vector<256x512xbf16>, vector<8x512xf32> -> vector<8x512xf32>
    %c0_5 = arith.constant 0 : index
    %c0_6 = arith.constant 0 : index
    %9 = vector.load %arg4[%c0_5, %c0_6] : memref<1x512xf32, #tpu.memory_space<vmem>>, vector<1x512xf32>
    %10 = vector.broadcast %9 : vector<1x512xf32> to vector<8x512xf32>
    %11 = arith.addf %8, %10 : vector<8x512xf32>
    %12 = vector.extract_strided_slice %11 {offsets = [0, 0], sizes = [8, 128], strides = [1, 1]} : vector<8x512xf32> to vector<8x128xf32>
    %13 = arith.negf %12 : vector<8x128xf32>
    %14 = math.exp %13 : vector<8x128xf32>
    %cst_7 = arith.constant 1.000000e+00 : f32
    %15 = vector.broadcast %cst_7 : f32 to vector<8x128xf32>
    %16 = arith.addf %15, %14 : vector<8x128xf32>
    %17 = arith.divf %15, %16 : vector<8x128xf32>
    %18 = vector.extract_strided_slice %11 {offsets = [0, 128], sizes = [8, 128], strides = [1, 1]} : vector<8x512xf32> to vector<8x128xf32>
    %19 = arith.negf %18 : vector<8x128xf32>
    %20 = math.exp %19 : vector<8x128xf32>
    %cst_8 = arith.constant 1.000000e+00 : f32
    %21 = vector.broadcast %cst_8 : f32 to vector<8x128xf32>
    %22 = arith.addf %21, %20 : vector<8x128xf32>
    %23 = arith.divf %21, %22 : vector<8x128xf32>
    %24 = vector.extract_strided_slice %11 {offsets = [0, 256], sizes = [8, 128], strides = [1, 1]} : vector<8x512xf32> to vector<8x128xf32>
    %25 = math.tanh %24 : vector<8x128xf32>
    %26 = vector.extract_strided_slice %11 {offsets = [0, 384], sizes = [8, 128], strides = [1, 1]} : vector<8x512xf32> to vector<8x128xf32>
    %27 = arith.negf %26 : vector<8x128xf32>
    %28 = math.exp %27 : vector<8x128xf32>
    %cst_9 = arith.constant 1.000000e+00 : f32
    %29 = vector.broadcast %cst_9 : f32 to vector<8x128xf32>
    %30 = arith.addf %29, %28 : vector<8x128xf32>
    %31 = arith.divf %29, %30 : vector<8x128xf32>
    %32 = arith.mulf %23, %1 : vector<8x128xf32>
    %33 = arith.mulf %17, %25 : vector<8x128xf32>
    %34 = arith.addf %32, %33 : vector<8x128xf32>
    %35 = math.tanh %34 : vector<8x128xf32>
    %36 = arith.mulf %31, %35 : vector<8x128xf32>
    %c1_i32 = arith.constant 1 : i32
    %37 = arith.index_cast %c1_i32 : i32 to index
    %c0_10 = arith.constant 0 : index
    %c0_11 = arith.constant 0 : index
    %38 = vector.load %arg1[%37, %c0_10, %c0_11] : memref<8x8x128xbf16, #tpu.memory_space<vmem>>, vector<1x8x128xbf16>
    %39 = vector.shape_cast %38 : vector<1x8x128xbf16> to vector<8x128xbf16>
    %40 = arith.truncf %36 : vector<8x128xf32> to vector<8x128xbf16>
    %41 = tpu.concatenate %39, %40 in 1 : vector<8x128xbf16>, vector<8x128xbf16> -> vector<8x256xbf16>
    %c0_12 = arith.constant 0 : index
    %c0_13 = arith.constant 0 : index
    %42 = vector.load %arg3[%c0_12, %c0_13] : memref<256x512xbf16, #tpu.memory_space<vmem>>, vector<256x512xbf16>
    %cst_14 = arith.constant dense<0.000000e+00> : vector<8x512xf32>
    %43 = tpu.matmul %41, %42, %cst_14 {dimension_numbers = #tpu.dot_dimension_numbers<[1], [0], [0], [1], [0, 0, 1, 1], [], []>} : vector<8x256xbf16>, vector<256x512xbf16>, vector<8x512xf32> -> vector<8x512xf32>
    %c0_15 = arith.constant 0 : index
    %c0_16 = arith.constant 0 : index
    %44 = vector.load %arg4[%c0_15, %c0_16] : memref<1x512xf32, #tpu.memory_space<vmem>>, vector<1x512xf32>
    %45 = vector.broadcast %44 : vector<1x512xf32> to vector<8x512xf32>
    %46 = arith.addf %43, %45 : vector<8x512xf32>
    %47 = vector.extract_strided_slice %46 {offsets = [0, 0], sizes = [8, 128], strides = [1, 1]} : vector<8x512xf32> to vector<8x128xf32>
    %48 = arith.negf %47 : vector<8x128xf32>
    %49 = math.exp %48 : vector<8x128xf32>
    %cst_17 = arith.constant 1.000000e+00 : f32
    %50 = vector.broadcast %cst_17 : f32 to vector<8x128xf32>
    %51 = arith.addf %50, %49 : vector<8x128xf32>
    %52 = arith.divf %50, %51 : vector<8x128xf32>
    %53 = vector.extract_strided_slice %46 {offsets = [0, 128], sizes = [8, 128], strides = [1, 1]} : vector<8x512xf32> to vector<8x128xf32>
    %54 = arith.negf %53 : vector<8x128xf32>
    %55 = math.exp %54 : vector<8x128xf32>
    %cst_18 = arith.constant 1.000000e+00 : f32
    %56 = vector.broadcast %cst_18 : f32 to vector<8x128xf32>
    %57 = arith.addf %56, %55 : vector<8x128xf32>
    %58 = arith.divf %56, %57 : vector<8x128xf32>
    %59 = vector.extract_strided_slice %46 {offsets = [0, 256], sizes = [8, 128], strides = [1, 1]} : vector<8x512xf32> to vector<8x128xf32>
    %60 = math.tanh %59 : vector<8x128xf32>
    %61 = vector.extract_strided_slice %46 {offsets = [0, 384], sizes = [8, 128], strides = [1, 1]} : vector<8x512xf32> to vector<8x128xf32>
    %62 = arith.negf %61 : vector<8x128xf32>
    %63 = math.exp %62 : vector<8x128xf32>
    %cst_19 = arith.constant 1.000000e+00 : f32
    %64 = vector.broadcast %cst_19 : f32 to vector<8x128xf32>
    %65 = arith.addf %64, %63 : vector<8x128xf32>
    %66 = arith.divf %64, %65 : vector<8x128xf32>
    %67 = arith.mulf %58, %34 : vector<8x128xf32>
    %68 = arith.mulf %52, %60 : vector<8x128xf32>
    %69 = arith.addf %67, %68 : vector<8x128xf32>
    %70 = math.tanh %69 : vector<8x128xf32>
    %71 = arith.mulf %66, %70 : vector<8x128xf32>
    %c2_i32 = arith.constant 2 : i32
    %72 = arith.index_cast %c2_i32 : i32 to index
    %c0_20 = arith.constant 0 : index
    %c0_21 = arith.constant 0 : index
    %73 = vector.load %arg1[%72, %c0_20, %c0_21] : memref<8x8x128xbf16, #tpu.memory_space<vmem>>, vector<1x8x128xbf16>
    %74 = vector.shape_cast %73 : vector<1x8x128xbf16> to vector<8x128xbf16>
    %75 = arith.truncf %71 : vector<8x128xf32> to vector<8x128xbf16>
    %76 = tpu.concatenate %74, %75 in 1 : vector<8x128xbf16>, vector<8x128xbf16> -> vector<8x256xbf16>
    %c0_22 = arith.constant 0 : index
    %c0_23 = arith.constant 0 : index
    %77 = vector.load %arg3[%c0_22, %c0_23] : memref<256x512xbf16, #tpu.memory_space<vmem>>, vector<256x512xbf16>
    %cst_24 = arith.constant dense<0.000000e+00> : vector<8x512xf32>
    %78 = tpu.matmul %76, %77, %cst_24 {dimension_numbers = #tpu.dot_dimension_numbers<[1], [0], [0], [1], [0, 0, 1, 1], [], []>} : vector<8x256xbf16>, vector<256x512xbf16>, vector<8x512xf32> -> vector<8x512xf32>
    %c0_25 = arith.constant 0 : index
    %c0_26 = arith.constant 0 : index
    %79 = vector.load %arg4[%c0_25, %c0_26] : memref<1x512xf32, #tpu.memory_space<vmem>>, vector<1x512xf32>
    %80 = vector.broadcast %79 : vector<1x512xf32> to vector<8x512xf32>
    %81 = arith.addf %78, %80 : vector<8x512xf32>
    %82 = vector.extract_strided_slice %81 {offsets = [0, 0], sizes = [8, 128], strides = [1, 1]} : vector<8x512xf32> to vector<8x128xf32>
    %83 = arith.negf %82 : vector<8x128xf32>
    %84 = math.exp %83 : vector<8x128xf32>
    %cst_27 = arith.constant 1.000000e+00 : f32
    %85 = vector.broadcast %cst_27 : f32 to vector<8x128xf32>
    %86 = arith.addf %85, %84 : vector<8x128xf32>
    %87 = arith.divf %85, %86 : vector<8x128xf32>
    %88 = vector.extract_strided_slice %81 {offsets = [0, 128], sizes = [8, 128], strides = [1, 1]} : vector<8x512xf32> to vector<8x128xf32>
    %89 = arith.negf %88 : vector<8x128xf32>
    %90 = math.exp %89 : vector<8x128xf32>
    %cst_28 = arith.constant 1.000000e+00 : f32
    %91 = vector.broadcast %cst_28 : f32 to vector<8x128xf32>
    %92 = arith.addf %91, %90 : vector<8x128xf32>
    %93 = arith.divf %91, %92 : vector<8x128xf32>
    %94 = vector.extract_strided_slice %81 {offsets = [0, 256], sizes = [8, 128], strides = [1, 1]} : vector<8x512xf32> to vector<8x128xf32>
    %95 = math.tanh %94 : vector<8x128xf32>
    %96 = vector.extract_strided_slice %81 {offsets = [0, 384], sizes = [8, 128], strides = [1, 1]} : vector<8x512xf32> to vector<8x128xf32>
    %97 = arith.negf %96 : vector<8x128xf32>
    %98 = math.exp %97 : vector<8x128xf32>
    %cst_29 = arith.constant 1.000000e+00 : f32
    %99 = vector.broadcast %cst_29 : f32 to vector<8x128xf32>
    %100 = arith.addf %99, %98 : vector<8x128xf32>
    %101 = arith.divf %99, %100 : vector<8x128xf32>
    %102 = arith.mulf %93, %69 : vector<8x128xf32>
    %103 = arith.mulf %87, %95 : vector<8x128xf32>
    %104 = arith.addf %102, %103 : vector<8x128xf32>
    %105 = math.tanh %104 : vector<8x128xf32>
    %106 = arith.mulf %101, %105 : vector<8x128xf32>
    %c3_i32 = arith.constant 3 : i32
    %107 = arith.index_cast %c3_i32 : i32 to index
    %c0_30 = arith.constant 0 : index
    %c0_31 = arith.constant 0 : index
    %108 = vector.load %arg1[%107, %c0_30, %c0_31] : memref<8x8x128xbf16, #tpu.memory_space<vmem>>, vector<1x8x128xbf16>
    %109 = vector.shape_cast %108 : vector<1x8x128xbf16> to vector<8x128xbf16>
    %110 = arith.truncf %106 : vector<8x128xf32> to vector<8x128xbf16>
    %111 = tpu.concatenate %109, %110 in 1 : vector<8x128xbf16>, vector<8x128xbf16> -> vector<8x256xbf16>
    %c0_32 = arith.constant 0 : index
    %c0_33 = arith.constant 0 : index
    %112 = vector.load %arg3[%c0_32, %c0_33] : memref<256x512xbf16, #tpu.memory_space<vmem>>, vector<256x512xbf16>
    %cst_34 = arith.constant dense<0.000000e+00> : vector<8x512xf32>
    %113 = tpu.matmul %111, %112, %cst_34 {dimension_numbers = #tpu.dot_dimension_numbers<[1], [0], [0], [1], [0, 0, 1, 1], [], []>} : vector<8x256xbf16>, vector<256x512xbf16>, vector<8x512xf32> -> vector<8x512xf32>
    %c0_35 = arith.constant 0 : index
    %c0_36 = arith.constant 0 : index
    %114 = vector.load %arg4[%c0_35, %c0_36] : memref<1x512xf32, #tpu.memory_space<vmem>>, vector<1x512xf32>
    %115 = vector.broadcast %114 : vector<1x512xf32> to vector<8x512xf32>
    %116 = arith.addf %113, %115 : vector<8x512xf32>
    %117 = vector.extract_strided_slice %116 {offsets = [0, 0], sizes = [8, 128], strides = [1, 1]} : vector<8x512xf32> to vector<8x128xf32>
    %118 = arith.negf %117 : vector<8x128xf32>
    %119 = math.exp %118 : vector<8x128xf32>
    %cst_37 = arith.constant 1.000000e+00 : f32
    %120 = vector.broadcast %cst_37 : f32 to vector<8x128xf32>
    %121 = arith.addf %120, %119 : vector<8x128xf32>
    %122 = arith.divf %120, %121 : vector<8x128xf32>
    %123 = vector.extract_strided_slice %116 {offsets = [0, 128], sizes = [8, 128], strides = [1, 1]} : vector<8x512xf32> to vector<8x128xf32>
    %124 = arith.negf %123 : vector<8x128xf32>
    %125 = math.exp %124 : vector<8x128xf32>
    %cst_38 = arith.constant 1.000000e+00 : f32
    %126 = vector.broadcast %cst_38 : f32 to vector<8x128xf32>
    %127 = arith.addf %126, %125 : vector<8x128xf32>
    %128 = arith.divf %126, %127 : vector<8x128xf32>
    %129 = vector.extract_strided_slice %116 {offsets = [0, 256], sizes = [8, 128], strides = [1, 1]} : vector<8x512xf32> to vector<8x128xf32>
    %130 = math.tanh %129 : vector<8x128xf32>
    %131 = vector.extract_strided_slice %116 {offsets = [0, 384], sizes = [8, 128], strides = [1, 1]} : vector<8x512xf32> to vector<8x128xf32>
    %132 = arith.negf %131 : vector<8x128xf32>
    %133 = math.exp %132 : vector<8x128xf32>
    %cst_39 = arith.constant 1.000000e+00 : f32
    %134 = vector.broadcast %cst_39 : f32 to vector<8x128xf32>
    %135 = arith.addf %134, %133 : vector<8x128xf32>
    %136 = arith.divf %134, %135 : vector<8x128xf32>
    %137 = arith.mulf %128, %104 : vector<8x128xf32>
    %138 = arith.mulf %122, %130 : vector<8x128xf32>
    %139 = arith.addf %137, %138 : vector<8x128xf32>
    %140 = math.tanh %139 : vector<8x128xf32>
    %141 = arith.mulf %136, %140 : vector<8x128xf32>
    %c4_i32 = arith.constant 4 : i32
    %142 = arith.index_cast %c4_i32 : i32 to index
    %c0_40 = arith.constant 0 : index
    %c0_41 = arith.constant 0 : index
    %143 = vector.load %arg1[%142, %c0_40, %c0_41] : memref<8x8x128xbf16, #tpu.memory_space<vmem>>, vector<1x8x128xbf16>
    %144 = vector.shape_cast %143 : vector<1x8x128xbf16> to vector<8x128xbf16>
    %145 = arith.truncf %141 : vector<8x128xf32> to vector<8x128xbf16>
    %146 = tpu.concatenate %144, %145 in 1 : vector<8x128xbf16>, vector<8x128xbf16> -> vector<8x256xbf16>
    %c0_42 = arith.constant 0 : index
    %c0_43 = arith.constant 0 : index
    %147 = vector.load %arg3[%c0_42, %c0_43] : memref<256x512xbf16, #tpu.memory_space<vmem>>, vector<256x512xbf16>
    %cst_44 = arith.constant dense<0.000000e+00> : vector<8x512xf32>
    %148 = tpu.matmul %146, %147, %cst_44 {dimension_numbers = #tpu.dot_dimension_numbers<[1], [0], [0], [1], [0, 0, 1, 1], [], []>} : vector<8x256xbf16>, vector<256x512xbf16>, vector<8x512xf32> -> vector<8x512xf32>
    %c0_45 = arith.constant 0 : index
    %c0_46 = arith.constant 0 : index
    %149 = vector.load %arg4[%c0_45, %c0_46] : memref<1x512xf32, #tpu.memory_space<vmem>>, vector<1x512xf32>
    %150 = vector.broadcast %149 : vector<1x512xf32> to vector<8x512xf32>
    %151 = arith.addf %148, %150 : vector<8x512xf32>
    %152 = vector.extract_strided_slice %151 {offsets = [0, 0], sizes = [8, 128], strides = [1, 1]} : vector<8x512xf32> to vector<8x128xf32>
    %153 = arith.negf %152 : vector<8x128xf32>
    %154 = math.exp %153 : vector<8x128xf32>
    %cst_47 = arith.constant 1.000000e+00 : f32
    %155 = vector.broadcast %cst_47 : f32 to vector<8x128xf32>
    %156 = arith.addf %155, %154 : vector<8x128xf32>
    %157 = arith.divf %155, %156 : vector<8x128xf32>
    %158 = vector.extract_strided_slice %151 {offsets = [0, 128], sizes = [8, 128], strides = [1, 1]} : vector<8x512xf32> to vector<8x128xf32>
    %159 = arith.negf %158 : vector<8x128xf32>
    %160 = math.exp %159 : vector<8x128xf32>
    %cst_48 = arith.constant 1.000000e+00 : f32
    %161 = vector.broadcast %cst_48 : f32 to vector<8x128xf32>
    %162 = arith.addf %161, %160 : vector<8x128xf32>
    %163 = arith.divf %161, %162 : vector<8x128xf32>
    %164 = vector.extract_strided_slice %151 {offsets = [0, 256], sizes = [8, 128], strides = [1, 1]} : vector<8x512xf32> to vector<8x128xf32>
    %165 = math.tanh %164 : vector<8x128xf32>
    %166 = vector.extract_strided_slice %151 {offsets = [0, 384], sizes = [8, 128], strides = [1, 1]} : vector<8x512xf32> to vector<8x128xf32>
    %167 = arith.negf %166 : vector<8x128xf32>
    %168 = math.exp %167 : vector<8x128xf32>
    %cst_49 = arith.constant 1.000000e+00 : f32
    %169 = vector.broadcast %cst_49 : f32 to vector<8x128xf32>
    %170 = arith.addf %169, %168 : vector<8x128xf32>
    %171 = arith.divf %169, %170 : vector<8x128xf32>
    %172 = arith.mulf %163, %139 : vector<8x128xf32>
    %173 = arith.mulf %157, %165 : vector<8x128xf32>
    %174 = arith.addf %172, %173 : vector<8x128xf32>
    %175 = math.tanh %174 : vector<8x128xf32>
    %176 = arith.mulf %171, %175 : vector<8x128xf32>
    %c5_i32 = arith.constant 5 : i32
    %177 = arith.index_cast %c5_i32 : i32 to index
    %c0_50 = arith.constant 0 : index
    %c0_51 = arith.constant 0 : index
    %178 = vector.load %arg1[%177, %c0_50, %c0_51] : memref<8x8x128xbf16, #tpu.memory_space<vmem>>, vector<1x8x128xbf16>
    %179 = vector.shape_cast %178 : vector<1x8x128xbf16> to vector<8x128xbf16>
    %180 = arith.truncf %176 : vector<8x128xf32> to vector<8x128xbf16>
    %181 = tpu.concatenate %179, %180 in 1 : vector<8x128xbf16>, vector<8x128xbf16> -> vector<8x256xbf16>
    %c0_52 = arith.constant 0 : index
    %c0_53 = arith.constant 0 : index
    %182 = vector.load %arg3[%c0_52, %c0_53] : memref<256x512xbf16, #tpu.memory_space<vmem>>, vector<256x512xbf16>
    %cst_54 = arith.constant dense<0.000000e+00> : vector<8x512xf32>
    %183 = tpu.matmul %181, %182, %cst_54 {dimension_numbers = #tpu.dot_dimension_numbers<[1], [0], [0], [1], [0, 0, 1, 1], [], []>} : vector<8x256xbf16>, vector<256x512xbf16>, vector<8x512xf32> -> vector<8x512xf32>
    %c0_55 = arith.constant 0 : index
    %c0_56 = arith.constant 0 : index
    %184 = vector.load %arg4[%c0_55, %c0_56] : memref<1x512xf32, #tpu.memory_space<vmem>>, vector<1x512xf32>
    %185 = vector.broadcast %184 : vector<1x512xf32> to vector<8x512xf32>
    %186 = arith.addf %183, %185 : vector<8x512xf32>
    %187 = vector.extract_strided_slice %186 {offsets = [0, 0], sizes = [8, 128], strides = [1, 1]} : vector<8x512xf32> to vector<8x128xf32>
    %188 = arith.negf %187 : vector<8x128xf32>
    %189 = math.exp %188 : vector<8x128xf32>
    %cst_57 = arith.constant 1.000000e+00 : f32
    %190 = vector.broadcast %cst_57 : f32 to vector<8x128xf32>
    %191 = arith.addf %190, %189 : vector<8x128xf32>
    %192 = arith.divf %190, %191 : vector<8x128xf32>
    %193 = vector.extract_strided_slice %186 {offsets = [0, 128], sizes = [8, 128], strides = [1, 1]} : vector<8x512xf32> to vector<8x128xf32>
    %194 = arith.negf %193 : vector<8x128xf32>
    %195 = math.exp %194 : vector<8x128xf32>
    %cst_58 = arith.constant 1.000000e+00 : f32
    %196 = vector.broadcast %cst_58 : f32 to vector<8x128xf32>
    %197 = arith.addf %196, %195 : vector<8x128xf32>
    %198 = arith.divf %196, %197 : vector<8x128xf32>
    %199 = vector.extract_strided_slice %186 {offsets = [0, 256], sizes = [8, 128], strides = [1, 1]} : vector<8x512xf32> to vector<8x128xf32>
    %200 = math.tanh %199 : vector<8x128xf32>
    %201 = vector.extract_strided_slice %186 {offsets = [0, 384], sizes = [8, 128], strides = [1, 1]} : vector<8x512xf32> to vector<8x128xf32>
    %202 = arith.negf %201 : vector<8x128xf32>
    %203 = math.exp %202 : vector<8x128xf32>
    %cst_59 = arith.constant 1.000000e+00 : f32
    %204 = vector.broadcast %cst_59 : f32 to vector<8x128xf32>
    %205 = arith.addf %204, %203 : vector<8x128xf32>
    %206 = arith.divf %204, %205 : vector<8x128xf32>
    %207 = arith.mulf %198, %174 : vector<8x128xf32>
    %208 = arith.mulf %192, %200 : vector<8x128xf32>
    %209 = arith.addf %207, %208 : vector<8x128xf32>
    %210 = math.tanh %209 : vector<8x128xf32>
    %211 = arith.mulf %206, %210 : vector<8x128xf32>
    %c6_i32 = arith.constant 6 : i32
    %212 = arith.index_cast %c6_i32 : i32 to index
    %c0_60 = arith.constant 0 : index
    %c0_61 = arith.constant 0 : index
    %213 = vector.load %arg1[%212, %c0_60, %c0_61] : memref<8x8x128xbf16, #tpu.memory_space<vmem>>, vector<1x8x128xbf16>
    %214 = vector.shape_cast %213 : vector<1x8x128xbf16> to vector<8x128xbf16>
    %215 = arith.truncf %211 : vector<8x128xf32> to vector<8x128xbf16>
    %216 = tpu.concatenate %214, %215 in 1 : vector<8x128xbf16>, vector<8x128xbf16> -> vector<8x256xbf16>
    %c0_62 = arith.constant 0 : index
    %c0_63 = arith.constant 0 : index
    %217 = vector.load %arg3[%c0_62, %c0_63] : memref<256x512xbf16, #tpu.memory_space<vmem>>, vector<256x512xbf16>
    %cst_64 = arith.constant dense<0.000000e+00> : vector<8x512xf32>
    %218 = tpu.matmul %216, %217, %cst_64 {dimension_numbers = #tpu.dot_dimension_numbers<[1], [0], [0], [1], [0, 0, 1, 1], [], []>} : vector<8x256xbf16>, vector<256x512xbf16>, vector<8x512xf32> -> vector<8x512xf32>
    %c0_65 = arith.constant 0 : index
    %c0_66 = arith.constant 0 : index
    %219 = vector.load %arg4[%c0_65, %c0_66] : memref<1x512xf32, #tpu.memory_space<vmem>>, vector<1x512xf32>
    %220 = vector.broadcast %219 : vector<1x512xf32> to vector<8x512xf32>
    %221 = arith.addf %218, %220 : vector<8x512xf32>
    %222 = vector.extract_strided_slice %221 {offsets = [0, 0], sizes = [8, 128], strides = [1, 1]} : vector<8x512xf32> to vector<8x128xf32>
    %223 = arith.negf %222 : vector<8x128xf32>
    %224 = math.exp %223 : vector<8x128xf32>
    %cst_67 = arith.constant 1.000000e+00 : f32
    %225 = vector.broadcast %cst_67 : f32 to vector<8x128xf32>
    %226 = arith.addf %225, %224 : vector<8x128xf32>
    %227 = arith.divf %225, %226 : vector<8x128xf32>
    %228 = vector.extract_strided_slice %221 {offsets = [0, 128], sizes = [8, 128], strides = [1, 1]} : vector<8x512xf32> to vector<8x128xf32>
    %229 = arith.negf %228 : vector<8x128xf32>
    %230 = math.exp %229 : vector<8x128xf32>
    %cst_68 = arith.constant 1.000000e+00 : f32
    %231 = vector.broadcast %cst_68 : f32 to vector<8x128xf32>
    %232 = arith.addf %231, %230 : vector<8x128xf32>
    %233 = arith.divf %231, %232 : vector<8x128xf32>
    %234 = vector.extract_strided_slice %221 {offsets = [0, 256], sizes = [8, 128], strides = [1, 1]} : vector<8x512xf32> to vector<8x128xf32>
    %235 = math.tanh %234 : vector<8x128xf32>
    %236 = vector.extract_strided_slice %221 {offsets = [0, 384], sizes = [8, 128], strides = [1, 1]} : vector<8x512xf32> to vector<8x128xf32>
    %237 = arith.negf %236 : vector<8x128xf32>
    %238 = math.exp %237 : vector<8x128xf32>
    %cst_69 = arith.constant 1.000000e+00 : f32
    %239 = vector.broadcast %cst_69 : f32 to vector<8x128xf32>
    %240 = arith.addf %239, %238 : vector<8x128xf32>
    %241 = arith.divf %239, %240 : vector<8x128xf32>
    %242 = arith.mulf %233, %209 : vector<8x128xf32>
    %243 = arith.mulf %227, %235 : vector<8x128xf32>
    %244 = arith.addf %242, %243 : vector<8x128xf32>
    %245 = math.tanh %244 : vector<8x128xf32>
    %246 = arith.mulf %241, %245 : vector<8x128xf32>
    %c7_i32 = arith.constant 7 : i32
    %247 = arith.index_cast %c7_i32 : i32 to index
    %c0_70 = arith.constant 0 : index
    %c0_71 = arith.constant 0 : index
    %248 = vector.load %arg1[%247, %c0_70, %c0_71] : memref<8x8x128xbf16, #tpu.memory_space<vmem>>, vector<1x8x128xbf16>
    %249 = vector.shape_cast %248 : vector<1x8x128xbf16> to vector<8x128xbf16>
    %250 = arith.truncf %246 : vector<8x128xf32> to vector<8x128xbf16>
    %251 = tpu.concatenate %249, %250 in 1 : vector<8x128xbf16>, vector<8x128xbf16> -> vector<8x256xbf16>
    %c0_72 = arith.constant 0 : index
    %c0_73 = arith.constant 0 : index
    %252 = vector.load %arg3[%c0_72, %c0_73] : memref<256x512xbf16, #tpu.memory_space<vmem>>, vector<256x512xbf16>
    %cst_74 = arith.constant dense<0.000000e+00> : vector<8x512xf32>
    %253 = tpu.matmul %251, %252, %cst_74 {dimension_numbers = #tpu.dot_dimension_numbers<[1], [0], [0], [1], [0, 0, 1, 1], [], []>} : vector<8x256xbf16>, vector<256x512xbf16>, vector<8x512xf32> -> vector<8x512xf32>
    %c0_75 = arith.constant 0 : index
    %c0_76 = arith.constant 0 : index
    %254 = vector.load %arg4[%c0_75, %c0_76] : memref<1x512xf32, #tpu.memory_space<vmem>>, vector<1x512xf32>
    %255 = vector.broadcast %254 : vector<1x512xf32> to vector<8x512xf32>
    %256 = arith.addf %253, %255 : vector<8x512xf32>
    %257 = vector.extract_strided_slice %256 {offsets = [0, 0], sizes = [8, 128], strides = [1, 1]} : vector<8x512xf32> to vector<8x128xf32>
    %258 = arith.negf %257 : vector<8x128xf32>
    %259 = math.exp %258 : vector<8x128xf32>
    %cst_77 = arith.constant 1.000000e+00 : f32
    %260 = vector.broadcast %cst_77 : f32 to vector<8x128xf32>
    %261 = arith.addf %260, %259 : vector<8x128xf32>
    %262 = arith.divf %260, %261 : vector<8x128xf32>
    %263 = vector.extract_strided_slice %256 {offsets = [0, 128], sizes = [8, 128], strides = [1, 1]} : vector<8x512xf32> to vector<8x128xf32>
    %264 = arith.negf %263 : vector<8x128xf32>
    %265 = math.exp %264 : vector<8x128xf32>
    %cst_78 = arith.constant 1.000000e+00 : f32
    %266 = vector.broadcast %cst_78 : f32 to vector<8x128xf32>
    %267 = arith.addf %266, %265 : vector<8x128xf32>
    %268 = arith.divf %266, %267 : vector<8x128xf32>
    %269 = vector.extract_strided_slice %256 {offsets = [0, 256], sizes = [8, 128], strides = [1, 1]} : vector<8x512xf32> to vector<8x128xf32>
    %270 = math.tanh %269 : vector<8x128xf32>
    %271 = vector.extract_strided_slice %256 {offsets = [0, 384], sizes = [8, 128], strides = [1, 1]} : vector<8x512xf32> to vector<8x128xf32>
    %272 = arith.negf %271 : vector<8x128xf32>
    %273 = math.exp %272 : vector<8x128xf32>
    %cst_79 = arith.constant 1.000000e+00 : f32
    %274 = vector.broadcast %cst_79 : f32 to vector<8x128xf32>
    %275 = arith.addf %274, %273 : vector<8x128xf32>
    %276 = arith.divf %274, %275 : vector<8x128xf32>
    %277 = arith.mulf %268, %244 : vector<8x128xf32>
    %278 = arith.mulf %262, %270 : vector<8x128xf32>
    %279 = arith.addf %277, %278 : vector<8x128xf32>
    %280 = math.tanh %279 : vector<8x128xf32>
    %281 = arith.mulf %276, %280 : vector<8x128xf32>
    %c8_i32 = arith.constant 8 : i32
    %c0_80 = arith.constant 0 : index
    %c0_81 = arith.constant 0 : index
    %282 = vector.load %arg2[%c0_80, %c0_81] : memref<512x128xbf16, #tpu.memory_space<vmem>>, vector<1x128xbf16>
    %283 = vector.shape_cast %282 : vector<1x128xbf16> to vector<1x128xbf16>
    %284 = vector.broadcast %283 : vector<1x128xbf16> to vector<8x128xbf16>
    %c0_i32_82 = arith.constant 0 : i32
    %285 = arith.truncf %281 : vector<8x128xf32> to vector<8x128xbf16>
    %286 = tpu.concatenate %284, %285 in 1 : vector<8x128xbf16>, vector<8x128xbf16> -> vector<8x256xbf16>
    %c0_83 = arith.constant 0 : index
    %c0_84 = arith.constant 0 : index
    %287 = vector.load %arg5[%c0_83, %c0_84] : memref<256x512xbf16, #tpu.memory_space<vmem>>, vector<256x512xbf16>
    %cst_85 = arith.constant dense<0.000000e+00> : vector<8x512xf32>
    %288 = tpu.matmul %286, %287, %cst_85 {dimension_numbers = #tpu.dot_dimension_numbers<[1], [0], [0], [1], [0, 0, 1, 1], [], []>} : vector<8x256xbf16>, vector<256x512xbf16>, vector<8x512xf32> -> vector<8x512xf32>
    %c0_86 = arith.constant 0 : index
    %c0_87 = arith.constant 0 : index
    %289 = vector.load %arg6[%c0_86, %c0_87] : memref<1x512xf32, #tpu.memory_space<vmem>>, vector<1x512xf32>
    %290 = vector.broadcast %289 : vector<1x512xf32> to vector<8x512xf32>
    %291 = arith.addf %288, %290 : vector<8x512xf32>
    %292 = vector.extract_strided_slice %291 {offsets = [0, 0], sizes = [8, 128], strides = [1, 1]} : vector<8x512xf32> to vector<8x128xf32>
    %293 = arith.negf %292 : vector<8x128xf32>
    %294 = math.exp %293 : vector<8x128xf32>
    %cst_88 = arith.constant 1.000000e+00 : f32
    %295 = vector.broadcast %cst_88 : f32 to vector<8x128xf32>
    %296 = arith.addf %295, %294 : vector<8x128xf32>
    %297 = arith.divf %295, %296 : vector<8x128xf32>
    %298 = vector.extract_strided_slice %291 {offsets = [0, 128], sizes = [8, 128], strides = [1, 1]} : vector<8x512xf32> to vector<8x128xf32>
    %299 = arith.negf %298 : vector<8x128xf32>
    %300 = math.exp %299 : vector<8x128xf32>
    %cst_89 = arith.constant 1.000000e+00 : f32
    %301 = vector.broadcast %cst_89 : f32 to vector<8x128xf32>
    %302 = arith.addf %301, %300 : vector<8x128xf32>
    %303 = arith.divf %301, %302 : vector<8x128xf32>
    %304 = vector.extract_strided_slice %291 {offsets = [0, 256], sizes = [8, 128], strides = [1, 1]} : vector<8x512xf32> to vector<8x128xf32>
    %305 = math.tanh %304 : vector<8x128xf32>
    %306 = vector.extract_strided_slice %291 {offsets = [0, 384], sizes = [8, 128], strides = [1, 1]} : vector<8x512xf32> to vector<8x128xf32>
    %307 = arith.negf %306 : vector<8x128xf32>
    %308 = math.exp %307 : vector<8x128xf32>
    %cst_90 = arith.constant 1.000000e+00 : f32
    %309 = vector.broadcast %cst_90 : f32 to vector<8x128xf32>
    %310 = arith.addf %309, %308 : vector<8x128xf32>
    %311 = arith.divf %309, %310 : vector<8x128xf32>
    %312 = arith.mulf %303, %279 : vector<8x128xf32>
    %313 = arith.mulf %297, %305 : vector<8x128xf32>
    %314 = arith.addf %312, %313 : vector<8x128xf32>
    %315 = math.tanh %314 : vector<8x128xf32>
    %316 = arith.mulf %311, %315 : vector<8x128xf32>
    %317 = arith.truncf %316 : vector<8x128xf32> to vector<8x128xbf16>
    %c0_91 = arith.constant 0 : index
    %c0_92 = arith.constant 0 : index
    %318 = vector.load %arg7[%c0_91, %c0_92] : memref<128x512xbf16, #tpu.memory_space<vmem>>, vector<128x512xbf16>
    %cst_93 = arith.constant dense<0.000000e+00> : vector<8x512xf32>
    %319 = tpu.matmul %317, %318, %cst_93 {dimension_numbers = #tpu.dot_dimension_numbers<[1], [0], [0], [1], [0, 0, 1, 1], [], []>} : vector<8x128xbf16>, vector<128x512xbf16>, vector<8x512xf32> -> vector<8x512xf32>
    %c0_94 = arith.constant 0 : index
    %c0_95 = arith.constant 0 : index
    %320 = vector.load %arg8[%c0_94, %c0_95] : memref<1x512xf32, #tpu.memory_space<vmem>>, vector<1x512xf32>
    %321 = vector.broadcast %320 : vector<1x512xf32> to vector<8x512xf32>
    %322 = arith.addf %319, %321 : vector<8x512xf32>
    %323 = arith.index_cast %c0_i32_82 : i32 to index
    %c0_96 = arith.constant 0 : index
    %c0_97 = arith.constant 0 : index
    %324 = vector.load %arg9[%323, %c0_96, %c0_97] : memref<4x8x512xf32, #tpu.memory_space<vmem>>, vector<1x8x512xf32>
    %325 = vector.shape_cast %324 : vector<1x8x512xf32> to vector<8x512xf32>
    %326 = vector.shape_cast %322 : vector<8x512xf32> to vector<1x8x512xf32>
    tpu.vector_store %arg9[%323, %c0_96, %c0_97], %326 {strides = array<i32>} : memref<4x8x512xf32, #tpu.memory_space<vmem>>, vector<1x8x512xf32>,
    %327 = tpu.iota {dimensions = array<i32: 1>} : vector<8x512xi32>
    %cst_98 = arith.constant dense<0xFF800000> : vector<8xf32>
    %328 = vector.multi_reduction <maximumf>, %322, %cst_98 [1] : vector<8x512xf32> to vector<8xf32>
    %329 = vector.shape_cast %328 : vector<8xf32> to vector<8x1xf32>
    %330 = vector.broadcast %329 : vector<8x1xf32> to vector<8x512xf32>
    %331 = arith.cmpf oeq, %322, %330 : vector<8x512xf32>
    %c512_i32 = arith.constant 512 : i32
    %332 = vector.broadcast %c512_i32 : i32 to vector<8x512xi32>
    %333 = arith.select %331, %327, %332 : vector<8x512xi1>, vector<8x512xi32>
    %cst_99 = arith.constant dense<2147483647> : vector<8xi32>
    %334 = vector.multi_reduction <minsi>, %333, %cst_99 [1] : vector<8x512xi32> to vector<8xi32>
    %335 = vector.shape_cast %334 : vector<8xi32> to vector<8x1xi32>
    %336 = vector.broadcast %335 : vector<8x1xi32> to vector<8x512xi32>
    %337 = arith.cmpi eq, %327, %336 : vector<8x512xi32>
    %338 = arith.extui %337 : vector<8x512xi1> to vector<8x512xi32>
    %339 = arith.sitofp %338 : vector<8x512xi32> to vector<8x512xf32>
    %340 = arith.truncf %339 : vector<8x512xf32> to vector<8x512xbf16>
    %c0_100 = arith.constant 0 : index
    %c0_101 = arith.constant 0 : index
    %341 = vector.load %arg2[%c0_100, %c0_101] : memref<512x128xbf16, #tpu.memory_space<vmem>>, vector<512x128xbf16>
    %cst_102 = arith.constant dense<0.000000e+00> : vector<8x128xf32>
    %342 = tpu.matmul %340, %341, %cst_102 {dimension_numbers = #tpu.dot_dimension_numbers<[1], [0], [0], [1], [0, 0, 1, 1], [], []>} : vector<8x512xbf16>, vector<512x128xbf16>, vector<8x128xf32> -> vector<8x128xf32>
    %343 = arith.truncf %342 : vector<8x128xf32> to vector<8x128xbf16>
    %c1_i32_103 = arith.constant 1 : i32
    %344 = arith.truncf %316 : vector<8x128xf32> to vector<8x128xbf16>
    %345 = tpu.concatenate %343, %344 in 1 : vector<8x128xbf16>, vector<8x128xbf16> -> vector<8x256xbf16>
    %c0_104 = arith.constant 0 : index
    %c0_105 = arith.constant 0 : index
    %346 = vector.load %arg5[%c0_104, %c0_105] : memref<256x512xbf16, #tpu.memory_space<vmem>>, vector<256x512xbf16>
    %cst_106 = arith.constant dense<0.000000e+00> : vector<8x512xf32>
    %347 = tpu.matmul %345, %346, %cst_106 {dimension_numbers = #tpu.dot_dimension_numbers<[1], [0], [0], [1], [0, 0, 1, 1], [], []>} : vector<8x256xbf16>, vector<256x512xbf16>, vector<8x512xf32> -> vector<8x512xf32>
    %c0_107 = arith.constant 0 : index
    %c0_108 = arith.constant 0 : index
    %348 = vector.load %arg6[%c0_107, %c0_108] : memref<1x512xf32, #tpu.memory_space<vmem>>, vector<1x512xf32>
    %349 = vector.broadcast %348 : vector<1x512xf32> to vector<8x512xf32>
    %350 = arith.addf %347, %349 : vector<8x512xf32>
    %351 = vector.extract_strided_slice %350 {offsets = [0, 0], sizes = [8, 128], strides = [1, 1]} : vector<8x512xf32> to vector<8x128xf32>
    %352 = arith.negf %351 : vector<8x128xf32>
    %353 = math.exp %352 : vector<8x128xf32>
    %cst_109 = arith.constant 1.000000e+00 : f32
    %354 = vector.broadcast %cst_109 : f32 to vector<8x128xf32>
    %355 = arith.addf %354, %353 : vector<8x128xf32>
    %356 = arith.divf %354, %355 : vector<8x128xf32>
    %357 = vector.extract_strided_slice %350 {offsets = [0, 128], sizes = [8, 128], strides = [1, 1]} : vector<8x512xf32> to vector<8x128xf32>
    %358 = arith.negf %357 : vector<8x128xf32>
    %359 = math.exp %358 : vector<8x128xf32>
    %cst_110 = arith.constant 1.000000e+00 : f32
    %360 = vector.broadcast %cst_110 : f32 to vector<8x128xf32>
    %361 = arith.addf %360, %359 : vector<8x128xf32>
    %362 = arith.divf %360, %361 : vector<8x128xf32>
    %363 = vector.extract_strided_slice %350 {offsets = [0, 256], sizes = [8, 128], strides = [1, 1]} : vector<8x512xf32> to vector<8x128xf32>
    %364 = math.tanh %363 : vector<8x128xf32>
    %365 = vector.extract_strided_slice %350 {offsets = [0, 384], sizes = [8, 128], strides = [1, 1]} : vector<8x512xf32> to vector<8x128xf32>
    %366 = arith.negf %365 : vector<8x128xf32>
    %367 = math.exp %366 : vector<8x128xf32>
    %cst_111 = arith.constant 1.000000e+00 : f32
    %368 = vector.broadcast %cst_111 : f32 to vector<8x128xf32>
    %369 = arith.addf %368, %367 : vector<8x128xf32>
    %370 = arith.divf %368, %369 : vector<8x128xf32>
    %371 = arith.mulf %362, %314 : vector<8x128xf32>
    %372 = arith.mulf %356, %364 : vector<8x128xf32>
    %373 = arith.addf %371, %372 : vector<8x128xf32>
    %374 = math.tanh %373 : vector<8x128xf32>
    %375 = arith.mulf %370, %374 : vector<8x128xf32>
    %376 = arith.truncf %375 : vector<8x128xf32> to vector<8x128xbf16>
    %c0_112 = arith.constant 0 : index
    %c0_113 = arith.constant 0 : index
    %377 = vector.load %arg7[%c0_112, %c0_113] : memref<128x512xbf16, #tpu.memory_space<vmem>>, vector<128x512xbf16>
    %cst_114 = arith.constant dense<0.000000e+00> : vector<8x512xf32>
    %378 = tpu.matmul %376, %377, %cst_114 {dimension_numbers = #tpu.dot_dimension_numbers<[1], [0], [0], [1], [0, 0, 1, 1], [], []>} : vector<8x128xbf16>, vector<128x512xbf16>, vector<8x512xf32> -> vector<8x512xf32>
    %c0_115 = arith.constant 0 : index
    %c0_116 = arith.constant 0 : index
    %379 = vector.load %arg8[%c0_115, %c0_116] : memref<1x512xf32, #tpu.memory_space<vmem>>, vector<1x512xf32>
    %380 = vector.broadcast %379 : vector<1x512xf32> to vector<8x512xf32>
    %381 = arith.addf %378, %380 : vector<8x512xf32>
    %382 = arith.index_cast %c1_i32_103 : i32 to index
    %c0_117 = arith.constant 0 : index
    %c0_118 = arith.constant 0 : index
    %383 = vector.load %arg9[%382, %c0_117, %c0_118] : memref<4x8x512xf32, #tpu.memory_space<vmem>>, vector<1x8x512xf32>
    %384 = vector.shape_cast %383 : vector<1x8x512xf32> to vector<8x512xf32>
    %385 = vector.shape_cast %381 : vector<8x512xf32> to vector<1x8x512xf32>
    tpu.vector_store %arg9[%382, %c0_117, %c0_118], %385 {strides = array<i32>} : memref<4x8x512xf32, #tpu.memory_space<vmem>>, vector<1x8x512xf32>,
    %386 = tpu.iota {dimensions = array<i32: 1>} : vector<8x512xi32>
    %cst_119 = arith.constant dense<0xFF800000> : vector<8xf32>
    %387 = vector.multi_reduction <maximumf>, %381, %cst_119 [1] : vector<8x512xf32> to vector<8xf32>
    %388 = vector.shape_cast %387 : vector<8xf32> to vector<8x1xf32>
    %389 = vector.broadcast %388 : vector<8x1xf32> to vector<8x512xf32>
    %390 = arith.cmpf oeq, %381, %389 : vector<8x512xf32>
    %c512_i32_120 = arith.constant 512 : i32
    %391 = vector.broadcast %c512_i32_120 : i32 to vector<8x512xi32>
    %392 = arith.select %390, %386, %391 : vector<8x512xi1>, vector<8x512xi32>
    %cst_121 = arith.constant dense<2147483647> : vector<8xi32>
    %393 = vector.multi_reduction <minsi>, %392, %cst_121 [1] : vector<8x512xi32> to vector<8xi32>
    %394 = vector.shape_cast %393 : vector<8xi32> to vector<8x1xi32>
    %395 = vector.broadcast %394 : vector<8x1xi32> to vector<8x512xi32>
    %396 = arith.cmpi eq, %386, %395 : vector<8x512xi32>
    %397 = arith.extui %396 : vector<8x512xi1> to vector<8x512xi32>
    %398 = arith.sitofp %397 : vector<8x512xi32> to vector<8x512xf32>
    %399 = arith.truncf %398 : vector<8x512xf32> to vector<8x512xbf16>
    %c0_122 = arith.constant 0 : index
    %c0_123 = arith.constant 0 : index
    %400 = vector.load %arg2[%c0_122, %c0_123] : memref<512x128xbf16, #tpu.memory_space<vmem>>, vector<512x128xbf16>
    %cst_124 = arith.constant dense<0.000000e+00> : vector<8x128xf32>
    %401 = tpu.matmul %399, %400, %cst_124 {dimension_numbers = #tpu.dot_dimension_numbers<[1], [0], [0], [1], [0, 0, 1, 1], [], []>} : vector<8x512xbf16>, vector<512x128xbf16>, vector<8x128xf32> -> vector<8x128xf32>
    %402 = arith.truncf %401 : vector<8x128xf32> to vector<8x128xbf16>
    %c2_i32_125 = arith.constant 2 : i32
    %403 = arith.truncf %375 : vector<8x128xf32> to vector<8x128xbf16>
    %404 = tpu.concatenate %402, %403 in 1 : vector<8x128xbf16>, vector<8x128xbf16> -> vector<8x256xbf16>
    %c0_126 = arith.constant 0 : index
    %c0_127 = arith.constant 0 : index
    %405 = vector.load %arg5[%c0_126, %c0_127] : memref<256x512xbf16, #tpu.memory_space<vmem>>, vector<256x512xbf16>
    %cst_128 = arith.constant dense<0.000000e+00> : vector<8x512xf32>
    %406 = tpu.matmul %404, %405, %cst_128 {dimension_numbers = #tpu.dot_dimension_numbers<[1], [0], [0], [1], [0, 0, 1, 1], [], []>} : vector<8x256xbf16>, vector<256x512xbf16>, vector<8x512xf32> -> vector<8x512xf32>
    %c0_129 = arith.constant 0 : index
    %c0_130 = arith.constant 0 : index
    %407 = vector.load %arg6[%c0_129, %c0_130] : memref<1x512xf32, #tpu.memory_space<vmem>>, vector<1x512xf32>
    %408 = vector.broadcast %407 : vector<1x512xf32> to vector<8x512xf32>
    %409 = arith.addf %406, %408 : vector<8x512xf32>
    %410 = vector.extract_strided_slice %409 {offsets = [0, 0], sizes = [8, 128], strides = [1, 1]} : vector<8x512xf32> to vector<8x128xf32>
    %411 = arith.negf %410 : vector<8x128xf32>
    %412 = math.exp %411 : vector<8x128xf32>
    %cst_131 = arith.constant 1.000000e+00 : f32
    %413 = vector.broadcast %cst_131 : f32 to vector<8x128xf32>
    %414 = arith.addf %413, %412 : vector<8x128xf32>
    %415 = arith.divf %413, %414 : vector<8x128xf32>
    %416 = vector.extract_strided_slice %409 {offsets = [0, 128], sizes = [8, 128], strides = [1, 1]} : vector<8x512xf32> to vector<8x128xf32>
    %417 = arith.negf %416 : vector<8x128xf32>
    %418 = math.exp %417 : vector<8x128xf32>
    %cst_132 = arith.constant 1.000000e+00 : f32
    %419 = vector.broadcast %cst_132 : f32 to vector<8x128xf32>
    %420 = arith.addf %419, %418 : vector<8x128xf32>
    %421 = arith.divf %419, %420 : vector<8x128xf32>
    %422 = vector.extract_strided_slice %409 {offsets = [0, 256], sizes = [8, 128], strides = [1, 1]} : vector<8x512xf32> to vector<8x128xf32>
    %423 = math.tanh %422 : vector<8x128xf32>
    %424 = vector.extract_strided_slice %409 {offsets = [0, 384], sizes = [8, 128], strides = [1, 1]} : vector<8x512xf32> to vector<8x128xf32>
    %425 = arith.negf %424 : vector<8x128xf32>
    %426 = math.exp %425 : vector<8x128xf32>
    %cst_133 = arith.constant 1.000000e+00 : f32
    %427 = vector.broadcast %cst_133 : f32 to vector<8x128xf32>
    %428 = arith.addf %427, %426 : vector<8x128xf32>
    %429 = arith.divf %427, %428 : vector<8x128xf32>
    %430 = arith.mulf %421, %373 : vector<8x128xf32>
    %431 = arith.mulf %415, %423 : vector<8x128xf32>
    %432 = arith.addf %430, %431 : vector<8x128xf32>
    %433 = math.tanh %432 : vector<8x128xf32>
    %434 = arith.mulf %429, %433 : vector<8x128xf32>
    %435 = arith.truncf %434 : vector<8x128xf32> to vector<8x128xbf16>
    %c0_134 = arith.constant 0 : index
    %c0_135 = arith.constant 0 : index
    %436 = vector.load %arg7[%c0_134, %c0_135] : memref<128x512xbf16, #tpu.memory_space<vmem>>, vector<128x512xbf16>
    %cst_136 = arith.constant dense<0.000000e+00> : vector<8x512xf32>
    %437 = tpu.matmul %435, %436, %cst_136 {dimension_numbers = #tpu.dot_dimension_numbers<[1], [0], [0], [1], [0, 0, 1, 1], [], []>} : vector<8x128xbf16>, vector<128x512xbf16>, vector<8x512xf32> -> vector<8x512xf32>
    %c0_137 = arith.constant 0 : index
    %c0_138 = arith.constant 0 : index
    %438 = vector.load %arg8[%c0_137, %c0_138] : memref<1x512xf32, #tpu.memory_space<vmem>>, vector<1x512xf32>
    %439 = vector.broadcast %438 : vector<1x512xf32> to vector<8x512xf32>
    %440 = arith.addf %437, %439 : vector<8x512xf32>
    %441 = arith.index_cast %c2_i32_125 : i32 to index
    %c0_139 = arith.constant 0 : index
    %c0_140 = arith.constant 0 : index
    %442 = vector.load %arg9[%441, %c0_139, %c0_140] : memref<4x8x512xf32, #tpu.memory_space<vmem>>, vector<1x8x512xf32>
    %443 = vector.shape_cast %442 : vector<1x8x512xf32> to vector<8x512xf32>
    %444 = vector.shape_cast %440 : vector<8x512xf32> to vector<1x8x512xf32>
    tpu.vector_store %arg9[%441, %c0_139, %c0_140], %444 {strides = array<i32>} : memref<4x8x512xf32, #tpu.memory_space<vmem>>, vector<1x8x512xf32>,
    %445 = tpu.iota {dimensions = array<i32: 1>} : vector<8x512xi32>
    %cst_141 = arith.constant dense<0xFF800000> : vector<8xf32>
    %446 = vector.multi_reduction <maximumf>, %440, %cst_141 [1] : vector<8x512xf32> to vector<8xf32>
    %447 = vector.shape_cast %446 : vector<8xf32> to vector<8x1xf32>
    %448 = vector.broadcast %447 : vector<8x1xf32> to vector<8x512xf32>
    %449 = arith.cmpf oeq, %440, %448 : vector<8x512xf32>
    %c512_i32_142 = arith.constant 512 : i32
    %450 = vector.broadcast %c512_i32_142 : i32 to vector<8x512xi32>
    %451 = arith.select %449, %445, %450 : vector<8x512xi1>, vector<8x512xi32>
    %cst_143 = arith.constant dense<2147483647> : vector<8xi32>
    %452 = vector.multi_reduction <minsi>, %451, %cst_143 [1] : vector<8x512xi32> to vector<8xi32>
    %453 = vector.shape_cast %452 : vector<8xi32> to vector<8x1xi32>
    %454 = vector.broadcast %453 : vector<8x1xi32> to vector<8x512xi32>
    %455 = arith.cmpi eq, %445, %454 : vector<8x512xi32>
    %456 = arith.extui %455 : vector<8x512xi1> to vector<8x512xi32>
    %457 = arith.sitofp %456 : vector<8x512xi32> to vector<8x512xf32>
    %458 = arith.truncf %457 : vector<8x512xf32> to vector<8x512xbf16>
    %c0_144 = arith.constant 0 : index
    %c0_145 = arith.constant 0 : index
    %459 = vector.load %arg2[%c0_144, %c0_145] : memref<512x128xbf16, #tpu.memory_space<vmem>>, vector<512x128xbf16>
    %cst_146 = arith.constant dense<0.000000e+00> : vector<8x128xf32>
    %460 = tpu.matmul %458, %459, %cst_146 {dimension_numbers = #tpu.dot_dimension_numbers<[1], [0], [0], [1], [0, 0, 1, 1], [], []>} : vector<8x512xbf16>, vector<512x128xbf16>, vector<8x128xf32> -> vector<8x128xf32>
    %461 = arith.truncf %460 : vector<8x128xf32> to vector<8x128xbf16>
    %c3_i32_147 = arith.constant 3 : i32
    %462 = arith.truncf %434 : vector<8x128xf32> to vector<8x128xbf16>
    %463 = tpu.concatenate %461, %462 in 1 : vector<8x128xbf16>, vector<8x128xbf16> -> vector<8x256xbf16>
    %c0_148 = arith.constant 0 : index
    %c0_149 = arith.constant 0 : index
    %464 = vector.load %arg5[%c0_148, %c0_149] : memref<256x512xbf16, #tpu.memory_space<vmem>>, vector<256x512xbf16>
    %cst_150 = arith.constant dense<0.000000e+00> : vector<8x512xf32>
    %465 = tpu.matmul %463, %464, %cst_150 {dimension_numbers = #tpu.dot_dimension_numbers<[1], [0], [0], [1], [0, 0, 1, 1], [], []>} : vector<8x256xbf16>, vector<256x512xbf16>, vector<8x512xf32> -> vector<8x512xf32>
    %c0_151 = arith.constant 0 : index
    %c0_152 = arith.constant 0 : index
    %466 = vector.load %arg6[%c0_151, %c0_152] : memref<1x512xf32, #tpu.memory_space<vmem>>, vector<1x512xf32>
    %467 = vector.broadcast %466 : vector<1x512xf32> to vector<8x512xf32>
    %468 = arith.addf %465, %467 : vector<8x512xf32>
    %469 = vector.extract_strided_slice %468 {offsets = [0, 0], sizes = [8, 128], strides = [1, 1]} : vector<8x512xf32> to vector<8x128xf32>
    %470 = arith.negf %469 : vector<8x128xf32>
    %471 = math.exp %470 : vector<8x128xf32>
    %cst_153 = arith.constant 1.000000e+00 : f32
    %472 = vector.broadcast %cst_153 : f32 to vector<8x128xf32>
    %473 = arith.addf %472, %471 : vector<8x128xf32>
    %474 = arith.divf %472, %473 : vector<8x128xf32>
    %475 = vector.extract_strided_slice %468 {offsets = [0, 128], sizes = [8, 128], strides = [1, 1]} : vector<8x512xf32> to vector<8x128xf32>
    %476 = arith.negf %475 : vector<8x128xf32>
    %477 = math.exp %476 : vector<8x128xf32>
    %cst_154 = arith.constant 1.000000e+00 : f32
    %478 = vector.broadcast %cst_154 : f32 to vector<8x128xf32>
    %479 = arith.addf %478, %477 : vector<8x128xf32>
    %480 = arith.divf %478, %479 : vector<8x128xf32>
    %481 = vector.extract_strided_slice %468 {offsets = [0, 256], sizes = [8, 128], strides = [1, 1]} : vector<8x512xf32> to vector<8x128xf32>
    %482 = math.tanh %481 : vector<8x128xf32>
    %483 = vector.extract_strided_slice %468 {offsets = [0, 384], sizes = [8, 128], strides = [1, 1]} : vector<8x512xf32> to vector<8x128xf32>
    %484 = arith.negf %483 : vector<8x128xf32>
    %485 = math.exp %484 : vector<8x128xf32>
    %cst_155 = arith.constant 1.000000e+00 : f32
    %486 = vector.broadcast %cst_155 : f32 to vector<8x128xf32>
    %487 = arith.addf %486, %485 : vector<8x128xf32>
    %488 = arith.divf %486, %487 : vector<8x128xf32>
    %489 = arith.mulf %480, %432 : vector<8x128xf32>
    %490 = arith.mulf %474, %482 : vector<8x128xf32>
    %491 = arith.addf %489, %490 : vector<8x128xf32>
    %492 = math.tanh %491 : vector<8x128xf32>
    %493 = arith.mulf %488, %492 : vector<8x128xf32>
    %494 = arith.truncf %493 : vector<8x128xf32> to vector<8x128xbf16>
    %c0_156 = arith.constant 0 : index
    %c0_157 = arith.constant 0 : index
    %495 = vector.load %arg7[%c0_156, %c0_157] : memref<128x512xbf16, #tpu.memory_space<vmem>>, vector<128x512xbf16>
    %cst_158 = arith.constant dense<0.000000e+00> : vector<8x512xf32>
    %496 = tpu.matmul %494, %495, %cst_158 {dimension_numbers = #tpu.dot_dimension_numbers<[1], [0], [0], [1], [0, 0, 1, 1], [], []>} : vector<8x128xbf16>, vector<128x512xbf16>, vector<8x512xf32> -> vector<8x512xf32>
    %c0_159 = arith.constant 0 : index
    %c0_160 = arith.constant 0 : index
    %497 = vector.load %arg8[%c0_159, %c0_160] : memref<1x512xf32, #tpu.memory_space<vmem>>, vector<1x512xf32>
    %498 = vector.broadcast %497 : vector<1x512xf32> to vector<8x512xf32>
    %499 = arith.addf %496, %498 : vector<8x512xf32>
    %500 = arith.index_cast %c3_i32_147 : i32 to index
    %c0_161 = arith.constant 0 : index
    %c0_162 = arith.constant 0 : index
    %501 = vector.load %arg9[%500, %c0_161, %c0_162] : memref<4x8x512xf32, #tpu.memory_space<vmem>>, vector<1x8x512xf32>
    %502 = vector.shape_cast %501 : vector<1x8x512xf32> to vector<8x512xf32>
    %503 = vector.shape_cast %499 : vector<8x512xf32> to vector<1x8x512xf32>
    tpu.vector_store %arg9[%500, %c0_161, %c0_162], %503 {strides = array<i32>} : memref<4x8x512xf32, #tpu.memory_space<vmem>>, vector<1x8x512xf32>,
    %504 = tpu.iota {dimensions = array<i32: 1>} : vector<8x512xi32>
    %cst_163 = arith.constant dense<0xFF800000> : vector<8xf32>
    %505 = vector.multi_reduction <maximumf>, %499, %cst_163 [1] : vector<8x512xf32> to vector<8xf32>
    %506 = vector.shape_cast %505 : vector<8xf32> to vector<8x1xf32>
    %507 = vector.broadcast %506 : vector<8x1xf32> to vector<8x512xf32>
    %508 = arith.cmpf oeq, %499, %507 : vector<8x512xf32>
    %c512_i32_164 = arith.constant 512 : i32
    %509 = vector.broadcast %c512_i32_164 : i32 to vector<8x512xi32>
    %510 = arith.select %508, %504, %509 : vector<8x512xi1>, vector<8x512xi32>
    %cst_165 = arith.constant dense<2147483647> : vector<8xi32>
    %511 = vector.multi_reduction <minsi>, %510, %cst_165 [1] : vector<8x512xi32> to vector<8xi32>
    %512 = vector.shape_cast %511 : vector<8xi32> to vector<8x1xi32>
    %513 = vector.broadcast %512 : vector<8x1xi32> to vector<8x512xi32>
    %514 = arith.cmpi eq, %504, %513 : vector<8x512xi32>
    %515 = arith.extui %514 : vector<8x512xi1> to vector<8x512xi32>
    %516 = arith.sitofp %515 : vector<8x512xi32> to vector<8x512xf32>
    %517 = arith.truncf %516 : vector<8x512xf32> to vector<8x512xbf16>
    %c0_166 = arith.constant 0 : index
    %c0_167 = arith.constant 0 : index
    %518 = vector.load %arg2[%c0_166, %c0_167] : memref<512x128xbf16, #tpu.memory_space<vmem>>, vector<512x128xbf16>
    %cst_168 = arith.constant dense<0.000000e+00> : vector<8x128xf32>
    %519 = tpu.matmul %517, %518, %cst_168 {dimension_numbers = #tpu.dot_dimension_numbers<[1], [0], [0], [1], [0, 0, 1, 1], [], []>} : vector<8x512xbf16>, vector<512x128xbf16>, vector<8x128xf32> -> vector<8x128xf32>
    %520 = arith.truncf %519 : vector<8x128xf32> to vector<8x128xbf16>
    %c4_i32_169 = arith.constant 4 : i32
    return
  }
  func.func @transform_0(%arg0: i32) -> (i32, i32, i32) {
    %c0_i32 = arith.constant 0 : i32
    %c0_i32_0 = arith.constant 0 : i32
    %c0_i32_1 = arith.constant 0 : i32
    return %c0_i32, %arg0, %c0_i32_0 : i32, i32, i32
  }
  func.func @transform_1(%arg0: i32) -> (i32, i32) {
    %c0_i32 = arith.constant 0 : i32
    %c0_i32_0 = arith.constant 0 : i32
    %c0_i32_1 = arith.constant 0 : i32
    return %c0_i32, %c0_i32_0 : i32, i32
  }
  func.func @transform_2(%arg0: i32) -> (i32, i32) {
    %c0_i32 = arith.constant 0 : i32
    %c0_i32_0 = arith.constant 0 : i32
    %c0_i32_1 = arith.constant 0 : i32
    return %c0_i32, %c0_i32_0 : i32, i32
  }
  func.func @transform_3(%arg0: i32) -> (i32, i32) {
    %c0_i32 = arith.constant 0 : i32
    %c0_i32_0 = arith.constant 0 : i32
    %c0_i32_1 = arith.constant 0 : i32
    return %c0_i32, %c0_i32_0 : i32, i32
  }
  func.func @transform_4(%arg0: i32) -> (i32, i32) {
    %c0_i32 = arith.constant 0 : i32
    %c0_i32_0 = arith.constant 0 : i32
    %c0_i32_1 = arith.constant 0 : i32
    return %c0_i32, %c0_i32_0 : i32, i32
  }
  func.func @transform_5(%arg0: i32) -> (i32, i32) {
    %c0_i32 = arith.constant 0 : i32
    %c0_i32_0 = arith.constant 0 : i32
    %c0_i32_1 = arith.constant 0 : i32
    return %c0_i32, %c0_i32_0 : i32, i32
  }
  func.func @transform_6(%arg0: i32) -> (i32, i32) {
    %c0_i32 = arith.constant 0 : i32
    %c0_i32_0 = arith.constant 0 : i32
    %c0_i32_1 = arith.constant 0 : i32
    return %c0_i32, %c0_i32_0 : i32, i32
  }
  func.func @transform_7(%arg0: i32) -> (i32, i32) {
    %c0_i32 = arith.constant 0 : i32
    %c0_i32_0 = arith.constant 0 : i32
    %c0_i32_1 = arith.constant 0 : i32
    return %c0_i32, %c0_i32_0 : i32, i32
  }
  func.func @transform_8(%arg0: i32) -> (i32, i32, i32) {
    %c0_i32 = arith.constant 0 : i32
    %c0_i32_0 = arith.constant 0 : i32
    %c0_i32_1 = arith.constant 0 : i32
    return %c0_i32, %arg0, %c0_i32_0 : i32, i32, i32
  }
}

</mosaic_0001>

<bundles_post_ra>
// kernel: tpu_custom_call.1
= control target key start
LH: loop header
LB: loop body
LE: loop exit
PB: predicated region body
PF: predicated region fallthrough
CT: control target
= control target key end

     0   :  { %13 = vsyncpa [#allocation3], 0  ;;  %s8894_s0 = inlined_call_operand.hbm [shape: bf16[8,8,128], index: 0, kind: input, shape index: {}]   ;;  %s8895_s1 = inlined_call_operand.hbm [shape: bf16[512,128], index: 1, kind: input, shape index: {}]   ;;  %s8896_s2 = inlined_call_operand.hbm [shape: bf16[256,512], index: 2, kind: input, shape index: {}]   ;;  %s8897_s3 = inlined_call_operand.vmem [shape: f32[1,512], index: 3, kind: input, shape index: {}]   ;;  %s8898_s4 = inlined_call_operand.hbm [shape: bf16[256,512], index: 4, kind: input, shape index: {}]   ;;  %s8899_s5 = inlined_call_operand.vmem [shape: f32[1,512], index: 5, kind: input, shape index: {}]   ;;  %s8900_s6 = inlined_call_operand.hbm [shape: bf16[128,512], index: 6, kind: input, shape index: {}]   ;;  %s8901_s7 = inlined_call_operand.vmem [shape: f32[1,512], index: 7, kind: input, shape index: {}]   ;;  %s8902_s8 = inlined_call_operand.hbm [shape: f32[4,8,512], index: 8, kind: output, shape index: {}]  }
   0x1   :  { %14 = vsyncpa [#allocation6], 0 }
   0x2   :  { %15 = vsyncpa [#allocation9], 0 }
   0x3   :  { %16 = vsyncpa [#allocation4], 0  ;;  %s7809_s27 = smov [#allocation5]   ;;  %s7669_s9 = scalar_lea.hbm %s8895_s1, 4096 }
   0x4   :  { %s34_s28 = sshll.u32 %s7809_s27, 4  ;;  %p7670_p0 = scmp.ne.s32.totalorder %s8895_s1, %s7669_s9  ;;  %s35_s28 = int_to_ptr.vmem [resolvable:$true] %s34_s28 }
   0x5   :  { %p7673_p1 = scmp.lt.u32.totalorder %s7669_s9, %s8895_s1 }
   0x7   :  { %p7675_p2 = pnand %p7673_p1, %p7670_p0 }
   0x9   :  { %7678 = shalt.err (!%p7675_p2)
}
   0xa   :  { %s7679_s14 = scalar_lea.vmem %s35_s28, 4096  ;;  %p7684_p4 = scmp.lt.s32.totalorder %s35_s28, %s35_s28 }
   0xb   :  { %p7680_p3 = scmp.ne.s32.totalorder %s35_s28, %s7679_s14  ;;  %p7685_p5 = scmp.lt.s32.totalorder %s7679_s14, %s7679_s14 }
   0xd   :  { %p7686_p6 = por %p7685_p5, %p7684_p4 }
   0xf   :  { %p7687_p7 = pnand %p7686_p6, %p7680_p3 }
  0x11   :  { %7690 = shalt.err (!%p7687_p7)
}
  0x12   :  { %s7810_s15 = smov 64   ;;  %s7811_s16 = smov 4  }
  0x13   :  { %40 = dma.hbm_to_vmem [thread:$0]  %s8895_s1, 4096, %s35_s28, [#allocation6], %s7810_s15, %s7810_s15, %s7811_s16  }
  0x14   :  { %s7812_s19 = smov [#allocation8]   ;;  %s7813_s21 = smov [#allocation2]  }
  0x15   :  { %s60_s20 = sshll.u32 %s7812_s19, 4  ;;  %s22_s22 = sshll.u32 %s7813_s21, 4  ;;  %s61_s20 = int_to_ptr.vmem [resolvable:$true] %s60_s20  ;;  %s23_s22 = int_to_ptr.vmem [resolvable:$true] %s22_s22 }
  0x16   :  { %s7691_s25 = scalar_lea.hbm %s8898_s4, 8192 }
  0x17   :  { %p7692_p8 = scmp.ne.s32.totalorder %s8898_s4, %s7691_s25  ;;  %p7695_p9 = scmp.lt.u32.totalorder %s7691_s25, %s8898_s4 }
  0x19   :  { %p7697_p10 = pnand %p7695_p9, %p7692_p8 }
  0x1b   :  { %7700 = shalt.err (!%p7697_p10)
}
  0x1c   :  { %s7701_s1 = scalar_lea.vmem %s61_s20, 8192  ;;  %p7706_p12 = scmp.lt.s32.totalorder %s61_s20, %s61_s20 }
  0x1d   :  { %p7702_p11 = scmp.ne.s32.totalorder %s61_s20, %s7701_s1  ;;  %p7707_p13 = scmp.lt.s32.totalorder %s7701_s1, %s7701_s1 }
  0x1f   :  { %p7708_p0 = por %p7707_p13, %p7706_p12 }
  0x21   :  { %p7709_p1 = pnand %p7708_p0, %p7702_p11 }
  0x23   :  { %7712 = shalt.err (!%p7709_p1)
}
  0x24   :  { %s7814_s28 = smov 256   ;;  %s7815_s9 = smov 16  }
  0x25   :  { %66 = dma.hbm_to_vmem [thread:$0]  %s8898_s4, 8192, %s61_s20, [#allocation9], %s7814_s28, %s7814_s28, %s7815_s9  }
  0x26   :  { %s7713_s14 = scalar_lea.hbm %s8894_s0, 512 }
  0x27   :  { %p7714_p2 = scmp.ne.s32.totalorder %s8894_s0, %s7713_s14  ;;  %p7717_p3 = scmp.lt.u32.totalorder %s7713_s14, %s8894_s0 }
  0x29   :  { %p7719_p4 = pnand %p7717_p3, %p7714_p2 }
  0x2b   :  { %7722 = shalt.err (!%p7719_p4)
}
  0x2c   :  { %s7723_s23 = scalar_lea.vmem %s23_s22, 512  ;;  %p7728_p6 = scmp.lt.s32.totalorder %s23_s22, %s23_s22 }
  0x2d   :  { %p7724_p5 = scmp.ne.s32.totalorder %s23_s22, %s7723_s23  ;;  %p7729_p7 = scmp.lt.s32.totalorder %s7723_s23, %s7723_s23 }
  0x2f   :  { %p7730_p8 = por %p7729_p7, %p7728_p6 }
  0x31   :  { %p7731_p9 = pnand %p7730_p8, %p7724_p5 }
  0x33   :  { %7734 = shalt.err (!%p7731_p9)
}
  0x34   :  { %28 = dma.hbm_to_vmem [thread:$0]  %s8894_s0, 512, %s23_s22, [#allocation3], %s7810_s15, %s7810_s15, %s7811_s16  }
  0x35   :  { %s7816_s24 = smov [#allocation7]   ;;  %s7817_s26 = smov [#allocation10]  }
  0x36   :  { %s46_s25 = sshll.u32 %s7816_s24, 4  ;;  %s74_s27 = sshll.u32 %s7817_s26, 4  ;;  %s47_s25 = int_to_ptr.vmem [resolvable:$true] %s46_s25  ;;  %s75_s27 = int_to_ptr.vmem [resolvable:$true] %s74_s27 }
  0x37   :  { %s7735_s1 = scalar_lea.hbm %s8896_s2, 8192 }
  0x38   :  { %p7736_p10 = scmp.ne.s32.totalorder %s8896_s2, %s7735_s1  ;;  %p7739_p11 = scmp.lt.u32.totalorder %s7735_s1, %s8896_s2 }
  0x3a   :  { %p7741_p12 = pnand %p7739_p11, %p7736_p10 }
  0x3c   :  { %7744 = shalt.err (!%p7741_p12)
}
  0x3d   :  { %s7745_s0 = scalar_lea.vmem %s47_s25, 8192  ;;  %p7750_p0 = scmp.lt.s32.totalorder %s47_s25, %s47_s25 }
  0x3e   :  { %p7746_p13 = scmp.ne.s32.totalorder %s47_s25, %s7745_s0  ;;  %p7751_p1 = scmp.lt.s32.totalorder %s7745_s0, %s7745_s0 }
  0x40   :  { %p7752_p2 = por %p7751_p1, %p7750_p0 }
  0x42   :  { %p7753_p3 = pnand %p7752_p2, %p7746_p13 }
  0x44   :  { %7756 = shalt.err (!%p7753_p3)
}
  0x45   :  { %52 = dma.hbm_to_vmem [thread:$0]  %s8896_s2, 8192, %s47_s25, [#allocation6], %s7814_s28, %s7814_s28, %s7815_s9  }
  0x46   :  { %s7757_s17 = scalar_lea.hbm %s8900_s6, 4096 }
  0x47   :  { %p7758_p4 = scmp.ne.s32.totalorder %s8900_s6, %s7757_s17  ;;  %p7761_p5 = scmp.lt.u32.totalorder %s7757_s17, %s8900_s6 }
  0x49   :  { %p7763_p6 = pnand %p7761_p5, %p7758_p4 }
  0x4b   :  { %7766 = shalt.err (!%p7763_p6)
}
  0x4c   :  { %s7767_s4 = scalar_lea.vmem %s75_s27, 4096  ;;  %p7772_p8 = scmp.lt.s32.totalorder %s75_s27, %s75_s27 }
  0x4d   :  { %p7768_p7 = scmp.ne.s32.totalorder %s75_s27, %s7767_s4  ;;  %p7773_p9 = scmp.lt.s32.totalorder %s7767_s4, %s7767_s4 }
  0x4f   :  { %p7774_p10 = por %p7773_p9, %p7772_p8 }
  0x51   :  { %p7775_p11 = pnand %p7774_p10, %p7768_p7 }
  0x53   :  { %7778 = shalt.err (!%p7775_p11)
}
  0x54   :  { %80 = dma.hbm_to_vmem [thread:$0]  %s8900_s6, 4096, %s75_s27, [#allocation9], %s7814_s28, %s7814_s28, %s7815_s9  }
  0x55   :  { %7801 = dma.done.wait [#allocation3], 512  }
  0x56   :  { %7802 = vsyncadd [#allocation3], 4294966784 }
  0x57   :  { %7803 = dma.done.wait [#allocation6], 12288  }
  0x58   :  { %7804 = vsyncadd [#allocation6], 4294955008 }
  0x59   :  { %7805 = dma.done.wait [#allocation9], 12288  }
  0x5a   :  { %7806 = vsyncadd [#allocation9], 4294955008  ;;  %v8903_v0 = vmov 0   ;;  %v7945_v1 = vld [vmem:[#allocation7 + $0x4] ss:$16 sps:$4 sm:$0xff]   ;;  %s7820_s16 = smov [#allocation11]  }
  0x5b   :  { %538 = vmatprep.mubr.bf16.mxu0 %v8903_v0  ;;  %579 = vmatprep.mubr.bf16.mxu1 %v8903_v0  ;;  %v7947_v2 = vld [vmem:[#allocation7] ss:$16 sps:$4 sm:$0xff]   ;;  %v7950_v3 = vld [vmem:[#allocation7 + $0x24] ss:$16 sps:$4 sm:$0xff]   ;;  %v7958_v6 = vld [vmem:[#allocation7 + $0xc] ss:$16 sps:$4 sm:$0xff]  }
  0x5c   :  { %506 = vmatprep.subr.bf16.mxu0 %v7945_v1  ;;  %v7953_v4 = vld [vmem:[#allocation7 + $0x20] ss:$16 sps:$4 sm:$0xff]   ;;  %v7956_v5 = vld [vmem:[#allocation7 + $0x44] ss:$16 sps:$4 sm:$0xff]   ;;  %v7960_v7 = vld [vmem:[#allocation7 + $0x8] ss:$16 sps:$4 sm:$0xff]   ;;  %547 = vmatprep.subr.bf16.mxu1 %v7958_v6 }
  0x5d   :  { %507 = vmatpush1.bf16.msra.mxu0 %v7947_v2  ;;  %v7963_v8 = vld [vmem:[#allocation7 + $0x40] ss:$16 sps:$4 sm:$0xff]   ;;  %v7967_v9 = vld [vmem:[#allocation7 + $0x64] ss:$16 sps:$4 sm:$0xff]   ;;  %548 = vmatpush1.bf16.msra.mxu1 %v7960_v7  ;;  %v7970_v10 = vld [vmem:[#allocation7 + $0x2c] ss:$16 sps:$4 sm:$0xff]  }
  0x5e   :  { %508 = vmatprep.subr.bf16.mxu0 %v7950_v3  ;;  %v7972_v11 = vld [vmem:[#allocation7 + $0x28] ss:$16 sps:$4 sm:$0xff]   ;;  %549 = vmatprep.subr.bf16.mxu1 %v7970_v10  ;;  %v7976_v12 = vld [vmem:[#allocation7 + $0x60] ss:$16 sps:$4 sm:$0xff]   ;;  %v7978_v13 = vld [vmem:[#allocation7 + $0x84] ss:$16 sps:$4 sm:$0xff]  }
  0x5f   :  { %v7980_v14 = vld [vmem:[#allocation7 + $0x4c] ss:$16 sps:$4 sm:$0xff]   ;;  %v7984_v15 = vld [vmem:[#allocation7 + $0x48] ss:$16 sps:$4 sm:$0xff]   ;;  %v7990_v17 = vld [vmem:[#allocation7 + $0x80] ss:$16 sps:$4 sm:$0xff]  }
  0x60   :  { %v7987_v16 = vld [vmem:[#allocation7 + $0x6c] ss:$16 sps:$4 sm:$0xff]   ;;  %v7993_v18 = vld [vmem:[#allocation7 + $0xa4] ss:$16 sps:$4 sm:$0xff]   ;;  %v7996_v19 = vld [vmem:[#allocation7 + $0x68] ss:$16 sps:$4 sm:$0xff]  }
  0x61   :  { %509 = vmatpush1.bf16.msra.mxu0 %v7953_v4  ;;  %550 = vmatpush1.bf16.msra.mxu1 %v7972_v11  ;;  %v7999_v20 = vld [vmem:[#allocation7 + $0x8c] ss:$16 sps:$4 sm:$0xff]   ;;  %v8002_v21 = vld [vmem:[#allocation7 + $0xa0] ss:$16 sps:$4 sm:$0xff]   ;;  %v8004_v22 = vld [vmem:[#allocation7 + $0xc4] ss:$16 sps:$4 sm:$0xff]  }
  0x62   :  { %510 = vmatprep.subr.bf16.mxu0 %v7956_v5  ;;  %551 = vmatprep.subr.bf16.mxu1 %v7980_v14  ;;  %v8008_v23 = vld [vmem:[#allocation7 + $0x88] ss:$16 sps:$4 sm:$0xff]   ;;  %v8011_v24 = vld [vmem:[#allocation7 + $0xac] ss:$16 sps:$4 sm:$0xff]   ;;  %v8014_v25 = vld [vmem:[#allocation7 + $0xc0] ss:$16 sps:$4 sm:$0xff]  }
  0x63   :  { %v8017_v26 = vld [vmem:[#allocation7 + $0xe4] ss:$16 sps:$4 sm:$0xff]   ;;  %v8020_v27 = vld [vmem:[#allocation7 + $0xa8] ss:$16 sps:$4 sm:$0xff]   ;;  %v8023_v28 = vld [vmem:[#allocation7 + $0xcc] ss:$16 sps:$4 sm:$0xff]  }
  0x64   :  { %v8026_v29 = vld [vmem:[#allocation7 + $0xe0] ss:$16 sps:$4 sm:$0xff]   ;;  %v8028_v30 = vld [vmem:[#allocation7 + $0x104] ss:$16 sps:$4 sm:$0xff]   ;;  %v8032_v31 = vld [vmem:[#allocation7 + $0xc8] ss:$16 sps:$4 sm:$0xff]  }
  0x65   :  { %511 = vmatpush1.bf16.msra.mxu0 %v7963_v8  ;;  %552 = vmatpush1.bf16.msra.mxu1 %v7984_v15  ;;  %v8035_v32 = vld [vmem:[#allocation7 + $0xec] ss:$16 sps:$4 sm:$0xff]   ;;  %v8038_v33 = vld [vmem:[#allocation7 + $0x100] ss:$16 sps:$4 sm:$0xff]   ;;  %v8041_v34 = vld [vmem:[#allocation7 + $0x124] ss:$16 sps:$4 sm:$0xff]  }
  0x66   :  { %512 = vmatprep.subr.bf16.mxu0 %v7967_v9  ;;  %553 = vmatprep.subr.bf16.mxu1 %v7987_v16  ;;  %v8044_v35 = vld [vmem:[#allocation7 + $0xe8] ss:$16 sps:$4 sm:$0xff]   ;;  %v8047_v36 = vld [vmem:[#allocation7 + $0x10c] ss:$16 sps:$4 sm:$0xff]   ;;  %v8050_v37 = vld [vmem:[#allocation7 + $0x120] ss:$16 sps:$4 sm:$0xff]  }
  0x67   :  { %v8052_v38 = vld [vmem:[#allocation7 + $0x144] ss:$16 sps:$4 sm:$0xff]   ;;  %v8056_v39 = vld [vmem:[#allocation7 + $0x108] ss:$16 sps:$4 sm:$0xff]   ;;  %v8059_v40 = vld [vmem:[#allocation7 + $0x12c] ss:$16 sps:$4 sm:$0xff]  }
  0x68   :  { %v8061_v41 = vld [vmem:[#allocation7 + $0x140] ss:$16 sps:$4 sm:$0xff]   ;;  %v8064_v42 = vld [vmem:[#allocation7 + $0x164] ss:$16 sps:$4 sm:$0xff]   ;;  %v8068_v43 = vld [vmem:[#allocation7 + $0x128] ss:$16 sps:$4 sm:$0xff]  }
  0x69   :  { %513 = vmatpush1.bf16.msra.mxu0 %v7976_v12  ;;  %554 = vmatpush1.bf16.msra.mxu1 %v7996_v19  ;;  %v8070_v44 = vld [vmem:[#allocation7 + $0x160] ss:$16 sps:$4 sm:$0xff]   ;;  %v8073_v45 = vld [vmem:[#allocation7 + $0x14c] ss:$16 sps:$4 sm:$0xff]   ;;  %v8075_v46 = vld [vmem:[#allocation7 + $0x184] ss:$16 sps:$4 sm:$0xff]  }
  0x6a   :  { %514 = vmatprep.subr.bf16.mxu0 %v7978_v13  ;;  %555 = vmatprep.subr.bf16.mxu1 %v7999_v20  ;;  %v8077_v47 = vld [vmem:[#allocation7 + $0x148] ss:$16 sps:$4 sm:$0xff]   ;;  %v8080_v48 = vld [vmem:[#allocation7 + $0x16c] ss:$16 sps:$4 sm:$0xff]   ;;  %v8084_v49 = vld [vmem:[#allocation7 + $0x180] ss:$16 sps:$4 sm:$0xff]  }
  0x6b   :  { %v8087_v50 = vld [vmem:[#allocation7 + $0x1a4] ss:$16 sps:$4 sm:$0xff]   ;;  %v8089_v51 = vld [vmem:[#allocation7 + $0x168] ss:$16 sps:$4 sm:$0xff]   ;;  %v8092_v52 = vld [vmem:[#allocation7 + $0x18c] ss:$16 sps:$4 sm:$0xff]  }
  0x6c   :  { %v8096_v53 = vld [vmem:[#allocation7 + $0x1a0] ss:$16 sps:$4 sm:$0xff]   ;;  %v8099_v54 = vld [vmem:[#allocation7 + $0x1c4] ss:$16 sps:$4 sm:$0xff]   ;;  %v8101_v55 = vld [vmem:[#allocation7 + $0x188] ss:$16 sps:$4 sm:$0xff]  }
  0x6d   :  { %515 = vmatpush1.bf16.msra.mxu0 %v7990_v17  ;;  %556 = vmatpush1.bf16.msra.mxu1 %v8008_v23  ;;  %8961 = vst [vmem:[#allocation16_spill] sm:$0xff] %v8099_v54  ;;  %v8104_v56 = vld [vmem:[#allocation7 + $0x1ac] ss:$16 sps:$4 sm:$0xff]   ;;  %v8108_v57 = vld [vmem:[#allocation7 + $0x1c0] ss:$16 sps:$4 sm:$0xff]   ;;  %s5807_s22 = sshll.u32 %s7820_s16, 4  ;;  %s5808_s22 = int_to_ptr.vmem [resolvable:$true] %s5807_s22 }
  0x6e   :  { %516 = vmatprep.subr.bf16.mxu0 %v7993_v18  ;;  %557 = vmatprep.subr.bf16.mxu1 %v8011_v24  ;;  %v8111_v58 = vld [vmem:[#allocation7 + $0x1e4] ss:$16 sps:$4 sm:$0xff]   ;;  %v8113_v59 = vld [vmem:[#allocation7 + $0x1a8] ss:$16 sps:$4 sm:$0xff]   ;;  %v8116_v60 = vld [vmem:[#allocation7 + $0x1cc] ss:$16 sps:$4 sm:$0xff]   ;;  %p7784_p13 = scmp.lt.s32.totalorder %s5808_s22, %s5808_s22 }
  0x6f   :  { %v8120_v61 = vld [vmem:[#allocation7 + $0x1e0] ss:$16 sps:$4 sm:$0xff]   ;;  %v8123_v62 = vld [vmem:[#allocation7 + $0x1c8] ss:$16 sps:$4 sm:$0xff]   ;;  %v8126_v63 = vld [vmem:[#allocation7 + $0x1ec] ss:$16 sps:$4 sm:$0xff]  }
  0x70   :  { %v99_v0 = vld [vmem:[#allocation2] sm:$0xf] }
  0x71   :  { %517 = vmatpush1.bf16.msra.mxu0 %v8002_v21  ;;  %558 = vmatpush1.bf16.msra.mxu1 %v8020_v27 }
  0x72   :  { %518 = vmatprep.subr.bf16.mxu0 %v8004_v22  ;;  %559 = vmatprep.subr.bf16.mxu1 %v8023_v28 }
  0x75   :  { %519 = vmatpush1.bf16.msra.mxu0 %v8014_v25  ;;  %560 = vmatpush1.bf16.msra.mxu1 %v8032_v31 }
  0x76   :  { %520 = vmatprep.subr.bf16.mxu0 %v8017_v26  ;;  %561 = vmatprep.subr.bf16.mxu1 %v8035_v32 }
  0x79   :  { %521 = vmatpush1.bf16.msra.mxu0 %v8026_v29  ;;  %562 = vmatpush1.bf16.msra.mxu1 %v8044_v35 }
  0x7a   :  { %522 = vmatprep.subr.bf16.mxu0 %v8028_v30  ;;  %563 = vmatprep.subr.bf16.mxu1 %v8047_v36 }
  0x7d   :  { %523 = vmatpush1.bf16.msra.mxu0 %v8038_v33  ;;  %564 = vmatpush1.bf16.msra.mxu1 %v8056_v39 }
  0x7e   :  { %524 = vmatprep.subr.bf16.mxu0 %v8041_v34  ;;  %565 = vmatprep.subr.bf16.mxu1 %v8059_v40 }
  0x81   :  { %525 = vmatpush1.bf16.msra.mxu0 %v8050_v37  ;;  %566 = vmatpush1.bf16.msra.mxu1 %v8068_v43 }
  0x82   :  { %526 = vmatprep.subr.bf16.mxu0 %v8052_v38  ;;  %567 = vmatprep.subr.bf16.mxu1 %v8073_v45 }
  0x85   :  { %527 = vmatpush1.bf16.msra.mxu0 %v8061_v41  ;;  %568 = vmatpush1.bf16.msra.mxu1 %v8077_v47 }
  0x86   :  { %528 = vmatprep.subr.bf16.mxu0 %v8064_v42  ;;  %569 = vmatprep.subr.bf16.mxu1 %v8080_v48 }
  0x89   :  { %529 = vmatpush1.bf16.msra.mxu0 %v8070_v44  ;;  %570 = vmatpush1.bf16.msra.mxu1 %v8089_v51 }
  0x8a   :  { %530 = vmatprep.subr.bf16.mxu0 %v8075_v46  ;;  %571 = vmatprep.subr.bf16.mxu1 %v8092_v52 }
  0x8d   :  { %531 = vmatpush1.bf16.msra.mxu0 %v8084_v49  ;;  %572 = vmatpush1.bf16.msra.mxu1 %v8101_v55 }
  0x8e   :  { %532 = vmatprep.subr.bf16.mxu0 %v8087_v50  ;;  %573 = vmatprep.subr.bf16.mxu1 %v8104_v56 }
  0x91   :  { %533 = vmatpush1.bf16.msra.mxu0 %v8096_v53  ;;  %574 = vmatpush1.bf16.msra.mxu1 %v8113_v59 }
  0x92   :  { %534 = vmatprep.subr.bf16.mxu0 %v8099_v54  ;;  %575 = vmatprep.subr.bf16.mxu1 %v8116_v60  ;;  %v8131_v54 = vld [vmem:[#allocation7 + $0x1e8] ss:$16 sps:$4 sm:$0xff]  }
  0x95   :  { %535 = vmatpush1.bf16.msra.mxu0 %v8108_v57  ;;  %576 = vmatpush1.bf16.msra.mxu1 %v8123_v62 }
  0x96   :  { %536 = vmatprep.subr.bf16.mxu0 %v8111_v58  ;;  %577 = vmatprep.subr.bf16.mxu1 %v8126_v63 }
  0x99   :  { %537 = vmatpush1.bf16.msra.mxu0 %v8120_v61  ;;  %578 = vmatpush1.bf16.msra.mxu1 %v8131_v54 }
  0x9a   :  { %615 = vmatprep.subr.bf16.mxu0 %v7945_v1  ;;  %656 = vmatprep.subr.bf16.mxu1 %v7958_v6 }
  0x9c   :  { %539 = vmatmul.mubr.bf16.vlgmr.msra.gmra.mrb[0].mxu0 %v99_v0  ;;  %580 = vmatmul.mubr.bf16.vlgmr.msra.gmra.mrb[0].mxu1 %v99_v0  ;;  %v8962_v0 = vld [vmem:[#allocation16_spill] sm:$0xff] }
  0x9d   :  { %616 = vmatpush1.bf16.msra.mxu0 %v7947_v2  ;;  %657 = vmatpush1.bf16.msra.mxu1 %v7960_v7  ;;  %v8906_v2 = vlaneseq }
  0x9e   :  { %617 = vmatprep.subr.bf16.mxu0 %v7950_v3  ;;  %658 = vmatprep.subr.bf16.mxu1 %v7970_v10 }
  0x9f   :  { %v167_v3 = vshrl.u32 %v8906_v2, 7  ;;  %v8396_v2 = vld [vmem:[#allocation7 + $0x1c4] ss:$16 sps:$4 sm:$0xff]  }
  0xa0   :  { %8980 = vst [vmem:[#allocation33_spill] sm:$0xff] %v8396_v2 }
  0xa1   :  { %618 = vmatpush1.bf16.msra.mxu0 %v7953_v4  ;;  %659 = vmatpush1.bf16.msra.mxu1 %v7972_v11  ;;  %v8204_v4 = vsub.s32 0, %v167_v3  ;;  %v8209_v7 = vsub.s32 1, %v167_v3 }
  0xa2   :  { %619 = vmatprep.subr.bf16.mxu0 %v7956_v5  ;;  %660 = vmatprep.subr.bf16.mxu1 %v7980_v14  ;;  %v164_v5 = vld [vmem:[%s8897_s3] sm:$0xf] }
  0xa3   :  { %8963 = vst [vmem:[#allocation16_spill] sm:$0xff] %v8204_v4  ;;  %8964 = vst [vmem:[#allocation17_spill] sm:$0xff] %v8209_v7 }
  0xa5   :  { %620 = vmatpush1.bf16.msra.mxu0 %v7963_v8  ;;  %661 = vmatpush1.bf16.msra.mxu1 %v7984_v15  ;;  %v8212_v8 = vrot.slane %v164_v5, %v8204_v4  ;;  %v8408_v4 = vld [vmem:[#allocation7 + $0x1e4] ss:$16 sps:$4 sm:$0xff]  }
  0xa6   :  { %621 = vmatprep.subr.bf16.mxu0 %v7967_v9  ;;  %662 = vmatprep.subr.bf16.mxu1 %v7987_v16  ;;  %v8217_v9 = vsub.s32 3, %v167_v3  ;;  %8984 = vst [vmem:[#allocation37_spill] sm:$0xff] %v8408_v4 }
  0xa7   :  { %8965 = vst [vmem:[#allocation18_spill] sm:$0xff] %v8212_v8 }
  0xa8   :  { %8966 = vst [vmem:[#allocation19_spill] sm:$0xff] %v8217_v9  ;;  %v8222_v16 = vrot.slane %v164_v5, %v8217_v9  ;;  %v8402_v9 = vld [vmem:[#allocation7 + $0x1c0] ss:$16 sps:$4 sm:$0xff]  }
  0xa9   :  { %622 = vmatpush1.bf16.msra.mxu0 %v7976_v12  ;;  %663 = vmatpush1.bf16.msra.mxu1 %v7996_v19  ;;  %8982 = vst [vmem:[#allocation35_spill] sm:$0xff] %v8402_v9 }
  0xaa   :  { %623 = vmatprep.subr.bf16.mxu0 %v7978_v13  ;;  %664 = vmatprep.subr.bf16.mxu1 %v7999_v20 }
  0xad   :  { %624 = vmatpush1.bf16.msra.mxu0 %v7990_v17  ;;  %665 = vmatpush1.bf16.msra.mxu1 %v8008_v23 }
  0xae   :  { %625 = vmatprep.subr.bf16.mxu0 %v7993_v18  ;;  %666 = vmatprep.subr.bf16.mxu1 %v8011_v24  ;;  %v8224_v18 = vsub.s32 2, %v167_v3  ;;  %v8297_v3 = vld [vmem:[#allocation7 + $0xa8] ss:$16 sps:$4 sm:$0xff]  }
  0xb0   :  { %8967 = vst [vmem:[#allocation20_spill] sm:$0xff] %v8224_v18  ;;  %v8228_v23 = vrot.slane %v164_v5, %v8224_v18  ;;  %v8399_v18 = vld [vmem:[#allocation7 + $0x1cc] ss:$16 sps:$4 sm:$0xff]  }
  0xb1   :  { %626 = vmatpush1.bf16.msra.mxu0 %v8002_v21  ;;  %667 = vmatpush1.bf16.msra.mxu1 %v8020_v27  ;;  %8981 = vst [vmem:[#allocation34_spill] sm:$0xff] %v8399_v18 }
  0xb2   :  { %627 = vmatprep.subr.bf16.mxu0 %v8004_v22  ;;  %668 = vmatprep.subr.bf16.mxu1 %v8023_v28 }
  0xb5   :  { %628 = vmatpush1.bf16.msra.mxu0 %v8014_v25  ;;  %669 = vmatpush1.bf16.msra.mxu1 %v8032_v31 }
  0xb6   :  { %629 = vmatprep.subr.bf16.mxu0 %v8017_v26  ;;  %670 = vmatprep.subr.bf16.mxu1 %v8035_v32 }
  0xb9   :  { %630 = vmatpush1.bf16.msra.mxu0 %v8026_v29  ;;  %671 = vmatpush1.bf16.msra.mxu1 %v8044_v35 }
  0xba   :  { %631 = vmatprep.subr.bf16.mxu0 %v8028_v30  ;;  %672 = vmatprep.subr.bf16.mxu1 %v8047_v36 }
  0xbd   :  { %632 = vmatpush1.bf16.msra.mxu0 %v8038_v33  ;;  %673 = vmatpush1.bf16.msra.mxu1 %v8056_v39 }
  0xbe   :  { %633 = vmatprep.subr.bf16.mxu0 %v8041_v34  ;;  %674 = vmatprep.subr.bf16.mxu1 %v8059_v40 }
  0xc1   :  { %634 = vmatpush1.bf16.msra.mxu0 %v8050_v37  ;;  %675 = vmatpush1.bf16.msra.mxu1 %v8068_v43  ;;  %v613_v43 = vld [vmem:[#allocation2 + $0x4] sm:$0xf] }
  0xc2   :  { %635 = vmatprep.subr.bf16.mxu0 %v8052_v38  ;;  %676 = vmatprep.subr.bf16.mxu1 %v8073_v45  ;;  %v8237_v45 = vld [vmem:[#allocation7 + $0x8] ss:$16 sps:$4 sm:$0xff]  }
  0xc5   :  { %636 = vmatpush1.bf16.msra.mxu0 %v8061_v41  ;;  %677 = vmatpush1.bf16.msra.mxu1 %v8077_v47  ;;  %v8243_v47 = vld [vmem:[#allocation7 + $0x2c] ss:$16 sps:$4 sm:$0xff]  }
  0xc6   :  { %637 = vmatprep.subr.bf16.mxu0 %v8064_v42  ;;  %678 = vmatprep.subr.bf16.mxu1 %v8080_v48  ;;  %v8246_v48 = vld [vmem:[#allocation7 + $0x20] ss:$16 sps:$4 sm:$0xff]  }
  0xc9   :  { %638 = vmatpush1.bf16.msra.mxu0 %v8070_v44  ;;  %679 = vmatpush1.bf16.msra.mxu1 %v8089_v51  ;;  %v8234_v44 = vld [vmem:[#allocation7] ss:$16 sps:$4 sm:$0xff]   ;;  %v8255_v51 = vld [vmem:[#allocation7 + $0x4c] ss:$16 sps:$4 sm:$0xff]  }
  0xca   :  { %639 = vmatprep.subr.bf16.mxu0 %v8075_v46  ;;  %680 = vmatprep.subr.bf16.mxu1 %v8092_v52  ;;  %v8240_v46 = vld [vmem:[#allocation7 + $0x24] ss:$16 sps:$4 sm:$0xff]   ;;  %v8258_v52 = vld [vmem:[#allocation7 + $0x40] ss:$16 sps:$4 sm:$0xff]  }
  0xcd   :  { %640 = vmatpush1.bf16.msra.mxu0 %v8084_v49  ;;  %681 = vmatpush1.bf16.msra.mxu1 %v8101_v55  ;;  %v8249_v49 = vld [vmem:[#allocation7 + $0x28] ss:$16 sps:$4 sm:$0xff]   ;;  %v8267_v55 = vld [vmem:[#allocation7 + $0x6c] ss:$16 sps:$4 sm:$0xff]  }
  0xce   :  { %641 = vmatprep.subr.bf16.mxu0 %v8087_v50  ;;  %682 = vmatprep.subr.bf16.mxu1 %v8104_v56  ;;  %v8252_v50 = vld [vmem:[#allocation7 + $0x44] ss:$16 sps:$4 sm:$0xff]   ;;  %v8270_v56 = vld [vmem:[#allocation7 + $0x60] ss:$16 sps:$4 sm:$0xff]  }
  0xd1   :  { %642 = vmatpush1.bf16.msra.mxu0 %v8096_v53  ;;  %683 = vmatpush1.bf16.msra.mxu1 %v8113_v59  ;;  %v8261_v53 = vld [vmem:[#allocation7 + $0x48] ss:$16 sps:$4 sm:$0xff]   ;;  %v8279_v59 = vld [vmem:[#allocation7 + $0x8c] ss:$16 sps:$4 sm:$0xff]  }
  0xd2   :  { %643 = vmatprep.subr.bf16.mxu0 %v8962_v0  ;;  %684 = vmatprep.subr.bf16.mxu1 %v8116_v60  ;;  %v8282_v60 = vld [vmem:[#allocation7 + $0x80] ss:$16 sps:$4 sm:$0xff]  }
  0xd3   :  { %v8294_v0 = vld [vmem:[#allocation7 + $0xa0] ss:$16 sps:$4 sm:$0xff]  }
  0xd5   :  { %644 = vmatpush1.bf16.msra.mxu0 %v8108_v57  ;;  %685 = vmatpush1.bf16.msra.mxu1 %v8123_v62  ;;  %v8273_v57 = vld [vmem:[#allocation7 + $0x68] ss:$16 sps:$4 sm:$0xff]   ;;  %v8288_v62 = vld [vmem:[#allocation7 + $0xa4] ss:$16 sps:$4 sm:$0xff]  }
  0xd6   :  { %645 = vmatprep.subr.bf16.mxu0 %v8111_v58  ;;  %686 = vmatprep.subr.bf16.mxu1 %v8126_v63  ;;  %v8276_v58 = vld [vmem:[#allocation7 + $0x84] ss:$16 sps:$4 sm:$0xff]   ;;  %v8291_v63 = vld [vmem:[#allocation7 + $0xac] ss:$16 sps:$4 sm:$0xff]  }
  0xd9   :  { %646 = vmatpush1.bf16.msra.mxu0 %v8120_v61  ;;  %687 = vmatpush1.bf16.msra.mxu1 %v8131_v54  ;;  %v8264_v54 = vld [vmem:[#allocation7 + $0x64] ss:$16 sps:$4 sm:$0xff]   ;;  %v8285_v61 = vld [vmem:[#allocation7 + $0x88] ss:$16 sps:$4 sm:$0xff]  }
  0xda   :  { %724 = vmatprep.subr.bf16.mxu0 %v7945_v1  ;;  %765 = vmatprep.subr.bf16.mxu1 %v7958_v6  ;;  %v8215_v1 = vrot.slane %v164_v5, %v8209_v7  ;;  %v8300_v5 = vld [vmem:[#allocation7 + $0xc4] ss:$16 sps:$4 sm:$0xff]   ;;  %v8405_v7 = vld [vmem:[#allocation7 + $0x1c8] ss:$16 sps:$4 sm:$0xff]  }
  0xdb   :  { %8983 = vst [vmem:[#allocation36_spill] sm:$0xff] %v8405_v7 }
 0x16f   :  { %v540_v6 = vpop.f32.mrb[0].mxu0  ;;  %v581_v19 = vpop.f32.mrb[0].mxu1 }
 0x170   :  { %v541_v10 = vadd.f32 %v540_v6, %v8212_v8  ;;  %v542_v11 = vpop.f32.mrb[1].mxu0  ;;  %v583_v20 = vpop.f32.mrb[1].mxu1  ;;  %v582_v26 = vadd.f32 %v581_v19, %v8228_v23  ;;  %v8303_v6 = vld [vmem:[#allocation7 + $0xcc] ss:$16 sps:$4 sm:$0xff]  }
 0x171   :  { %v543_v12 = vadd.f32 %v542_v11, %v8215_v1  ;;  %v544_v13 = vpop.f32.mrb[2].mxu0  ;;  %v584_v21 = vadd.f32 %v583_v20, %v8222_v16  ;;  %v585_v22 = vpop.f32.mrb[2].mxu1  ;;  %v8309_v11 = vld [vmem:[#allocation7 + $0xc8] ss:$16 sps:$4 sm:$0xff]   ;;  %v8327_v19 = vld [vmem:[#allocation7 + $0x10c] ss:$16 sps:$4 sm:$0xff]  }
 0x172   :  { %v5885_v14 = vmul.f32 -1.442695, %v541_v10  ;;  %v545_v15 = vpop.f32.mrb[3].mxu0  ;;  %v586_v24 = vpop.f32.mrb[3].mxu1  ;;  %v8306_v10 = vld [vmem:[#allocation7 + $0xc0] ss:$16 sps:$4 sm:$0xff]  }
 0x173   :  { %v5886_v17 = vmul.f32 -1.442695, %v543_v12  ;;  %v5887_v25 = vmul.f32 -1.442695, %v584_v21  ;;  %v8312_v12 = vld [vmem:[#allocation7 + $0xe4] ss:$16 sps:$4 sm:$0xff]  }
 0x174   :  { %7351 = vpow2.f32 %v5885_v14  ;;  %v8315_v13 = vld [vmem:[#allocation7 + $0xec] ss:$16 sps:$4 sm:$0xff]   ;;  %v8318_v14 = vld [vmem:[#allocation7 + $0xe0] ss:$16 sps:$4 sm:$0xff]   ;;  %v8321_v15 = vld [vmem:[#allocation7 + $0xe8] ss:$16 sps:$4 sm:$0xff]  }
 0x175   :  { %7353 = vpow2.f32 %v5886_v17  ;;  %v8324_v17 = vld [vmem:[#allocation7 + $0x104] ss:$16 sps:$4 sm:$0xff]   ;;  %v8330_v20 = vld [vmem:[#allocation7 + $0x100] ss:$16 sps:$4 sm:$0xff]   ;;  %v8333_v21 = vld [vmem:[#allocation7 + $0x108] ss:$16 sps:$4 sm:$0xff]  }
 0x176   :  { %7355 = vpow2.f32 %v5887_v25  ;;  %v8336_v22 = vld [vmem:[#allocation7 + $0x124] ss:$16 sps:$4 sm:$0xff]   ;;  %v8339_v24 = vld [vmem:[#allocation7 + $0x12c] ss:$16 sps:$4 sm:$0xff]   ;;  %v8342_v25 = vld [vmem:[#allocation7 + $0x120] ss:$16 sps:$4 sm:$0xff]  }
 0x177   :  { %7357 = vtanh.f32 %v582_v26  ;;  %v8345_v26 = vld [vmem:[#allocation7 + $0x128] ss:$16 sps:$4 sm:$0xff]  }
 0x17e   :  { %v7352_v27 = vpop.eup %7351 }
 0x17f   :  { %v7354_v28 = vpop.eup %7353  ;;  %v591_v29 = vadd.f32 1.0, %v7352_v27  ;;  %v8348_v27 = vld [vmem:[#allocation7 + $0x144] ss:$16 sps:$4 sm:$0xff]  }
 0x180   :  { %v597_v30 = vadd.f32 1.0, %v7354_v28  ;;  %v7356_v31 = vpop.eup %7355  ;;  %v8351_v28 = vld [vmem:[#allocation7 + $0x14c] ss:$16 sps:$4 sm:$0xff]  }
 0x181   :  { %7359 = vrcp.f32 %v591_v29  ;;  %v7358_v32 = vpop.eup %7357  ;;  %v604_v34 = vadd.f32 1.0, %v7356_v31  ;;  %v8354_v29 = vld [vmem:[#allocation7 + $0x140] ss:$16 sps:$4 sm:$0xff]   ;;  %v8360_v31 = vld [vmem:[#allocation7 + $0x164] ss:$16 sps:$4 sm:$0xff]  }
 0x182   :  { %7361 = vrcp.f32 %v597_v30  ;;  %v8357_v30 = vld [vmem:[#allocation7 + $0x148] ss:$16 sps:$4 sm:$0xff]   ;;  %8968 = vst [vmem:[#allocation21_spill] sm:$0xff] %v8360_v31 }
 0x183   :  { %7363 = vrcp.f32 %v604_v34  ;;  %v8369_v34 = vld [vmem:[#allocation7 + $0x168] ss:$16 sps:$4 sm:$0xff]  }
 0x184   :  { %8971 = vst [vmem:[#allocation24_spill] sm:$0xff] %v8369_v34 }
 0x18b   :  { %v7360_v33 = vpop.eup %7359 }
 0x18c   :  { %v7362_v35 = vpop.eup %7361  ;;  %v608_v36 = vmul.f32 %v7360_v33, %v7358_v32  ;;  %v8363_v32 = vld [vmem:[#allocation7 + $0x16c] ss:$16 sps:$4 sm:$0xff]   ;;  %v8366_v33 = vld [vmem:[#allocation7 + $0x160] ss:$16 sps:$4 sm:$0xff]  }
 0x18d   :  { %v607_v37 = vmul.f32 0.0, %v7362_v35  ;;  %v7364_v39 = vpop.eup %7363  ;;  %8969 = vst [vmem:[#allocation22_spill] sm:$0xff] %v8363_v32  ;;  %8970 = vst [vmem:[#allocation23_spill] sm:$0xff] %v8366_v33  ;;  %v8372_v35 = vld [vmem:[#allocation7 + $0x184] ss:$16 sps:$4 sm:$0xff]  }
 0x18e   :  { %8972 = vst [vmem:[#allocation25_spill] sm:$0xff] %v8372_v35 }
 0x18f   :  { %v8231_v38 = vadd.f32 %v608_v36, %v607_v37  ;;  %v8375_v36 = vld [vmem:[#allocation7 + $0x18c] ss:$16 sps:$4 sm:$0xff]   ;;  %v8378_v37 = vld [vmem:[#allocation7 + $0x180] ss:$16 sps:$4 sm:$0xff]  }
 0x190   :  { %8973 = vst [vmem:[#allocation26_spill] sm:$0xff] %v8375_v36  ;;  %8974 = vst [vmem:[#allocation27_spill] sm:$0xff] %v8378_v37 }
 0x191   :  { %7365 = vtanh.f32 %v8231_v38 }
 0x19b   :  { %v7366_v40 = vpop.eup %7365 }
 0x19c   :  { %v611_v41 = vmul.f32 %v7366_v40, %v7364_v39  ;;  %v8381_v39 = vld [vmem:[#allocation7 + $0x188] ss:$16 sps:$4 sm:$0xff]   ;;  %v8384_v40 = vld [vmem:[#allocation7 + $0x1a4] ss:$16 sps:$4 sm:$0xff]  }
 0x19d   :  { %8975 = vst [vmem:[#allocation28_spill] sm:$0xff] %v8381_v39  ;;  %8976 = vst [vmem:[#allocation29_spill] sm:$0xff] %v8384_v40 }
 0x19e   :  { %v614_v42 = vpack.c.bf16 %v611_v41, %v611_v41  ;;  %v8387_v41 = vld [vmem:[#allocation7 + $0x1ac] ss:$16 sps:$4 sm:$0xff]  }
 0x19f   :  { %8977 = vst [vmem:[#allocation30_spill] sm:$0xff] %v8387_v41 }
 0x1a0   :  { %647 = vmatprep.mubr.bf16.mxu0 %v614_v42  ;;  %688 = vmatprep.mubr.bf16.mxu1 %v614_v42  ;;  %v8390_v42 = vld [vmem:[#allocation7 + $0x1a0] ss:$16 sps:$4 sm:$0xff]  }
 0x1a1   :  { %648 = vmatmul.mubr.bf16.vlgmr.msra.gmra.mrb[4].mxu0 %v613_v43  ;;  %689 = vmatmul.mubr.bf16.vlgmr.msra.gmra.mrb[4].mxu1 %v613_v43  ;;  %8978 = vst [vmem:[#allocation31_spill] sm:$0xff] %v8390_v42  ;;  %v8393_v43 = vld [vmem:[#allocation7 + $0x1a8] ss:$16 sps:$4 sm:$0xff]  }
 0x1a2   :  { %725 = vmatpush1.bf16.msra.mxu0 %v8234_v44  ;;  %766 = vmatpush1.bf16.msra.mxu1 %v8237_v45  ;;  %8979 = vst [vmem:[#allocation32_spill] sm:$0xff] %v8393_v43 }
 0x1a3   :  { %726 = vmatprep.subr.bf16.mxu0 %v8240_v46  ;;  %767 = vmatprep.subr.bf16.mxu1 %v8243_v47 }
 0x1a6   :  { %727 = vmatpush1.bf16.msra.mxu0 %v8246_v48  ;;  %768 = vmatpush1.bf16.msra.mxu1 %v8249_v49 }
 0x1a7   :  { %728 = vmatprep.subr.bf16.mxu0 %v8252_v50  ;;  %769 = vmatprep.subr.bf16.mxu1 %v8255_v51 }
 0x1aa   :  { %729 = vmatpush1.bf16.msra.mxu0 %v8258_v52  ;;  %770 = vmatpush1.bf16.msra.mxu1 %v8261_v53 }
 0x1ab   :  { %730 = vmatprep.subr.bf16.mxu0 %v8264_v54  ;;  %771 = vmatprep.subr.bf16.mxu1 %v8267_v55 }
 0x1ae   :  { %731 = vmatpush1.bf16.msra.mxu0 %v8270_v56  ;;  %772 = vmatpush1.bf16.msra.mxu1 %v8273_v57 }
 0x1af   :  { %732 = vmatprep.subr.bf16.mxu0 %v8276_v58  ;;  %773 = vmatprep.subr.bf16.mxu1 %v8279_v59 }
 0x1b2   :  { %733 = vmatpush1.bf16.msra.mxu0 %v8282_v60  ;;  %774 = vmatpush1.bf16.msra.mxu1 %v8285_v61 }
 0x1b3   :  { %734 = vmatprep.subr.bf16.mxu0 %v8288_v62  ;;  %775 = vmatprep.subr.bf16.mxu1 %v8291_v63 }
 0x1b6   :  { %735 = vmatpush1.bf16.msra.mxu0 %v8294_v0  ;;  %776 = vmatpush1.bf16.msra.mxu1 %v8297_v3 }
 0x1b7   :  { %736 = vmatprep.subr.bf16.mxu0 %v8300_v5  ;;  %777 = vmatprep.subr.bf16.mxu1 %v8303_v6 }
 0x1ba   :  { %737 = vmatpush1.bf16.msra.mxu0 %v8306_v10  ;;  %778 = vmatpush1.bf16.msra.mxu1 %v8309_v11 }
 0x1bb   :  { %738 = vmatprep.subr.bf16.mxu0 %v8312_v12  ;;  %779 = vmatprep.subr.bf16.mxu1 %v8315_v13 }
 0x1be   :  { %739 = vmatpush1.bf16.msra.mxu0 %v8318_v14  ;;  %780 = vmatpush1.bf16.msra.mxu1 %v8321_v15 }
 0x1bf   :  { %740 = vmatprep.subr.bf16.mxu0 %v8324_v17  ;;  %781 = vmatprep.subr.bf16.mxu1 %v8327_v19 }
 0x1c2   :  { %741 = vmatpush1.bf16.msra.mxu0 %v8330_v20  ;;  %782 = vmatpush1.bf16.msra.mxu1 %v8333_v21 }
 0x1c3   :  { %742 = vmatprep.subr.bf16.mxu0 %v8336_v22  ;;  %783 = vmatprep.subr.bf16.mxu1 %v8339_v24 }
 0x1c6   :  { %743 = vmatpush1.bf16.msra.mxu0 %v8342_v25  ;;  %784 = vmatpush1.bf16.msra.mxu1 %v8345_v26 }
 0x1c7   :  { %744 = vmatprep.subr.bf16.mxu0 %v8348_v27  ;;  %785 = vmatprep.subr.bf16.mxu1 %v8351_v28 }
 0x1ca   :  { %745 = vmatpush1.bf16.msra.mxu0 %v8354_v29  ;;  %786 = vmatpush1.bf16.msra.mxu1 %v8357_v30 }
 0x1cb   :  { %746 = vmatprep.subr.bf16.mxu0 %v8360_v31  ;;  %787 = vmatprep.subr.bf16.mxu1 %v8363_v32 }
 0x1ce   :  { %747 = vmatpush1.bf16.msra.mxu0 %v8366_v33  ;;  %788 = vmatpush1.bf16.msra.mxu1 %v8369_v34 }
 0x1cf   :  { %748 = vmatprep.subr.bf16.mxu0 %v8372_v35  ;;  %789 = vmatprep.subr.bf16.mxu1 %v8375_v36 }
 0x1d2   :  { %749 = vmatpush1.bf16.msra.mxu0 %v8378_v37  ;;  %790 = vmatpush1.bf16.msra.mxu1 %v8381_v39 }
 0x1d3   :  { %750 = vmatprep.subr.bf16.mxu0 %v8384_v40  ;;  %791 = vmatprep.subr.bf16.mxu1 %v8387_v41 }
 0x1d6   :  { %751 = vmatpush1.bf16.msra.mxu0 %v8390_v42  ;;  %792 = vmatpush1.bf16.msra.mxu1 %v8393_v43  ;;  %v8411_v43 = vld [vmem:[#allocation7 + $0x1ec] ss:$16 sps:$4 sm:$0xff]  }
 0x1d7   :  { %752 = vmatprep.subr.bf16.mxu0 %v8396_v2  ;;  %793 = vmatprep.subr.bf16.mxu1 %v8399_v18  ;;  %8985 = vst [vmem:[#allocation38_spill] sm:$0xff] %v8411_v43  ;;  %v8414_v2 = vld [vmem:[#allocation7 + $0x1e0] ss:$16 sps:$4 sm:$0xff]   ;;  %v8417_v18 = vld [vmem:[#allocation7 + $0x1e8] ss:$16 sps:$4 sm:$0xff]  }
 0x1d8   :  { %8986 = vst [vmem:[#allocation39_spill] sm:$0xff] %v8414_v2  ;;  %8987 = vst [vmem:[#allocation40_spill] sm:$0xff] %v8417_v18 }
 0x1da   :  { %753 = vmatpush1.bf16.msra.mxu0 %v8402_v9  ;;  %794 = vmatpush1.bf16.msra.mxu1 %v8405_v7  ;;  %v8420_v9 = vld [vmem:[#allocation7 + $0x4] ss:$16 sps:$4 sm:$0xff]   ;;  %v8423_v7 = vld [vmem:[#allocation7 + $0xc] ss:$16 sps:$4 sm:$0xff]  }
 0x1db   :  { %754 = vmatprep.subr.bf16.mxu0 %v8408_v4  ;;  %795 = vmatprep.subr.bf16.mxu1 %v8411_v43  ;;  %8988 = vst [vmem:[#allocation41_spill] sm:$0xff] %v8420_v9  ;;  %8989 = vst [vmem:[#allocation42_spill] sm:$0xff] %v8423_v7 }
 0x1de   :  { %755 = vmatpush1.bf16.msra.mxu0 %v8414_v2  ;;  %796 = vmatpush1.bf16.msra.mxu1 %v8417_v18 }
 0x1df   :  { %833 = vmatprep.subr.bf16.mxu0 %v8420_v9  ;;  %874 = vmatprep.subr.bf16.mxu1 %v8423_v7 }
 0x274   :  { %v649_v4 = vpop.f32.mrb[4].mxu0  ;;  %v690_v42 = vpop.f32.mrb[4].mxu1 }
 0x275   :  { %v650_v43 = vadd.f32 %v649_v4, %v8212_v8  ;;  %v651_v41 = vpop.f32.mrb[5].mxu0  ;;  %v692_v40 = vpop.f32.mrb[5].mxu1  ;;  %v691_v7 = vadd.f32 %v690_v42, %v8228_v23  ;;  %v8993_v42 = vld [vmem:[#allocation24_spill] sm:$0xff] }
 0x276   :  { %v652_v2 = vadd.f32 %v651_v41, %v8215_v1  ;;  %v653_v39 = vpop.f32.mrb[6].mxu0  ;;  %v694_v37 = vpop.f32.mrb[6].mxu1  ;;  %v693_v9 = vadd.f32 %v692_v40, %v8222_v16  ;;  %v722_v41 = vld [vmem:[#allocation2 + $0x8] sm:$0xf] }
 0x277   :  { %v5888_v36 = vmul.f32 -1.442695, %v650_v43  ;;  %v654_v18 = vpop.f32.mrb[7].mxu0  ;;  %v695_v35 = vpop.f32.mrb[7].mxu1  ;;  %v8994_v43 = vld [vmem:[#allocation25_spill] sm:$0xff] }
 0x278   :  { %v5889_v34 = vmul.f32 -1.442695, %v652_v2  ;;  %v5890_v33 = vmul.f32 -1.442695, %v693_v9 }
 0x279   :  { %7367 = vpow2.f32 %v5888_v36 }
 0x27a   :  { %7369 = vpow2.f32 %v5889_v34 }
 0x27b   :  { %7371 = vpow2.f32 %v5890_v33 }
 0x27c   :  { %7373 = vtanh.f32 %v691_v7 }
 0x283   :  { %v7368_v32 = vpop.eup %7367 }
 0x284   :  { %v7370_v4 = vpop.eup %7369  ;;  %v700_v8 = vadd.f32 1.0, %v7368_v32 }
 0x285   :  { %v706_v31 = vadd.f32 1.0, %v7370_v4  ;;  %v7372_v37 = vpop.eup %7371  ;;  %v8995_v4 = vld [vmem:[#allocation26_spill] sm:$0xff] }
 0x286   :  { %7375 = vrcp.f32 %v700_v8  ;;  %v7374_v39 = vpop.eup %7373  ;;  %v713_v35 = vadd.f32 1.0, %v7372_v37  ;;  %v8990_v8 = vld [vmem:[#allocation21_spill] sm:$0xff]  ;;  %v8996_v37 = vld [vmem:[#allocation27_spill] sm:$0xff] }
 0x287   :  { %7377 = vrcp.f32 %v706_v31  ;;  %v8992_v31 = vld [vmem:[#allocation23_spill] sm:$0xff] }
 0x288   :  { %7379 = vrcp.f32 %v713_v35  ;;  %v8999_v35 = vld [vmem:[#allocation30_spill] sm:$0xff] }
 0x290   :  { %v7376_v18 = vpop.eup %7375 }
 0x291   :  { %v7378_v2 = vpop.eup %7377  ;;  %v717_v36 = vmul.f32 %v7376_v18, %v7374_v39  ;;  %v8997_v39 = vld [vmem:[#allocation28_spill] sm:$0xff]  ;;  %v8998_v18 = vld [vmem:[#allocation29_spill] sm:$0xff] }
 0x292   :  { %v716_v34 = vmul.f32 %v7378_v2, %v8231_v38  ;;  %v7380_v9 = vpop.eup %7379  ;;  %v8991_v38 = vld [vmem:[#allocation22_spill] sm:$0xff]  ;;  %v9000_v2 = vld [vmem:[#allocation31_spill] sm:$0xff] }
 0x294   :  { %v8431_v40 = vadd.f32 %v717_v36, %v716_v34  ;;  %v9001_v36 = vld [vmem:[#allocation32_spill] sm:$0xff]  ;;  %v9002_v34 = vld [vmem:[#allocation33_spill] sm:$0xff] }
 0x296   :  { %7381 = vtanh.f32 %v8431_v40 }
 0x2a0   :  { %v7382_v33 = vpop.eup %7381 }
 0x2a1   :  { %v720_v32 = vmul.f32 %v7382_v33, %v7380_v9  ;;  %v9003_v9 = vld [vmem:[#allocation34_spill] sm:$0xff]  ;;  %v9004_v33 = vld [vmem:[#allocation35_spill] sm:$0xff] }
 0x2a3   :  { %v723_v7 = vpack.c.bf16 %v720_v32, %v720_v32  ;;  %v9005_v32 = vld [vmem:[#allocation36_spill] sm:$0xff] }
 0x2a5   :  { %756 = vmatprep.mubr.bf16.mxu0 %v723_v7  ;;  %797 = vmatprep.mubr.bf16.mxu1 %v723_v7  ;;  %v9006_v7 = vld [vmem:[#allocation37_spill] sm:$0xff] }
 0x2a6   :  { %757 = vmatmul.mubr.bf16.vlgmr.msra.gmra.mrb[8].mxu0 %v722_v41  ;;  %798 = vmatmul.mubr.bf16.vlgmr.msra.gmra.mrb[8].mxu1 %v722_v41  ;;  %v9007_v41 = vld [vmem:[#allocation38_spill] sm:$0xff] }
 0x2a7   :  { %834 = vmatpush1.bf16.msra.mxu0 %v8234_v44  ;;  %875 = vmatpush1.bf16.msra.mxu1 %v8237_v45 }
 0x2a8   :  { %835 = vmatprep.subr.bf16.mxu0 %v8240_v46  ;;  %876 = vmatprep.subr.bf16.mxu1 %v8243_v47 }
 0x2ab   :  { %836 = vmatpush1.bf16.msra.mxu0 %v8246_v48  ;;  %877 = vmatpush1.bf16.msra.mxu1 %v8249_v49 }
 0x2ac   :  { %837 = vmatprep.subr.bf16.mxu0 %v8252_v50  ;;  %878 = vmatprep.subr.bf16.mxu1 %v8255_v51 }
 0x2af   :  { %838 = vmatpush1.bf16.msra.mxu0 %v8258_v52  ;;  %879 = vmatpush1.bf16.msra.mxu1 %v8261_v53 }
 0x2b0   :  { %839 = vmatprep.subr.bf16.mxu0 %v8264_v54  ;;  %880 = vmatprep.subr.bf16.mxu1 %v8267_v55 }
 0x2b3   :  { %840 = vmatpush1.bf16.msra.mxu0 %v8270_v56  ;;  %881 = vmatpush1.bf16.msra.mxu1 %v8273_v57 }
 0x2b4   :  { %841 = vmatprep.subr.bf16.mxu0 %v8276_v58  ;;  %882 = vmatprep.subr.bf16.mxu1 %v8279_v59 }
 0x2b7   :  { %842 = vmatpush1.bf16.msra.mxu0 %v8282_v60  ;;  %883 = vmatpush1.bf16.msra.mxu1 %v8285_v61 }
 0x2b8   :  { %843 = vmatprep.subr.bf16.mxu0 %v8288_v62  ;;  %884 = vmatprep.subr.bf16.mxu1 %v8291_v63 }
 0x2bb   :  { %844 = vmatpush1.bf16.msra.mxu0 %v8294_v0  ;;  %885 = vmatpush1.bf16.msra.mxu1 %v8297_v3 }
 0x2bc   :  { %845 = vmatprep.subr.bf16.mxu0 %v8300_v5  ;;  %886 = vmatprep.subr.bf16.mxu1 %v8303_v6 }
 0x2bf   :  { %846 = vmatpush1.bf16.msra.mxu0 %v8306_v10  ;;  %887 = vmatpush1.bf16.msra.mxu1 %v8309_v11 }
 0x2c0   :  { %847 = vmatprep.subr.bf16.mxu0 %v8312_v12  ;;  %888 = vmatprep.subr.bf16.mxu1 %v8315_v13 }
 0x2c3   :  { %848 = vmatpush1.bf16.msra.mxu0 %v8318_v14  ;;  %889 = vmatpush1.bf16.msra.mxu1 %v8321_v15 }
 0x2c4   :  { %849 = vmatprep.subr.bf16.mxu0 %v8324_v17  ;;  %890 = vmatprep.subr.bf16.mxu1 %v8327_v19 }
 0x2c7   :  { %850 = vmatpush1.bf16.msra.mxu0 %v8330_v20  ;;  %891 = vmatpush1.bf16.msra.mxu1 %v8333_v21 }
 0x2c8   :  { %851 = vmatprep.subr.bf16.mxu0 %v8336_v22  ;;  %892 = vmatprep.subr.bf16.mxu1 %v8339_v24 }
 0x2cb   :  { %852 = vmatpush1.bf16.msra.mxu0 %v8342_v25  ;;  %893 = vmatpush1.bf16.msra.mxu1 %v8345_v26 }
 0x2cc   :  { %853 = vmatprep.subr.bf16.mxu0 %v8348_v27  ;;  %894 = vmatprep.subr.bf16.mxu1 %v8351_v28 }
 0x2cf   :  { %854 = vmatpush1.bf16.msra.mxu0 %v8354_v29  ;;  %895 = vmatpush1.bf16.msra.mxu1 %v8357_v30 }
 0x2d0   :  { %855 = vmatprep.subr.bf16.mxu0 %v8990_v8  ;;  %896 = vmatprep.subr.bf16.mxu1 %v8991_v38 }
 0x2d3   :  { %856 = vmatpush1.bf16.msra.mxu0 %v8992_v31  ;;  %897 = vmatpush1.bf16.msra.mxu1 %v8993_v42 }
 0x2d4   :  { %857 = vmatprep.subr.bf16.mxu0 %v8994_v43  ;;  %898 = vmatprep.subr.bf16.mxu1 %v8995_v4 }
 0x2d7   :  { %858 = vmatpush1.bf16.msra.mxu0 %v8996_v37  ;;  %899 = vmatpush1.bf16.msra.mxu1 %v8997_v39  ;;  %v9008_v39 = vld [vmem:[#allocation39_spill] sm:$0xff]  ;;  %v9012_v37 = vld [vmem:[#allocation18_spill] sm:$0xff] }
 0x2d8   :  { %859 = vmatprep.subr.bf16.mxu0 %v8998_v18  ;;  %900 = vmatprep.subr.bf16.mxu1 %v8999_v35  ;;  %v9009_v18 = vld [vmem:[#allocation40_spill] sm:$0xff]  ;;  %v9010_v35 = vld [vmem:[#allocation41_spill] sm:$0xff] }
 0x2db   :  { %860 = vmatpush1.bf16.msra.mxu0 %v9000_v2  ;;  %901 = vmatpush1.bf16.msra.mxu1 %v9001_v36  ;;  %v9011_v2 = vld [vmem:[#allocation42_spill] sm:$0xff] }
 0x2dc   :  { %861 = vmatprep.subr.bf16.mxu0 %v9002_v34  ;;  %902 = vmatprep.subr.bf16.mxu1 %v9003_v9 }
 0x2df   :  { %862 = vmatpush1.bf16.msra.mxu0 %v9004_v33  ;;  %903 = vmatpush1.bf16.msra.mxu1 %v9005_v32 }
 0x2e0   :  { %863 = vmatprep.subr.bf16.mxu0 %v9006_v7  ;;  %904 = vmatprep.subr.bf16.mxu1 %v9007_v41 }
 0x2e3   :  { %864 = vmatpush1.bf16.msra.mxu0 %v9008_v39  ;;  %905 = vmatpush1.bf16.msra.mxu1 %v9009_v18 }
 0x2e4   :  { %942 = vmatprep.subr.bf16.mxu0 %v9010_v35  ;;  %983 = vmatprep.subr.bf16.mxu1 %v9011_v2 }
 0x379   :  { %v758_v36 = vpop.f32.mrb[8].mxu0  ;;  %v799_v34 = vpop.f32.mrb[8].mxu1 }
 0x37a   :  { %v759_v9 = vadd.f32 %v758_v36, %v9012_v37  ;;  %v760_v4 = vpop.f32.mrb[9].mxu0  ;;  %v801_v33 = vpop.f32.mrb[9].mxu1  ;;  %v800_v2 = vadd.f32 %v799_v34, %v8228_v23  ;;  %v831_v34 = vld [vmem:[#allocation2 + $0xc] sm:$0xf] }
 0x37b   :  { %v761_v32 = vadd.f32 %v760_v4, %v8215_v1  ;;  %v762_v43 = vpop.f32.mrb[10].mxu0  ;;  %v803_v7 = vpop.f32.mrb[10].mxu1  ;;  %v802_v35 = vadd.f32 %v801_v33, %v8222_v16 }
 0x37c   :  { %v5891_v42 = vmul.f32 -1.442695, %v759_v9  ;;  %v763_v41 = vpop.f32.mrb[11].mxu0  ;;  %v804_v31 = vpop.f32.mrb[11].mxu1  ;;  %v9016_v7 = vld [vmem:[#allocation24_spill] sm:$0xff] }
 0x37d   :  { %v5892_v39 = vmul.f32 -1.442695, %v761_v32  ;;  %v5893_v18 = vmul.f32 -1.442695, %v802_v35  ;;  %v9017_v41 = vld [vmem:[#allocation25_spill] sm:$0xff] }
 0x37e   :  { %7383 = vpow2.f32 %v5891_v42 }
 0x37f   :  { %7385 = vpow2.f32 %v5892_v39 }
 0x380   :  { %7387 = vpow2.f32 %v5893_v18 }
 0x381   :  { %7389 = vtanh.f32 %v800_v2 }
 0x388   :  { %v7384_v38 = vpop.eup %7383 }
 0x389   :  { %v7386_v36 = vpop.eup %7385  ;;  %v809_v37 = vadd.f32 1.0, %v7384_v38 }
 0x38a   :  { %v815_v8 = vadd.f32 1.0, %v7386_v36  ;;  %v7388_v43 = vpop.eup %7387  ;;  %v9018_v36 = vld [vmem:[#allocation26_spill] sm:$0xff] }
 0x38b   :  { %7391 = vrcp.f32 %v809_v37  ;;  %v7390_v4 = vpop.eup %7389  ;;  %v822_v31 = vadd.f32 1.0, %v7388_v43  ;;  %v9015_v37 = vld [vmem:[#allocation23_spill] sm:$0xff] }
 0x38c   :  { %7393 = vrcp.f32 %v815_v8  ;;  %v9014_v8 = vld [vmem:[#allocation22_spill] sm:$0xff]  ;;  %v9019_v43 = vld [vmem:[#allocation27_spill] sm:$0xff] }
 0x38d   :  { %7395 = vrcp.f32 %v822_v31  ;;  %v9022_v31 = vld [vmem:[#allocation30_spill] sm:$0xff] }
 0x395   :  { %v7392_v9 = vpop.eup %7391 }
 0x396   :  { %v7394_v32 = vpop.eup %7393  ;;  %v826_v42 = vmul.f32 %v7392_v9, %v7390_v4  ;;  %v9020_v4 = vld [vmem:[#allocation28_spill] sm:$0xff]  ;;  %v9021_v9 = vld [vmem:[#allocation29_spill] sm:$0xff] }
 0x397   :  { %v825_v39 = vmul.f32 %v7394_v32, %v8431_v40  ;;  %v7396_v18 = vpop.eup %7395  ;;  %v9013_v40 = vld [vmem:[#allocation21_spill] sm:$0xff]  ;;  %v9023_v32 = vld [vmem:[#allocation31_spill] sm:$0xff] }
 0x399   :  { %v8503_v33 = vadd.f32 %v826_v42, %v825_v39  ;;  %v9024_v42 = vld [vmem:[#allocation32_spill] sm:$0xff]  ;;  %v9025_v39 = vld [vmem:[#allocation33_spill] sm:$0xff] }
 0x39b   :  { %7397 = vtanh.f32 %v8503_v33 }
 0x3a5   :  { %v7398_v35 = vpop.eup %7397 }
 0x3a6   :  { %v829_v38 = vmul.f32 %v7398_v35, %v7396_v18  ;;  %v9026_v18 = vld [vmem:[#allocation34_spill] sm:$0xff]  ;;  %v9027_v35 = vld [vmem:[#allocation35_spill] sm:$0xff] }
 0x3a8   :  { %v832_v2 = vpack.c.bf16 %v829_v38, %v829_v38  ;;  %v9028_v38 = vld [vmem:[#allocation36_spill] sm:$0xff] }
 0x3aa   :  { %865 = vmatprep.mubr.bf16.mxu0 %v832_v2  ;;  %906 = vmatprep.mubr.bf16.mxu1 %v832_v2  ;;  %v9029_v2 = vld [vmem:[#allocation37_spill] sm:$0xff] }
 0x3ab   :  { %866 = vmatmul.mubr.bf16.vlgmr.msra.gmra.mrb[12].mxu0 %v831_v34  ;;  %907 = vmatmul.mubr.bf16.vlgmr.msra.gmra.mrb[12].mxu1 %v831_v34  ;;  %v9030_v34 = vld [vmem:[#allocation38_spill] sm:$0xff] }
 0x3ac   :  { %943 = vmatpush1.bf16.msra.mxu0 %v8234_v44  ;;  %984 = vmatpush1.bf16.msra.mxu1 %v8237_v45 }
 0x3ad   :  { %944 = vmatprep.subr.bf16.mxu0 %v8240_v46  ;;  %985 = vmatprep.subr.bf16.mxu1 %v8243_v47 }
 0x3b0   :  { %945 = vmatpush1.bf16.msra.mxu0 %v8246_v48  ;;  %986 = vmatpush1.bf16.msra.mxu1 %v8249_v49 }
 0x3b1   :  { %946 = vmatprep.subr.bf16.mxu0 %v8252_v50  ;;  %987 = vmatprep.subr.bf16.mxu1 %v8255_v51 }
 0x3b4   :  { %947 = vmatpush1.bf16.msra.mxu0 %v8258_v52  ;;  %988 = vmatpush1.bf16.msra.mxu1 %v8261_v53 }
 0x3b5   :  { %948 = vmatprep.subr.bf16.mxu0 %v8264_v54  ;;  %989 = vmatprep.subr.bf16.mxu1 %v8267_v55 }
 0x3b8   :  { %949 = vmatpush1.bf16.msra.mxu0 %v8270_v56  ;;  %990 = vmatpush1.bf16.msra.mxu1 %v8273_v57 }
 0x3b9   :  { %950 = vmatprep.subr.bf16.mxu0 %v8276_v58  ;;  %991 = vmatprep.subr.bf16.mxu1 %v8279_v59 }
 0x3bc   :  { %951 = vmatpush1.bf16.msra.mxu0 %v8282_v60  ;;  %992 = vmatpush1.bf16.msra.mxu1 %v8285_v61 }
 0x3bd   :  { %952 = vmatprep.subr.bf16.mxu0 %v8288_v62  ;;  %993 = vmatprep.subr.bf16.mxu1 %v8291_v63 }
 0x3c0   :  { %953 = vmatpush1.bf16.msra.mxu0 %v8294_v0  ;;  %994 = vmatpush1.bf16.msra.mxu1 %v8297_v3 }
 0x3c1   :  { %954 = vmatprep.subr.bf16.mxu0 %v8300_v5  ;;  %995 = vmatprep.subr.bf16.mxu1 %v8303_v6 }
 0x3c4   :  { %955 = vmatpush1.bf16.msra.mxu0 %v8306_v10  ;;  %996 = vmatpush1.bf16.msra.mxu1 %v8309_v11 }
 0x3c5   :  { %956 = vmatprep.subr.bf16.mxu0 %v8312_v12  ;;  %997 = vmatprep.subr.bf16.mxu1 %v8315_v13 }
 0x3c8   :  { %957 = vmatpush1.bf16.msra.mxu0 %v8318_v14  ;;  %998 = vmatpush1.bf16.msra.mxu1 %v8321_v15 }
 0x3c9   :  { %958 = vmatprep.subr.bf16.mxu0 %v8324_v17  ;;  %999 = vmatprep.subr.bf16.mxu1 %v8327_v19 }
 0x3cc   :  { %959 = vmatpush1.bf16.msra.mxu0 %v8330_v20  ;;  %1000 = vmatpush1.bf16.msra.mxu1 %v8333_v21 }
 0x3cd   :  { %960 = vmatprep.subr.bf16.mxu0 %v8336_v22  ;;  %1001 = vmatprep.subr.bf16.mxu1 %v8339_v24 }
 0x3d0   :  { %961 = vmatpush1.bf16.msra.mxu0 %v8342_v25  ;;  %1002 = vmatpush1.bf16.msra.mxu1 %v8345_v26 }
 0x3d1   :  { %962 = vmatprep.subr.bf16.mxu0 %v8348_v27  ;;  %1003 = vmatprep.subr.bf16.mxu1 %v8351_v28 }
 0x3d4   :  { %963 = vmatpush1.bf16.msra.mxu0 %v8354_v29  ;;  %1004 = vmatpush1.bf16.msra.mxu1 %v8357_v30 }
 0x3d5   :  { %964 = vmatprep.subr.bf16.mxu0 %v9013_v40  ;;  %1005 = vmatprep.subr.bf16.mxu1 %v9014_v8 }
 0x3d8   :  { %965 = vmatpush1.bf16.msra.mxu0 %v9015_v37  ;;  %1006 = vmatpush1.bf16.msra.mxu1 %v9016_v7 }
 0x3d9   :  { %966 = vmatprep.subr.bf16.mxu0 %v9017_v41  ;;  %1007 = vmatprep.subr.bf16.mxu1 %v9018_v36 }
 0x3dc   :  { %967 = vmatpush1.bf16.msra.mxu0 %v9019_v43  ;;  %1008 = vmatpush1.bf16.msra.mxu1 %v9020_v4  ;;  %v9031_v4 = vld [vmem:[#allocation39_spill] sm:$0xff]  ;;  %v9035_v43 = vld [vmem:[#allocation18_spill] sm:$0xff] }
 0x3dd   :  { %968 = vmatprep.subr.bf16.mxu0 %v9021_v9  ;;  %1009 = vmatprep.subr.bf16.mxu1 %v9022_v31  ;;  %v9032_v9 = vld [vmem:[#allocation40_spill] sm:$0xff]  ;;  %v9033_v31 = vld [vmem:[#allocation41_spill] sm:$0xff] }
 0x3e0   :  { %969 = vmatpush1.bf16.msra.mxu0 %v9023_v32  ;;  %1010 = vmatpush1.bf16.msra.mxu1 %v9024_v42  ;;  %v9034_v32 = vld [vmem:[#allocation42_spill] sm:$0xff] }
 0x3e1   :  { %970 = vmatprep.subr.bf16.mxu0 %v9025_v39  ;;  %1011 = vmatprep.subr.bf16.mxu1 %v9026_v18 }
 0x3e4   :  { %971 = vmatpush1.bf16.msra.mxu0 %v9027_v35  ;;  %1012 = vmatpush1.bf16.msra.mxu1 %v9028_v38 }
 0x3e5   :  { %972 = vmatprep.subr.bf16.mxu0 %v9029_v2  ;;  %1013 = vmatprep.subr.bf16.mxu1 %v9030_v34 }
 0x3e8   :  { %973 = vmatpush1.bf16.msra.mxu0 %v9031_v4  ;;  %1014 = vmatpush1.bf16.msra.mxu1 %v9032_v9 }
 0x3e9   :  { %1051 = vmatprep.subr.bf16.mxu0 %v9033_v31  ;;  %1092 = vmatprep.subr.bf16.mxu1 %v9034_v32 }
 0x47e   :  { %v867_v42 = vpop.f32.mrb[12].mxu0  ;;  %v908_v39 = vpop.f32.mrb[12].mxu1 }
 0x47f   :  { %v868_v18 = vadd.f32 %v867_v42, %v9035_v43  ;;  %v869_v36 = vpop.f32.mrb[13].mxu0  ;;  %v910_v35 = vpop.f32.mrb[13].mxu1  ;;  %v909_v32 = vadd.f32 %v908_v39, %v8228_v23  ;;  %v940_v39 = vld [vmem:[#allocation2 + $0x10] sm:$0xf] }
 0x480   :  { %v870_v38 = vadd.f32 %v869_v36, %v8215_v1  ;;  %v871_v41 = vpop.f32.mrb[14].mxu0  ;;  %v912_v2 = vpop.f32.mrb[14].mxu1  ;;  %v911_v31 = vadd.f32 %v910_v35, %v8222_v16 }
 0x481   :  { %v5894_v7 = vmul.f32 -1.442695, %v868_v18  ;;  %v872_v34 = vpop.f32.mrb[15].mxu0  ;;  %v913_v37 = vpop.f32.mrb[15].mxu1  ;;  %v9039_v2 = vld [vmem:[#allocation24_spill] sm:$0xff] }
 0x482   :  { %v5895_v4 = vmul.f32 -1.442695, %v870_v38  ;;  %v5896_v9 = vmul.f32 -1.442695, %v911_v31  ;;  %v9040_v34 = vld [vmem:[#allocation25_spill] sm:$0xff] }
 0x483   :  { %7399 = vpow2.f32 %v5894_v7 }
 0x484   :  { %7401 = vpow2.f32 %v5895_v4 }
 0x485   :  { %7403 = vpow2.f32 %v5896_v9 }
 0x486   :  { %7405 = vtanh.f32 %v909_v32 }
 0x48d   :  { %v7400_v8 = vpop.eup %7399 }
 0x48e   :  { %v7402_v42 = vpop.eup %7401  ;;  %v918_v43 = vadd.f32 1.0, %v7400_v8 }
 0x48f   :  { %v924_v40 = vadd.f32 1.0, %v7402_v42  ;;  %v7404_v41 = vpop.eup %7403  ;;  %v9041_v42 = vld [vmem:[#allocation26_spill] sm:$0xff] }
 0x490   :  { %7407 = vrcp.f32 %v918_v43  ;;  %v7406_v36 = vpop.eup %7405  ;;  %v931_v37 = vadd.f32 1.0, %v7404_v41  ;;  %v9038_v43 = vld [vmem:[#allocation23_spill] sm:$0xff] }
 0x491   :  { %7409 = vrcp.f32 %v924_v40  ;;  %v9037_v40 = vld [vmem:[#allocation22_spill] sm:$0xff]  ;;  %v9042_v41 = vld [vmem:[#allocation27_spill] sm:$0xff] }
 0x492   :  { %7411 = vrcp.f32 %v931_v37  ;;  %v9045_v37 = vld [vmem:[#allocation30_spill] sm:$0xff] }
 0x49a   :  { %v7408_v18 = vpop.eup %7407 }
 0x49b   :  { %v7410_v38 = vpop.eup %7409  ;;  %v935_v7 = vmul.f32 %v7408_v18, %v7406_v36  ;;  %v9043_v36 = vld [vmem:[#allocation28_spill] sm:$0xff]  ;;  %v9044_v18 = vld [vmem:[#allocation29_spill] sm:$0xff] }
 0x49c   :  { %v934_v4 = vmul.f32 %v7410_v38, %v8503_v33  ;;  %v7412_v9 = vpop.eup %7411  ;;  %v9036_v33 = vld [vmem:[#allocation21_spill] sm:$0xff]  ;;  %v9046_v38 = vld [vmem:[#allocation31_spill] sm:$0xff] }
 0x49e   :  { %v8575_v35 = vadd.f32 %v935_v7, %v934_v4  ;;  %v9047_v7 = vld [vmem:[#allocation32_spill] sm:$0xff]  ;;  %v9048_v4 = vld [vmem:[#allocation33_spill] sm:$0xff] }
 0x4a0   :  { %7413 = vtanh.f32 %v8575_v35 }
 0x4aa   :  { %v7414_v31 = vpop.eup %7413 }
 0x4ab   :  { %v938_v8 = vmul.f32 %v7414_v31, %v7412_v9  ;;  %v9049_v9 = vld [vmem:[#allocation34_spill] sm:$0xff]  ;;  %v9050_v31 = vld [vmem:[#allocation35_spill] sm:$0xff] }
 0x4ad   :  { %v941_v32 = vpack.c.bf16 %v938_v8, %v938_v8  ;;  %v9051_v8 = vld [vmem:[#allocation36_spill] sm:$0xff] }
 0x4af   :  { %974 = vmatprep.mubr.bf16.mxu0 %v941_v32  ;;  %1015 = vmatprep.mubr.bf16.mxu1 %v941_v32  ;;  %v9052_v32 = vld [vmem:[#allocation37_spill] sm:$0xff] }
 0x4b0   :  { %975 = vmatmul.mubr.bf16.vlgmr.msra.gmra.mrb[16].mxu0 %v940_v39  ;;  %1016 = vmatmul.mubr.bf16.vlgmr.msra.gmra.mrb[16].mxu1 %v940_v39  ;;  %v9053_v39 = vld [vmem:[#allocation38_spill] sm:$0xff] }
 0x4b1   :  { %1052 = vmatpush1.bf16.msra.mxu0 %v8234_v44  ;;  %1093 = vmatpush1.bf16.msra.mxu1 %v8237_v45 }
 0x4b2   :  { %1053 = vmatprep.subr.bf16.mxu0 %v8240_v46  ;;  %1094 = vmatprep.subr.bf16.mxu1 %v8243_v47 }
 0x4b5   :  { %1054 = vmatpush1.bf16.msra.mxu0 %v8246_v48  ;;  %1095 = vmatpush1.bf16.msra.mxu1 %v8249_v49 }
 0x4b6   :  { %1055 = vmatprep.subr.bf16.mxu0 %v8252_v50  ;;  %1096 = vmatprep.subr.bf16.mxu1 %v8255_v51 }
 0x4b9   :  { %1056 = vmatpush1.bf16.msra.mxu0 %v8258_v52  ;;  %1097 = vmatpush1.bf16.msra.mxu1 %v8261_v53 }
 0x4ba   :  { %1057 = vmatprep.subr.bf16.mxu0 %v8264_v54  ;;  %1098 = vmatprep.subr.bf16.mxu1 %v8267_v55 }
 0x4bd   :  { %1058 = vmatpush1.bf16.msra.mxu0 %v8270_v56  ;;  %1099 = vmatpush1.bf16.msra.mxu1 %v8273_v57 }
 0x4be   :  { %1059 = vmatprep.subr.bf16.mxu0 %v8276_v58  ;;  %1100 = vmatprep.subr.bf16.mxu1 %v8279_v59 }
 0x4c1   :  { %1060 = vmatpush1.bf16.msra.mxu0 %v8282_v60  ;;  %1101 = vmatpush1.bf16.msra.mxu1 %v8285_v61 }
 0x4c2   :  { %1061 = vmatprep.subr.bf16.mxu0 %v8288_v62  ;;  %1102 = vmatprep.subr.bf16.mxu1 %v8291_v63 }
 0x4c5   :  { %1062 = vmatpush1.bf16.msra.mxu0 %v8294_v0  ;;  %1103 = vmatpush1.bf16.msra.mxu1 %v8297_v3 }
 0x4c6   :  { %1063 = vmatprep.subr.bf16.mxu0 %v8300_v5  ;;  %1104 = vmatprep.subr.bf16.mxu1 %v8303_v6 }
 0x4c9   :  { %1064 = vmatpush1.bf16.msra.mxu0 %v8306_v10  ;;  %1105 = vmatpush1.bf16.msra.mxu1 %v8309_v11 }
 0x4ca   :  { %1065 = vmatprep.subr.bf16.mxu0 %v8312_v12  ;;  %1106 = vmatprep.subr.bf16.mxu1 %v8315_v13 }
 0x4cd   :  { %1066 = vmatpush1.bf16.msra.mxu0 %v8318_v14  ;;  %1107 = vmatpush1.bf16.msra.mxu1 %v8321_v15 }
 0x4ce   :  { %1067 = vmatprep.subr.bf16.mxu0 %v8324_v17  ;;  %1108 = vmatprep.subr.bf16.mxu1 %v8327_v19 }
 0x4d1   :  { %1068 = vmatpush1.bf16.msra.mxu0 %v8330_v20  ;;  %1109 = vmatpush1.bf16.msra.mxu1 %v8333_v21 }
 0x4d2   :  { %1069 = vmatprep.subr.bf16.mxu0 %v8336_v22  ;;  %1110 = vmatprep.subr.bf16.mxu1 %v8339_v24 }
 0x4d5   :  { %1070 = vmatpush1.bf16.msra.mxu0 %v8342_v25  ;;  %1111 = vmatpush1.bf16.msra.mxu1 %v8345_v26 }
 0x4d6   :  { %1071 = vmatprep.subr.bf16.mxu0 %v8348_v27  ;;  %1112 = vmatprep.subr.bf16.mxu1 %v8351_v28 }
 0x4d9   :  { %1072 = vmatpush1.bf16.msra.mxu0 %v8354_v29  ;;  %1113 = vmatpush1.bf16.msra.mxu1 %v8357_v30 }
 0x4da   :  { %1073 = vmatprep.subr.bf16.mxu0 %v9036_v33  ;;  %1114 = vmatprep.subr.bf16.mxu1 %v9037_v40 }
 0x4dd   :  { %1074 = vmatpush1.bf16.msra.mxu0 %v9038_v43  ;;  %1115 = vmatpush1.bf16.msra.mxu1 %v9039_v2 }
 0x4de   :  { %1075 = vmatprep.subr.bf16.mxu0 %v9040_v34  ;;  %1116 = vmatprep.subr.bf16.mxu1 %v9041_v42 }
 0x4e1   :  { %1076 = vmatpush1.bf16.msra.mxu0 %v9042_v41  ;;  %1117 = vmatpush1.bf16.msra.mxu1 %v9043_v36  ;;  %v9054_v36 = vld [vmem:[#allocation39_spill] sm:$0xff]  ;;  %v9058_v41 = vld [vmem:[#allocation18_spill] sm:$0xff] }
 0x4e2   :  { %1077 = vmatprep.subr.bf16.mxu0 %v9044_v18  ;;  %1118 = vmatprep.subr.bf16.mxu1 %v9045_v37  ;;  %v9055_v18 = vld [vmem:[#allocation40_spill] sm:$0xff]  ;;  %v9056_v37 = vld [vmem:[#allocation41_spill] sm:$0xff] }
 0x4e5   :  { %1078 = vmatpush1.bf16.msra.mxu0 %v9046_v38  ;;  %1119 = vmatpush1.bf16.msra.mxu1 %v9047_v7  ;;  %v9057_v38 = vld [vmem:[#allocation42_spill] sm:$0xff] }
 0x4e6   :  { %1079 = vmatprep.subr.bf16.mxu0 %v9048_v4  ;;  %1120 = vmatprep.subr.bf16.mxu1 %v9049_v9 }
 0x4e9   :  { %1080 = vmatpush1.bf16.msra.mxu0 %v9050_v31  ;;  %1121 = vmatpush1.bf16.msra.mxu1 %v9051_v8 }
 0x4ea   :  { %1081 = vmatprep.subr.bf16.mxu0 %v9052_v32  ;;  %1122 = vmatprep.subr.bf16.mxu1 %v9053_v39 }
 0x4ed   :  { %1082 = vmatpush1.bf16.msra.mxu0 %v9054_v36  ;;  %1123 = vmatpush1.bf16.msra.mxu1 %v9055_v18 }
 0x4ee   :  { %1160 = vmatprep.subr.bf16.mxu0 %v9056_v37  ;;  %1201 = vmatprep.subr.bf16.mxu1 %v9057_v38 }
 0x583   :  { %v976_v7 = vpop.f32.mrb[16].mxu0  ;;  %v1017_v4 = vpop.f32.mrb[16].mxu1 }
 0x584   :  { %v977_v9 = vadd.f32 %v976_v7, %v9058_v41  ;;  %v978_v42 = vpop.f32.mrb[17].mxu0  ;;  %v1019_v31 = vpop.f32.mrb[17].mxu1  ;;  %v1018_v38 = vadd.f32 %v1017_v4, %v8228_v23  ;;  %v1049_v4 = vld [vmem:[#allocation2 + $0x14] sm:$0xf] }
 0x585   :  { %v979_v8 = vadd.f32 %v978_v42, %v8215_v1  ;;  %v980_v34 = vpop.f32.mrb[18].mxu0  ;;  %v1021_v32 = vpop.f32.mrb[18].mxu1  ;;  %v1020_v37 = vadd.f32 %v1019_v31, %v8222_v16 }
 0x586   :  { %v5897_v2 = vmul.f32 -1.442695, %v977_v9  ;;  %v981_v39 = vpop.f32.mrb[19].mxu0  ;;  %v1022_v43 = vpop.f32.mrb[19].mxu1 }
 0x587   :  { %v5898_v36 = vmul.f32 -1.442695, %v979_v8  ;;  %v5899_v18 = vmul.f32 -1.442695, %v1020_v37 }
 0x588   :  { %7415 = vpow2.f32 %v5897_v2 }
 0x589   :  { %7417 = vpow2.f32 %v5898_v36 }
 0x58a   :  { %7419 = vpow2.f32 %v5899_v18 }
 0x58b   :  { %7421 = vtanh.f32 %v1018_v38 }
 0x592   :  { %v7416_v40 = vpop.eup %7415 }
 0x593   :  { %v7418_v7 = vpop.eup %7417  ;;  %v1027_v41 = vadd.f32 1.0, %v7416_v40 }
 0x594   :  { %v1033_v33 = vadd.f32 1.0, %v7418_v7  ;;  %v7420_v34 = vpop.eup %7419 }
 0x595   :  { %7423 = vrcp.f32 %v1027_v41  ;;  %v7422_v42 = vpop.eup %7421  ;;  %v1040_v43 = vadd.f32 1.0, %v7420_v34 }
 0x596   :  { %7425 = vrcp.f32 %v1033_v33 }
 0x597   :  { %7427 = vrcp.f32 %v1040_v43 }
 0x59f   :  { %v7424_v9 = vpop.eup %7423 }
 0x5a0   :  { %v7426_v8 = vpop.eup %7425  ;;  %v1044_v2 = vmul.f32 %v7424_v9, %v7422_v42 }
 0x5a1   :  { %v1043_v36 = vmul.f32 %v7426_v8, %v8575_v35  ;;  %v7428_v18 = vpop.eup %7427 }
 0x5a3   :  { %v8647_v31 = vadd.f32 %v1044_v2, %v1043_v36  ;;  %v1158_v36 = vld [vmem:[#allocation2 + $0x18] sm:$0xf] }
 0x5a5   :  { %7429 = vtanh.f32 %v8647_v31 }
 0x5af   :  { %v7430_v37 = vpop.eup %7429 }
 0x5b0   :  { %v1047_v40 = vmul.f32 %v7430_v37, %v7428_v18  ;;  %v7607_v18 = vld [vmem:[#allocation7] ss:$16 sps:$4 sm:$0xff]   ;;  %v7608_v37 = vld [vmem:[#allocation7 + $0x8] ss:$16 sps:$4 sm:$0xff]  }
 0x5b2   :  { %v1050_v38 = vpack.c.bf16 %v1047_v40, %v1047_v40  ;;  %v7609_v40 = vld [vmem:[#allocation7 + $0x24] ss:$16 sps:$4 sm:$0xff]  }
 0x5b4   :  { %1083 = vmatprep.mubr.bf16.mxu0 %v1050_v38  ;;  %1124 = vmatprep.mubr.bf16.mxu1 %v1050_v38  ;;  %v7611_v38 = vld [vmem:[#allocation7 + $0x20] ss:$16 sps:$4 sm:$0xff]  }
 0x5b5   :  { %1084 = vmatmul.mubr.bf16.vlgmr.msra.gmra.mrb[20].mxu0 %v1049_v4  ;;  %1125 = vmatmul.mubr.bf16.vlgmr.msra.gmra.mrb[20].mxu1 %v1049_v4  ;;  %v7612_v4 = vld [vmem:[#allocation7 + $0x28] ss:$16 sps:$4 sm:$0xff]  }
 0x5b6   :  { %1161 = vmatpush1.bf16.msra.mxu0 %v8234_v44  ;;  %1202 = vmatpush1.bf16.msra.mxu1 %v8237_v45  ;;  %v9059_v44 = vld [vmem:[#allocation21_spill] sm:$0xff]  ;;  %v9060_v45 = vld [vmem:[#allocation22_spill] sm:$0xff] }
 0x5b7   :  { %1162 = vmatprep.subr.bf16.mxu0 %v8240_v46  ;;  %1203 = vmatprep.subr.bf16.mxu1 %v8243_v47  ;;  %v9061_v46 = vld [vmem:[#allocation23_spill] sm:$0xff]  ;;  %v9062_v47 = vld [vmem:[#allocation24_spill] sm:$0xff] }
 0x5ba   :  { %1163 = vmatpush1.bf16.msra.mxu0 %v8246_v48  ;;  %1204 = vmatpush1.bf16.msra.mxu1 %v8249_v49  ;;  %v9063_v48 = vld [vmem:[#allocation25_spill] sm:$0xff]  ;;  %v9064_v49 = vld [vmem:[#allocation26_spill] sm:$0xff] }
 0x5bb   :  { %1164 = vmatprep.subr.bf16.mxu0 %v8252_v50  ;;  %1205 = vmatprep.subr.bf16.mxu1 %v8255_v51  ;;  %v9065_v50 = vld [vmem:[#allocation27_spill] sm:$0xff]  ;;  %v9066_v51 = vld [vmem:[#allocation28_spill] sm:$0xff] }
 0x5be   :  { %1165 = vmatpush1.bf16.msra.mxu0 %v8258_v52  ;;  %1206 = vmatpush1.bf16.msra.mxu1 %v8261_v53  ;;  %v9067_v52 = vld [vmem:[#allocation29_spill] sm:$0xff]  ;;  %v9068_v53 = vld [vmem:[#allocation30_spill] sm:$0xff] }
 0x5bf   :  { %1166 = vmatprep.subr.bf16.mxu0 %v8264_v54  ;;  %1207 = vmatprep.subr.bf16.mxu1 %v8267_v55  ;;  %v9069_v54 = vld [vmem:[#allocation31_spill] sm:$0xff]  ;;  %v9070_v55 = vld [vmem:[#allocation32_spill] sm:$0xff] }
 0x5c2   :  { %1167 = vmatpush1.bf16.msra.mxu0 %v8270_v56  ;;  %1208 = vmatpush1.bf16.msra.mxu1 %v8273_v57  ;;  %v9071_v56 = vld [vmem:[#allocation33_spill] sm:$0xff]  ;;  %v9072_v57 = vld [vmem:[#allocation34_spill] sm:$0xff] }
 0x5c3   :  { %1168 = vmatprep.subr.bf16.mxu0 %v8276_v58  ;;  %1209 = vmatprep.subr.bf16.mxu1 %v8279_v59  ;;  %v9073_v58 = vld [vmem:[#allocation35_spill] sm:$0xff]  ;;  %v9074_v59 = vld [vmem:[#allocation36_spill] sm:$0xff] }
 0x5c6   :  { %1169 = vmatpush1.bf16.msra.mxu0 %v8282_v60  ;;  %1210 = vmatpush1.bf16.msra.mxu1 %v8285_v61  ;;  %v9075_v60 = vld [vmem:[#allocation37_spill] sm:$0xff]  ;;  %v9076_v61 = vld [vmem:[#allocation38_spill] sm:$0xff] }
 0x5c7   :  { %1170 = vmatprep.subr.bf16.mxu0 %v8288_v62  ;;  %1211 = vmatprep.subr.bf16.mxu1 %v8291_v63  ;;  %v9077_v62 = vld [vmem:[#allocation39_spill] sm:$0xff]  ;;  %v9078_v63 = vld [vmem:[#allocation40_spill] sm:$0xff] }
 0x5ca   :  { %1171 = vmatpush1.bf16.msra.mxu0 %v8294_v0  ;;  %1212 = vmatpush1.bf16.msra.mxu1 %v8297_v3  ;;  %v9079_v0 = vld [vmem:[#allocation41_spill] sm:$0xff]  ;;  %v9080_v3 = vld [vmem:[#allocation42_spill] sm:$0xff] }
 0x5cb   :  { %1172 = vmatprep.subr.bf16.mxu0 %v8300_v5  ;;  %1213 = vmatprep.subr.bf16.mxu1 %v8303_v6 }
 0x5ce   :  { %1173 = vmatpush1.bf16.msra.mxu0 %v8306_v10  ;;  %1214 = vmatpush1.bf16.msra.mxu1 %v8309_v11  ;;  %v9081_v10 = vld [vmem:[#allocation18_spill] sm:$0xff] }
 0x5cf   :  { %1174 = vmatprep.subr.bf16.mxu0 %v8312_v12  ;;  %1215 = vmatprep.subr.bf16.mxu1 %v8315_v13 }
 0x5d2   :  { %1175 = vmatpush1.bf16.msra.mxu0 %v8318_v14  ;;  %1216 = vmatpush1.bf16.msra.mxu1 %v8321_v15 }
 0x5d3   :  { %1176 = vmatprep.subr.bf16.mxu0 %v8324_v17  ;;  %1217 = vmatprep.subr.bf16.mxu1 %v8327_v19 }
 0x5d6   :  { %1177 = vmatpush1.bf16.msra.mxu0 %v8330_v20  ;;  %1218 = vmatpush1.bf16.msra.mxu1 %v8333_v21 }
 0x5d7   :  { %1178 = vmatprep.subr.bf16.mxu0 %v8336_v22  ;;  %1219 = vmatprep.subr.bf16.mxu1 %v8339_v24 }
 0x5da   :  { %1179 = vmatpush1.bf16.msra.mxu0 %v8342_v25  ;;  %1220 = vmatpush1.bf16.msra.mxu1 %v8345_v26 }
 0x5db   :  { %1180 = vmatprep.subr.bf16.mxu0 %v8348_v27  ;;  %1221 = vmatprep.subr.bf16.mxu1 %v8351_v28 }
 0x5de   :  { %1181 = vmatpush1.bf16.msra.mxu0 %v8354_v29  ;;  %1222 = vmatpush1.bf16.msra.mxu1 %v8357_v30 }
 0x5df   :  { %1182 = vmatprep.subr.bf16.mxu0 %v9059_v44  ;;  %1223 = vmatprep.subr.bf16.mxu1 %v9060_v45  ;;  %v7613_v44 = vld [vmem:[#allocation7 + $0x44] ss:$16 sps:$4 sm:$0xff]   ;;  %v7614_v45 = vld [vmem:[#allocation7 + $0x4c] ss:$16 sps:$4 sm:$0xff]  }
 0x5e2   :  { %1183 = vmatpush1.bf16.msra.mxu0 %v9061_v46  ;;  %1224 = vmatpush1.bf16.msra.mxu1 %v9062_v47  ;;  %v7615_v46 = vld [vmem:[#allocation7 + $0x40] ss:$16 sps:$4 sm:$0xff]   ;;  %v7616_v47 = vld [vmem:[#allocation7 + $0x48] ss:$16 sps:$4 sm:$0xff]  }
 0x5e3   :  { %1184 = vmatprep.subr.bf16.mxu0 %v9063_v48  ;;  %1225 = vmatprep.subr.bf16.mxu1 %v9064_v49  ;;  %v7617_v48 = vld [vmem:[#allocation7 + $0x64] ss:$16 sps:$4 sm:$0xff]   ;;  %v7618_v49 = vld [vmem:[#allocation7 + $0x6c] ss:$16 sps:$4 sm:$0xff]  }
 0x5e6   :  { %1185 = vmatpush1.bf16.msra.mxu0 %v9065_v50  ;;  %1226 = vmatpush1.bf16.msra.mxu1 %v9066_v51  ;;  %v7619_v50 = vld [vmem:[#allocation7 + $0x60] ss:$16 sps:$4 sm:$0xff]   ;;  %v7620_v51 = vld [vmem:[#allocation7 + $0x68] ss:$16 sps:$4 sm:$0xff]  }
 0x5e7   :  { %1186 = vmatprep.subr.bf16.mxu0 %v9067_v52  ;;  %1227 = vmatprep.subr.bf16.mxu1 %v9068_v53  ;;  %v7621_v52 = vld [vmem:[#allocation7 + $0x84] ss:$16 sps:$4 sm:$0xff]   ;;  %v7622_v53 = vld [vmem:[#allocation7 + $0x8c] ss:$16 sps:$4 sm:$0xff]  }
 0x5ea   :  { %1187 = vmatpush1.bf16.msra.mxu0 %v9069_v54  ;;  %1228 = vmatpush1.bf16.msra.mxu1 %v9070_v55  ;;  %v7623_v54 = vld [vmem:[#allocation7 + $0x80] ss:$16 sps:$4 sm:$0xff]   ;;  %v7624_v55 = vld [vmem:[#allocation7 + $0x88] ss:$16 sps:$4 sm:$0xff]  }
 0x5eb   :  { %1188 = vmatprep.subr.bf16.mxu0 %v9071_v56  ;;  %1229 = vmatprep.subr.bf16.mxu1 %v9072_v57  ;;  %v7625_v56 = vld [vmem:[#allocation7 + $0xa4] ss:$16 sps:$4 sm:$0xff]   ;;  %v7626_v57 = vld [vmem:[#allocation7 + $0xac] ss:$16 sps:$4 sm:$0xff]  }
 0x5ee   :  { %1189 = vmatpush1.bf16.msra.mxu0 %v9073_v58  ;;  %1230 = vmatpush1.bf16.msra.mxu1 %v9074_v59  ;;  %v7627_v58 = vld [vmem:[#allocation7 + $0xa0] ss:$16 sps:$4 sm:$0xff]   ;;  %v7628_v59 = vld [vmem:[#allocation7 + $0xa8] ss:$16 sps:$4 sm:$0xff]  }
 0x5ef   :  { %1190 = vmatprep.subr.bf16.mxu0 %v9075_v60  ;;  %1231 = vmatprep.subr.bf16.mxu1 %v9076_v61  ;;  %v7629_v60 = vld [vmem:[#allocation7 + $0xc4] ss:$16 sps:$4 sm:$0xff]   ;;  %v7630_v61 = vld [vmem:[#allocation7 + $0xcc] ss:$16 sps:$4 sm:$0xff]  }
 0x5f2   :  { %1191 = vmatpush1.bf16.msra.mxu0 %v9077_v62  ;;  %1232 = vmatpush1.bf16.msra.mxu1 %v9078_v63  ;;  %v7631_v62 = vld [vmem:[#allocation7 + $0xc0] ss:$16 sps:$4 sm:$0xff]   ;;  %v7632_v63 = vld [vmem:[#allocation7 + $0xc8] ss:$16 sps:$4 sm:$0xff]  }
 0x5f3   :  { %1269 = vmatprep.subr.bf16.mxu0 %v9079_v0  ;;  %1310 = vmatprep.subr.bf16.mxu1 %v9080_v3  ;;  %v7633_v0 = vld [vmem:[#allocation7 + $0xe4] ss:$16 sps:$4 sm:$0xff]   ;;  %v7634_v3 = vld [vmem:[#allocation7 + $0xec] ss:$16 sps:$4 sm:$0xff]  }
 0x688   :  { %v1085_v5 = vpop.f32.mrb[20].mxu0  ;;  %v1126_v6 = vpop.f32.mrb[20].mxu1 }
 0x689   :  { %v1086_v11 = vadd.f32 %v1085_v5, %v9081_v10  ;;  %v1087_v12 = vpop.f32.mrb[21].mxu0  ;;  %v1128_v13 = vpop.f32.mrb[21].mxu1  ;;  %v1127_v26 = vadd.f32 %v1126_v6, %v8228_v23  ;;  %v7635_v5 = vld [vmem:[#allocation7 + $0xe0] ss:$16 sps:$4 sm:$0xff]   ;;  %v7636_v6 = vld [vmem:[#allocation7 + $0xe8] ss:$16 sps:$4 sm:$0xff]  }
 0x68a   :  { %v1088_v14 = vadd.f32 %v1087_v12, %v8215_v1  ;;  %v1089_v15 = vpop.f32.mrb[22].mxu0  ;;  %v1130_v17 = vpop.f32.mrb[22].mxu1  ;;  %v1129_v24 = vadd.f32 %v1128_v13, %v8222_v16  ;;  %v7638_v12 = vld [vmem:[#allocation7 + $0x10c] ss:$16 sps:$4 sm:$0xff]   ;;  %v7639_v13 = vld [vmem:[#allocation7 + $0x100] ss:$16 sps:$4 sm:$0xff]  }
 0x68b   :  { %v5900_v19 = vmul.f32 -1.442695, %v1086_v11  ;;  %v1090_v20 = vpop.f32.mrb[23].mxu0  ;;  %v1131_v21 = vpop.f32.mrb[23].mxu1  ;;  %v7637_v11 = vld [vmem:[#allocation7 + $0x104] ss:$16 sps:$4 sm:$0xff]  }
 0x68c   :  { %v5901_v22 = vmul.f32 -1.442695, %v1088_v14  ;;  %v5902_v25 = vmul.f32 -1.442695, %v1129_v24  ;;  %v7640_v14 = vld [vmem:[#allocation7 + $0x108] ss:$16 sps:$4 sm:$0xff]  }
 0x68d   :  { %7431 = vpow2.f32 %v5900_v19  ;;  %v7641_v15 = vld [vmem:[#allocation7 + $0x124] ss:$16 sps:$4 sm:$0xff]   ;;  %v7642_v17 = vld [vmem:[#allocation7 + $0x12c] ss:$16 sps:$4 sm:$0xff]   ;;  %v7643_v19 = vld [vmem:[#allocation7 + $0x120] ss:$16 sps:$4 sm:$0xff]  }
 0x68e   :  { %7433 = vpow2.f32 %v5901_v22  ;;  %v7644_v20 = vld [vmem:[#allocation7 + $0x128] ss:$16 sps:$4 sm:$0xff]   ;;  %v7645_v21 = vld [vmem:[#allocation7 + $0x144] ss:$16 sps:$4 sm:$0xff]   ;;  %v7646_v22 = vld [vmem:[#allocation7 + $0x14c] ss:$16 sps:$4 sm:$0xff]  }
 0x68f   :  { %7435 = vpow2.f32 %v5902_v25  ;;  %v7647_v24 = vld [vmem:[#allocation7 + $0x140] ss:$16 sps:$4 sm:$0xff]   ;;  %v7648_v25 = vld [vmem:[#allocation7 + $0x148] ss:$16 sps:$4 sm:$0xff]  }
 0x690   :  { %7437 = vtanh.f32 %v1127_v26  ;;  %v7649_v26 = vld [vmem:[#allocation7 + $0x164] ss:$16 sps:$4 sm:$0xff]  }
 0x697   :  { %v7432_v27 = vpop.eup %7431 }
 0x698   :  { %v7434_v28 = vpop.eup %7433  ;;  %v1136_v29 = vadd.f32 1.0, %v7432_v27  ;;  %v7650_v27 = vld [vmem:[#allocation7 + $0x16c] ss:$16 sps:$4 sm:$0xff]  }
 0x699   :  { %v1142_v30 = vadd.f32 1.0, %v7434_v28  ;;  %v7436_v35 = vpop.eup %7435  ;;  %v7651_v28 = vld [vmem:[#allocation7 + $0x160] ss:$16 sps:$4 sm:$0xff]  }
 0x69a   :  { %7439 = vrcp.f32 %v1136_v29  ;;  %v7438_v33 = vpop.eup %7437  ;;  %v1149_v32 = vadd.f32 1.0, %v7436_v35  ;;  %v7652_v29 = vld [vmem:[#allocation7 + $0x168] ss:$16 sps:$4 sm:$0xff]   ;;  %v7654_v35 = vld [vmem:[#allocation7 + $0x18c] ss:$16 sps:$4 sm:$0xff]  }
 0x69b   :  { %7441 = vrcp.f32 %v1142_v30  ;;  %v7653_v30 = vld [vmem:[#allocation7 + $0x184] ss:$16 sps:$4 sm:$0xff]  }
 0x69c   :  { %7443 = vrcp.f32 %v1149_v32  ;;  %v7657_v32 = vld [vmem:[#allocation7 + $0x1a4] ss:$16 sps:$4 sm:$0xff]  }
 0x6a4   :  { %v7440_v41 = vpop.eup %7439 }
 0x6a5   :  { %v7442_v39 = vpop.eup %7441  ;;  %v1153_v7 = vmul.f32 %v7440_v41, %v7438_v33  ;;  %v7655_v33 = vld [vmem:[#allocation7 + $0x180] ss:$16 sps:$4 sm:$0xff]   ;;  %v7656_v41 = vld [vmem:[#allocation7 + $0x188] ss:$16 sps:$4 sm:$0xff]  }
 0x6a6   :  { %v1152_v34 = vmul.f32 %v7442_v39, %v8647_v31  ;;  %v7444_v9 = vpop.eup %7443  ;;  %v7610_v31 = vld [vmem:[#allocation7 + $0x2c] ss:$16 sps:$4 sm:$0xff]  }
 0x6a7   :  { %v7658_v39 = vld [vmem:[#allocation7 + $0x1ac] ss:$16 sps:$4 sm:$0xff]  }
 0x6a8   :  { %v8719_v42 = vadd.f32 %v1153_v7, %v1152_v34  ;;  %v7659_v7 = vld [vmem:[#allocation7 + $0x1a0] ss:$16 sps:$4 sm:$0xff]   ;;  %v7660_v34 = vld [vmem:[#allocation7 + $0x1a8] ss:$16 sps:$4 sm:$0xff]  }
 0x6aa   :  { %7445 = vtanh.f32 %v8719_v42 }
 0x6b4   :  { %v7446_v43 = vpop.eup %7445 }
 0x6b5   :  { %v1156_v8 = vmul.f32 %v7446_v43, %v7444_v9  ;;  %v7661_v9 = vld [vmem:[#allocation7 + $0x1c4] ss:$16 sps:$4 sm:$0xff]   ;;  %v7662_v43 = vld [vmem:[#allocation7 + $0x1cc] ss:$16 sps:$4 sm:$0xff]  }
 0x6b7   :  { %v1159_v2 = vpack.c.bf16 %v1156_v8, %v1156_v8  ;;  %v7663_v8 = vld [vmem:[#allocation7 + $0x1c0] ss:$16 sps:$4 sm:$0xff]  }
 0x6b9   :  { %1192 = vmatprep.mubr.bf16.mxu0 %v1159_v2  ;;  %1233 = vmatprep.mubr.bf16.mxu1 %v1159_v2  ;;  %v7664_v2 = vld [vmem:[#allocation7 + $0x1c8] ss:$16 sps:$4 sm:$0xff]  }
 0x6ba   :  { %1193 = vmatmul.mubr.bf16.vlgmr.msra.gmra.mrb[24].mxu0 %v1158_v36  ;;  %1234 = vmatmul.mubr.bf16.vlgmr.msra.gmra.mrb[24].mxu1 %v1158_v36  ;;  %v7665_v36 = vld [vmem:[#allocation7 + $0x1e4] ss:$16 sps:$4 sm:$0xff]  }
 0x6bb   :  { %1270 = vmatpush1.bf16.msra.mxu0 %v7607_v18  ;;  %1311 = vmatpush1.bf16.msra.mxu1 %v7608_v37  ;;  %v7666_v18 = vld [vmem:[#allocation7 + $0x1ec] ss:$16 sps:$4 sm:$0xff]   ;;  %v7667_v37 = vld [vmem:[#allocation7 + $0x1e0] ss:$16 sps:$4 sm:$0xff]  }
 0x6bc   :  { %1271 = vmatprep.subr.bf16.mxu0 %v7609_v40  ;;  %1312 = vmatprep.subr.bf16.mxu1 %v7610_v31  ;;  %v7668_v40 = vld [vmem:[#allocation7 + $0x1e8] ss:$16 sps:$4 sm:$0xff]   ;;  %v6681_v31 = vld [vmem:[#allocation8 + $0x4] ss:$16 sps:$4 sm:$0xff]  }
 0x6bf   :  { %1272 = vmatpush1.bf16.msra.mxu0 %v7611_v38  ;;  %1313 = vmatpush1.bf16.msra.mxu1 %v7612_v4  ;;  %v6693_v38 = vld [vmem:[#allocation8 + $0xc] ss:$16 sps:$4 sm:$0xff]  }
 0x6c0   :  { %1273 = vmatprep.subr.bf16.mxu0 %v7613_v44  ;;  %1314 = vmatprep.subr.bf16.mxu1 %v7614_v45 }
 0x6c3   :  { %1274 = vmatpush1.bf16.msra.mxu0 %v7615_v46  ;;  %1315 = vmatpush1.bf16.msra.mxu1 %v7616_v47 }
 0x6c4   :  { %1275 = vmatprep.subr.bf16.mxu0 %v7617_v48  ;;  %1316 = vmatprep.subr.bf16.mxu1 %v7618_v49 }
 0x6c7   :  { %1276 = vmatpush1.bf16.msra.mxu0 %v7619_v50  ;;  %1317 = vmatpush1.bf16.msra.mxu1 %v7620_v51 }
 0x6c8   :  { %1277 = vmatprep.subr.bf16.mxu0 %v7621_v52  ;;  %1318 = vmatprep.subr.bf16.mxu1 %v7622_v53 }
 0x6cb   :  { %1278 = vmatpush1.bf16.msra.mxu0 %v7623_v54  ;;  %1319 = vmatpush1.bf16.msra.mxu1 %v7624_v55 }
 0x6cc   :  { %1279 = vmatprep.subr.bf16.mxu0 %v7625_v56  ;;  %1320 = vmatprep.subr.bf16.mxu1 %v7626_v57 }
 0x6cf   :  { %1280 = vmatpush1.bf16.msra.mxu0 %v7627_v58  ;;  %1321 = vmatpush1.bf16.msra.mxu1 %v7628_v59 }
 0x6d0   :  { %1281 = vmatprep.subr.bf16.mxu0 %v7629_v60  ;;  %1322 = vmatprep.subr.bf16.mxu1 %v7630_v61 }
 0x6d3   :  { %1282 = vmatpush1.bf16.msra.mxu0 %v7631_v62  ;;  %1323 = vmatpush1.bf16.msra.mxu1 %v7632_v63 }
 0x6d4   :  { %1283 = vmatprep.subr.bf16.mxu0 %v7633_v0  ;;  %1324 = vmatprep.subr.bf16.mxu1 %v7634_v3 }
 0x6d7   :  { %1284 = vmatpush1.bf16.msra.mxu0 %v7635_v5  ;;  %1325 = vmatpush1.bf16.msra.mxu1 %v7636_v6 }
 0x6d8   :  { %1285 = vmatprep.subr.bf16.mxu0 %v7637_v11  ;;  %1326 = vmatprep.subr.bf16.mxu1 %v7638_v12 }
 0x6db   :  { %1286 = vmatpush1.bf16.msra.mxu0 %v7639_v13  ;;  %1327 = vmatpush1.bf16.msra.mxu1 %v7640_v14 }
 0x6dc   :  { %1287 = vmatprep.subr.bf16.mxu0 %v7641_v15  ;;  %1328 = vmatprep.subr.bf16.mxu1 %v7642_v17 }
 0x6df   :  { %1288 = vmatpush1.bf16.msra.mxu0 %v7643_v19  ;;  %1329 = vmatpush1.bf16.msra.mxu1 %v7644_v20  ;;  %v1267_v19 = vld [vmem:[#allocation2 + $0x1c] sm:$0xf]  ;;  %v6679_v20 = vld [vmem:[#allocation8] ss:$16 sps:$4 sm:$0xff]  }
 0x6e0   :  { %1289 = vmatprep.subr.bf16.mxu0 %v7645_v21  ;;  %1330 = vmatprep.subr.bf16.mxu1 %v7646_v22  ;;  %v6691_v21 = vld [vmem:[#allocation8 + $0x8] ss:$16 sps:$4 sm:$0xff]   ;;  %v6684_v22 = vld [vmem:[#allocation8 + $0x24] ss:$16 sps:$4 sm:$0xff]  }
 0x6e3   :  { %1290 = vmatpush1.bf16.msra.mxu0 %v7647_v24  ;;  %1331 = vmatpush1.bf16.msra.mxu1 %v7648_v25  ;;  %v6682_v24 = vld [vmem:[#allocation8 + $0x20] ss:$16 sps:$4 sm:$0xff]  }
 0x6e4   :  { %1291 = vmatprep.subr.bf16.mxu0 %v7649_v26  ;;  %1332 = vmatprep.subr.bf16.mxu1 %v7650_v27  ;;  %v6685_v25 = vld [vmem:[#allocation8 + $0x40] ss:$16 sps:$4 sm:$0xff]   ;;  %v6690_v26 = vld [vmem:[#allocation8 + $0x64] ss:$16 sps:$4 sm:$0xff]  }
 0x6e5   :  { %v6688_v27 = vld [vmem:[#allocation8 + $0x60] ss:$16 sps:$4 sm:$0xff]  }
 0x6e7   :  { %1292 = vmatpush1.bf16.msra.mxu0 %v7651_v28  ;;  %1333 = vmatpush1.bf16.msra.mxu1 %v7652_v29  ;;  %v6696_v28 = vld [vmem:[#allocation8 + $0x84] ss:$16 sps:$4 sm:$0xff]   ;;  %v6699_v29 = vld [vmem:[#allocation8 + $0x2c] ss:$16 sps:$4 sm:$0xff]  }
 0x6e8   :  { %1293 = vmatprep.subr.bf16.mxu0 %v7653_v30  ;;  %1334 = vmatprep.subr.bf16.mxu1 %v7654_v35  ;;  %v6694_v30 = vld [vmem:[#allocation8 + $0x80] ss:$16 sps:$4 sm:$0xff]   ;;  %v6697_v35 = vld [vmem:[#allocation8 + $0x28] ss:$16 sps:$4 sm:$0xff]  }
 0x6eb   :  { %1294 = vmatpush1.bf16.msra.mxu0 %v7655_v33  ;;  %1335 = vmatpush1.bf16.msra.mxu1 %v7656_v41  ;;  %v6702_v33 = vld [vmem:[#allocation8 + $0xa4] ss:$16 sps:$4 sm:$0xff]   ;;  %v6705_v41 = vld [vmem:[#allocation8 + $0x4c] ss:$16 sps:$4 sm:$0xff]  }
 0x6ec   :  { %1295 = vmatprep.subr.bf16.mxu0 %v7657_v32  ;;  %1336 = vmatprep.subr.bf16.mxu1 %v7658_v39  ;;  %v6700_v32 = vld [vmem:[#allocation8 + $0xa0] ss:$16 sps:$4 sm:$0xff]   ;;  %v6703_v39 = vld [vmem:[#allocation8 + $0x48] ss:$16 sps:$4 sm:$0xff]  }
 0x6ef   :  { %1296 = vmatpush1.bf16.msra.mxu0 %v7659_v7  ;;  %1337 = vmatpush1.bf16.msra.mxu1 %v7660_v34  ;;  %v6708_v7 = vld [vmem:[#allocation8 + $0xc4] ss:$16 sps:$4 sm:$0xff]   ;;  %v6711_v34 = vld [vmem:[#allocation8 + $0x6c] ss:$16 sps:$4 sm:$0xff]  }
 0x6f0   :  { %1297 = vmatprep.subr.bf16.mxu0 %v7661_v9  ;;  %1338 = vmatprep.subr.bf16.mxu1 %v7662_v43  ;;  %v6706_v9 = vld [vmem:[#allocation8 + $0xc0] ss:$16 sps:$4 sm:$0xff]   ;;  %v6709_v43 = vld [vmem:[#allocation8 + $0x68] ss:$16 sps:$4 sm:$0xff]  }
 0x6f3   :  { %1298 = vmatpush1.bf16.msra.mxu0 %v7663_v8  ;;  %1339 = vmatpush1.bf16.msra.mxu1 %v7664_v2  ;;  %v6714_v8 = vld [vmem:[#allocation8 + $0xe4] ss:$16 sps:$4 sm:$0xff]   ;;  %v6717_v2 = vld [vmem:[#allocation8 + $0x8c] ss:$16 sps:$4 sm:$0xff]  }
 0x6f4   :  { %1299 = vmatprep.subr.bf16.mxu0 %v7665_v36  ;;  %1340 = vmatprep.subr.bf16.mxu1 %v7666_v18  ;;  %v6712_v36 = vld [vmem:[#allocation8 + $0xe0] ss:$16 sps:$4 sm:$0xff]   ;;  %v6715_v18 = vld [vmem:[#allocation8 + $0x88] ss:$16 sps:$4 sm:$0xff]  }
 0x6f7   :  { %1300 = vmatpush1.bf16.msra.mxu0 %v7667_v37  ;;  %1341 = vmatpush1.bf16.msra.mxu1 %v7668_v40  ;;  %v6720_v37 = vld [vmem:[#allocation8 + $0x104] ss:$16 sps:$4 sm:$0xff]   ;;  %v6723_v40 = vld [vmem:[#allocation8 + $0xac] ss:$16 sps:$4 sm:$0xff]  }
 0x6f8   :  { %1790 = vmatprep.subr.bf16.mxu0 %v6681_v31  ;;  %1831 = vmatprep.subr.bf16.mxu1 %v6693_v38  ;;  %v6718_v31 = vld [vmem:[#allocation8 + $0x100] ss:$16 sps:$4 sm:$0xff]   ;;  %v6721_v38 = vld [vmem:[#allocation8 + $0xa8] ss:$16 sps:$4 sm:$0xff]  }
 0x78d   :  { %v1194_v4 = vpop.f32.mrb[24].mxu0  ;;  %v1235_v44 = vpop.f32.mrb[24].mxu1 }
 0x78e   :  { %v1195_v45 = vadd.f32 %v1194_v4, %v9081_v10  ;;  %v1196_v46 = vpop.f32.mrb[25].mxu0  ;;  %v1237_v47 = vpop.f32.mrb[25].mxu1  ;;  %v1236_v57 = vadd.f32 %v1235_v44, %v8228_v23  ;;  %v6726_v4 = vld [vmem:[#allocation8 + $0x124] ss:$16 sps:$4 sm:$0xff]   ;;  %v6729_v44 = vld [vmem:[#allocation8 + $0xcc] ss:$16 sps:$4 sm:$0xff]  }
 0x78f   :  { %v1197_v48 = vadd.f32 %v1196_v46, %v8215_v1  ;;  %v1198_v49 = vpop.f32.mrb[26].mxu0  ;;  %v1239_v50 = vpop.f32.mrb[26].mxu1  ;;  %v1238_v55 = vadd.f32 %v1237_v47, %v8222_v16  ;;  %v6727_v46 = vld [vmem:[#allocation8 + $0xc8] ss:$16 sps:$4 sm:$0xff]   ;;  %v6732_v47 = vld [vmem:[#allocation8 + $0x144] ss:$16 sps:$4 sm:$0xff]  }
 0x790   :  { %v5903_v51 = vmul.f32 -1.442695, %v1195_v45  ;;  %v1199_v52 = vpop.f32.mrb[27].mxu0  ;;  %v1240_v53 = vpop.f32.mrb[27].mxu1  ;;  %v6724_v45 = vld [vmem:[#allocation8 + $0x120] ss:$16 sps:$4 sm:$0xff]  }
 0x791   :  { %v5904_v54 = vmul.f32 -1.442695, %v1197_v48  ;;  %v5905_v56 = vmul.f32 -1.442695, %v1238_v55  ;;  %v6735_v48 = vld [vmem:[#allocation8 + $0xec] ss:$16 sps:$4 sm:$0xff]  }
 0x792   :  { %7447 = vpow2.f32 %v5903_v51  ;;  %v6730_v49 = vld [vmem:[#allocation8 + $0x140] ss:$16 sps:$4 sm:$0xff]   ;;  %v6733_v50 = vld [vmem:[#allocation8 + $0xe8] ss:$16 sps:$4 sm:$0xff]   ;;  %v6738_v51 = vld [vmem:[#allocation8 + $0x164] ss:$16 sps:$4 sm:$0xff]  }
 0x793   :  { %7449 = vpow2.f32 %v5904_v54  ;;  %v6741_v52 = vld [vmem:[#allocation8 + $0x10c] ss:$16 sps:$4 sm:$0xff]   ;;  %v6736_v53 = vld [vmem:[#allocation8 + $0x160] ss:$16 sps:$4 sm:$0xff]   ;;  %v6739_v54 = vld [vmem:[#allocation8 + $0x108] ss:$16 sps:$4 sm:$0xff]  }
 0x794   :  { %7451 = vpow2.f32 %v5905_v56  ;;  %v6742_v55 = vld [vmem:[#allocation8 + $0x180] ss:$16 sps:$4 sm:$0xff]   ;;  %v6744_v56 = vld [vmem:[#allocation8 + $0x184] ss:$16 sps:$4 sm:$0xff]  }
 0x795   :  { %7453 = vtanh.f32 %v1236_v57  ;;  %v6745_v57 = vld [vmem:[#allocation8 + $0x128] ss:$16 sps:$4 sm:$0xff]  }
 0x79c   :  { %v7448_v58 = vpop.eup %7447 }
 0x79d   :  { %v7450_v59 = vpop.eup %7449  ;;  %v1245_v60 = vadd.f32 1.0, %v7448_v58  ;;  %v6747_v58 = vld [vmem:[#allocation8 + $0x12c] ss:$16 sps:$4 sm:$0xff]  }
 0x79e   :  { %v1251_v61 = vadd.f32 1.0, %v7450_v59  ;;  %v7452_v62 = vpop.eup %7451  ;;  %v6750_v59 = vld [vmem:[#allocation8 + $0x1a4] ss:$16 sps:$4 sm:$0xff]  }
 0x79f   :  { %7455 = vrcp.f32 %v1245_v60  ;;  %v7454_v63 = vpop.eup %7453  ;;  %v1258_v3 = vadd.f32 1.0, %v7452_v62  ;;  %v6753_v60 = vld [vmem:[#allocation8 + $0x14c] ss:$16 sps:$4 sm:$0xff]   ;;  %v6751_v62 = vld [vmem:[#allocation8 + $0x148] ss:$16 sps:$4 sm:$0xff]  }
 0x7a0   :  { %7457 = vrcp.f32 %v1251_v61  ;;  %v6748_v61 = vld [vmem:[#allocation8 + $0x1a0] ss:$16 sps:$4 sm:$0xff]  }
 0x7a1   :  { %7459 = vrcp.f32 %v1258_v3  ;;  %v6754_v3 = vld [vmem:[#allocation8 + $0x1c0] ss:$16 sps:$4 sm:$0xff]  }
 0x7a9   :  { %v7456_v0 = vpop.eup %7455 }
 0x7aa   :  { %v7458_v5 = vpop.eup %7457  ;;  %v1262_v6 = vmul.f32 %v7456_v0, %v7454_v63  ;;  %v6756_v63 = vld [vmem:[#allocation8 + $0x1c4] ss:$16 sps:$4 sm:$0xff]   ;;  %v6759_v0 = vld [vmem:[#allocation8 + $0x16c] ss:$16 sps:$4 sm:$0xff]  }
 0x7ab   :  { %v1261_v11 = vmul.f32 %v7458_v5, %v8719_v42  ;;  %v7460_v13 = vpop.eup %7459  ;;  %v6687_v42 = vld [vmem:[#allocation8 + $0x44] ss:$16 sps:$4 sm:$0xff]   ;;  %v6757_v5 = vld [vmem:[#allocation8 + $0x168] ss:$16 sps:$4 sm:$0xff]  }
 0x7ad   :  { %v8727_v12 = vadd.f32 %v1262_v6, %v1261_v11  ;;  %v6762_v6 = vld [vmem:[#allocation8 + $0x1e4] ss:$16 sps:$4 sm:$0xff]   ;;  %v6765_v11 = vld [vmem:[#allocation8 + $0x18c] ss:$16 sps:$4 sm:$0xff]  }
 0x7af   :  { %7461 = vtanh.f32 %v8727_v12 }
 0x7b9   :  { %v7462_v14 = vpop.eup %7461 }
 0x7ba   :  { %v1265_v15 = vmul.f32 %v7462_v14, %v7460_v13  ;;  %v6760_v13 = vld [vmem:[#allocation8 + $0x1e0] ss:$16 sps:$4 sm:$0xff]   ;;  %v6763_v14 = vld [vmem:[#allocation8 + $0x188] ss:$16 sps:$4 sm:$0xff]  }
 0x7bc   :  { %v1268_v17 = vpack.c.bf16 %v1265_v15, %v1265_v15  ;;  %v6768_v15 = vld [vmem:[#allocation8 + $0x1ac] ss:$16 sps:$4 sm:$0xff]  }
 0x7be   :  { %1301 = vmatprep.mubr.bf16.mxu0 %v1268_v17  ;;  %1342 = vmatprep.mubr.bf16.mxu1 %v1268_v17  ;;  %v6766_v17 = vld [vmem:[#allocation8 + $0x1a8] ss:$16 sps:$4 sm:$0xff]  }
 0x7bf   :  { %1302 = vmatmul.mubr.bf16.vlgmr.msra.gmra.mrb[28].mxu0 %v1267_v19  ;;  %1343 = vmatmul.mubr.bf16.vlgmr.msra.gmra.mrb[28].mxu1 %v1267_v19  ;;  %v6771_v19 = vld [vmem:[#allocation8 + $0x1cc] ss:$16 sps:$4 sm:$0xff]  }
 0x7c0   :  { %1791 = vmatpush1.bf16.msra.mxu0 %v6679_v20  ;;  %1832 = vmatpush1.bf16.msra.mxu1 %v6691_v21  ;;  %v6769_v20 = vld [vmem:[#allocation8 + $0x1c8] ss:$16 sps:$4 sm:$0xff]   ;;  %v6774_v21 = vld [vmem:[#allocation8 + $0x1ec] ss:$16 sps:$4 sm:$0xff]  }
 0x7c1   :  { %1792 = vmatprep.subr.bf16.mxu0 %v6684_v22  ;;  %1833 = vmatprep.subr.bf16.mxu1 %v6699_v29  ;;  %v6772_v22 = vld [vmem:[#allocation8 + $0x1e8] ss:$16 sps:$4 sm:$0xff]  }
 0x7c4   :  { %1793 = vmatpush1.bf16.msra.mxu0 %v6682_v24  ;;  %1834 = vmatpush1.bf16.msra.mxu1 %v6697_v35 }
 0x7c5   :  { %1794 = vmatprep.subr.bf16.mxu0 %v6687_v42  ;;  %1835 = vmatprep.subr.bf16.mxu1 %v6705_v41 }
 0x7c8   :  { %1795 = vmatpush1.bf16.msra.mxu0 %v6685_v25  ;;  %1836 = vmatpush1.bf16.msra.mxu1 %v6703_v39 }
 0x7c9   :  { %1796 = vmatprep.subr.bf16.mxu0 %v6690_v26  ;;  %1837 = vmatprep.subr.bf16.mxu1 %v6711_v34 }
 0x7cc   :  { %1797 = vmatpush1.bf16.msra.mxu0 %v6688_v27  ;;  %1838 = vmatpush1.bf16.msra.mxu1 %v6709_v43 }
 0x7cd   :  { %1798 = vmatprep.subr.bf16.mxu0 %v6696_v28  ;;  %1839 = vmatprep.subr.bf16.mxu1 %v6717_v2 }
 0x7d0   :  { %1799 = vmatpush1.bf16.msra.mxu0 %v6694_v30  ;;  %1840 = vmatpush1.bf16.msra.mxu1 %v6715_v18 }
 0x7d1   :  { %1800 = vmatprep.subr.bf16.mxu0 %v6702_v33  ;;  %1841 = vmatprep.subr.bf16.mxu1 %v6723_v40 }
 0x7d4   :  { %1801 = vmatpush1.bf16.msra.mxu0 %v6700_v32  ;;  %1842 = vmatpush1.bf16.msra.mxu1 %v6721_v38 }
 0x7d5   :  { %1802 = vmatprep.subr.bf16.mxu0 %v6708_v7  ;;  %1843 = vmatprep.subr.bf16.mxu1 %v6729_v44 }
 0x7d8   :  { %1803 = vmatpush1.bf16.msra.mxu0 %v6706_v9  ;;  %1844 = vmatpush1.bf16.msra.mxu1 %v6727_v46  ;;  %v9082_v46 = vld [vmem:[#allocation16_spill] sm:$0xff] }
 0x7d9   :  { %1804 = vmatprep.subr.bf16.mxu0 %v6714_v8  ;;  %1845 = vmatprep.subr.bf16.mxu1 %v6735_v48 }
 0x7dc   :  { %1805 = vmatpush1.bf16.msra.mxu0 %v6712_v36  ;;  %1846 = vmatpush1.bf16.msra.mxu1 %v6733_v50  ;;  %v6780_v50 = vld [vmem:[#allocation10 + $0xc] ss:$16 sps:$4 sm:$0xff]  }
 0x7dd   :  { %1806 = vmatprep.subr.bf16.mxu0 %v6720_v37  ;;  %1847 = vmatprep.subr.bf16.mxu1 %v6741_v52  ;;  %v6778_v52 = vld [vmem:[#allocation10 + $0x8] ss:$16 sps:$4 sm:$0xff]  }
 0x7e0   :  { %1807 = vmatpush1.bf16.msra.mxu0 %v6718_v31  ;;  %1848 = vmatpush1.bf16.msra.mxu1 %v6739_v54  ;;  %v6786_v54 = vld [vmem:[#allocation10 + $0x2c] ss:$16 sps:$4 sm:$0xff]  }
 0x7e1   :  { %1808 = vmatprep.subr.bf16.mxu0 %v6726_v4  ;;  %1849 = vmatprep.subr.bf16.mxu1 %v6747_v58  ;;  %v6792_v58 = vld [vmem:[#allocation10 + $0x4c] ss:$16 sps:$4 sm:$0xff]  }
 0x7e4   :  { %1809 = vmatpush1.bf16.msra.mxu0 %v6724_v45  ;;  %1850 = vmatpush1.bf16.msra.mxu1 %v6745_v57  ;;  %v6789_v57 = vld [vmem:[#allocation10 + $0x44] ss:$16 sps:$4 sm:$0xff]  }
 0x7e5   :  { %1810 = vmatprep.subr.bf16.mxu0 %v6732_v47  ;;  %1851 = vmatprep.subr.bf16.mxu1 %v6753_v60  ;;  %v6790_v60 = vld [vmem:[#allocation10 + $0x48] ss:$16 sps:$4 sm:$0xff]  }
 0x7e8   :  { %1811 = vmatpush1.bf16.msra.mxu0 %v6730_v49  ;;  %1852 = vmatpush1.bf16.msra.mxu1 %v6751_v62  ;;  %v9083_v49 = vmov 0   ;;  %v6798_v62 = vld [vmem:[#allocation10 + $0x6c] ss:$16 sps:$4 sm:$0xff]  }
 0x7e9   :  { %1812 = vmatprep.subr.bf16.mxu0 %v6738_v51  ;;  %1853 = vmatprep.subr.bf16.mxu1 %v6759_v0  ;;  %v6775_v51 = vld [vmem:[#allocation10] ss:$16 sps:$4 sm:$0xff]   ;;  %v6796_v0 = vld [vmem:[#allocation10 + $0x68] ss:$16 sps:$4 sm:$0xff]  }
 0x7ec   :  { %1813 = vmatpush1.bf16.msra.mxu0 %v6736_v53  ;;  %1854 = vmatpush1.bf16.msra.mxu1 %v6757_v5  ;;  %v6783_v53 = vld [vmem:[#allocation10 + $0x24] ss:$16 sps:$4 sm:$0xff]   ;;  %v6804_v5 = vld [vmem:[#allocation10 + $0x8c] ss:$16 sps:$4 sm:$0xff]  }
 0x7ed   :  { %1814 = vmatprep.subr.bf16.mxu0 %v6744_v56  ;;  %1855 = vmatprep.subr.bf16.mxu1 %v6765_v11  ;;  %v6784_v56 = vld [vmem:[#allocation10 + $0x28] ss:$16 sps:$4 sm:$0xff]  }
 0x7ee   :  { %v6802_v11 = vld [vmem:[#allocation10 + $0x88] ss:$16 sps:$4 sm:$0xff]  }
 0x7f0   :  { %1815 = vmatpush1.bf16.msra.mxu0 %v6742_v55  ;;  %1856 = vmatpush1.bf16.msra.mxu1 %v6763_v14  ;;  %v6781_v55 = vld [vmem:[#allocation10 + $0x20] ss:$16 sps:$4 sm:$0xff]   ;;  %v6807_v14 = vld [vmem:[#allocation10 + $0xa4] ss:$16 sps:$4 sm:$0xff]  }
 0x7f1   :  { %1816 = vmatprep.subr.bf16.mxu0 %v6750_v59  ;;  %1857 = vmatprep.subr.bf16.mxu1 %v6768_v15  ;;  %v6787_v59 = vld [vmem:[#allocation10 + $0x40] ss:$16 sps:$4 sm:$0xff]   ;;  %v6808_v15 = vld [vmem:[#allocation10 + $0xa8] ss:$16 sps:$4 sm:$0xff]  }
 0x7f4   :  { %1817 = vmatpush1.bf16.msra.mxu0 %v6748_v61  ;;  %1858 = vmatpush1.bf16.msra.mxu1 %v6766_v17  ;;  %v6795_v61 = vld [vmem:[#allocation10 + $0x64] ss:$16 sps:$4 sm:$0xff]   ;;  %v6810_v17 = vld [vmem:[#allocation10 + $0xac] ss:$16 sps:$4 sm:$0xff]  }
 0x7f5   :  { %1818 = vmatprep.subr.bf16.mxu0 %v6756_v63  ;;  %1859 = vmatprep.subr.bf16.mxu1 %v6771_v19  ;;  %v6793_v63 = vld [vmem:[#allocation10 + $0x60] ss:$16 sps:$4 sm:$0xff]   ;;  %v6813_v19 = vld [vmem:[#allocation10 + $0xc4] ss:$16 sps:$4 sm:$0xff]  }
 0x7f8   :  { %1819 = vmatpush1.bf16.msra.mxu0 %v6754_v3  ;;  %1860 = vmatpush1.bf16.msra.mxu1 %v6769_v20  ;;  %v6801_v3 = vld [vmem:[#allocation10 + $0x84] ss:$16 sps:$4 sm:$0xff]   ;;  %v6816_v20 = vld [vmem:[#allocation10 + $0xcc] ss:$16 sps:$4 sm:$0xff]  }
 0x7f9   :  { %1820 = vmatprep.subr.bf16.mxu0 %v6762_v6  ;;  %1861 = vmatprep.subr.bf16.mxu1 %v6774_v21  ;;  %v6799_v6 = vld [vmem:[#allocation10 + $0x80] ss:$16 sps:$4 sm:$0xff]  }
 0x7fa   :  { %v6811_v21 = vld [vmem:[#allocation10 + $0xc0] ss:$16 sps:$4 sm:$0xff]  }
 0x7fc   :  { %1821 = vmatpush1.bf16.msra.mxu0 %v6760_v13  ;;  %1862 = vmatpush1.bf16.msra.mxu1 %v6772_v22  ;;  %v6805_v13 = vld [vmem:[#allocation10 + $0xa0] ss:$16 sps:$4 sm:$0xff]   ;;  %v6814_v22 = vld [vmem:[#allocation10 + $0xc8] ss:$16 sps:$4 sm:$0xff]  }
 0x7fd   :  { %2152 = vmatprep.subr.bf16.mxu1 %v6780_v50 }
 0x892   :  { %v1303_v24 = vpop.f32.mrb[28].mxu0  ;;  %v1344_v42 = vpop.f32.mrb[28].mxu1 }
 0x893   :  { %v1304_v25 = vadd.f32 %v1303_v24, %v9081_v10  ;;  %v1305_v26 = vpop.f32.mrb[29].mxu0  ;;  %v1346_v27 = vpop.f32.mrb[29].mxu1  ;;  %v1345_v34 = vadd.f32 %v1344_v42, %v8228_v23  ;;  %v1375_v23 = vld [vmem:[#allocation5] sm:$0x1]  ;;  %v6819_v24 = vld [vmem:[#allocation10 + $0xe4] ss:$16 sps:$4 sm:$0xff]  }
 0x894   :  { %v1306_v28 = vadd.f32 %v1305_v26, %v8215_v1  ;;  %v1307_v29 = vpop.f32.mrb[30].mxu0  ;;  %v1348_v30 = vpop.f32.mrb[30].mxu1  ;;  %v1347_v39 = vadd.f32 %v1346_v27, %v8222_v16  ;;  %v1377_v4 = vpack.i.b16 %v1375_v23, %v1375_v23  ;;  %v6822_v42 = vld [vmem:[#allocation10 + $0xec] ss:$16 sps:$4 sm:$0xff]   ;;  %v6820_v26 = vld [vmem:[#allocation10 + $0xe8] ss:$16 sps:$4 sm:$0xff]  }
 0x895   :  { %v5906_v35 = vmul.f32 -1.442695, %v1304_v25  ;;  %v1308_v33 = vpop.f32.mrb[31].mxu0  ;;  %v1349_v41 = vpop.f32.mrb[31].mxu1  ;;  %v6817_v25 = vld [vmem:[#allocation10 + $0xe0] ss:$16 sps:$4 sm:$0xff]  }
 0x896   :  { %v5907_v32 = vmul.f32 -1.442695, %v1306_v28  ;;  %v5908_v7 = vmul.f32 -1.442695, %v1347_v39  ;;  %v1382_v47 = vrot.slane %v1377_v4, %v9082_v46  ;;  %v1448_v27 = vld [vmem:[%s8899_s5] sm:$0xf] }
 0x897   :  { %7463 = vpow2.f32 %v5906_v35  ;;  %v1453_v28 = vrot.slane %v1448_v27, %v9082_v46  ;;  %v9084_v29 = vld [vmem:[#allocation17_spill] sm:$0xff] }
 0x898   :  { %7465 = vpow2.f32 %v5907_v32  ;;  %v1457_v30 = vrot.slane %v1448_v27, %v9084_v29 }
 0x899   :  { %7467 = vpow2.f32 %v5908_v7 }
 0x89a   :  { %7469 = vtanh.f32 %v1345_v34 }
 0x8a1   :  { %v7464_v9 = vpop.eup %7463 }
 0x8a2   :  { %v7466_v10 = vpop.eup %7465  ;;  %v1354_v43 = vadd.f32 1.0, %v7464_v9 }
 0x8a3   :  { %v1360_v8 = vadd.f32 1.0, %v7466_v10  ;;  %v7468_v1 = vpop.eup %7467 }
 0x8a4   :  { %7471 = vrcp.f32 %v1354_v43  ;;  %v7470_v2 = vpop.eup %7469  ;;  %v1367_v18 = vadd.f32 1.0, %v7468_v1 }
 0x8a5   :  { %7473 = vrcp.f32 %v1360_v8  ;;  %v9085_v8 = vld [vmem:[#allocation19_spill] sm:$0xff] }
 0x8a6   :  { %7475 = vrcp.f32 %v1367_v18  ;;  %v1465_v1 = vrot.slane %v1448_v27, %v9085_v8 }
 0x8ae   :  { %v7472_v36 = vpop.eup %7471 }
 0x8af   :  { %v7474_v37 = vpop.eup %7473  ;;  %v1371_v40 = vmul.f32 %v7472_v36, %v7470_v2 }
 0x8b0   :  { %v1370_v31 = vmul.f32 %v7474_v37, %v8727_v12  ;;  %v7476_v38 = vpop.eup %7475  ;;  %v6777_v12 = vld [vmem:[#allocation10 + $0x4] ss:$16 sps:$4 sm:$0xff]  }
 0x8b1   :  { %2111 = vmatprep.subr.bf16.mxu0 %v6777_v12  ;;  %v9086_v37 = vld [vmem:[#allocation20_spill] sm:$0xff] }
 0x8b2   :  { %v8735_v16 = vadd.f32 %v1371_v40, %v1370_v31  ;;  %v1461_v40 = vrot.slane %v1448_v27, %v9086_v37 }
 0x8b4   :  { %7477 = vtanh.f32 %v8735_v16 }
 0x8be   :  { %v7478_v44 = vpop.eup %7477 }
 0x8bf   :  { %v1374_v45 = vmul.f32 %v7478_v44, %v7476_v38 }
 0x8c1   :  { %v1383_v48 = vpack.c.bf16 %v1374_v45, %v1374_v45 }
 0x8c3   :  { %1822 = vmatprep.mubr.bf16.mxu0 %v1383_v48  ;;  %1863 = vmatprep.mubr.bf16.mxu1 %v1383_v48 }
 0x8c4   :  { %1823 = vmatmul.mubr.bf16.vlgmr.msra.gmra.mrb[32].mxu0 %v1382_v47  ;;  %1864 = vmatmul.mubr.bf16.vlgmr.msra.gmra.mrb[32].mxu1 %v1382_v47 }
 0x8c5   :  { %2143 = vmatprep.mubr.bf16.mxu0 %v9083_v49  ;;  %2184 = vmatprep.mubr.bf16.mxu1 %v9083_v49 }
 0x8c6   :  { %2112 = vmatpush1.bf16.msra.mxu0 %v6775_v51  ;;  %2153 = vmatpush1.bf16.msra.mxu1 %v6778_v52 }
 0x8c7   :  { %2113 = vmatprep.subr.bf16.mxu0 %v6783_v53  ;;  %2154 = vmatprep.subr.bf16.mxu1 %v6786_v54 }
 0x8ca   :  { %2114 = vmatpush1.bf16.msra.mxu0 %v6781_v55  ;;  %2155 = vmatpush1.bf16.msra.mxu1 %v6784_v56 }
 0x8cb   :  { %2115 = vmatprep.subr.bf16.mxu0 %v6789_v57  ;;  %2156 = vmatprep.subr.bf16.mxu1 %v6792_v58 }
 0x8ce   :  { %2116 = vmatpush1.bf16.msra.mxu0 %v6787_v59  ;;  %2157 = vmatpush1.bf16.msra.mxu1 %v6790_v60  ;;  %v1929_v59 = vld [vmem:[%s8901_s7] sm:$0xf] }
 0x8cf   :  { %2117 = vmatprep.subr.bf16.mxu0 %v6795_v61  ;;  %2158 = vmatprep.subr.bf16.mxu1 %v6798_v62  ;;  %v1942_v60 = vrot.slane %v1929_v59, %v9086_v37  ;;  %v1938_v61 = vrot.slane %v1929_v59, %v9084_v29  ;;  %v1946_v62 = vrot.slane %v1929_v59, %v9085_v8 }
 0x8d2   :  { %2118 = vmatpush1.bf16.msra.mxu0 %v6793_v63  ;;  %2159 = vmatpush1.bf16.msra.mxu1 %v6796_v0 }
 0x8d3   :  { %2119 = vmatprep.subr.bf16.mxu0 %v6801_v3  ;;  %2160 = vmatprep.subr.bf16.mxu1 %v6804_v5 }
 0x8d6   :  { %2120 = vmatpush1.bf16.msra.mxu0 %v6799_v6  ;;  %2161 = vmatpush1.bf16.msra.mxu1 %v6802_v11 }
 0x8d7   :  { %2121 = vmatprep.subr.bf16.mxu0 %v6807_v14  ;;  %2162 = vmatprep.subr.bf16.mxu1 %v6810_v17 }
 0x8da   :  { %2122 = vmatpush1.bf16.msra.mxu0 %v6805_v13  ;;  %2163 = vmatpush1.bf16.msra.mxu1 %v6808_v15 }
 0x8db   :  { %2123 = vmatprep.subr.bf16.mxu0 %v6813_v19  ;;  %2164 = vmatprep.subr.bf16.mxu1 %v6816_v20 }
 0x8de   :  { %2124 = vmatpush1.bf16.msra.mxu0 %v6811_v21  ;;  %2165 = vmatpush1.bf16.msra.mxu1 %v6814_v22 }
 0x8df   :  { %2125 = vmatprep.subr.bf16.mxu0 %v6819_v24  ;;  %2166 = vmatprep.subr.bf16.mxu1 %v6822_v42  ;;  %v9087_v42 = vlaneseq }
 0x8e2   :  { %2126 = vmatpush1.bf16.msra.mxu0 %v6817_v25  ;;  %2167 = vmatpush1.bf16.msra.mxu1 %v6820_v26  ;;  %v8764_v25 = vand.u32 127, %v9087_v42 }
 0x8e4   :  { %v8767_v26 = vadd.s32 128, %v8764_v25  ;;  %v8770_v27 = vadd.s32 256, %v8764_v25 }
 0x997   :  { %v1824_v35 = vpop.f32.mrb[32].mxu0  ;;  %v1865_v33 = vpop.f32.mrb[32].mxu1 }
 0x998   :  { %v1825_v41 = vadd.f32 %v1824_v35, %v1453_v28  ;;  %v1826_v32 = vpop.f32.mrb[33].mxu0  ;;  %v1867_v39 = vpop.f32.mrb[33].mxu1  ;;  %v1866_v23 = vadd.f32 %v1865_v33, %v1461_v40  ;;  %v8773_v28 = vadd.s32 384, %v8764_v25  ;;  %v6828_v40 = vld [vmem:[#allocation5 + $0xc8] sm:$0xff]  }
 0x999   :  { %v1827_v7 = vadd.f32 %v1826_v32, %v1457_v30  ;;  %v1828_v34 = vpop.f32.mrb[34].mxu0  ;;  %v1869_v9 = vpop.f32.mrb[34].mxu1  ;;  %v1868_v18 = vadd.f32 %v1867_v39, %v1465_v1  ;;  %v6824_v1 = vld [vmem:[#allocation5 + $0xc0] sm:$0xff]  }
 0x99a   :  { %v5973_v10 = vmul.f32 -1.442695, %v1825_v41  ;;  %v1829_v43 = vpop.f32.mrb[35].mxu0  ;;  %v1870_v2 = vpop.f32.mrb[35].mxu1  ;;  %6459 = vmatprep.subr.bf16.mxu1 %v6824_v1  ;;  %v6875_v1 = vld [vmem:[#allocation8 + $0x64] ss:$16 sps:$4 sm:$0xff]  }
 0x99b   :  { %v5974_v36 = vmul.f32 -1.442695, %v1827_v7  ;;  %v5975_v31 = vmul.f32 -1.442695, %v1868_v18  ;;  %v6823_v43 = vld [vmem:[#allocation5 + $0x40] sm:$0xff]   ;;  %v6827_v18 = vld [vmem:[#allocation5 + $0x48] sm:$0xff]  }
 0x99c   :  { %7479 = vpow2.f32 %v5973_v10  ;;  %v6825_v2 = vld [vmem:[#allocation5] sm:$0xff]   ;;  %6437 = vmatprep.subr.bf16.mxu0 %v6823_v43  ;;  %v6870_v43 = vld [vmem:[#allocation8 + $0x48] ss:$16 sps:$4 sm:$0xff]  }
 0x99d   :  { %7481 = vpow2.f32 %v5974_v36  ;;  %v6826_v36 = vld [vmem:[#allocation5 + $0x80] sm:$0xff]  }
 0x99e   :  { %7483 = vpow2.f32 %v5975_v31  ;;  %v6829_v31 = vld [vmem:[#allocation5 + $0x8] sm:$0xff]  }
 0x99f   :  { %7485 = vtanh.f32 %v1866_v23  ;;  %v6830_v23 = vld [vmem:[#allocation5 + $0x88] sm:$0xff]  }
 0x9a6   :  { %v7480_v38 = vpop.eup %7479 }
 0x9a7   :  { %v7482_v4 = vpop.eup %7481  ;;  %v1875_v44 = vadd.f32 1.0, %v7480_v38  ;;  %v6831_v38 = vld [vmem:[#allocation5 + $0x50] sm:$0xff]  }
 0x9a8   :  { %v1881_v45 = vadd.f32 1.0, %v7482_v4  ;;  %v7484_v47 = vpop.eup %7483  ;;  %v6832_v4 = vld [vmem:[#allocation5 + $0xd0] sm:$0xff]  }
 0x9a9   :  { %7487 = vrcp.f32 %v1875_v44  ;;  %v7486_v48 = vpop.eup %7485  ;;  %v1888_v50 = vadd.f32 1.0, %v7484_v47  ;;  %v6833_v44 = vld [vmem:[#allocation5 + $0x10] sm:$0xff]   ;;  %v6835_v47 = vld [vmem:[#allocation5 + $0x58] sm:$0xff]  }
 0x9aa   :  { %7489 = vrcp.f32 %v1881_v45  ;;  %v6834_v45 = vld [vmem:[#allocation5 + $0x90] sm:$0xff]  }
 0x9ab   :  { %7491 = vrcp.f32 %v1888_v50  ;;  %v6838_v50 = vld [vmem:[#allocation5 + $0x98] sm:$0xff]  }
 0x9b3   :  { %v7488_v12 = vpop.eup %7487 }
 0x9b4   :  { %v7490_v51 = vpop.eup %7489  ;;  %v1892_v52 = vmul.f32 %v7488_v12, %v7486_v48  ;;  %v6836_v48 = vld [vmem:[#allocation5 + $0xd8] sm:$0xff]  }
 0x9b5   :  { %v1891_v53 = vmul.f32 %v7490_v51, %v8735_v16  ;;  %v7492_v55 = vpop.eup %7491  ;;  %v1934_v16 = vrot.slane %v1929_v59, %v9082_v46  ;;  %v6837_v12 = vld [vmem:[#allocation5 + $0x18] sm:$0xff]   ;;  %v6839_v51 = vld [vmem:[#allocation5 + $0x60] sm:$0xff]   ;;  %v6845_v59 = vld [vmem:[#allocation5 + $0x28] sm:$0xff]  }
 0x9b7   :  { %v8749_v54 = vadd.f32 %v1892_v52, %v1891_v53  ;;  %v6840_v52 = vld [vmem:[#allocation5 + $0xe0] sm:$0xff]  }
 0x9b8   :  { %v6841_v53 = vld [vmem:[#allocation5 + $0x20] sm:$0xff]  }
 0x9b9   :  { %7493 = vtanh.f32 %v8749_v54 }
 0x9c3   :  { %v7494_v56 = vpop.eup %7493 }
 0x9c4   :  { %v1895_v57 = vmul.f32 %v7494_v56, %v7492_v55  ;;  %v6842_v55 = vld [vmem:[#allocation5 + $0xa0] sm:$0xff]   ;;  %v6843_v56 = vld [vmem:[#allocation5 + $0x68] sm:$0xff]  }
 0x9c6   :  { %v8752_v58 = vpack.c.bf16 %v1895_v57, %v1895_v57  ;;  %v6844_v57 = vld [vmem:[#allocation5 + $0xe8] sm:$0xff]  }
 0x9c8   :  { %2144 = vmatmul.mubr.bf16.vlgmr.msra.gmra.mrb[36].mxu0 %v8752_v58  ;;  %2185 = vmatmul.mubr.bf16.vlgmr.msra.gmra.mrb[36].mxu1 %v8752_v58 }
 0x9c9   :  { %6438 = vmatpush3.bf16.msra.mxu0 %v6825_v2  ;;  %6460 = vmatpush3.bf16.msra.mxu1 %v6826_v36  ;;  %v6878_v2 = vld [vmem:[#allocation8 + $0x6c] ss:$16 sps:$4 sm:$0xff]   ;;  %v6873_v36 = vld [vmem:[#allocation8 + $0x60] ss:$16 sps:$4 sm:$0xff]  }
 0x9ca   :  { %6439 = vmatprep.subr.bf16.mxu0 %v6827_v18  ;;  %6461 = vmatprep.subr.bf16.mxu1 %v6828_v40  ;;  %v6881_v18 = vld [vmem:[#allocation8 + $0x84] ss:$16 sps:$4 sm:$0xff]   ;;  %v6884_v40 = vld [vmem:[#allocation8 + $0x8c] ss:$16 sps:$4 sm:$0xff]  }
 0x9cd   :  { %6440 = vmatpush3.bf16.msra.mxu0 %v6829_v31  ;;  %6462 = vmatpush3.bf16.msra.mxu1 %v6830_v23  ;;  %v6879_v31 = vld [vmem:[#allocation8 + $0x80] ss:$16 sps:$4 sm:$0xff]   ;;  %v6882_v23 = vld [vmem:[#allocation8 + $0x88] ss:$16 sps:$4 sm:$0xff]  }
 0x9ce   :  { %6441 = vmatprep.subr.bf16.mxu0 %v6831_v38  ;;  %6463 = vmatprep.subr.bf16.mxu1 %v6832_v4  ;;  %v6887_v38 = vld [vmem:[#allocation8 + $0xa4] ss:$16 sps:$4 sm:$0xff]   ;;  %v6890_v4 = vld [vmem:[#allocation8 + $0xac] ss:$16 sps:$4 sm:$0xff]  }
 0x9d1   :  { %6442 = vmatpush3.bf16.msra.mxu0 %v6833_v44  ;;  %6464 = vmatpush3.bf16.msra.mxu1 %v6834_v45  ;;  %v6885_v44 = vld [vmem:[#allocation8 + $0xa0] ss:$16 sps:$4 sm:$0xff]   ;;  %v6888_v45 = vld [vmem:[#allocation8 + $0xa8] ss:$16 sps:$4 sm:$0xff]  }
 0x9d2   :  { %6443 = vmatprep.subr.bf16.mxu0 %v6835_v47  ;;  %6465 = vmatprep.subr.bf16.mxu1 %v6836_v48  ;;  %v6893_v47 = vld [vmem:[#allocation8 + $0xc4] ss:$16 sps:$4 sm:$0xff]   ;;  %v6896_v48 = vld [vmem:[#allocation8 + $0xcc] ss:$16 sps:$4 sm:$0xff]  }
 0x9d5   :  { %6444 = vmatpush3.bf16.msra.mxu0 %v6837_v12  ;;  %6466 = vmatpush3.bf16.msra.mxu1 %v6838_v50  ;;  %v6891_v12 = vld [vmem:[#allocation8 + $0xc0] ss:$16 sps:$4 sm:$0xff]   ;;  %v6894_v50 = vld [vmem:[#allocation8 + $0xc8] ss:$16 sps:$4 sm:$0xff]  }
 0x9d6   :  { %6445 = vmatprep.subr.bf16.mxu0 %v6839_v51  ;;  %6467 = vmatprep.subr.bf16.mxu1 %v6840_v52  ;;  %v6899_v51 = vld [vmem:[#allocation8 + $0xe4] ss:$16 sps:$4 sm:$0xff]   ;;  %v6902_v52 = vld [vmem:[#allocation8 + $0xec] ss:$16 sps:$4 sm:$0xff]  }
 0x9d9   :  { %6446 = vmatpush3.bf16.msra.mxu0 %v6841_v53  ;;  %6468 = vmatpush3.bf16.msra.mxu1 %v6842_v55  ;;  %v6897_v53 = vld [vmem:[#allocation8 + $0xe0] ss:$16 sps:$4 sm:$0xff]   ;;  %v6900_v55 = vld [vmem:[#allocation8 + $0xe8] ss:$16 sps:$4 sm:$0xff]  }
 0x9da   :  { %6447 = vmatprep.subr.bf16.mxu0 %v6843_v56  ;;  %6469 = vmatprep.subr.bf16.mxu1 %v6844_v57  ;;  %v6905_v56 = vld [vmem:[#allocation8 + $0x104] ss:$16 sps:$4 sm:$0xff]   ;;  %v6908_v57 = vld [vmem:[#allocation8 + $0x10c] ss:$16 sps:$4 sm:$0xff]  }
 0x9dd   :  { %6448 = vmatpush3.bf16.msra.mxu0 %v6845_v59  ;;  %v6903_v59 = vld [vmem:[#allocation8 + $0x100] ss:$16 sps:$4 sm:$0xff]  }
 0xa9b   :  { %v2145_v63 = vpop.f32.mrb[36].mxu0  ;;  %v2186_v0 = vpop.f32.mrb[36].mxu1 }
 0xa9c   :  { %v2146_v3 = vadd.f32 %v2145_v63, %v1934_v16  ;;  %v2187_v5 = vadd.f32 %v2186_v0, %v1942_v60  ;;  %v2147_v6 = vpop.f32.mrb[37].mxu0  ;;  %v2188_v11 = vpop.f32.mrb[37].mxu1  ;;  %v6846_v16 = vld [vmem:[#allocation5 + $0xa8] sm:$0xff]   ;;  %v6847_v60 = vld [vmem:[#allocation5 + $0x70] sm:$0xff]  }
 0xa9d   :  { %v2148_v13 = vadd.f32 %v2147_v6, %v1938_v61  ;;  %v2189_v14 = vadd.f32 %v2188_v11, %v1946_v62  ;;  %v2149_v15 = vpop.f32.mrb[38].mxu0  ;;  %v2190_v17 = vpop.f32.mrb[38].mxu1  ;;  %v6848_v61 = vld [vmem:[#allocation5 + $0xf0] sm:$0xff]   ;;  %6470 = vmatpush3.bf16.msra.mxu1 %v6846_v16  ;;  %6449 = vmatprep.subr.bf16.mxu0 %v6847_v60  ;;  %v6851_v11 = vld [vmem:[#allocation5 + $0x78] sm:$0xff]  }
 0xa9e   :  { %2193 = vst [vmem:[#allocation11] sm:$0xff] %v2146_v3  ;;  %2195 = vst [vmem:[#allocation11 + $0x10] sm:$0xff] %v2187_v5  ;;  %v2150_v19 = vpop.f32.mrb[39].mxu0  ;;  %v2191_v20 = vpop.f32.mrb[39].mxu1  ;;  %6471 = vmatprep.subr.bf16.mxu1 %v6848_v61  ;;  %v6850_v6 = vld [vmem:[#allocation5 + $0xb0] sm:$0xff]   ;;  %v6854_v15 = vld [vmem:[#allocation5 + $0xb8] sm:$0xff]  }
 0xa9f   :  { %2194 = vst [vmem:[#allocation11 + $0x8] sm:$0xff] %v2148_v13  ;;  %2196 = vst [vmem:[#allocation11 + $0x18] sm:$0xff] %v2189_v14  ;;  %v2202_v21 = vmax.f32 %v2146_v3, %v2148_v13  ;;  %v2203_v22 = vmax.f32 %v2187_v5, %v2189_v14  ;;  %v6857_v17 = vld [vmem:[#allocation8 + $0x4] ss:$16 sps:$4 sm:$0xff]   ;;  %v6860_v19 = vld [vmem:[#allocation8 + $0xc] ss:$16 sps:$4 sm:$0xff]  }
 0xaa0   :  { %v6906_v16 = vld [vmem:[#allocation8 + $0x108] ss:$16 sps:$4 sm:$0xff]   ;;  %v6911_v60 = vld [vmem:[#allocation8 + $0x124] ss:$16 sps:$4 sm:$0xff]   ;;  %v6914_v61 = vld [vmem:[#allocation8 + $0x12c] ss:$16 sps:$4 sm:$0xff]  }
 0xaa1   :  { %v2204_v24 = vmax.f32 %v2202_v21, %v2203_v22  ;;  %6472 = vmatpush3.bf16.msra.mxu1 %v6850_v6  ;;  %v6918_v6 = vld [vmem:[#allocation8 + $0x148] ss:$16 sps:$4 sm:$0xff]  }
 0xaa3   :  { %2205 = vmax.xlane.f32.xlu0 %v2204_v24 }
 0xb30   :  { %v2206_v30 = vpop.xlane.xlu0 %2205 }
 0xb31   :  { %vm2207_vm0 = vcmp.eq.f32.partialorder %v2146_v3, %v2206_v30  ;;  %vm2208_vm1 = vcmp.eq.f32.partialorder %v2148_v13, %v2206_v30  ;;  %vm2209_vm2 = vcmp.eq.f32.partialorder %v2187_v5, %v2206_v30  ;;  %vm2210_vm3 = vcmp.eq.f32.partialorder %v2189_v14, %v2206_v30  ;;  %v6849_v5 = vld [vmem:[#allocation5 + $0x30] sm:$0xff]   ;;  %v6852_v13 = vld [vmem:[#allocation5 + $0xf8] sm:$0xff]  }
 0xb32   :  { %v2211_v35 = vsel %vm2207_vm0, %v8764_v25, 512  ;;  %v2212_v33 = vsel %vm2208_vm1, %v8767_v26, 512  ;;  %v2213_v41 = vsel %vm2209_vm2, %v8770_v27, 512  ;;  %v2214_v32 = vsel %vm2210_vm3, %v8773_v28, 512  ;;  %6450 = vmatpush3.bf16.msra.mxu0 %v6849_v5  ;;  %v6853_v14 = vld [vmem:[#allocation5 + $0x38] sm:$0xff]   ;;  %6473 = vmatprep.subr.bf16.mxu1 %v6852_v13 }
 0xb33   :  { %vm2215_vm4 = vcmp.lt.s32.totalorder %v2211_v35, %v2212_v33  ;;  %vm2217_vm5 = vcmp.lt.s32.totalorder %v2213_v41, %v2214_v32  ;;  %6451 = vmatprep.subr.bf16.mxu0 %v6851_v11  ;;  %6474 = vmatpush3.bf16.msra.mxu1 %v6854_v15  ;;  %v7819_v30 = vmov 1.0|1.0   ;;  %v6915_v5 = vld [vmem:[#allocation8 + $0x140] ss:$16 sps:$4 sm:$0xff]   ;;  %v6923_v11 = vld [vmem:[#allocation8 + $0x164] ss:$16 sps:$4 sm:$0xff]  }
 0xb34   :  { %v2216_v39 = vsel %vm2215_vm4, %v2211_v35, %v2212_v33  ;;  %v2218_v7 = vsel %vm2217_vm5, %v2213_v41, %v2214_v32  ;;  %3035 = vmatprep.subr.bf16.mxu1 %v6860_v19  ;;  %v6855_v35 = vld [vmem:[#allocation8] ss:$16 sps:$4 sm:$0xff]   ;;  %v6858_v33 = vld [vmem:[#allocation8 + $0x8] ss:$16 sps:$4 sm:$0xff]   ;;  %v6863_v41 = vld [vmem:[#allocation8 + $0x24] ss:$16 sps:$4 sm:$0xff]  }
 0xb35   :  { %vm2219_vm6 = vcmp.lt.s32.totalorder %v2216_v39, %v2218_v7  ;;  %v6866_v32 = vld [vmem:[#allocation8 + $0x2c] ss:$16 sps:$4 sm:$0xff]   ;;  %v6924_v15 = vld [vmem:[#allocation8 + $0x168] ss:$16 sps:$4 sm:$0xff]  }
 0xb36   :  { %v2220_v34 = vsel %vm2219_vm6, %v2216_v39, %v2218_v7  ;;  %6452 = vmatpush3.bf16.msra.mxu0 %v6853_v14  ;;  %v6861_v39 = vld [vmem:[#allocation8 + $0x20] ss:$16 sps:$4 sm:$0xff]   ;;  %v6864_v7 = vld [vmem:[#allocation8 + $0x28] ss:$16 sps:$4 sm:$0xff]   ;;  %v6926_v13 = vld [vmem:[#allocation8 + $0x16c] ss:$16 sps:$4 sm:$0xff]  }
 0xb37   :  { %v2222_v9 = vshra.s32 %v2220_v34, 16  ;;  %v2221_v62 = vand.u32 65535, %v2220_v34  ;;  %2994 = vmatprep.subr.bf16.mxu0 %v6857_v17  ;;  %v6869_v34 = vld [vmem:[#allocation8 + $0x44] ss:$16 sps:$4 sm:$0xff]   ;;  %v6921_v14 = vld [vmem:[#allocation8 + $0x160] ss:$16 sps:$4 sm:$0xff]  }
 0xb38   :  { %v6929_v17 = vld [vmem:[#allocation8 + $0x184] ss:$16 sps:$4 sm:$0xff]   ;;  %v6932_v19 = vld [vmem:[#allocation8 + $0x18c] ss:$16 sps:$4 sm:$0xff]  }
 0xb39   :  { %v2224_v10 = vcvt.s32.f32 %v2222_v9  ;;  %v2223_v0 = vcvt.s32.f32 %v2221_v62  ;;  %v6872_v9 = vld [vmem:[#allocation8 + $0x4c] ss:$16 sps:$4 sm:$0xff]   ;;  %v6909_v62 = vld [vmem:[#allocation8 + $0x120] ss:$16 sps:$4 sm:$0xff]  }
 0xb3b   :  { %2225 = vmin.xlane.f32.xlu0 %v2224_v10 }
 0xbc8   :  { %v2226_v63 = vpop.xlane.xlu0 %2225 }
 0xbc9   :  { %vm2227_vm7 = vcmp.eq.f32.partialorder %v2224_v10, %v2226_v63  ;;  %v2232_v20 = vcvt.f32.s32 %v2226_v63  ;;  %v6867_v10 = vld [vmem:[#allocation8 + $0x40] ss:$16 sps:$4 sm:$0xff]   ;;  %v6912_v63 = vld [vmem:[#allocation8 + $0x128] ss:$16 sps:$4 sm:$0xff]  }
 0xbca   :  { %v2228_v3 = vsel %vm2227_vm7, %v2223_v0, inf  ;;  %v6917_v0 = vld [vmem:[#allocation8 + $0x144] ss:$16 sps:$4 sm:$0xff]  }
 0xbcb   :  { %2229 = vmin.xlane.f32.xlu1 %v2228_v3  ;;  %v2233_v22 = vshll.u32 %v2232_v20, 16  ;;  %v6920_v3 = vld [vmem:[#allocation8 + $0x14c] ss:$16 sps:$4 sm:$0xff]   ;;  %v6927_v20 = vld [vmem:[#allocation8 + $0x180] ss:$16 sps:$4 sm:$0xff]  }
 0xc58   :  { %v2230_v21 = vpop.xlane.xlu1 %2229 }
 0xc59   :  { %v2231_v24 = vcvt.f32.s32 %v2230_v21  ;;  %v6930_v21 = vld [vmem:[#allocation8 + $0x188] ss:$16 sps:$4 sm:$0xff]  }
 0xc5b   :  { %v2234_v42 = vadd.s32 %v2233_v22, %v2231_v24  ;;  %v6935_v22 = vld [vmem:[#allocation8 + $0x1a4] ss:$16 sps:$4 sm:$0xff]   ;;  %v6938_v24 = vld [vmem:[#allocation8 + $0x1ac] ss:$16 sps:$4 sm:$0xff]  }
 0xc5d   :  { %vm2236_vm8 = vcmp.eq.s32.totalorder %v8767_v26, %v2234_v42  ;;  %vm2238_vm9 = vcmp.eq.s32.totalorder %v8773_v28, %v2234_v42  ;;  %vm2235_vm10 = vcmp.eq.s32.totalorder %v8764_v25, %v2234_v42  ;;  %vm2237_vm12 = vcmp.eq.s32.totalorder %v8770_v27, %v2234_v42  ;;  %v6933_v42 = vld [vmem:[#allocation8 + $0x1a0] ss:$16 sps:$4 sm:$0xff]  }
 0xc5e   :  { %vm6044_vm11 = vmpackc.low %vm2236_vm8, %vm2236_vm8 }
 0xc5f   :  { %6045 = vmatprep.mubr.msk.bf16.mxu0 %vm6044_vm11, %v7819_v30  ;;  %vm6048_vm13 = vmpackc.low %vm2238_vm9, %vm2238_vm9 }
 0xc60   :  { %6049 = vmatprep.mubr.msk.bf16.mxu1 %vm6048_vm13, %v7819_v30  ;;  %vm6046_vm14 = vmpackc.low %vm2235_vm10, %vm2235_vm10 }
 0xc61   :  { %6047 = vmatmul.mubr.msk.bf16.vlgmr.msra.gmra.mrb[40].mxu0 %vm6046_vm14, %v7819_v30  ;;  %vm6050_vm15 = vmpackc.low %vm2237_vm12, %vm2237_vm12 }
 0xc62   :  { %6051 = vmatmul.mubr.msk.bf16.vlgmr.msra.gmra.mrb[40].mxu1 %vm6050_vm15, %v7819_v30  ;;  %3026 = vmatprep.mubr.bf16.mxu0 %v8752_v58 }
 0xc63   :  { %3067 = vmatprep.mubr.bf16.mxu1 %v8752_v58  ;;  %2995 = vmatpush1.bf16.msra.mxu0 %v6855_v35  ;;  %v6876_v58 = vld [vmem:[#allocation8 + $0x68] ss:$16 sps:$4 sm:$0xff]  }
 0xc64   :  { %3036 = vmatpush1.bf16.msra.mxu1 %v6858_v33  ;;  %2996 = vmatprep.subr.bf16.mxu0 %v6863_v41  ;;  %v6936_v35 = vld [vmem:[#allocation8 + $0x1a8] ss:$16 sps:$4 sm:$0xff]   ;;  %v6941_v33 = vld [vmem:[#allocation8 + $0x1c4] ss:$16 sps:$4 sm:$0xff]   ;;  %v6944_v41 = vld [vmem:[#allocation8 + $0x1cc] ss:$16 sps:$4 sm:$0xff]  }
 0xc65   :  { %3037 = vmatprep.subr.bf16.mxu1 %v6866_v32  ;;  %v6939_v32 = vld [vmem:[#allocation8 + $0x1c0] ss:$16 sps:$4 sm:$0xff]  }
 0xc67   :  { %2997 = vmatpush1.bf16.msra.mxu0 %v6861_v39  ;;  %v6942_v39 = vld [vmem:[#allocation8 + $0x1c8] ss:$16 sps:$4 sm:$0xff]  }
 0xc68   :  { %3038 = vmatpush1.bf16.msra.mxu1 %v6864_v7  ;;  %2998 = vmatprep.subr.bf16.mxu0 %v6869_v34  ;;  %v6947_v7 = vld [vmem:[#allocation8 + $0x1e4] ss:$16 sps:$4 sm:$0xff]   ;;  %v6950_v34 = vld [vmem:[#allocation8 + $0x1ec] ss:$16 sps:$4 sm:$0xff]  }
 0xc69   :  { %3039 = vmatprep.subr.bf16.mxu1 %v6872_v9  ;;  %v6945_v9 = vld [vmem:[#allocation8 + $0x1e0] ss:$16 sps:$4 sm:$0xff]  }
 0xc6b   :  { %2999 = vmatpush1.bf16.msra.mxu0 %v6867_v10  ;;  %v6948_v10 = vld [vmem:[#allocation8 + $0x1e8] ss:$16 sps:$4 sm:$0xff]  }
 0xc6c   :  { %3040 = vmatpush1.bf16.msra.mxu1 %v6870_v43  ;;  %3000 = vmatprep.subr.bf16.mxu0 %v6875_v1 }
 0xc6d   :  { %3041 = vmatprep.subr.bf16.mxu1 %v6878_v2 }
 0xc6f   :  { %3001 = vmatpush1.bf16.msra.mxu0 %v6873_v36 }
 0xc70   :  { %3042 = vmatpush1.bf16.msra.mxu1 %v6876_v58  ;;  %3002 = vmatprep.subr.bf16.mxu0 %v6881_v18 }
 0xc71   :  { %3043 = vmatprep.subr.bf16.mxu1 %v6884_v40 }
 0xc73   :  { %3003 = vmatpush1.bf16.msra.mxu0 %v6879_v31 }
 0xc74   :  { %3044 = vmatpush1.bf16.msra.mxu1 %v6882_v23  ;;  %3004 = vmatprep.subr.bf16.mxu0 %v6887_v38 }
 0xc75   :  { %3045 = vmatprep.subr.bf16.mxu1 %v6890_v4 }
 0xc77   :  { %3005 = vmatpush1.bf16.msra.mxu0 %v6885_v44 }
 0xc78   :  { %3046 = vmatpush1.bf16.msra.mxu1 %v6888_v45  ;;  %3006 = vmatprep.subr.bf16.mxu0 %v6893_v47  ;;  %v6953_v45 = vld [vmem:[#allocation10 + $0x4] ss:$16 sps:$4 sm:$0xff]   ;;  %v6956_v47 = vld [vmem:[#allocation10 + $0xc] ss:$16 sps:$4 sm:$0xff]  }
 0xc79   :  { %3047 = vmatprep.subr.bf16.mxu1 %v6896_v48  ;;  %v6951_v48 = vld [vmem:[#allocation10] ss:$16 sps:$4 sm:$0xff]  }
 0xc7b   :  { %3007 = vmatpush1.bf16.msra.mxu0 %v6891_v12  ;;  %v6954_v12 = vld [vmem:[#allocation10 + $0x8] ss:$16 sps:$4 sm:$0xff]  }
 0xc7c   :  { %3048 = vmatpush1.bf16.msra.mxu1 %v6894_v50  ;;  %3008 = vmatprep.subr.bf16.mxu0 %v6899_v51  ;;  %v6959_v50 = vld [vmem:[#allocation10 + $0x24] ss:$16 sps:$4 sm:$0xff]   ;;  %v6962_v51 = vld [vmem:[#allocation10 + $0x2c] ss:$16 sps:$4 sm:$0xff]  }
 0xc7d   :  { %3049 = vmatprep.subr.bf16.mxu1 %v6902_v52  ;;  %v6957_v52 = vld [vmem:[#allocation10 + $0x20] ss:$16 sps:$4 sm:$0xff]  }
 0xc7f   :  { %3009 = vmatpush1.bf16.msra.mxu0 %v6897_v53  ;;  %v6960_v53 = vld [vmem:[#allocation10 + $0x28] ss:$16 sps:$4 sm:$0xff]  }
 0xc80   :  { %3050 = vmatpush1.bf16.msra.mxu1 %v6900_v55  ;;  %3010 = vmatprep.subr.bf16.mxu0 %v6905_v56  ;;  %v6965_v55 = vld [vmem:[#allocation10 + $0x44] ss:$16 sps:$4 sm:$0xff]   ;;  %v6968_v56 = vld [vmem:[#allocation10 + $0x4c] ss:$16 sps:$4 sm:$0xff]  }
 0xc81   :  { %3051 = vmatprep.subr.bf16.mxu1 %v6908_v57  ;;  %v6963_v57 = vld [vmem:[#allocation10 + $0x40] ss:$16 sps:$4 sm:$0xff]  }
 0xc83   :  { %3011 = vmatpush1.bf16.msra.mxu0 %v6903_v59  ;;  %v6966_v59 = vld [vmem:[#allocation10 + $0x48] ss:$16 sps:$4 sm:$0xff]  }
 0xc84   :  { %3052 = vmatpush1.bf16.msra.mxu1 %v6906_v16  ;;  %3012 = vmatprep.subr.bf16.mxu0 %v6911_v60  ;;  %v6971_v16 = vld [vmem:[#allocation10 + $0x64] ss:$16 sps:$4 sm:$0xff]   ;;  %v6974_v60 = vld [vmem:[#allocation10 + $0x6c] ss:$16 sps:$4 sm:$0xff]  }
 0xc85   :  { %3053 = vmatprep.subr.bf16.mxu1 %v6914_v61  ;;  %v6969_v61 = vld [vmem:[#allocation10 + $0x60] ss:$16 sps:$4 sm:$0xff]  }
 0xc87   :  { %3013 = vmatpush1.bf16.msra.mxu0 %v6909_v62  ;;  %v6972_v62 = vld [vmem:[#allocation10 + $0x68] ss:$16 sps:$4 sm:$0xff]  }
 0xc88   :  { %3054 = vmatpush1.bf16.msra.mxu1 %v6912_v63  ;;  %3014 = vmatprep.subr.bf16.mxu0 %v6917_v0  ;;  %v6975_v63 = vld [vmem:[#allocation10 + $0x80] ss:$16 sps:$4 sm:$0xff]   ;;  %v6977_v0 = vld [vmem:[#allocation10 + $0x84] ss:$16 sps:$4 sm:$0xff]  }
 0xc89   :  { %3055 = vmatprep.subr.bf16.mxu1 %v6920_v3  ;;  %v6978_v3 = vld [vmem:[#allocation10 + $0x88] ss:$16 sps:$4 sm:$0xff]  }
 0xc8b   :  { %3015 = vmatpush1.bf16.msra.mxu0 %v6915_v5  ;;  %v6980_v5 = vld [vmem:[#allocation10 + $0x8c] ss:$16 sps:$4 sm:$0xff]  }
 0xc8c   :  { %3056 = vmatpush1.bf16.msra.mxu1 %v6918_v6  ;;  %3016 = vmatprep.subr.bf16.mxu0 %v6923_v11  ;;  %v6983_v6 = vld [vmem:[#allocation10 + $0xa4] ss:$16 sps:$4 sm:$0xff]   ;;  %v6986_v11 = vld [vmem:[#allocation10 + $0xac] ss:$16 sps:$4 sm:$0xff]  }
 0xc8d   :  { %3057 = vmatprep.subr.bf16.mxu1 %v6926_v13  ;;  %v6981_v13 = vld [vmem:[#allocation10 + $0xa0] ss:$16 sps:$4 sm:$0xff]  }
 0xc8f   :  { %3017 = vmatpush1.bf16.msra.mxu0 %v6921_v14  ;;  %v6984_v14 = vld [vmem:[#allocation10 + $0xa8] ss:$16 sps:$4 sm:$0xff]  }
 0xc90   :  { %3058 = vmatpush1.bf16.msra.mxu1 %v6924_v15  ;;  %3018 = vmatprep.subr.bf16.mxu0 %v6929_v17  ;;  %v6989_v15 = vld [vmem:[#allocation10 + $0xc4] ss:$16 sps:$4 sm:$0xff]   ;;  %v6992_v17 = vld [vmem:[#allocation10 + $0xcc] ss:$16 sps:$4 sm:$0xff]  }
 0xc91   :  { %3059 = vmatprep.subr.bf16.mxu1 %v6932_v19  ;;  %v6987_v19 = vld [vmem:[#allocation10 + $0xc0] ss:$16 sps:$4 sm:$0xff]  }
 0xc93   :  { %3019 = vmatpush1.bf16.msra.mxu0 %v6927_v20  ;;  %v6990_v20 = vld [vmem:[#allocation10 + $0xc8] ss:$16 sps:$4 sm:$0xff]  }
 0xc94   :  { %3060 = vmatpush1.bf16.msra.mxu1 %v6930_v21  ;;  %3020 = vmatprep.subr.bf16.mxu0 %v6935_v22  ;;  %v6995_v21 = vld [vmem:[#allocation10 + $0xe4] ss:$16 sps:$4 sm:$0xff]   ;;  %v6998_v22 = vld [vmem:[#allocation10 + $0xec] ss:$16 sps:$4 sm:$0xff]  }
 0xc95   :  { %3061 = vmatprep.subr.bf16.mxu1 %v6938_v24  ;;  %v6993_v24 = vld [vmem:[#allocation10 + $0xe0] ss:$16 sps:$4 sm:$0xff]  }
 0xc97   :  { %3021 = vmatpush1.bf16.msra.mxu0 %v6933_v42  ;;  %v6996_v42 = vld [vmem:[#allocation10 + $0xe8] ss:$16 sps:$4 sm:$0xff]  }
 0xc98   :  { %3062 = vmatpush1.bf16.msra.mxu1 %v6936_v35  ;;  %3022 = vmatprep.subr.bf16.mxu0 %v6941_v33  ;;  %v2652_v35 = vld [vmem:[%s8899_s5] sm:$0xf] }
 0xc99   :  { %3063 = vmatprep.subr.bf16.mxu1 %v6944_v41  ;;  %v2657_v33 = vrot.slane %v2652_v35, %v9082_v46  ;;  %v2661_v41 = vrot.slane %v2652_v35, %v9084_v29 }
 0xc9b   :  { %3023 = vmatpush1.bf16.msra.mxu0 %v6939_v32 }
 0xc9c   :  { %3064 = vmatpush1.bf16.msra.mxu1 %v6942_v39  ;;  %3024 = vmatprep.subr.bf16.mxu0 %v6947_v7 }
 0xc9d   :  { %3065 = vmatprep.subr.bf16.mxu1 %v6950_v34 }
 0xc9f   :  { %3025 = vmatpush1.bf16.msra.mxu0 %v6945_v9 }
 0xca0   :  { %3066 = vmatpush1.bf16.msra.mxu1 %v6948_v10  ;;  %3315 = vmatprep.subr.bf16.mxu0 %v6953_v45 }
 0xca1   :  { %3356 = vmatprep.subr.bf16.mxu1 %v6956_v47 }
 0xd34   :  { %v6453_v43 = vpop.f32.mrb[40].mxu0 }
 0xd35   :  { %v6475_v1 = vpop.f32.mrb[40].mxu1  ;;  %v6454_v2 = vpop.f32.mrb[41].mxu0 }
 0xd36   :  { %v6455_v36 = vadd.f32 %v6454_v2, %v6453_v43  ;;  %v6476_v58 = vpop.f32.mrb[41].mxu1  ;;  %v6456_v18 = vpop.f32.mrb[42].mxu0 }
 0xd37   :  { %v6477_v40 = vadd.f32 %v6476_v58, %v6475_v1  ;;  %v6478_v31 = vpop.f32.mrb[42].mxu1  ;;  %v6457_v23 = vpop.f32.mrb[43].mxu0 }
 0xd38   :  { %v6479_v38 = vpop.f32.mrb[43].mxu1  ;;  %v2665_v23 = vrot.slane %v2652_v35, %v9086_v37 }
 0xd39   :  { %v2582_v4 = vadd.f32 %v6477_v40, %v6455_v36  ;;  %v2669_v40 = vrot.slane %v2652_v35, %v9085_v8 }
 0xd3b   :  { %v2587_v44 = vpack.c.bf16 %v2582_v4, %v2582_v4 }
 0xd3d   :  { %3027 = vmatmul.mubr.bf16.vlgmr.msra.gmra.mrb[44].mxu0 %v2587_v44  ;;  %3068 = vmatmul.mubr.bf16.vlgmr.msra.gmra.mrb[44].mxu1 %v2587_v44 }
 0xd3e   :  { %3347 = vmatprep.mubr.bf16.mxu0 %v9083_v49  ;;  %3388 = vmatprep.mubr.bf16.mxu1 %v9083_v49 }
 0xd3f   :  { %3316 = vmatpush1.bf16.msra.mxu0 %v6951_v48  ;;  %3357 = vmatpush1.bf16.msra.mxu1 %v6954_v12 }
 0xd40   :  { %3317 = vmatprep.subr.bf16.mxu0 %v6959_v50  ;;  %3358 = vmatprep.subr.bf16.mxu1 %v6962_v51 }
 0xd43   :  { %3318 = vmatpush1.bf16.msra.mxu0 %v6957_v52  ;;  %3359 = vmatpush1.bf16.msra.mxu1 %v6960_v53 }
 0xd44   :  { %3319 = vmatprep.subr.bf16.mxu0 %v6965_v55  ;;  %3360 = vmatprep.subr.bf16.mxu1 %v6968_v56 }
 0xd47   :  { %3320 = vmatpush1.bf16.msra.mxu0 %v6963_v57  ;;  %3361 = vmatpush1.bf16.msra.mxu1 %v6966_v59 }
 0xd48   :  { %3321 = vmatprep.subr.bf16.mxu0 %v6971_v16  ;;  %3362 = vmatprep.subr.bf16.mxu1 %v6974_v60 }
 0xd4b   :  { %3322 = vmatpush1.bf16.msra.mxu0 %v6969_v61  ;;  %3363 = vmatpush1.bf16.msra.mxu1 %v6972_v62  ;;  %v3133_v62 = vld [vmem:[%s8901_s7] sm:$0xf] }
 0xd4c   :  { %3323 = vmatprep.subr.bf16.mxu0 %v6977_v0  ;;  %3364 = vmatprep.subr.bf16.mxu1 %v6980_v5  ;;  %v3142_v0 = vrot.slane %v3133_v62, %v9084_v29 }
 0xd4f   :  { %3324 = vmatpush1.bf16.msra.mxu0 %v6975_v63  ;;  %3365 = vmatpush1.bf16.msra.mxu1 %v6978_v3  ;;  %v3146_v63 = vrot.slane %v3133_v62, %v9086_v37  ;;  %v3150_v3 = vrot.slane %v3133_v62, %v9085_v8 }
 0xd50   :  { %3325 = vmatprep.subr.bf16.mxu0 %v6983_v6  ;;  %3366 = vmatprep.subr.bf16.mxu1 %v6986_v11 }
 0xd53   :  { %3326 = vmatpush1.bf16.msra.mxu0 %v6981_v13  ;;  %3367 = vmatpush1.bf16.msra.mxu1 %v6984_v14 }
 0xd54   :  { %3327 = vmatprep.subr.bf16.mxu0 %v6989_v15  ;;  %3368 = vmatprep.subr.bf16.mxu1 %v6992_v17 }
 0xd57   :  { %3328 = vmatpush1.bf16.msra.mxu0 %v6987_v19  ;;  %3369 = vmatpush1.bf16.msra.mxu1 %v6990_v20 }
 0xd58   :  { %3329 = vmatprep.subr.bf16.mxu0 %v6995_v21  ;;  %3370 = vmatprep.subr.bf16.mxu1 %v6998_v22 }
 0xd5b   :  { %3330 = vmatpush1.bf16.msra.mxu0 %v6993_v24  ;;  %3371 = vmatpush1.bf16.msra.mxu1 %v6996_v42 }
 0xe10   :  { %v3028_v32 = vpop.f32.mrb[44].mxu0  ;;  %v3069_v39 = vpop.f32.mrb[44].mxu1 }
 0xe11   :  { %v3029_v7 = vadd.f32 %v3028_v32, %v2657_v33  ;;  %v3030_v34 = vpop.f32.mrb[45].mxu0  ;;  %v3071_v9 = vpop.f32.mrb[45].mxu1  ;;  %v3070_v4 = vadd.f32 %v3069_v39, %v2665_v23  ;;  %v7004_v23 = vld [vmem:[#allocation5 + $0xc8] sm:$0xff]  }
 0xe12   :  { %v3031_v10 = vadd.f32 %v3030_v34, %v2661_v41  ;;  %v3032_v43 = vpop.f32.mrb[46].mxu0  ;;  %v3073_v1 = vpop.f32.mrb[46].mxu1  ;;  %v3072_v31 = vadd.f32 %v3071_v9, %v2669_v40  ;;  %v7002_v40 = vld [vmem:[#allocation5 + $0x80] sm:$0xff]  }
 0xe13   :  { %v6116_v2 = vmul.f32 -1.442695, %v3029_v7  ;;  %v3033_v36 = vpop.f32.mrb[47].mxu0  ;;  %v3074_v58 = vpop.f32.mrb[47].mxu1 }
 0xe14   :  { %v6117_v18 = vmul.f32 -1.442695, %v3031_v10  ;;  %v6118_v38 = vmul.f32 -1.442695, %v3072_v31  ;;  %v6999_v36 = vld [vmem:[#allocation5 + $0x40] sm:$0xff]   ;;  %v7003_v31 = vld [vmem:[#allocation5 + $0x48] sm:$0xff]  }
 0xe15   :  { %7495 = vpow2.f32 %v6116_v2  ;;  %v7000_v58 = vld [vmem:[#allocation5 + $0xc0] sm:$0xff]   ;;  %6481 = vmatprep.subr.bf16.mxu0 %v6999_v36  ;;  %v7046_v36 = vld [vmem:[#allocation8 + $0x48] ss:$16 sps:$4 sm:$0xff]  }
 0xe16   :  { %7497 = vpow2.f32 %v6117_v18  ;;  %v7001_v18 = vld [vmem:[#allocation5] sm:$0xff]   ;;  %6503 = vmatprep.subr.bf16.mxu1 %v7000_v58 }
 0xe17   :  { %7499 = vpow2.f32 %v6118_v38  ;;  %v7005_v38 = vld [vmem:[#allocation5 + $0x8] sm:$0xff]   ;;  %v7051_v58 = vld [vmem:[#allocation8 + $0x64] ss:$16 sps:$4 sm:$0xff]  }
 0xe18   :  { %7501 = vtanh.f32 %v3070_v4  ;;  %v7006_v4 = vld [vmem:[#allocation5 + $0x88] sm:$0xff]  }
 0xe1f   :  { %v7496_v44 = vpop.eup %7495 }
 0xe20   :  { %v7498_v45 = vpop.eup %7497  ;;  %v3079_v47 = vadd.f32 1.0, %v7496_v44  ;;  %v7007_v44 = vld [vmem:[#allocation5 + $0x50] sm:$0xff]  }
 0xe21   :  { %v3085_v48 = vadd.f32 1.0, %v7498_v45  ;;  %v7500_v12 = vpop.eup %7499  ;;  %v7008_v45 = vld [vmem:[#allocation5 + $0xd0] sm:$0xff]  }
 0xe22   :  { %7503 = vrcp.f32 %v3079_v47  ;;  %v7502_v50 = vpop.eup %7501  ;;  %v3092_v55 = vadd.f32 1.0, %v7500_v12  ;;  %v7009_v47 = vld [vmem:[#allocation5 + $0x10] sm:$0xff]   ;;  %v7011_v12 = vld [vmem:[#allocation5 + $0x58] sm:$0xff]  }
 0xe23   :  { %7505 = vrcp.f32 %v3085_v48  ;;  %v7010_v48 = vld [vmem:[#allocation5 + $0x90] sm:$0xff]  }
 0xe24   :  { %7507 = vrcp.f32 %v3092_v55  ;;  %v7016_v55 = vld [vmem:[#allocation5 + $0xe0] sm:$0xff]  }
 0xe2c   :  { %v7504_v51 = vpop.eup %7503 }
 0xe2d   :  { %v7506_v52 = vpop.eup %7505  ;;  %v3096_v53 = vmul.f32 %v7504_v51, %v7502_v50  ;;  %v7012_v50 = vld [vmem:[#allocation5 + $0xd8] sm:$0xff]  }
 0xe2e   :  { %v3095_v56 = vmul.f32 %v7506_v52, %v8749_v54  ;;  %v7508_v59 = vpop.eup %7507  ;;  %v3138_v54 = vrot.slane %v3133_v62, %v9082_v46  ;;  %v7013_v51 = vld [vmem:[#allocation5 + $0x18] sm:$0xff]   ;;  %v7021_v62 = vld [vmem:[#allocation5 + $0x28] sm:$0xff]  }
 0xe2f   :  { %v7014_v52 = vld [vmem:[#allocation5 + $0x98] sm:$0xff]  }
 0xe30   :  { %v8799_v57 = vadd.f32 %v3096_v53, %v3095_v56  ;;  %v7015_v53 = vld [vmem:[#allocation5 + $0x60] sm:$0xff]  }
 0xe31   :  { %v7017_v56 = vld [vmem:[#allocation5 + $0x20] sm:$0xff]  }
 0xe32   :  { %7509 = vtanh.f32 %v8799_v57 }
 0xe3c   :  { %v7510_v16 = vpop.eup %7509 }
 0xe3d   :  { %v3099_v60 = vmul.f32 %v7510_v16, %v7508_v59  ;;  %v7018_v59 = vld [vmem:[#allocation5 + $0xa0] sm:$0xff]   ;;  %v7019_v16 = vld [vmem:[#allocation5 + $0x68] sm:$0xff]  }
 0xe3f   :  { %v8802_v61 = vpack.c.bf16 %v3099_v60, %v3099_v60  ;;  %v7020_v60 = vld [vmem:[#allocation5 + $0xe8] sm:$0xff]  }
 0xe41   :  { %3348 = vmatmul.mubr.bf16.vlgmr.msra.gmra.mrb[48].mxu0 %v8802_v61  ;;  %3389 = vmatmul.mubr.bf16.vlgmr.msra.gmra.mrb[48].mxu1 %v8802_v61 }
 0xe42   :  { %6482 = vmatpush3.bf16.msra.mxu0 %v7001_v18  ;;  %6504 = vmatpush3.bf16.msra.mxu1 %v7002_v40  ;;  %v7054_v18 = vld [vmem:[#allocation8 + $0x6c] ss:$16 sps:$4 sm:$0xff]   ;;  %v7049_v40 = vld [vmem:[#allocation8 + $0x60] ss:$16 sps:$4 sm:$0xff]  }
 0xe43   :  { %6483 = vmatprep.subr.bf16.mxu0 %v7003_v31  ;;  %6505 = vmatprep.subr.bf16.mxu1 %v7004_v23  ;;  %v7057_v31 = vld [vmem:[#allocation8 + $0x84] ss:$16 sps:$4 sm:$0xff]   ;;  %v7060_v23 = vld [vmem:[#allocation8 + $0x8c] ss:$16 sps:$4 sm:$0xff]  }
 0xe46   :  { %6484 = vmatpush3.bf16.msra.mxu0 %v7005_v38  ;;  %6506 = vmatpush3.bf16.msra.mxu1 %v7006_v4  ;;  %v7055_v38 = vld [vmem:[#allocation8 + $0x80] ss:$16 sps:$4 sm:$0xff]   ;;  %v7058_v4 = vld [vmem:[#allocation8 + $0x88] ss:$16 sps:$4 sm:$0xff]  }
 0xe47   :  { %6485 = vmatprep.subr.bf16.mxu0 %v7007_v44  ;;  %6507 = vmatprep.subr.bf16.mxu1 %v7008_v45  ;;  %v7063_v44 = vld [vmem:[#allocation8 + $0xa4] ss:$16 sps:$4 sm:$0xff]   ;;  %v7066_v45 = vld [vmem:[#allocation8 + $0xac] ss:$16 sps:$4 sm:$0xff]  }
 0xe4a   :  { %6486 = vmatpush3.bf16.msra.mxu0 %v7009_v47  ;;  %6508 = vmatpush3.bf16.msra.mxu1 %v7010_v48  ;;  %v7061_v47 = vld [vmem:[#allocation8 + $0xa0] ss:$16 sps:$4 sm:$0xff]   ;;  %v7064_v48 = vld [vmem:[#allocation8 + $0xa8] ss:$16 sps:$4 sm:$0xff]  }
 0xe4b   :  { %6487 = vmatprep.subr.bf16.mxu0 %v7011_v12  ;;  %6509 = vmatprep.subr.bf16.mxu1 %v7012_v50  ;;  %v7069_v12 = vld [vmem:[#allocation8 + $0xc4] ss:$16 sps:$4 sm:$0xff]   ;;  %v7072_v50 = vld [vmem:[#allocation8 + $0xcc] ss:$16 sps:$4 sm:$0xff]  }
 0xe4e   :  { %6488 = vmatpush3.bf16.msra.mxu0 %v7013_v51  ;;  %6510 = vmatpush3.bf16.msra.mxu1 %v7014_v52  ;;  %v7067_v51 = vld [vmem:[#allocation8 + $0xc0] ss:$16 sps:$4 sm:$0xff]   ;;  %v7070_v52 = vld [vmem:[#allocation8 + $0xc8] ss:$16 sps:$4 sm:$0xff]  }
 0xe4f   :  { %6489 = vmatprep.subr.bf16.mxu0 %v7015_v53  ;;  %6511 = vmatprep.subr.bf16.mxu1 %v7016_v55  ;;  %v7075_v53 = vld [vmem:[#allocation8 + $0xe4] ss:$16 sps:$4 sm:$0xff]   ;;  %v7078_v55 = vld [vmem:[#allocation8 + $0xec] ss:$16 sps:$4 sm:$0xff]  }
 0xe52   :  { %6490 = vmatpush3.bf16.msra.mxu0 %v7017_v56  ;;  %6512 = vmatpush3.bf16.msra.mxu1 %v7018_v59  ;;  %v7073_v56 = vld [vmem:[#allocation8 + $0xe0] ss:$16 sps:$4 sm:$0xff]   ;;  %v7076_v59 = vld [vmem:[#allocation8 + $0xe8] ss:$16 sps:$4 sm:$0xff]  }
 0xe53   :  { %6491 = vmatprep.subr.bf16.mxu0 %v7019_v16  ;;  %6513 = vmatprep.subr.bf16.mxu1 %v7020_v60  ;;  %v7081_v16 = vld [vmem:[#allocation8 + $0x104] ss:$16 sps:$4 sm:$0xff]   ;;  %v7084_v60 = vld [vmem:[#allocation8 + $0x10c] ss:$16 sps:$4 sm:$0xff]  }
 0xe56   :  { %6492 = vmatpush3.bf16.msra.mxu0 %v7021_v62  ;;  %v7079_v62 = vld [vmem:[#allocation8 + $0x100] ss:$16 sps:$4 sm:$0xff]  }
 0xf14   :  { %v3349_v5 = vpop.f32.mrb[48].mxu0  ;;  %v3390_v6 = vpop.f32.mrb[48].mxu1 }
 0xf15   :  { %v3350_v11 = vadd.f32 %v3349_v5, %v3138_v54  ;;  %v3391_v13 = vadd.f32 %v3390_v6, %v3146_v63  ;;  %v3351_v14 = vpop.f32.mrb[49].mxu0  ;;  %v3392_v15 = vpop.f32.mrb[49].mxu1  ;;  %v7022_v54 = vld [vmem:[#allocation5 + $0xa8] sm:$0xff]   ;;  %v7023_v63 = vld [vmem:[#allocation5 + $0x70] sm:$0xff]  }
 0xf16   :  { %v3352_v17 = vadd.f32 %v3351_v14, %v3142_v0  ;;  %v3393_v19 = vadd.f32 %v3392_v15, %v3150_v3  ;;  %v3353_v20 = vpop.f32.mrb[50].mxu0  ;;  %v3394_v21 = vpop.f32.mrb[50].mxu1  ;;  %v7024_v0 = vld [vmem:[#allocation5 + $0xf0] sm:$0xff]   ;;  %6514 = vmatpush3.bf16.msra.mxu1 %v7022_v54  ;;  %6493 = vmatprep.subr.bf16.mxu0 %v7023_v63  ;;  %v7027_v15 = vld [vmem:[#allocation5 + $0x78] sm:$0xff]  }
 0xf17   :  { %3398 = vst [vmem:[#allocation11 + $0x20] sm:$0xff] %v3350_v11  ;;  %3400 = vst [vmem:[#allocation11 + $0x30] sm:$0xff] %v3391_v13  ;;  %v3354_v22 = vpop.f32.mrb[51].mxu0  ;;  %v3395_v24 = vpop.f32.mrb[51].mxu1  ;;  %6515 = vmatprep.subr.bf16.mxu1 %v7024_v0  ;;  %v7026_v14 = vld [vmem:[#allocation5 + $0xb0] sm:$0xff]   ;;  %v7030_v20 = vld [vmem:[#allocation5 + $0xb8] sm:$0xff]  }
 0xf18   :  { %3399 = vst [vmem:[#allocation11 + $0x28] sm:$0xff] %v3352_v17  ;;  %3401 = vst [vmem:[#allocation11 + $0x38] sm:$0xff] %v3393_v19  ;;  %v3402_v42 = vmax.f32 %v3350_v11, %v3352_v17  ;;  %v3403_v35 = vmax.f32 %v3391_v13, %v3393_v19  ;;  %v7033_v21 = vld [vmem:[#allocation8 + $0x4] ss:$16 sps:$4 sm:$0xff]   ;;  %v7036_v22 = vld [vmem:[#allocation8 + $0xc] ss:$16 sps:$4 sm:$0xff]  }
 0xf19   :  { %v7082_v54 = vld [vmem:[#allocation8 + $0x108] ss:$16 sps:$4 sm:$0xff]   ;;  %v7087_v63 = vld [vmem:[#allocation8 + $0x124] ss:$16 sps:$4 sm:$0xff]   ;;  %v7090_v0 = vld [vmem:[#allocation8 + $0x12c] ss:$16 sps:$4 sm:$0xff]  }
 0xf1a   :  { %v3404_v33 = vmax.f32 %v3402_v42, %v3403_v35  ;;  %6516 = vmatpush3.bf16.msra.mxu1 %v7026_v14  ;;  %v7094_v14 = vld [vmem:[#allocation8 + $0x148] ss:$16 sps:$4 sm:$0xff]  }
 0xf1c   :  { %3405 = vmax.xlane.f32.xlu1 %v3404_v33 }
 0xfa9   :  { %v3406_v41 = vpop.xlane.xlu1 %3405 }
 0xfaa   :  { %vm3407_vm0 = vcmp.eq.f32.partialorder %v3350_v11, %v3406_v41  ;;  %vm3408_vm1 = vcmp.eq.f32.partialorder %v3352_v17, %v3406_v41  ;;  %vm3409_vm2 = vcmp.eq.f32.partialorder %v3391_v13, %v3406_v41  ;;  %vm3410_vm3 = vcmp.eq.f32.partialorder %v3393_v19, %v3406_v41  ;;  %v7025_v13 = vld [vmem:[#allocation5 + $0x30] sm:$0xff]   ;;  %v7028_v17 = vld [vmem:[#allocation5 + $0xf8] sm:$0xff]  }
 0xfab   :  { %v3411_v32 = vsel %vm3407_vm0, %v8764_v25, 512  ;;  %v3412_v39 = vsel %vm3408_vm1, %v8767_v26, 512  ;;  %v3413_v7 = vsel %vm3409_vm2, %v8770_v27, 512  ;;  %v3414_v34 = vsel %vm3410_vm3, %v8773_v28, 512  ;;  %6494 = vmatpush3.bf16.msra.mxu0 %v7025_v13  ;;  %v7029_v19 = vld [vmem:[#allocation5 + $0x38] sm:$0xff]   ;;  %6517 = vmatprep.subr.bf16.mxu1 %v7028_v17 }
 0xfac   :  { %vm3415_vm4 = vcmp.lt.s32.totalorder %v3411_v32, %v3412_v39  ;;  %vm3417_vm5 = vcmp.lt.s32.totalorder %v3413_v7, %v3414_v34  ;;  %6495 = vmatprep.subr.bf16.mxu0 %v7027_v15  ;;  %6518 = vmatpush3.bf16.msra.mxu1 %v7030_v20  ;;  %v7091_v13 = vld [vmem:[#allocation8 + $0x140] ss:$16 sps:$4 sm:$0xff]   ;;  %v7099_v15 = vld [vmem:[#allocation8 + $0x164] ss:$16 sps:$4 sm:$0xff]   ;;  %v7102_v17 = vld [vmem:[#allocation8 + $0x16c] ss:$16 sps:$4 sm:$0xff]  }
 0xfad   :  { %v3416_v9 = vsel %vm3415_vm4, %v3411_v32, %v3412_v39  ;;  %v3418_v10 = vsel %vm3417_vm5, %v3413_v7, %v3414_v34  ;;  %4235 = vmatprep.subr.bf16.mxu1 %v7036_v22  ;;  %v7031_v32 = vld [vmem:[#allocation8] ss:$16 sps:$4 sm:$0xff]   ;;  %v7034_v39 = vld [vmem:[#allocation8 + $0x8] ss:$16 sps:$4 sm:$0xff]   ;;  %v7039_v7 = vld [vmem:[#allocation8 + $0x24] ss:$16 sps:$4 sm:$0xff]  }
 0xfae   :  { %vm3419_vm6 = vcmp.lt.s32.totalorder %v3416_v9, %v3418_v10  ;;  %v7042_v34 = vld [vmem:[#allocation8 + $0x2c] ss:$16 sps:$4 sm:$0xff]   ;;  %v7100_v20 = vld [vmem:[#allocation8 + $0x168] ss:$16 sps:$4 sm:$0xff]  }
 0xfaf   :  { %v3420_v43 = vsel %vm3419_vm6, %v3416_v9, %v3418_v10  ;;  %6496 = vmatpush3.bf16.msra.mxu0 %v7029_v19  ;;  %v7037_v9 = vld [vmem:[#allocation8 + $0x20] ss:$16 sps:$4 sm:$0xff]   ;;  %v7040_v10 = vld [vmem:[#allocation8 + $0x28] ss:$16 sps:$4 sm:$0xff]   ;;  %v7108_v22 = vld [vmem:[#allocation8 + $0x18c] ss:$16 sps:$4 sm:$0xff]  }
 0xfb0   :  { %v3422_v1 = vshra.s32 %v3420_v43, 16  ;;  %v3421_v3 = vand.u32 65535, %v3420_v43  ;;  %4194 = vmatprep.subr.bf16.mxu0 %v7033_v21  ;;  %v7045_v43 = vld [vmem:[#allocation8 + $0x44] ss:$16 sps:$4 sm:$0xff]   ;;  %v7097_v19 = vld [vmem:[#allocation8 + $0x160] ss:$16 sps:$4 sm:$0xff]  }
 0xfb1   :  { %v7105_v21 = vld [vmem:[#allocation8 + $0x184] ss:$16 sps:$4 sm:$0xff]  }
 0xfb2   :  { %v3424_v2 = vcvt.s32.f32 %v3422_v1  ;;  %v3423_v6 = vcvt.s32.f32 %v3421_v3  ;;  %v7048_v1 = vld [vmem:[#allocation8 + $0x4c] ss:$16 sps:$4 sm:$0xff]   ;;  %v7085_v3 = vld [vmem:[#allocation8 + $0x120] ss:$16 sps:$4 sm:$0xff]  }
 0xfb4   :  { %3425 = vmin.xlane.f32.xlu0 %v3424_v2 }
0x1041   :  { %v3426_v5 = vpop.xlane.xlu0 %3425 }
0x1042   :  { %vm3427_vm7 = vcmp.eq.f32.partialorder %v3424_v2, %v3426_v5  ;;  %v3432_v24 = vcvt.f32.s32 %v3426_v5  ;;  %v7043_v2 = vld [vmem:[#allocation8 + $0x40] ss:$16 sps:$4 sm:$0xff]   ;;  %v7088_v5 = vld [vmem:[#allocation8 + $0x128] ss:$16 sps:$4 sm:$0xff]  }
0x1043   :  { %v3428_v11 = vsel %vm3427_vm7, %v3423_v6, inf  ;;  %v7093_v6 = vld [vmem:[#allocation8 + $0x144] ss:$16 sps:$4 sm:$0xff]  }
0x1044   :  { %3429 = vmin.xlane.f32.xlu1 %v3428_v11  ;;  %v3433_v35 = vshll.u32 %v3432_v24, 16  ;;  %v7096_v11 = vld [vmem:[#allocation8 + $0x14c] ss:$16 sps:$4 sm:$0xff]   ;;  %v7103_v24 = vld [vmem:[#allocation8 + $0x180] ss:$16 sps:$4 sm:$0xff]  }
0x10d1   :  { %v3430_v42 = vpop.xlane.xlu1 %3429 }
0x10d2   :  { %v3431_v33 = vcvt.f32.s32 %v3430_v42  ;;  %v7106_v42 = vld [vmem:[#allocation8 + $0x188] ss:$16 sps:$4 sm:$0xff]  }
0x10d4   :  { %v3434_v41 = vadd.s32 %v3433_v35, %v3431_v33  ;;  %v7111_v35 = vld [vmem:[#allocation8 + $0x1a4] ss:$16 sps:$4 sm:$0xff]   ;;  %v7114_v33 = vld [vmem:[#allocation8 + $0x1ac] ss:$16 sps:$4 sm:$0xff]  }
0x10d6   :  { %vm3436_vm8 = vcmp.eq.s32.totalorder %v8767_v26, %v3434_v41  ;;  %vm3438_vm9 = vcmp.eq.s32.totalorder %v8773_v28, %v3434_v41  ;;  %vm3435_vm10 = vcmp.eq.s32.totalorder %v8764_v25, %v3434_v41  ;;  %vm3437_vm12 = vcmp.eq.s32.totalorder %v8770_v27, %v3434_v41  ;;  %v7109_v41 = vld [vmem:[#allocation8 + $0x1a0] ss:$16 sps:$4 sm:$0xff]  }
0x10d7   :  { %vm6187_vm11 = vmpackc.low %vm3436_vm8, %vm3436_vm8 }
0x10d8   :  { %6188 = vmatprep.mubr.msk.bf16.mxu0 %vm6187_vm11, %v7819_v30  ;;  %vm6191_vm13 = vmpackc.low %vm3438_vm9, %vm3438_vm9 }
0x10d9   :  { %6192 = vmatprep.mubr.msk.bf16.mxu1 %vm6191_vm13, %v7819_v30  ;;  %vm6189_vm14 = vmpackc.low %vm3435_vm10, %vm3435_vm10 }
0x10da   :  { %6190 = vmatmul.mubr.msk.bf16.vlgmr.msra.gmra.mrb[52].mxu0 %vm6189_vm14, %v7819_v30  ;;  %vm6193_vm15 = vmpackc.low %vm3437_vm12, %vm3437_vm12 }
0x10db   :  { %6194 = vmatmul.mubr.msk.bf16.vlgmr.msra.gmra.mrb[52].mxu1 %vm6193_vm15, %v7819_v30  ;;  %4226 = vmatprep.mubr.bf16.mxu0 %v8802_v61 }
0x10dc   :  { %4267 = vmatprep.mubr.bf16.mxu1 %v8802_v61  ;;  %4195 = vmatpush1.bf16.msra.mxu0 %v7031_v32  ;;  %v7052_v61 = vld [vmem:[#allocation8 + $0x68] ss:$16 sps:$4 sm:$0xff]  }
0x10dd   :  { %4236 = vmatpush1.bf16.msra.mxu1 %v7034_v39  ;;  %4196 = vmatprep.subr.bf16.mxu0 %v7039_v7  ;;  %v7112_v32 = vld [vmem:[#allocation8 + $0x1a8] ss:$16 sps:$4 sm:$0xff]   ;;  %v7117_v39 = vld [vmem:[#allocation8 + $0x1c4] ss:$16 sps:$4 sm:$0xff]   ;;  %v7120_v7 = vld [vmem:[#allocation8 + $0x1cc] ss:$16 sps:$4 sm:$0xff]  }
0x10de   :  { %4237 = vmatprep.subr.bf16.mxu1 %v7042_v34  ;;  %v7115_v34 = vld [vmem:[#allocation8 + $0x1c0] ss:$16 sps:$4 sm:$0xff]  }
0x10e0   :  { %4197 = vmatpush1.bf16.msra.mxu0 %v7037_v9  ;;  %v7118_v9 = vld [vmem:[#allocation8 + $0x1c8] ss:$16 sps:$4 sm:$0xff]  }
0x10e1   :  { %4238 = vmatpush1.bf16.msra.mxu1 %v7040_v10  ;;  %4198 = vmatprep.subr.bf16.mxu0 %v7045_v43  ;;  %v7123_v10 = vld [vmem:[#allocation8 + $0x1e4] ss:$16 sps:$4 sm:$0xff]   ;;  %v7126_v43 = vld [vmem:[#allocation8 + $0x1ec] ss:$16 sps:$4 sm:$0xff]  }
0x10e2   :  { %4239 = vmatprep.subr.bf16.mxu1 %v7048_v1  ;;  %v7121_v1 = vld [vmem:[#allocation8 + $0x1e0] ss:$16 sps:$4 sm:$0xff]  }
0x10e4   :  { %4199 = vmatpush1.bf16.msra.mxu0 %v7043_v2  ;;  %v7124_v2 = vld [vmem:[#allocation8 + $0x1e8] ss:$16 sps:$4 sm:$0xff]  }
0x10e5   :  { %4240 = vmatpush1.bf16.msra.mxu1 %v7046_v36  ;;  %4200 = vmatprep.subr.bf16.mxu0 %v7051_v58 }
0x10e6   :  { %4241 = vmatprep.subr.bf16.mxu1 %v7054_v18 }
0x10e8   :  { %4201 = vmatpush1.bf16.msra.mxu0 %v7049_v40 }
0x10e9   :  { %4242 = vmatpush1.bf16.msra.mxu1 %v7052_v61  ;;  %4202 = vmatprep.subr.bf16.mxu0 %v7057_v31 }
0x10ea   :  { %4243 = vmatprep.subr.bf16.mxu1 %v7060_v23 }
0x10ec   :  { %4203 = vmatpush1.bf16.msra.mxu0 %v7055_v38 }
0x10ed   :  { %4244 = vmatpush1.bf16.msra.mxu1 %v7058_v4  ;;  %4204 = vmatprep.subr.bf16.mxu0 %v7063_v44 }
0x10ee   :  { %4245 = vmatprep.subr.bf16.mxu1 %v7066_v45 }
0x10f0   :  { %4205 = vmatpush1.bf16.msra.mxu0 %v7061_v47 }
0x10f1   :  { %4246 = vmatpush1.bf16.msra.mxu1 %v7064_v48  ;;  %4206 = vmatprep.subr.bf16.mxu0 %v7069_v12  ;;  %v7129_v48 = vld [vmem:[#allocation10 + $0x4] ss:$16 sps:$4 sm:$0xff]   ;;  %v7132_v12 = vld [vmem:[#allocation10 + $0xc] ss:$16 sps:$4 sm:$0xff]  }
0x10f2   :  { %4247 = vmatprep.subr.bf16.mxu1 %v7072_v50  ;;  %v7127_v50 = vld [vmem:[#allocation10] ss:$16 sps:$4 sm:$0xff]  }
0x10f4   :  { %4207 = vmatpush1.bf16.msra.mxu0 %v7067_v51  ;;  %v7130_v51 = vld [vmem:[#allocation10 + $0x8] ss:$16 sps:$4 sm:$0xff]  }
0x10f5   :  { %4248 = vmatpush1.bf16.msra.mxu1 %v7070_v52  ;;  %4208 = vmatprep.subr.bf16.mxu0 %v7075_v53  ;;  %v7135_v52 = vld [vmem:[#allocation10 + $0x24] ss:$16 sps:$4 sm:$0xff]   ;;  %v7138_v53 = vld [vmem:[#allocation10 + $0x2c] ss:$16 sps:$4 sm:$0xff]  }
0x10f6   :  { %4249 = vmatprep.subr.bf16.mxu1 %v7078_v55  ;;  %v7133_v55 = vld [vmem:[#allocation10 + $0x20] ss:$16 sps:$4 sm:$0xff]  }
0x10f8   :  { %4209 = vmatpush1.bf16.msra.mxu0 %v7073_v56  ;;  %v7136_v56 = vld [vmem:[#allocation10 + $0x28] ss:$16 sps:$4 sm:$0xff]  }
0x10f9   :  { %4250 = vmatpush1.bf16.msra.mxu1 %v7076_v59  ;;  %4210 = vmatprep.subr.bf16.mxu0 %v7081_v16  ;;  %v7141_v59 = vld [vmem:[#allocation10 + $0x44] ss:$16 sps:$4 sm:$0xff]   ;;  %v7144_v16 = vld [vmem:[#allocation10 + $0x4c] ss:$16 sps:$4 sm:$0xff]  }
0x10fa   :  { %4251 = vmatprep.subr.bf16.mxu1 %v7084_v60  ;;  %v7139_v60 = vld [vmem:[#allocation10 + $0x40] ss:$16 sps:$4 sm:$0xff]  }
0x10fc   :  { %4211 = vmatpush1.bf16.msra.mxu0 %v7079_v62  ;;  %v7142_v62 = vld [vmem:[#allocation10 + $0x48] ss:$16 sps:$4 sm:$0xff]  }
0x10fd   :  { %4252 = vmatpush1.bf16.msra.mxu1 %v7082_v54  ;;  %4212 = vmatprep.subr.bf16.mxu0 %v7087_v63  ;;  %v7147_v54 = vld [vmem:[#allocation10 + $0x64] ss:$16 sps:$4 sm:$0xff]   ;;  %v7150_v63 = vld [vmem:[#allocation10 + $0x6c] ss:$16 sps:$4 sm:$0xff]  }
0x10fe   :  { %4253 = vmatprep.subr.bf16.mxu1 %v7090_v0  ;;  %v7145_v0 = vld [vmem:[#allocation10 + $0x60] ss:$16 sps:$4 sm:$0xff]  }
0x1100   :  { %4213 = vmatpush1.bf16.msra.mxu0 %v7085_v3  ;;  %v7148_v3 = vld [vmem:[#allocation10 + $0x68] ss:$16 sps:$4 sm:$0xff]  }
0x1101   :  { %4254 = vmatpush1.bf16.msra.mxu1 %v7088_v5  ;;  %4214 = vmatprep.subr.bf16.mxu0 %v7093_v6  ;;  %v7151_v5 = vld [vmem:[#allocation10 + $0x80] ss:$16 sps:$4 sm:$0xff]   ;;  %v7153_v6 = vld [vmem:[#allocation10 + $0x84] ss:$16 sps:$4 sm:$0xff]  }
0x1102   :  { %4255 = vmatprep.subr.bf16.mxu1 %v7096_v11  ;;  %v7154_v11 = vld [vmem:[#allocation10 + $0x88] ss:$16 sps:$4 sm:$0xff]  }
0x1104   :  { %4215 = vmatpush1.bf16.msra.mxu0 %v7091_v13  ;;  %v7156_v13 = vld [vmem:[#allocation10 + $0x8c] ss:$16 sps:$4 sm:$0xff]  }
0x1105   :  { %4256 = vmatpush1.bf16.msra.mxu1 %v7094_v14  ;;  %4216 = vmatprep.subr.bf16.mxu0 %v7099_v15  ;;  %v7159_v14 = vld [vmem:[#allocation10 + $0xa4] ss:$16 sps:$4 sm:$0xff]   ;;  %v7162_v15 = vld [vmem:[#allocation10 + $0xac] ss:$16 sps:$4 sm:$0xff]  }
0x1106   :  { %4257 = vmatprep.subr.bf16.mxu1 %v7102_v17  ;;  %v7157_v17 = vld [vmem:[#allocation10 + $0xa0] ss:$16 sps:$4 sm:$0xff]  }
0x1108   :  { %4217 = vmatpush1.bf16.msra.mxu0 %v7097_v19  ;;  %v7160_v19 = vld [vmem:[#allocation10 + $0xa8] ss:$16 sps:$4 sm:$0xff]  }
0x1109   :  { %4258 = vmatpush1.bf16.msra.mxu1 %v7100_v20  ;;  %4218 = vmatprep.subr.bf16.mxu0 %v7105_v21  ;;  %v7165_v20 = vld [vmem:[#allocation10 + $0xc4] ss:$16 sps:$4 sm:$0xff]   ;;  %v7168_v21 = vld [vmem:[#allocation10 + $0xcc] ss:$16 sps:$4 sm:$0xff]  }
0x110a   :  { %4259 = vmatprep.subr.bf16.mxu1 %v7108_v22  ;;  %v7163_v22 = vld [vmem:[#allocation10 + $0xc0] ss:$16 sps:$4 sm:$0xff]  }
0x110c   :  { %4219 = vmatpush1.bf16.msra.mxu0 %v7103_v24  ;;  %v7166_v24 = vld [vmem:[#allocation10 + $0xc8] ss:$16 sps:$4 sm:$0xff]  }
0x110d   :  { %4260 = vmatpush1.bf16.msra.mxu1 %v7106_v42  ;;  %4220 = vmatprep.subr.bf16.mxu0 %v7111_v35  ;;  %v7171_v42 = vld [vmem:[#allocation10 + $0xe4] ss:$16 sps:$4 sm:$0xff]   ;;  %v7174_v35 = vld [vmem:[#allocation10 + $0xec] ss:$16 sps:$4 sm:$0xff]  }
0x110e   :  { %4261 = vmatprep.subr.bf16.mxu1 %v7114_v33  ;;  %v7169_v33 = vld [vmem:[#allocation10 + $0xe0] ss:$16 sps:$4 sm:$0xff]  }
0x1110   :  { %4221 = vmatpush1.bf16.msra.mxu0 %v7109_v41  ;;  %v7172_v41 = vld [vmem:[#allocation10 + $0xe8] ss:$16 sps:$4 sm:$0xff]  }
0x1111   :  { %4262 = vmatpush1.bf16.msra.mxu1 %v7112_v32  ;;  %4222 = vmatprep.subr.bf16.mxu0 %v7117_v39  ;;  %v3852_v32 = vld [vmem:[%s8899_s5] sm:$0xf] }
0x1112   :  { %4263 = vmatprep.subr.bf16.mxu1 %v7120_v7  ;;  %v3857_v39 = vrot.slane %v3852_v32, %v9082_v46  ;;  %v3861_v7 = vrot.slane %v3852_v32, %v9084_v29 }
0x1114   :  { %4223 = vmatpush1.bf16.msra.mxu0 %v7115_v34 }
0x1115   :  { %4264 = vmatpush1.bf16.msra.mxu1 %v7118_v9  ;;  %4224 = vmatprep.subr.bf16.mxu0 %v7123_v10 }
0x1116   :  { %4265 = vmatprep.subr.bf16.mxu1 %v7126_v43 }
0x1118   :  { %4225 = vmatpush1.bf16.msra.mxu0 %v7121_v1 }
0x1119   :  { %4266 = vmatpush1.bf16.msra.mxu1 %v7124_v2  ;;  %4515 = vmatprep.subr.bf16.mxu0 %v7129_v48 }
0x111a   :  { %4556 = vmatprep.subr.bf16.mxu1 %v7132_v12 }
0x11ad   :  { %v6497_v36 = vpop.f32.mrb[52].mxu0 }
0x11ae   :  { %v6519_v58 = vpop.f32.mrb[52].mxu1  ;;  %v6498_v18 = vpop.f32.mrb[53].mxu0 }
0x11af   :  { %v6499_v40 = vadd.f32 %v6498_v18, %v6497_v36  ;;  %v6520_v61 = vpop.f32.mrb[53].mxu1  ;;  %v6500_v31 = vpop.f32.mrb[54].mxu0 }
0x11b0   :  { %v6521_v23 = vadd.f32 %v6520_v61, %v6519_v58  ;;  %v6522_v38 = vpop.f32.mrb[54].mxu1  ;;  %v6501_v4 = vpop.f32.mrb[55].mxu0 }
0x11b1   :  { %v6523_v44 = vpop.f32.mrb[55].mxu1  ;;  %v3865_v4 = vrot.slane %v3852_v32, %v9086_v37 }
0x11b2   :  { %v3782_v45 = vadd.f32 %v6521_v23, %v6499_v40  ;;  %v3869_v23 = vrot.slane %v3852_v32, %v9085_v8 }
0x11b4   :  { %v3787_v47 = vpack.c.bf16 %v3782_v45, %v3782_v45 }
0x11b6   :  { %4227 = vmatmul.mubr.bf16.vlgmr.msra.gmra.mrb[56].mxu0 %v3787_v47  ;;  %4268 = vmatmul.mubr.bf16.vlgmr.msra.gmra.mrb[56].mxu1 %v3787_v47 }
0x11b7   :  { %4547 = vmatprep.mubr.bf16.mxu0 %v9083_v49  ;;  %4588 = vmatprep.mubr.bf16.mxu1 %v9083_v49 }
0x11b8   :  { %4516 = vmatpush1.bf16.msra.mxu0 %v7127_v50  ;;  %4557 = vmatpush1.bf16.msra.mxu1 %v7130_v51 }
0x11b9   :  { %4517 = vmatprep.subr.bf16.mxu0 %v7135_v52  ;;  %4558 = vmatprep.subr.bf16.mxu1 %v7138_v53 }
0x11bc   :  { %4518 = vmatpush1.bf16.msra.mxu0 %v7133_v55  ;;  %4559 = vmatpush1.bf16.msra.mxu1 %v7136_v56 }
0x11bd   :  { %4519 = vmatprep.subr.bf16.mxu0 %v7141_v59  ;;  %4560 = vmatprep.subr.bf16.mxu1 %v7144_v16 }
0x11c0   :  { %4520 = vmatpush1.bf16.msra.mxu0 %v7139_v60  ;;  %4561 = vmatpush1.bf16.msra.mxu1 %v7142_v62 }
0x11c1   :  { %4521 = vmatprep.subr.bf16.mxu0 %v7147_v54  ;;  %4562 = vmatprep.subr.bf16.mxu1 %v7150_v63 }
0x11c4   :  { %4522 = vmatpush1.bf16.msra.mxu0 %v7145_v0  ;;  %4563 = vmatpush1.bf16.msra.mxu1 %v7148_v3  ;;  %v4333_v3 = vld [vmem:[%s8901_s7] sm:$0xf] }
0x11c5   :  { %4523 = vmatprep.subr.bf16.mxu0 %v7153_v6  ;;  %4564 = vmatprep.subr.bf16.mxu1 %v7156_v13  ;;  %v4342_v6 = vrot.slane %v4333_v3, %v9084_v29 }
0x11c8   :  { %4524 = vmatpush1.bf16.msra.mxu0 %v7151_v5  ;;  %4565 = vmatpush1.bf16.msra.mxu1 %v7154_v11  ;;  %v4346_v5 = vrot.slane %v4333_v3, %v9086_v37  ;;  %v4350_v11 = vrot.slane %v4333_v3, %v9085_v8 }
0x11c9   :  { %4525 = vmatprep.subr.bf16.mxu0 %v7159_v14  ;;  %4566 = vmatprep.subr.bf16.mxu1 %v7162_v15 }
0x11cc   :  { %4526 = vmatpush1.bf16.msra.mxu0 %v7157_v17  ;;  %4567 = vmatpush1.bf16.msra.mxu1 %v7160_v19 }
0x11cd   :  { %4527 = vmatprep.subr.bf16.mxu0 %v7165_v20  ;;  %4568 = vmatprep.subr.bf16.mxu1 %v7168_v21 }
0x11d0   :  { %4528 = vmatpush1.bf16.msra.mxu0 %v7163_v22  ;;  %4569 = vmatpush1.bf16.msra.mxu1 %v7166_v24 }
0x11d1   :  { %4529 = vmatprep.subr.bf16.mxu0 %v7171_v42  ;;  %4570 = vmatprep.subr.bf16.mxu1 %v7174_v35 }
0x11d4   :  { %4530 = vmatpush1.bf16.msra.mxu0 %v7169_v33  ;;  %4571 = vmatpush1.bf16.msra.mxu1 %v7172_v41 }
0x1289   :  { %v4228_v34 = vpop.f32.mrb[56].mxu0  ;;  %v4269_v9 = vpop.f32.mrb[56].mxu1 }
0x128a   :  { %v4229_v10 = vadd.f32 %v4228_v34, %v3857_v39  ;;  %v4230_v43 = vpop.f32.mrb[57].mxu0  ;;  %v4271_v1 = vpop.f32.mrb[57].mxu1  ;;  %v4270_v45 = vadd.f32 %v4269_v9, %v3865_v4  ;;  %v7180_v4 = vld [vmem:[#allocation5 + $0xc8] sm:$0xff]  }
0x128b   :  { %v4231_v2 = vadd.f32 %v4230_v43, %v3861_v7  ;;  %v4232_v36 = vpop.f32.mrb[58].mxu0  ;;  %v4273_v58 = vpop.f32.mrb[58].mxu1  ;;  %v4272_v38 = vadd.f32 %v4271_v1, %v3869_v23  ;;  %v7178_v23 = vld [vmem:[#allocation5 + $0x80] sm:$0xff]  }
0x128c   :  { %v6259_v18 = vmul.f32 -1.442695, %v4229_v10  ;;  %v4233_v40 = vpop.f32.mrb[59].mxu0  ;;  %v4274_v61 = vpop.f32.mrb[59].mxu1 }
0x128d   :  { %v6260_v31 = vmul.f32 -1.442695, %v4231_v2  ;;  %v6261_v44 = vmul.f32 -1.442695, %v4272_v38  ;;  %v7175_v40 = vld [vmem:[#allocation5 + $0x40] sm:$0xff]   ;;  %v7179_v38 = vld [vmem:[#allocation5 + $0x48] sm:$0xff]  }
0x128e   :  { %7511 = vpow2.f32 %v6259_v18  ;;  %v7176_v61 = vld [vmem:[#allocation5 + $0xc0] sm:$0xff]   ;;  %6525 = vmatprep.subr.bf16.mxu0 %v7175_v40  ;;  %v7236_v40 = vld [vmem:[#allocation8 + $0x8c] ss:$16 sps:$4 sm:$0xff]  }
0x128f   :  { %7513 = vpow2.f32 %v6260_v31  ;;  %v7177_v31 = vld [vmem:[#allocation5] sm:$0xff]   ;;  %6547 = vmatprep.subr.bf16.mxu1 %v7176_v61 }
0x1290   :  { %7515 = vpow2.f32 %v6261_v44  ;;  %v7181_v44 = vld [vmem:[#allocation5 + $0x8] sm:$0xff]   ;;  %v7231_v61 = vld [vmem:[#allocation8 + $0x80] ss:$16 sps:$4 sm:$0xff]  }
0x1291   :  { %7517 = vtanh.f32 %v4270_v45  ;;  %v7182_v45 = vld [vmem:[#allocation5 + $0x88] sm:$0xff]  }
0x1298   :  { %v7512_v47 = vpop.eup %7511 }
0x1299   :  { %v7514_v48 = vpop.eup %7513  ;;  %v4279_v12 = vadd.f32 1.0, %v7512_v47  ;;  %v7183_v47 = vld [vmem:[#allocation5 + $0x50] sm:$0xff]  }
0x129a   :  { %v4285_v50 = vadd.f32 1.0, %v7514_v48  ;;  %v7516_v51 = vpop.eup %7515  ;;  %v7184_v48 = vld [vmem:[#allocation5 + $0xd0] sm:$0xff]  }
0x129b   :  { %7519 = vrcp.f32 %v4279_v12  ;;  %v7518_v52 = vpop.eup %7517  ;;  %v4292_v59 = vadd.f32 1.0, %v7516_v51  ;;  %v7185_v12 = vld [vmem:[#allocation5 + $0x10] sm:$0xff]   ;;  %v7187_v51 = vld [vmem:[#allocation5 + $0x58] sm:$0xff]  }
0x129c   :  { %7521 = vrcp.f32 %v4285_v50  ;;  %v7186_v50 = vld [vmem:[#allocation5 + $0x90] sm:$0xff]  }
0x129d   :  { %7523 = vrcp.f32 %v4292_v59  ;;  %v7192_v59 = vld [vmem:[#allocation5 + $0xe0] sm:$0xff]  }
0x12a5   :  { %v7520_v53 = vpop.eup %7519 }
0x12a6   :  { %v7522_v55 = vpop.eup %7521  ;;  %v4296_v56 = vmul.f32 %v7520_v53, %v7518_v52  ;;  %v7188_v52 = vld [vmem:[#allocation5 + $0xd8] sm:$0xff]  }
0x12a7   :  { %v4295_v16 = vmul.f32 %v7522_v55, %v8799_v57  ;;  %v7524_v62 = vpop.eup %7523  ;;  %v4338_v57 = vrot.slane %v4333_v3, %v9082_v46  ;;  %v7189_v53 = vld [vmem:[#allocation5 + $0x18] sm:$0xff]   ;;  %v7197_v3 = vld [vmem:[#allocation5 + $0x28] sm:$0xff]  }
0x12a8   :  { %v7190_v55 = vld [vmem:[#allocation5 + $0x98] sm:$0xff]  }
0x12a9   :  { %v8837_v60 = vadd.f32 %v4296_v56, %v4295_v16  ;;  %v7191_v56 = vld [vmem:[#allocation5 + $0x60] sm:$0xff]  }
0x12aa   :  { %v7193_v16 = vld [vmem:[#allocation5 + $0x20] sm:$0xff]  }
0x12ab   :  { %7525 = vtanh.f32 %v8837_v60 }
0x12b5   :  { %v7526_v54 = vpop.eup %7525 }
0x12b6   :  { %v4299_v63 = vmul.f32 %v7526_v54, %v7524_v62  ;;  %v7194_v62 = vld [vmem:[#allocation5 + $0xa0] sm:$0xff]   ;;  %v7195_v54 = vld [vmem:[#allocation5 + $0x68] sm:$0xff]  }
0x12b8   :  { %v8840_v0 = vpack.c.bf16 %v4299_v63, %v4299_v63  ;;  %v7196_v63 = vld [vmem:[#allocation5 + $0xe8] sm:$0xff]  }
0x12ba   :  { %4548 = vmatmul.mubr.bf16.vlgmr.msra.gmra.mrb[60].mxu0 %v8840_v0  ;;  %4589 = vmatmul.mubr.bf16.vlgmr.msra.gmra.mrb[60].mxu1 %v8840_v0 }
0x12bb   :  { %6526 = vmatpush3.bf16.msra.mxu0 %v7177_v31  ;;  %6548 = vmatpush3.bf16.msra.mxu1 %v7178_v23  ;;  %v7234_v31 = vld [vmem:[#allocation8 + $0x88] ss:$16 sps:$4 sm:$0xff]   ;;  %v7239_v23 = vld [vmem:[#allocation8 + $0xa4] ss:$16 sps:$4 sm:$0xff]  }
0x12bc   :  { %6527 = vmatprep.subr.bf16.mxu0 %v7179_v38  ;;  %6549 = vmatprep.subr.bf16.mxu1 %v7180_v4  ;;  %v7242_v38 = vld [vmem:[#allocation8 + $0xac] ss:$16 sps:$4 sm:$0xff]   ;;  %v7237_v4 = vld [vmem:[#allocation8 + $0xa0] ss:$16 sps:$4 sm:$0xff]  }
0x12bf   :  { %6528 = vmatpush3.bf16.msra.mxu0 %v7181_v44  ;;  %6550 = vmatpush3.bf16.msra.mxu1 %v7182_v45  ;;  %v7240_v44 = vld [vmem:[#allocation8 + $0xa8] ss:$16 sps:$4 sm:$0xff]   ;;  %v7245_v45 = vld [vmem:[#allocation8 + $0xc4] ss:$16 sps:$4 sm:$0xff]  }
0x12c0   :  { %6529 = vmatprep.subr.bf16.mxu0 %v7183_v47  ;;  %6551 = vmatprep.subr.bf16.mxu1 %v7184_v48  ;;  %v7248_v47 = vld [vmem:[#allocation8 + $0xcc] ss:$16 sps:$4 sm:$0xff]   ;;  %v7243_v48 = vld [vmem:[#allocation8 + $0xc0] ss:$16 sps:$4 sm:$0xff]  }
0x12c3   :  { %6530 = vmatpush3.bf16.msra.mxu0 %v7185_v12  ;;  %6552 = vmatpush3.bf16.msra.mxu1 %v7186_v50  ;;  %v7246_v12 = vld [vmem:[#allocation8 + $0xc8] ss:$16 sps:$4 sm:$0xff]   ;;  %v7251_v50 = vld [vmem:[#allocation8 + $0xe4] ss:$16 sps:$4 sm:$0xff]  }
0x12c4   :  { %6531 = vmatprep.subr.bf16.mxu0 %v7187_v51  ;;  %6553 = vmatprep.subr.bf16.mxu1 %v7188_v52  ;;  %v7254_v51 = vld [vmem:[#allocation8 + $0xec] ss:$16 sps:$4 sm:$0xff]   ;;  %v7249_v52 = vld [vmem:[#allocation8 + $0xe0] ss:$16 sps:$4 sm:$0xff]  }
0x12c7   :  { %6532 = vmatpush3.bf16.msra.mxu0 %v7189_v53  ;;  %6554 = vmatpush3.bf16.msra.mxu1 %v7190_v55  ;;  %v7252_v53 = vld [vmem:[#allocation8 + $0xe8] ss:$16 sps:$4 sm:$0xff]   ;;  %v7257_v55 = vld [vmem:[#allocation8 + $0x104] ss:$16 sps:$4 sm:$0xff]  }
0x12c8   :  { %6533 = vmatprep.subr.bf16.mxu0 %v7191_v56  ;;  %6555 = vmatprep.subr.bf16.mxu1 %v7192_v59  ;;  %v7260_v56 = vld [vmem:[#allocation8 + $0x10c] ss:$16 sps:$4 sm:$0xff]   ;;  %v7255_v59 = vld [vmem:[#allocation8 + $0x100] ss:$16 sps:$4 sm:$0xff]  }
0x12cb   :  { %6534 = vmatpush3.bf16.msra.mxu0 %v7193_v16  ;;  %6556 = vmatpush3.bf16.msra.mxu1 %v7194_v62  ;;  %v7258_v16 = vld [vmem:[#allocation8 + $0x108] ss:$16 sps:$4 sm:$0xff]   ;;  %v7263_v62 = vld [vmem:[#allocation8 + $0x124] ss:$16 sps:$4 sm:$0xff]  }
0x12cc   :  { %6535 = vmatprep.subr.bf16.mxu0 %v7195_v54  ;;  %6557 = vmatprep.subr.bf16.mxu1 %v7196_v63  ;;  %v7266_v54 = vld [vmem:[#allocation8 + $0x12c] ss:$16 sps:$4 sm:$0xff]   ;;  %v7261_v63 = vld [vmem:[#allocation8 + $0x120] ss:$16 sps:$4 sm:$0xff]  }
0x12cf   :  { %6536 = vmatpush3.bf16.msra.mxu0 %v7197_v3  ;;  %v7264_v3 = vld [vmem:[#allocation8 + $0x128] ss:$16 sps:$4 sm:$0xff]  }
0x138d   :  { %v4549_v13 = vpop.f32.mrb[60].mxu0  ;;  %v4590_v14 = vpop.f32.mrb[60].mxu1 }
0x138e   :  { %v4550_v15 = vadd.f32 %v4549_v13, %v4338_v57  ;;  %v4591_v17 = vadd.f32 %v4590_v14, %v4346_v5  ;;  %v4551_v19 = vpop.f32.mrb[61].mxu0  ;;  %v4592_v20 = vpop.f32.mrb[61].mxu1  ;;  %v7198_v57 = vld [vmem:[#allocation5 + $0xa8] sm:$0xff]   ;;  %v7199_v5 = vld [vmem:[#allocation5 + $0x70] sm:$0xff]  }
0x138f   :  { %v4552_v21 = vadd.f32 %v4551_v19, %v4342_v6  ;;  %v4593_v22 = vadd.f32 %v4592_v20, %v4350_v11  ;;  %v4553_v24 = vpop.f32.mrb[62].mxu0  ;;  %v4594_v42 = vpop.f32.mrb[62].mxu1  ;;  %v7200_v6 = vld [vmem:[#allocation5 + $0xf0] sm:$0xff]   ;;  %6558 = vmatpush3.bf16.msra.mxu1 %v7198_v57  ;;  %6537 = vmatprep.subr.bf16.mxu0 %v7199_v5  ;;  %v7203_v20 = vld [vmem:[#allocation5 + $0x78] sm:$0xff]  }
0x1390   :  { %4598 = vst [vmem:[#allocation11 + $0x40] sm:$0xff] %v4550_v15  ;;  %4600 = vst [vmem:[#allocation11 + $0x50] sm:$0xff] %v4591_v17  ;;  %v4554_v35 = vpop.f32.mrb[63].mxu0  ;;  %v4595_v33 = vpop.f32.mrb[63].mxu1  ;;  %6559 = vmatprep.subr.bf16.mxu1 %v7200_v6  ;;  %v7202_v19 = vld [vmem:[#allocation5 + $0xb0] sm:$0xff]   ;;  %v7206_v24 = vld [vmem:[#allocation5 + $0xb8] sm:$0xff]  }
0x1391   :  { %4599 = vst [vmem:[#allocation11 + $0x48] sm:$0xff] %v4552_v21  ;;  %4601 = vst [vmem:[#allocation11 + $0x58] sm:$0xff] %v4593_v22  ;;  %v4602_v41 = vmax.f32 %v4550_v15, %v4552_v21  ;;  %v4603_v32 = vmax.f32 %v4591_v17, %v4593_v22  ;;  %v7209_v42 = vld [vmem:[#allocation8 + $0x4] ss:$16 sps:$4 sm:$0xff]   ;;  %v7212_v35 = vld [vmem:[#allocation8 + $0xc] ss:$16 sps:$4 sm:$0xff]  }
0x1392   :  { %v7269_v57 = vld [vmem:[#allocation8 + $0x144] ss:$16 sps:$4 sm:$0xff]   ;;  %v7272_v5 = vld [vmem:[#allocation8 + $0x14c] ss:$16 sps:$4 sm:$0xff]   ;;  %v7267_v6 = vld [vmem:[#allocation8 + $0x140] ss:$16 sps:$4 sm:$0xff]  }
0x1393   :  { %v4604_v39 = vmax.f32 %v4602_v41, %v4603_v32  ;;  %6560 = vmatpush3.bf16.msra.mxu1 %v7202_v19  ;;  %v7281_v19 = vld [vmem:[#allocation8 + $0x184] ss:$16 sps:$4 sm:$0xff]  }
0x1395   :  { %4605 = vmax.xlane.f32.xlu0 %v4604_v39 }
0x1422   :  { %v4606_v7 = vpop.xlane.xlu0 %4605 }
0x1423   :  { %vm4607_vm0 = vcmp.eq.f32.partialorder %v4550_v15, %v4606_v7  ;;  %vm4608_vm1 = vcmp.eq.f32.partialorder %v4552_v21, %v4606_v7  ;;  %vm4609_vm2 = vcmp.eq.f32.partialorder %v4591_v17, %v4606_v7  ;;  %vm4610_vm3 = vcmp.eq.f32.partialorder %v4593_v22, %v4606_v7  ;;  %v7201_v17 = vld [vmem:[#allocation5 + $0x30] sm:$0xff]   ;;  %v7204_v21 = vld [vmem:[#allocation5 + $0xf8] sm:$0xff]  }
0x1424   :  { %v4611_v34 = vsel %vm4607_vm0, %v8764_v25, 512  ;;  %v4612_v9 = vsel %vm4608_vm1, %v8767_v26, 512  ;;  %v4613_v10 = vsel %vm4609_vm2, %v8770_v27, 512  ;;  %v4614_v43 = vsel %vm4610_vm3, %v8773_v28, 512  ;;  %6538 = vmatpush3.bf16.msra.mxu0 %v7201_v17  ;;  %v7205_v22 = vld [vmem:[#allocation5 + $0x38] sm:$0xff]   ;;  %6561 = vmatprep.subr.bf16.mxu1 %v7204_v21 }
0x1425   :  { %vm4615_vm4 = vcmp.lt.s32.totalorder %v4611_v34, %v4612_v9  ;;  %vm4617_vm5 = vcmp.lt.s32.totalorder %v4613_v10, %v4614_v43  ;;  %6539 = vmatprep.subr.bf16.mxu0 %v7203_v20  ;;  %6562 = vmatpush3.bf16.msra.mxu1 %v7206_v24  ;;  %v7276_v17 = vld [vmem:[#allocation8 + $0x168] ss:$16 sps:$4 sm:$0xff]   ;;  %v7284_v20 = vld [vmem:[#allocation8 + $0x18c] ss:$16 sps:$4 sm:$0xff]   ;;  %v7279_v21 = vld [vmem:[#allocation8 + $0x180] ss:$16 sps:$4 sm:$0xff]  }
0x1426   :  { %v4616_v1 = vsel %vm4615_vm4, %v4611_v34, %v4612_v9  ;;  %v4618_v2 = vsel %vm4617_vm5, %v4613_v10, %v4614_v43  ;;  %5435 = vmatprep.subr.bf16.mxu1 %v7212_v35  ;;  %v7207_v34 = vld [vmem:[#allocation8] ss:$16 sps:$4 sm:$0xff]   ;;  %v7210_v9 = vld [vmem:[#allocation8 + $0x8] ss:$16 sps:$4 sm:$0xff]   ;;  %v7215_v10 = vld [vmem:[#allocation8 + $0x24] ss:$16 sps:$4 sm:$0xff]  }
0x1427   :  { %vm4619_vm6 = vcmp.lt.s32.totalorder %v4616_v1, %v4618_v2  ;;  %v7224_v43 = vld [vmem:[#allocation8 + $0x4c] ss:$16 sps:$4 sm:$0xff]   ;;  %v7287_v24 = vld [vmem:[#allocation8 + $0x1a4] ss:$16 sps:$4 sm:$0xff]   ;;  %v7285_v35 = vld [vmem:[#allocation8 + $0x1a0] ss:$16 sps:$4 sm:$0xff]  }
0x1428   :  { %v4620_v36 = vsel %vm4619_vm6, %v4616_v1, %v4618_v2  ;;  %6540 = vmatpush3.bf16.msra.mxu0 %v7205_v22  ;;  %v7219_v1 = vld [vmem:[#allocation8 + $0x40] ss:$16 sps:$4 sm:$0xff]   ;;  %v7222_v2 = vld [vmem:[#allocation8 + $0x48] ss:$16 sps:$4 sm:$0xff]  }
0x1429   :  { %v4622_v58 = vshra.s32 %v4620_v36, 16  ;;  %v4621_v11 = vand.u32 65535, %v4620_v36  ;;  %5394 = vmatprep.subr.bf16.mxu0 %v7209_v42  ;;  %v7227_v36 = vld [vmem:[#allocation8 + $0x64] ss:$16 sps:$4 sm:$0xff]   ;;  %v7282_v22 = vld [vmem:[#allocation8 + $0x188] ss:$16 sps:$4 sm:$0xff]  }
0x142a   :  { %v7290_v42 = vld [vmem:[#allocation8 + $0x1ac] ss:$16 sps:$4 sm:$0xff]  }
0x142b   :  { %v4624_v18 = vcvt.s32.f32 %v4622_v58  ;;  %v4623_v14 = vcvt.s32.f32 %v4621_v11  ;;  %v7225_v58 = vld [vmem:[#allocation8 + $0x60] ss:$16 sps:$4 sm:$0xff]   ;;  %v7270_v11 = vld [vmem:[#allocation8 + $0x148] ss:$16 sps:$4 sm:$0xff]  }
0x142d   :  { %4625 = vmin.xlane.f32.xlu1 %v4624_v18 }
0x14ba   :  { %v4626_v13 = vpop.xlane.xlu1 %4625 }
0x14bb   :  { %vm4627_vm7 = vcmp.eq.f32.partialorder %v4624_v18, %v4626_v13  ;;  %v4632_v33 = vcvt.f32.s32 %v4626_v13  ;;  %v7233_v18 = vld [vmem:[#allocation8 + $0x84] ss:$16 sps:$4 sm:$0xff]  }
0x14bc   :  { %v4628_v15 = vsel %vm4627_vm7, %v4623_v14, inf  ;;  %v7275_v13 = vld [vmem:[#allocation8 + $0x164] ss:$16 sps:$4 sm:$0xff]   ;;  %v7278_v14 = vld [vmem:[#allocation8 + $0x16c] ss:$16 sps:$4 sm:$0xff]  }
0x14bd   :  { %4629 = vmin.xlane.f32.xlu0 %v4628_v15  ;;  %v4633_v32 = vshll.u32 %v4632_v33, 16  ;;  %v7273_v15 = vld [vmem:[#allocation8 + $0x160] ss:$16 sps:$4 sm:$0xff]   ;;  %v7288_v33 = vld [vmem:[#allocation8 + $0x1a8] ss:$16 sps:$4 sm:$0xff]  }
0x154a   :  { %v4630_v41 = vpop.xlane.xlu0 %4629 }
0x154b   :  { %v4631_v39 = vcvt.f32.s32 %v4630_v41  ;;  %v7293_v41 = vld [vmem:[#allocation8 + $0x1c4] ss:$16 sps:$4 sm:$0xff]  }
0x154d   :  { %v4634_v7 = vadd.s32 %v4633_v32, %v4631_v39  ;;  %v7296_v32 = vld [vmem:[#allocation8 + $0x1cc] ss:$16 sps:$4 sm:$0xff]   ;;  %v7291_v39 = vld [vmem:[#allocation8 + $0x1c0] ss:$16 sps:$4 sm:$0xff]  }
0x154f   :  { %vm4636_vm8 = vcmp.eq.s32.totalorder %v8767_v26, %v4634_v7  ;;  %vm4638_vm9 = vcmp.eq.s32.totalorder %v8773_v28, %v4634_v7  ;;  %vm4635_vm10 = vcmp.eq.s32.totalorder %v8764_v25, %v4634_v7  ;;  %vm4637_vm12 = vcmp.eq.s32.totalorder %v8770_v27, %v4634_v7  ;;  %v7218_v26 = vld [vmem:[#allocation8 + $0x2c] ss:$16 sps:$4 sm:$0xff]   ;;  %v7213_v25 = vld [vmem:[#allocation8 + $0x20] ss:$16 sps:$4 sm:$0xff]   ;;  %v7216_v27 = vld [vmem:[#allocation8 + $0x28] ss:$16 sps:$4 sm:$0xff]  }
0x1550   :  { %vm6330_vm11 = vmpackc.low %vm4636_vm8, %vm4636_vm8  ;;  %v7221_v28 = vld [vmem:[#allocation8 + $0x44] ss:$16 sps:$4 sm:$0xff]   ;;  %v7294_v7 = vld [vmem:[#allocation8 + $0x1c8] ss:$16 sps:$4 sm:$0xff]  }
0x1551   :  { %6331 = vmatprep.mubr.msk.bf16.mxu0 %vm6330_vm11, %v7819_v30  ;;  %vm6334_vm13 = vmpackc.low %vm4638_vm9, %vm4638_vm9 }
0x1552   :  { %6335 = vmatprep.mubr.msk.bf16.mxu1 %vm6334_vm13, %v7819_v30  ;;  %vm6332_vm14 = vmpackc.low %vm4635_vm10, %vm4635_vm10 }
0x1553   :  { %6333 = vmatmul.mubr.msk.bf16.vlgmr.msra.gmra.mrb[64].mxu0 %vm6332_vm14, %v7819_v30  ;;  %vm6336_vm15 = vmpackc.low %vm4637_vm12, %vm4637_vm12 }
0x1554   :  { %6337 = vmatmul.mubr.msk.bf16.vlgmr.msra.gmra.mrb[64].mxu1 %vm6336_vm15, %v7819_v30  ;;  %5426 = vmatprep.mubr.bf16.mxu0 %v8840_v0  ;;  %v7230_v30 = vld [vmem:[#allocation8 + $0x6c] ss:$16 sps:$4 sm:$0xff]  }
0x1555   :  { %5467 = vmatprep.mubr.bf16.mxu1 %v8840_v0  ;;  %5395 = vmatpush1.bf16.msra.mxu0 %v7207_v34  ;;  %v7228_v0 = vld [vmem:[#allocation8 + $0x68] ss:$16 sps:$4 sm:$0xff]   ;;  %v7299_v34 = vld [vmem:[#allocation8 + $0x1e4] ss:$16 sps:$4 sm:$0xff]  }
0x1556   :  { %5436 = vmatpush1.bf16.msra.mxu1 %v7210_v9  ;;  %5396 = vmatprep.subr.bf16.mxu0 %v7215_v10  ;;  %v7302_v9 = vld [vmem:[#allocation8 + $0x1ec] ss:$16 sps:$4 sm:$0xff]   ;;  %v7297_v10 = vld [vmem:[#allocation8 + $0x1e0] ss:$16 sps:$4 sm:$0xff]  }
0x1557   :  { %5437 = vmatprep.subr.bf16.mxu1 %v7218_v26  ;;  %v7300_v26 = vld [vmem:[#allocation8 + $0x1e8] ss:$16 sps:$4 sm:$0xff]  }
0x1559   :  { %5397 = vmatpush1.bf16.msra.mxu0 %v7213_v25 }
0x155a   :  { %5438 = vmatpush1.bf16.msra.mxu1 %v7216_v27  ;;  %5398 = vmatprep.subr.bf16.mxu0 %v7221_v28 }
0x155b   :  { %5439 = vmatprep.subr.bf16.mxu1 %v7224_v43 }
0x155d   :  { %5399 = vmatpush1.bf16.msra.mxu0 %v7219_v1 }
0x155e   :  { %5440 = vmatpush1.bf16.msra.mxu1 %v7222_v2  ;;  %5400 = vmatprep.subr.bf16.mxu0 %v7227_v36 }
0x155f   :  { %5441 = vmatprep.subr.bf16.mxu1 %v7230_v30 }
0x1561   :  { %5401 = vmatpush1.bf16.msra.mxu0 %v7225_v58 }
0x1562   :  { %5442 = vmatpush1.bf16.msra.mxu1 %v7228_v0  ;;  %5402 = vmatprep.subr.bf16.mxu0 %v7233_v18 }
0x1563   :  { %5443 = vmatprep.subr.bf16.mxu1 %v7236_v40 }
0x1565   :  { %5403 = vmatpush1.bf16.msra.mxu0 %v7231_v61  ;;  %v7305_v61 = vld [vmem:[#allocation10 + $0x4] ss:$16 sps:$4 sm:$0xff]  }
0x1566   :  { %5444 = vmatpush1.bf16.msra.mxu1 %v7234_v31  ;;  %5404 = vmatprep.subr.bf16.mxu0 %v7239_v23  ;;  %v7308_v31 = vld [vmem:[#allocation10 + $0xc] ss:$16 sps:$4 sm:$0xff]   ;;  %v7303_v23 = vld [vmem:[#allocation10] ss:$16 sps:$4 sm:$0xff]  }
0x1567   :  { %5445 = vmatprep.subr.bf16.mxu1 %v7242_v38  ;;  %v7306_v38 = vld [vmem:[#allocation10 + $0x8] ss:$16 sps:$4 sm:$0xff]  }
0x1569   :  { %5405 = vmatpush1.bf16.msra.mxu0 %v7237_v4  ;;  %v7311_v4 = vld [vmem:[#allocation10 + $0x24] ss:$16 sps:$4 sm:$0xff]  }
0x156a   :  { %5446 = vmatpush1.bf16.msra.mxu1 %v7240_v44  ;;  %5406 = vmatprep.subr.bf16.mxu0 %v7245_v45  ;;  %v7314_v44 = vld [vmem:[#allocation10 + $0x2c] ss:$16 sps:$4 sm:$0xff]   ;;  %v7309_v45 = vld [vmem:[#allocation10 + $0x20] ss:$16 sps:$4 sm:$0xff]  }
0x156b   :  { %5447 = vmatprep.subr.bf16.mxu1 %v7248_v47  ;;  %v7312_v47 = vld [vmem:[#allocation10 + $0x28] ss:$16 sps:$4 sm:$0xff]  }
0x156d   :  { %5407 = vmatpush1.bf16.msra.mxu0 %v7243_v48  ;;  %v7317_v48 = vld [vmem:[#allocation10 + $0x44] ss:$16 sps:$4 sm:$0xff]  }
0x156e   :  { %5448 = vmatpush1.bf16.msra.mxu1 %v7246_v12  ;;  %5408 = vmatprep.subr.bf16.mxu0 %v7251_v50  ;;  %v7320_v12 = vld [vmem:[#allocation10 + $0x4c] ss:$16 sps:$4 sm:$0xff]   ;;  %v7315_v50 = vld [vmem:[#allocation10 + $0x40] ss:$16 sps:$4 sm:$0xff]  }
0x156f   :  { %5449 = vmatprep.subr.bf16.mxu1 %v7254_v51  ;;  %v7323_v51 = vld [vmem:[#allocation10 + $0x64] ss:$16 sps:$4 sm:$0xff]  }
0x1571   :  { %5409 = vmatpush1.bf16.msra.mxu0 %v7249_v52  ;;  %v7326_v52 = vld [vmem:[#allocation10 + $0x6c] ss:$16 sps:$4 sm:$0xff]  }
0x1572   :  { %5450 = vmatpush1.bf16.msra.mxu1 %v7252_v53  ;;  %5410 = vmatprep.subr.bf16.mxu0 %v7257_v55  ;;  %v7321_v53 = vld [vmem:[#allocation10 + $0x60] ss:$16 sps:$4 sm:$0xff]   ;;  %v7324_v55 = vld [vmem:[#allocation10 + $0x68] ss:$16 sps:$4 sm:$0xff]  }
0x1573   :  { %5451 = vmatprep.subr.bf16.mxu1 %v7260_v56  ;;  %v7329_v56 = vld [vmem:[#allocation10 + $0x84] ss:$16 sps:$4 sm:$0xff]  }
0x1575   :  { %5411 = vmatpush1.bf16.msra.mxu0 %v7255_v59  ;;  %v7332_v59 = vld [vmem:[#allocation10 + $0x8c] ss:$16 sps:$4 sm:$0xff]  }
0x1576   :  { %5452 = vmatpush1.bf16.msra.mxu1 %v7258_v16  ;;  %5412 = vmatprep.subr.bf16.mxu0 %v7263_v62  ;;  %v7327_v16 = vld [vmem:[#allocation10 + $0x80] ss:$16 sps:$4 sm:$0xff]   ;;  %v7330_v62 = vld [vmem:[#allocation10 + $0x88] ss:$16 sps:$4 sm:$0xff]  }
0x1577   :  { %5453 = vmatprep.subr.bf16.mxu1 %v7266_v54  ;;  %v7335_v54 = vld [vmem:[#allocation10 + $0xa4] ss:$16 sps:$4 sm:$0xff]  }
0x1579   :  { %5413 = vmatpush1.bf16.msra.mxu0 %v7261_v63  ;;  %v7333_v63 = vld [vmem:[#allocation10 + $0xa0] ss:$16 sps:$4 sm:$0xff]  }
0x157a   :  { %5454 = vmatpush1.bf16.msra.mxu1 %v7264_v3  ;;  %5414 = vmatprep.subr.bf16.mxu0 %v7269_v57  ;;  %v7336_v3 = vld [vmem:[#allocation10 + $0xa8] ss:$16 sps:$4 sm:$0xff]   ;;  %v7338_v57 = vld [vmem:[#allocation10 + $0xac] ss:$16 sps:$4 sm:$0xff]  }
0x157b   :  { %5455 = vmatprep.subr.bf16.mxu1 %v7272_v5  ;;  %v7341_v5 = vld [vmem:[#allocation10 + $0xc4] ss:$16 sps:$4 sm:$0xff]  }
0x157d   :  { %5415 = vmatpush1.bf16.msra.mxu0 %v7267_v6  ;;  %v7344_v6 = vld [vmem:[#allocation10 + $0xcc] ss:$16 sps:$4 sm:$0xff]  }
0x157e   :  { %5456 = vmatpush1.bf16.msra.mxu1 %v7270_v11  ;;  %5416 = vmatprep.subr.bf16.mxu0 %v7275_v13  ;;  %v7339_v11 = vld [vmem:[#allocation10 + $0xc0] ss:$16 sps:$4 sm:$0xff]   ;;  %v7342_v13 = vld [vmem:[#allocation10 + $0xc8] ss:$16 sps:$4 sm:$0xff]  }
0x157f   :  { %5457 = vmatprep.subr.bf16.mxu1 %v7278_v14  ;;  %v7347_v14 = vld [vmem:[#allocation10 + $0xe4] ss:$16 sps:$4 sm:$0xff]  }
0x1581   :  { %5417 = vmatpush1.bf16.msra.mxu0 %v7273_v15  ;;  %v7350_v15 = vld [vmem:[#allocation10 + $0xec] ss:$16 sps:$4 sm:$0xff]  }
0x1582   :  { %5458 = vmatpush1.bf16.msra.mxu1 %v7276_v17  ;;  %5418 = vmatprep.subr.bf16.mxu0 %v7281_v19  ;;  %v7345_v17 = vld [vmem:[#allocation10 + $0xe0] ss:$16 sps:$4 sm:$0xff]   ;;  %v7348_v19 = vld [vmem:[#allocation10 + $0xe8] ss:$16 sps:$4 sm:$0xff]  }
0x1583   :  { %5459 = vmatprep.subr.bf16.mxu1 %v7284_v20  ;;  %v5052_v20 = vld [vmem:[%s8899_s5] sm:$0xf] }
0x1585   :  { %5419 = vmatpush1.bf16.msra.mxu0 %v7279_v21  ;;  %v5057_v21 = vrot.slane %v5052_v20, %v9082_v46 }
0x1586   :  { %5460 = vmatpush1.bf16.msra.mxu1 %v7282_v22  ;;  %5420 = vmatprep.subr.bf16.mxu0 %v7287_v24  ;;  %v5061_v22 = vrot.slane %v5052_v20, %v9084_v29 }
0x1587   :  { %5461 = vmatprep.subr.bf16.mxu1 %v7290_v42 }
0x1589   :  { %5421 = vmatpush1.bf16.msra.mxu0 %v7285_v35 }
0x158a   :  { %5462 = vmatpush1.bf16.msra.mxu1 %v7288_v33  ;;  %5422 = vmatprep.subr.bf16.mxu0 %v7293_v41 }
0x158b   :  { %5463 = vmatprep.subr.bf16.mxu1 %v7296_v32 }
0x158d   :  { %5423 = vmatpush1.bf16.msra.mxu0 %v7291_v39 }
0x158e   :  { %5464 = vmatpush1.bf16.msra.mxu1 %v7294_v7  ;;  %5424 = vmatprep.subr.bf16.mxu0 %v7299_v34 }
0x158f   :  { %5465 = vmatprep.subr.bf16.mxu1 %v7302_v9 }
0x1591   :  { %5425 = vmatpush1.bf16.msra.mxu0 %v7297_v10 }
0x1592   :  { %5466 = vmatpush1.bf16.msra.mxu1 %v7300_v26  ;;  %5715 = vmatprep.subr.bf16.mxu0 %v7305_v61 }
0x1593   :  { %5756 = vmatprep.subr.bf16.mxu1 %v7308_v31 }
0x1626   :  { %v6541_v25 = vpop.f32.mrb[64].mxu0 }
0x1627   :  { %v6563_v27 = vpop.f32.mrb[64].mxu1  ;;  %v6542_v28 = vpop.f32.mrb[65].mxu0 }
0x1628   :  { %v6543_v43 = vadd.f32 %v6542_v28, %v6541_v25  ;;  %v6564_v1 = vpop.f32.mrb[65].mxu1  ;;  %v6544_v2 = vpop.f32.mrb[66].mxu0  ;;  %v5069_v25 = vrot.slane %v5052_v20, %v9085_v8  ;;  %v5065_v28 = vrot.slane %v5052_v20, %v9086_v37 }
0x1629   :  { %v6565_v36 = vadd.f32 %v6564_v1, %v6563_v27  ;;  %v6566_v30 = vpop.f32.mrb[66].mxu1  ;;  %v6545_v58 = vpop.f32.mrb[67].mxu0 }
0x162a   :  { %v6567_v0 = vpop.f32.mrb[67].mxu1 }
0x162b   :  { %v4982_v18 = vadd.f32 %v6565_v36, %v6543_v43 }
0x162d   :  { %v4987_v40 = vpack.c.bf16 %v4982_v18, %v4982_v18 }
0x162f   :  { %5427 = vmatmul.mubr.bf16.vlgmr.msra.gmra.mrb[68].mxu0 %v4987_v40  ;;  %5468 = vmatmul.mubr.bf16.vlgmr.msra.gmra.mrb[68].mxu1 %v4987_v40 }
0x1630   :  { %5747 = vmatprep.mubr.bf16.mxu0 %v9083_v49  ;;  %5788 = vmatprep.mubr.bf16.mxu1 %v9083_v49  ;;  %v7318_v49 = vld [vmem:[#allocation10 + $0x48] ss:$16 sps:$4 sm:$0xff]  }
0x1631   :  { %5716 = vmatpush1.bf16.msra.mxu0 %v7303_v23  ;;  %5757 = vmatpush1.bf16.msra.mxu1 %v7306_v38 }
0x1632   :  { %5717 = vmatprep.subr.bf16.mxu0 %v7311_v4  ;;  %5758 = vmatprep.subr.bf16.mxu1 %v7314_v44 }
0x1635   :  { %5718 = vmatpush1.bf16.msra.mxu0 %v7309_v45  ;;  %5759 = vmatpush1.bf16.msra.mxu1 %v7312_v47 }
0x1636   :  { %5719 = vmatprep.subr.bf16.mxu0 %v7317_v48  ;;  %5760 = vmatprep.subr.bf16.mxu1 %v7320_v12  ;;  %v5533_v12 = vld [vmem:[%s8901_s7] sm:$0xf]  ;;  %s7779_s7 = scalar_lea.vmem %s5808_s22, 2048 }
0x1637   :  { %p7780_p12 = scmp.ne.s32.totalorder %s5808_s22, %s7779_s7  ;;  %p7785_p0 = scmp.lt.s32.totalorder %s7779_s7, %s7779_s7 }
0x1639   :  { %5720 = vmatpush1.bf16.msra.mxu0 %v7315_v50  ;;  %5761 = vmatpush1.bf16.msra.mxu1 %v7318_v49  ;;  %v5538_v50 = vrot.slane %v5533_v12, %v9082_v46  ;;  %v5546_v49 = vrot.slane %v5533_v12, %v9086_v37  ;;  %p7786_p1 = por %p7785_p0, %p7784_p13 }
0x163a   :  { %5721 = vmatprep.subr.bf16.mxu0 %v7323_v51  ;;  %5762 = vmatprep.subr.bf16.mxu1 %v7326_v52  ;;  %v5542_v51 = vrot.slane %v5533_v12, %v9084_v29 }
0x163b   :  { %p7787_p2 = pnand %p7786_p1, %p7780_p12 }
0x163d   :  { %5722 = vmatpush1.bf16.msra.mxu0 %v7321_v53  ;;  %5763 = vmatpush1.bf16.msra.mxu1 %v7324_v55 }
0x163e   :  { %5723 = vmatprep.subr.bf16.mxu0 %v7329_v56  ;;  %5764 = vmatprep.subr.bf16.mxu1 %v7332_v59 }
0x1641   :  { %5724 = vmatpush1.bf16.msra.mxu0 %v7327_v16  ;;  %5765 = vmatpush1.bf16.msra.mxu1 %v7330_v62 }
0x1642   :  { %5725 = vmatprep.subr.bf16.mxu0 %v7335_v54  ;;  %5766 = vmatprep.subr.bf16.mxu1 %v7338_v57 }
0x1645   :  { %5726 = vmatpush1.bf16.msra.mxu0 %v7333_v63  ;;  %5767 = vmatpush1.bf16.msra.mxu1 %v7336_v3 }
0x1646   :  { %5727 = vmatprep.subr.bf16.mxu0 %v7341_v5  ;;  %5768 = vmatprep.subr.bf16.mxu1 %v7344_v6 }
0x1649   :  { %5728 = vmatpush1.bf16.msra.mxu0 %v7339_v11  ;;  %5769 = vmatpush1.bf16.msra.mxu1 %v7342_v13 }
0x164a   :  { %5729 = vmatprep.subr.bf16.mxu0 %v7347_v14  ;;  %5770 = vmatprep.subr.bf16.mxu1 %v7350_v15 }
0x164d   :  { %5730 = vmatpush1.bf16.msra.mxu0 %v7345_v17  ;;  %5771 = vmatpush1.bf16.msra.mxu1 %v7348_v19 }
0x1702   :  { %v5428_v24 = vpop.f32.mrb[68].mxu0  ;;  %v5469_v42 = vpop.f32.mrb[68].mxu1 }
0x1703   :  { %v5429_v35 = vadd.f32 %v5428_v24, %v5057_v21  ;;  %v5430_v33 = vpop.f32.mrb[69].mxu0  ;;  %v5471_v41 = vpop.f32.mrb[69].mxu1  ;;  %v5470_v1 = vadd.f32 %v5469_v42, %v5065_v28 }
0x1704   :  { %v5431_v32 = vadd.f32 %v5430_v33, %v5061_v22  ;;  %v5432_v39 = vpop.f32.mrb[70].mxu0  ;;  %v5473_v7 = vpop.f32.mrb[70].mxu1  ;;  %v5472_v27 = vadd.f32 %v5471_v41, %v5069_v25 }
0x1705   :  { %v6402_v34 = vmul.f32 -1.442695, %v5429_v35  ;;  %v5433_v9 = vpop.f32.mrb[71].mxu0  ;;  %v5474_v10 = vpop.f32.mrb[71].mxu1 }
0x1706   :  { %v6403_v26 = vmul.f32 -1.442695, %v5431_v32  ;;  %v6404_v43 = vmul.f32 -1.442695, %v5472_v27 }
0x1707   :  { %7527 = vpow2.f32 %v6402_v34 }
0x1708   :  { %7529 = vpow2.f32 %v6403_v26 }
0x1709   :  { %7531 = vpow2.f32 %v6404_v43 }
0x170a   :  { %7533 = vtanh.f32 %v5470_v1 }
0x1711   :  { %v7528_v2 = vpop.eup %7527 }
0x1712   :  { %v7530_v36 = vpop.eup %7529  ;;  %v5479_v30 = vadd.f32 1.0, %v7528_v2 }
0x1713   :  { %v5485_v58 = vadd.f32 1.0, %v7530_v36  ;;  %v7532_v0 = vpop.eup %7531 }
0x1714   :  { %7535 = vrcp.f32 %v5479_v30  ;;  %v7534_v18 = vpop.eup %7533  ;;  %v5492_v23 = vadd.f32 1.0, %v7532_v0 }
0x1715   :  { %7537 = vrcp.f32 %v5485_v58 }
0x1716   :  { %7539 = vrcp.f32 %v5492_v23 }
0x171e   :  { %v7536_v40 = vpop.eup %7535 }
0x171f   :  { %v7538_v61 = vpop.eup %7537  ;;  %v5496_v31 = vmul.f32 %v7536_v40, %v7534_v18 }
0x1720   :  { %v5495_v38 = vmul.f32 %v7538_v61, %v8837_v60  ;;  %v7540_v44 = vpop.eup %7539  ;;  %v5550_v60 = vrot.slane %v5533_v12, %v9085_v8 }
0x1722   :  { %v5497_v4 = vadd.f32 %v5496_v31, %v5495_v38 }
0x1724   :  { %7541 = vtanh.f32 %v5497_v4 }
0x172e   :  { %v7542_v45 = vpop.eup %7541 }
0x172f   :  { %v5499_v47 = vmul.f32 %v7542_v45, %v7540_v44 }
0x1731   :  { %v5500_v48 = vpack.c.bf16 %v5499_v47, %v5499_v47 }
0x1733   :  { %5748 = vmatmul.mubr.bf16.vlgmr.msra.gmra.mrb[72].mxu0 %v5500_v48  ;;  %5789 = vmatmul.mubr.bf16.vlgmr.msra.gmra.mrb[72].mxu1 %v5500_v48 }
0x1806   :  { %v5749_v52 = vpop.f32.mrb[72].mxu0  ;;  %v5790_v53 = vpop.f32.mrb[72].mxu1 }
0x1807   :  { %v5750_v55 = vadd.f32 %v5749_v52, %v5538_v50  ;;  %v5791_v56 = vadd.f32 %v5790_v53, %v5546_v49  ;;  %v5751_v59 = vpop.f32.mrb[73].mxu0  ;;  %v5792_v16 = vpop.f32.mrb[73].mxu1 }
0x1808   :  { %v5752_v62 = vadd.f32 %v5751_v59, %v5542_v51  ;;  %v5793_v54 = vadd.f32 %v5792_v16, %v5550_v60  ;;  %v5753_v63 = vpop.f32.mrb[74].mxu0  ;;  %v5794_v3 = vpop.f32.mrb[74].mxu1 }
0x1809   :  { %5798 = vst [vmem:[#allocation11 + $0x60] sm:$0xff] %v5750_v55  ;;  %5800 = vst [vmem:[#allocation11 + $0x70] sm:$0xff] %v5791_v56  ;;  %v5754_v46 = vpop.f32.mrb[75].mxu0  ;;  %v5795_v37 = vpop.f32.mrb[75].mxu1 }
0x180a   :  { %5799 = vst [vmem:[#allocation11 + $0x68] sm:$0xff] %v5752_v62  ;;  %5801 = vst [vmem:[#allocation11 + $0x78] sm:$0xff] %v5793_v54 }
0x180b   :  { %7790 = shalt.err (!%p7787_p2)
}
0x180c   :  { %s7791_s18 = scalar_lea.hbm %s8902_s8, 2048 }
0x180d   :  { %p7792_p3 = scmp.ne.s32.totalorder %s8902_s8, %s7791_s18  ;;  %p7795_p4 = scmp.lt.u32.totalorder %s7791_s18, %s8902_s8 }
0x180f   :  { %p7797_p5 = pnand %p7795_p4, %p7792_p3 }
0x1811   :  { %7800 = shalt.err (!%p7797_p5)
}
0x1812   :  { %s7821_s2 = smov 512   ;;  %s7822_s20 = smov 32  }
0x1813   :  { %5813 = dma.vmem_to_hbm [thread:$0]  %s5808_s22, 2048, %s8902_s8, [#allocation4], %s7821_s2, %s7821_s2, %s7822_s20  }
0x1814   :  { %7807 = dma.done.wait [#allocation4], 2048  }
0x1815   :  { %7808 = vsyncadd [#allocation4], 4294965248 }
0x1816   :  { %5817 = vsyncpa [#allocation3], 1 }
0x1817   :  { %5818 = vsyncpa [#allocation6], 1 }
0x1818   :  { %5819 = vsyncpa [#allocation9], 1 }
0x1819   :  { %5820 = vsyncpa [#allocation4], 1 }

// kernel: tpu_custom_call.1
= control target key start
LH: loop header
LB: loop body
LE: loop exit
PB: predicated region body
PF: predicated region fallthrough
CT: control target
= control target key end

     0   :  { %13 = vsyncpa [#allocation3], 0  ;;  %s8894_s0 = inlined_call_operand.hbm [shape: bf16[8,8,128], index: 0, kind: input, shape index: {}]   ;;  %s8895_s1 = inlined_call_operand.hbm [shape: bf16[512,128], index: 1, kind: input, shape index: {}]   ;;  %s8896_s2 = inlined_call_operand.hbm [shape: bf16[256,512], index: 2, kind: input, shape index: {}]   ;;  %s8897_s3 = inlined_call_operand.vmem [shape: f32[1,512], index: 3, kind: input, shape index: {}]   ;;  %s8898_s4 = inlined_call_operand.hbm [shape: bf16[256,512], index: 4, kind: input, shape index: {}]   ;;  %s8899_s5 = inlined_call_operand.vmem [shape: f32[1,512], index: 5, kind: input, shape index: {}]   ;;  %s8900_s6 = inlined_call_operand.hbm [shape: bf16[128,512], index: 6, kind: input, shape index: {}]   ;;  %s8901_s7 = inlined_call_operand.vmem [shape: f32[1,512], index: 7, kind: input, shape index: {}]   ;;  %s8902_s8 = inlined_call_operand.hbm [shape: f32[4,8,512], index: 8, kind: output, shape index: {}]  }
   0x1   :  { %14 = vsyncpa [#allocation6], 0 }
   0x2   :  { %15 = vsyncpa [#allocation9], 0 }
   0x3   :  { %16 = vsyncpa [#allocation4], 0  ;;  %s7809_s27 = smov [#allocation5]   ;;  %s7669_s9 = scalar_lea.hbm %s8895_s1, 4096 }
   0x4   :  { %s34_s28 = sshll.u32 %s7809_s27, 4  ;;  %p7670_p0 = scmp.ne.s32.totalorder %s8895_s1, %s7669_s9  ;;  %s35_s28 = int_to_ptr.vmem [resolvable:$true] %s34_s28 }
   0x5   :  { %p7673_p1 = scmp.lt.u32.totalorder %s7669_s9, %s8895_s1 }
   0x7   :  { %p7675_p2 = pnand %p7673_p1, %p7670_p0 }
   0x9   :  { %7678 = shalt.err (!%p7675_p2)
}
   0xa   :  { %s7679_s14 = scalar_lea.vmem %s35_s28, 4096  ;;  %p7684_p4 = scmp.lt.s32.totalorder %s35_s28, %s35_s28 }
   0xb   :  { %p7680_p3 = scmp.ne.s32.totalorder %s35_s28, %s7679_s14  ;;  %p7685_p5 = scmp.lt.s32.totalorder %s7679_s14, %s7679_s14 }
   0xd   :  { %p7686_p6 = por %p7685_p5, %p7684_p4 }
   0xf   :  { %p7687_p7 = pnand %p7686_p6, %p7680_p3 }
  0x11   :  { %7690 = shalt.err (!%p7687_p7)
}
  0x12   :  { %s7810_s15 = smov 64   ;;  %s7811_s16 = smov 4  }
  0x13   :  { %40 = dma.hbm_to_vmem [thread:$0]  %s8895_s1, 4096, %s35_s28, [#allocation6], %s7810_s15, %s7810_s15, %s7811_s16  }
  0x14   :  { %s7812_s19 = smov [#allocation8]   ;;  %s7813_s21 = smov [#allocation2]  }
  0x15   :  { %s60_s20 = sshll.u32 %s7812_s19, 4  ;;  %s22_s22 = sshll.u32 %s7813_s21, 4  ;;  %s61_s20 = int_to_ptr.vmem [resolvable:$true] %s60_s20  ;;  %s23_s22 = int_to_ptr.vmem [resolvable:$true] %s22_s22 }
  0x16   :  { %s7691_s25 = scalar_lea.hbm %s8898_s4, 8192 }
  0x17   :  { %p7692_p8 = scmp.ne.s32.totalorder %s8898_s4, %s7691_s25  ;;  %p7695_p9 = scmp.lt.u32.totalorder %s7691_s25, %s8898_s4 }
  0x19   :  { %p7697_p10 = pnand %p7695_p9, %p7692_p8 }
  0x1b   :  { %7700 = shalt.err (!%p7697_p10)
}
  0x1c   :  { %s7701_s1 = scalar_lea.vmem %s61_s20, 8192  ;;  %p7706_p12 = scmp.lt.s32.totalorder %s61_s20, %s61_s20 }
  0x1d   :  { %p7702_p11 = scmp.ne.s32.totalorder %s61_s20, %s7701_s1  ;;  %p7707_p13 = scmp.lt.s32.totalorder %s7701_s1, %s7701_s1 }
  0x1f   :  { %p7708_p0 = por %p7707_p13, %p7706_p12 }
  0x21   :  { %p7709_p1 = pnand %p7708_p0, %p7702_p11 }
  0x23   :  { %7712 = shalt.err (!%p7709_p1)
}
  0x24   :  { %s7814_s28 = smov 256   ;;  %s7815_s9 = smov 16  }
  0x25   :  { %66 = dma.hbm_to_vmem [thread:$0]  %s8898_s4, 8192, %s61_s20, [#allocation9], %s7814_s28, %s7814_s28, %s7815_s9  }
  0x26   :  { %s7713_s14 = scalar_lea.hbm %s8894_s0, 512 }
  0x27   :  { %p7714_p2 = scmp.ne.s32.totalorder %s8894_s0, %s7713_s14  ;;  %p7717_p3 = scmp.lt.u32.totalorder %s7713_s14, %s8894_s0 }
  0x29   :  { %p7719_p4 = pnand %p7717_p3, %p7714_p2 }
  0x2b   :  { %7722 = shalt.err (!%p7719_p4)
}
  0x2c   :  { %s7723_s23 = scalar_lea.vmem %s23_s22, 512  ;;  %p7728_p6 = scmp.lt.s32.totalorder %s23_s22, %s23_s22 }
  0x2d   :  { %p7724_p5 = scmp.ne.s32.totalorder %s23_s22, %s7723_s23  ;;  %p7729_p7 = scmp.lt.s32.totalorder %s7723_s23, %s7723_s23 }
  0x2f   :  { %p7730_p8 = por %p7729_p7, %p7728_p6 }
  0x31   :  { %p7731_p9 = pnand %p7730_p8, %p7724_p5 }
  0x33   :  { %7734 = shalt.err (!%p7731_p9)
}
  0x34   :  { %28 = dma.hbm_to_vmem [thread:$0]  %s8894_s0, 512, %s23_s22, [#allocation3], %s7810_s15, %s7810_s15, %s7811_s16  }
  0x35   :  { %s7816_s24 = smov [#allocation7]   ;;  %s7817_s26 = smov [#allocation10]  }
  0x36   :  { %s46_s25 = sshll.u32 %s7816_s24, 4  ;;  %s74_s27 = sshll.u32 %s7817_s26, 4  ;;  %s47_s25 = int_to_ptr.vmem [resolvable:$true] %s46_s25  ;;  %s75_s27 = int_to_ptr.vmem [resolvable:$true] %s74_s27 }
  0x37   :  { %s7735_s1 = scalar_lea.hbm %s8896_s2, 8192 }
  0x38   :  { %p7736_p10 = scmp.ne.s32.totalorder %s8896_s2, %s7735_s1  ;;  %p7739_p11 = scmp.lt.u32.totalorder %s7735_s1, %s8896_s2 }
  0x3a   :  { %p7741_p12 = pnand %p7739_p11, %p7736_p10 }
  0x3c   :  { %7744 = shalt.err (!%p7741_p12)
}
  0x3d   :  { %s7745_s0 = scalar_lea.vmem %s47_s25, 8192  ;;  %p7750_p0 = scmp.lt.s32.totalorder %s47_s25, %s47_s25 }
  0x3e   :  { %p7746_p13 = scmp.ne.s32.totalorder %s47_s25, %s7745_s0  ;;  %p7751_p1 = scmp.lt.s32.totalorder %s7745_s0, %s7745_s0 }
  0x40   :  { %p7752_p2 = por %p7751_p1, %p7750_p0 }
  0x42   :  { %p7753_p3 = pnand %p7752_p2, %p7746_p13 }
  0x44   :  { %7756 = shalt.err (!%p7753_p3)
}
  0x45   :  { %52 = dma.hbm_to_vmem [thread:$0]  %s8896_s2, 8192, %s47_s25, [#allocation6], %s7814_s28, %s7814_s28, %s7815_s9  }
  0x46   :  { %s7757_s17 = scalar_lea.hbm %s8900_s6, 4096 }
  0x47   :  { %p7758_p4 = scmp.ne.s32.totalorder %s8900_s6, %s7757_s17  ;;  %p7761_p5 = scmp.lt.u32.totalorder %s7757_s17, %s8900_s6 }
  0x49   :  { %p7763_p6 = pnand %p7761_p5, %p7758_p4 }
  0x4b   :  { %7766 = shalt.err (!%p7763_p6)
}
  0x4c   :  { %s7767_s4 = scalar_lea.vmem %s75_s27, 4096  ;;  %p7772_p8 = scmp.lt.s32.totalorder %s75_s27, %s75_s27 }
  0x4d   :  { %p7768_p7 = scmp.ne.s32.totalorder %s75_s27, %s7767_s4  ;;  %p7773_p9 = scmp.lt.s32.totalorder %s7767_s4, %s7767_s4 }
  0x4f   :  { %p7774_p10 = por %p7773_p9, %p7772_p8 }
  0x51   :  { %p7775_p11 = pnand %p7774_p10, %p7768_p7 }
  0x53   :  { %7778 = shalt.err (!%p7775_p11)
}
  0x54   :  { %80 = dma.hbm_to_vmem [thread:$0]  %s8900_s6, 4096, %s75_s27, [#allocation9], %s7814_s28, %s7814_s28, %s7815_s9  }
  0x55   :  { %7801 = dma.done.wait [#allocation3], 512  }
  0x56   :  { %7802 = vsyncadd [#allocation3], 4294966784 }
  0x57   :  { %7803 = dma.done.wait [#allocation6], 12288  }
  0x58   :  { %7804 = vsyncadd [#allocation6], 4294955008 }
  0x59   :  { %7805 = dma.done.wait [#allocation9], 12288  }
  0x5a   :  { %7806 = vsyncadd [#allocation9], 4294955008  ;;  %v8903_v0 = vmov 0   ;;  %v7945_v1 = vld [vmem:[#allocation7 + $0x4] ss:$16 sps:$4 sm:$0xff]   ;;  %s7820_s16 = smov [#allocation11]  }
  0x5b   :  { %538 = vmatprep.mubr.bf16.mxu0 %v8903_v0  ;;  %579 = vmatprep.mubr.bf16.mxu1 %v8903_v0  ;;  %v7947_v2 = vld [vmem:[#allocation7] ss:$16 sps:$4 sm:$0xff]   ;;  %v7950_v3 = vld [vmem:[#allocation7 + $0x24] ss:$16 sps:$4 sm:$0xff]   ;;  %v7958_v6 = vld [vmem:[#allocation7 + $0xc] ss:$16 sps:$4 sm:$0xff]  }
  0x5c   :  { %506 = vmatprep.subr.bf16.mxu0 %v7945_v1  ;;  %v7953_v4 = vld [vmem:[#allocation7 + $0x20] ss:$16 sps:$4 sm:$0xff]   ;;  %v7956_v5 = vld [vmem:[#allocation7 + $0x44] ss:$16 sps:$4 sm:$0xff]   ;;  %v7960_v7 = vld [vmem:[#allocation7 + $0x8] ss:$16 sps:$4 sm:$0xff]   ;;  %547 = vmatprep.subr.bf16.mxu1 %v7958_v6 }
  0x5d   :  { %507 = vmatpush1.bf16.msra.mxu0 %v7947_v2  ;;  %v7963_v8 = vld [vmem:[#allocation7 + $0x40] ss:$16 sps:$4 sm:$0xff]   ;;  %v7967_v9 = vld [vmem:[#allocation7 + $0x64] ss:$16 sps:$4 sm:$0xff]   ;;  %548 = vmatpush1.bf16.msra.mxu1 %v7960_v7  ;;  %v7970_v10 = vld [vmem:[#allocation7 + $0x2c] ss:$16 sps:$4 sm:$0xff]  }
  0x5e   :  { %508 = vmatprep.subr.bf16.mxu0 %v7950_v3  ;;  %v7972_v11 = vld [vmem:[#allocation7 + $0x28] ss:$16 sps:$4 sm:$0xff]   ;;  %549 = vmatprep.subr.bf16.mxu1 %v7970_v10  ;;  %v7976_v12 = vld [vmem:[#allocation7 + $0x60] ss:$16 sps:$4 sm:$0xff]   ;;  %v7978_v13 = vld [vmem:[#allocation7 + $0x84] ss:$16 sps:$4 sm:$0xff]  }
  0x5f   :  { %v7980_v14 = vld [vmem:[#allocation7 + $0x4c] ss:$16 sps:$4 sm:$0xff]   ;;  %v7984_v15 = vld [vmem:[#allocation7 + $0x48] ss:$16 sps:$4 sm:$0xff]   ;;  %v7990_v17 = vld [vmem:[#allocation7 + $0x80] ss:$16 sps:$4 sm:$0xff]  }
  0x60   :  { %v7987_v16 = vld [vmem:[#allocation7 + $0x6c] ss:$16 sps:$4 sm:$0xff]   ;;  %v7993_v18 = vld [vmem:[#allocation7 + $0xa4] ss:$16 sps:$4 sm:$0xff]   ;;  %v7996_v19 = vld [vmem:[#allocation7 + $0x68] ss:$16 sps:$4 sm:$0xff]  }
  0x61   :  { %509 = vmatpush1.bf16.msra.mxu0 %v7953_v4  ;;  %550 = vmatpush1.bf16.msra.mxu1 %v7972_v11  ;;  %v7999_v20 = vld [vmem:[#allocation7 + $0x8c] ss:$16 sps:$4 sm:$0xff]   ;;  %v8002_v21 = vld [vmem:[#allocation7 + $0xa0] ss:$16 sps:$4 sm:$0xff]   ;;  %v8004_v22 = vld [vmem:[#allocation7 + $0xc4] ss:$16 sps:$4 sm:$0xff]  }
  0x62   :  { %510 = vmatprep.subr.bf16.mxu0 %v7956_v5  ;;  %551 = vmatprep.subr.bf16.mxu1 %v7980_v14  ;;  %v8008_v23 = vld [vmem:[#allocation7 + $0x88] ss:$16 sps:$4 sm:$0xff]   ;;  %v8011_v24 = vld [vmem:[#allocation7 + $0xac] ss:$16 sps:$4 sm:$0xff]   ;;  %v8014_v25 = vld [vmem:[#allocation7 + $0xc0] ss:$16 sps:$4 sm:$0xff]  }
  0x63   :  { %v8017_v26 = vld [vmem:[#allocation7 + $0xe4] ss:$16 sps:$4 sm:$0xff]   ;;  %v8020_v27 = vld [vmem:[#allocation7 + $0xa8] ss:$16 sps:$4 sm:$0xff]   ;;  %v8023_v28 = vld [vmem:[#allocation7 + $0xcc] ss:$16 sps:$4 sm:$0xff]  }
  0x64   :  { %v8026_v29 = vld [vmem:[#allocation7 + $0xe0] ss:$16 sps:$4 sm:$0xff]   ;;  %v8028_v30 = vld [vmem:[#allocation7 + $0x104] ss:$16 sps:$4 sm:$0xff]   ;;  %v8032_v31 = vld [vmem:[#allocation7 + $0xc8] ss:$16 sps:$4 sm:$0xff]  }
  0x65   :  { %511 = vmatpush1.bf16.msra.mxu0 %v7963_v8  ;;  %552 = vmatpush1.bf16.msra.mxu1 %v7984_v15  ;;  %v8035_v32 = vld [vmem:[#allocation7 + $0xec] ss:$16 sps:$4 sm:$0xff]   ;;  %v8038_v33 = vld [vmem:[#allocation7 + $0x100] ss:$16 sps:$4 sm:$0xff]   ;;  %v8041_v34 = vld [vmem:[#allocation7 + $0x124] ss:$16 sps:$4 sm:$0xff]  }
  0x66   :  { %512 = vmatprep.subr.bf16.mxu0 %v7967_v9  ;;  %553 = vmatprep.subr.bf16.mxu1 %v7987_v16  ;;  %v8044_v35 = vld [vmem:[#allocation7 + $0xe8] ss:$16 sps:$4 sm:$0xff]   ;;  %v8047_v36 = vld [vmem:[#allocation7 + $0x10c] ss:$16 sps:$4 sm:$0xff]   ;;  %v8050_v37 = vld [vmem:[#allocation7 + $0x120] ss:$16 sps:$4 sm:$0xff]  }
  0x67   :  { %v8052_v38 = vld [vmem:[#allocation7 + $0x144] ss:$16 sps:$4 sm:$0xff]   ;;  %v8056_v39 = vld [vmem:[#allocation7 + $0x108] ss:$16 sps:$4 sm:$0xff]   ;;  %v8059_v40 = vld [vmem:[#allocation7 + $0x12c] ss:$16 sps:$4 sm:$0xff]  }
  0x68   :  { %v8061_v41 = vld [vmem:[#allocation7 + $0x140] ss:$16 sps:$4 sm:$0xff]   ;;  %v8064_v42 = vld [vmem:[#allocation7 + $0x164] ss:$16 sps:$4 sm:$0xff]   ;;  %v8068_v43 = vld [vmem:[#allocation7 + $0x128] ss:$16 sps:$4 sm:$0xff]  }
  0x69   :  { %513 = vmatpush1.bf16.msra.mxu0 %v7976_v12  ;;  %554 = vmatpush1.bf16.msra.mxu1 %v7996_v19  ;;  %v8070_v44 = vld [vmem:[#allocation7 + $0x160] ss:$16 sps:$4 sm:$0xff]   ;;  %v8073_v45 = vld [vmem:[#allocation7 + $0x14c] ss:$16 sps:$4 sm:$0xff]   ;;  %v8075_v46 = vld [vmem:[#allocation7 + $0x184] ss:$16 sps:$4 sm:$0xff]  }
  0x6a   :  { %514 = vmatprep.subr.bf16.mxu0 %v7978_v13  ;;  %555 = vmatprep.subr.bf16.mxu1 %v7999_v20  ;;  %v8077_v47 = vld [vmem:[#allocation7 + $0x148] ss:$16 sps:$4 sm:$0xff]   ;;  %v8080_v48 = vld [vmem:[#allocation7 + $0x16c] ss:$16 sps:$4 sm:$0xff]   ;;  %v8084_v49 = vld [vmem:[#allocation7 + $0x180] ss:$16 sps:$4 sm:$0xff]  }
  0x6b   :  { %v8087_v50 = vld [vmem:[#allocation7 + $0x1a4] ss:$16 sps:$4 sm:$0xff]   ;;  %v8089_v51 = vld [vmem:[#allocation7 + $0x168] ss:$16 sps:$4 sm:$0xff]   ;;  %v8092_v52 = vld [vmem:[#allocation7 + $0x18c] ss:$16 sps:$4 sm:$0xff]  }
  0x6c   :  { %v8096_v53 = vld [vmem:[#allocation7 + $0x1a0] ss:$16 sps:$4 sm:$0xff]   ;;  %v8099_v54 = vld [vmem:[#allocation7 + $0x1c4] ss:$16 sps:$4 sm:$0xff]   ;;  %v8101_v55 = vld [vmem:[#allocation7 + $0x188] ss:$16 sps:$4 sm:$0xff]  }
  0x6d   :  { %515 = vmatpush1.bf16.msra.mxu0 %v7990_v17  ;;  %556 = vmatpush1.bf16.msra.mxu1 %v8008_v23  ;;  %8961 = vst [vmem:[#allocation16_spill] sm:$0xff] %v8099_v54  ;;  %v8104_v56 = vld [vmem:[#allocation7 + $0x1ac] ss:$16 sps:$4 sm:$0xff]   ;;  %v8108_v57 = vld [vmem:[#allocation7 + $0x1c0] ss:$16 sps:$4 sm:$0xff]   ;;  %s5807_s22 = sshll.u32 %s7820_s16, 4  ;;  %s5808_s22 = int_to_ptr.vmem [resolvable:$true] %s5807_s22 }
  0x6e   :  { %516 = vmatprep.subr.bf16.mxu0 %v7993_v18  ;;  %557 = vmatprep.subr.bf16.mxu1 %v8011_v24  ;;  %v8111_v58 = vld [vmem:[#allocation7 + $0x1e4] ss:$16 sps:$4 sm:$0xff]   ;;  %v8113_v59 = vld [vmem:[#allocation7 + $0x1a8] ss:$16 sps:$4 sm:$0xff]   ;;  %v8116_v60 = vld [vmem:[#allocation7 + $0x1cc] ss:$16 sps:$4 sm:$0xff]   ;;  %p7784_p13 = scmp.lt.s32.totalorder %s5808_s22, %s5808_s22 }
  0x6f   :  { %v8120_v61 = vld [vmem:[#allocation7 + $0x1e0] ss:$16 sps:$4 sm:$0xff]   ;;  %v8123_v62 = vld [vmem:[#allocation7 + $0x1c8] ss:$16 sps:$4 sm:$0xff]   ;;  %v8126_v63 = vld [vmem:[#allocation7 + $0x1ec] ss:$16 sps:$4 sm:$0xff]  }
  0x70   :  { %v99_v0 = vld [vmem:[#allocation2] sm:$0xf] }
  0x71   :  { %517 = vmatpush1.bf16.msra.mxu0 %v8002_v21  ;;  %558 = vmatpush1.bf16.msra.mxu1 %v8020_v27 }
  0x72   :  { %518 = vmatprep.subr.bf16.mxu0 %v8004_v22  ;;  %559 = vmatprep.subr.bf16.mxu1 %v8023_v28 }
  0x75   :  { %519 = vmatpush1.bf16.msra.mxu0 %v8014_v25  ;;  %560 = vmatpush1.bf16.msra.mxu1 %v8032_v31 }
  0x76   :  { %520 = vmatprep.subr.bf16.mxu0 %v8017_v26  ;;  %561 = vmatprep.subr.bf16.mxu1 %v8035_v32 }
  0x79   :  { %521 = vmatpush1.bf16.msra.mxu0 %v8026_v29  ;;  %562 = vmatpush1.bf16.msra.mxu1 %v8044_v35 }
  0x7a   :  { %522 = vmatprep.subr.bf16.mxu0 %v8028_v30  ;;  %563 = vmatprep.subr.bf16.mxu1 %v8047_v36 }
  0x7d   :  { %523 = vmatpush1.bf16.msra.mxu0 %v8038_v33  ;;  %564 = vmatpush1.bf16.msra.mxu1 %v8056_v39 }
  0x7e   :  { %524 = vmatprep.subr.bf16.mxu0 %v8041_v34  ;;  %565 = vmatprep.subr.bf16.mxu1 %v8059_v40 }
  0x81   :  { %525 = vmatpush1.bf16.msra.mxu0 %v8050_v37  ;;  %566 = vmatpush1.bf16.msra.mxu1 %v8068_v43 }
  0x82   :  { %526 = vmatprep.subr.bf16.mxu0 %v8052_v38  ;;  %567 = vmatprep.subr.bf16.mxu1 %v8073_v45 }
  0x85   :  { %527 = vmatpush1.bf16.msra.mxu0 %v8061_v41  ;;  %568 = vmatpush1.bf16.msra.mxu1 %v8077_v47 }
  0x86   :  { %528 = vmatprep.subr.bf16.mxu0 %v8064_v42  ;;  %569 = vmatprep.subr.bf16.mxu1 %v8080_v48 }
  0x89   :  { %529 = vmatpush1.bf16.msra.mxu0 %v8070_v44  ;;  %570 = vmatpush1.bf16.msra.mxu1 %v8089_v51 }
  0x8a   :  { %530 = vmatprep.subr.bf16.mxu0 %v8075_v46  ;;  %571 = vmatprep.subr.bf16.mxu1 %v8092_v52 }
  0x8d   :  { %531 = vmatpush1.bf16.msra.mxu0 %v8084_v49  ;;  %572 = vmatpush1.bf16.msra.mxu1 %v8101_v55 }
  0x8e   :  { %532 = vmatprep.subr.bf16.mxu0 %v8087_v50  ;;  %573 = vmatprep.subr.bf16.mxu1 %v8104_v56 }
  0x91   :  { %533 = vmatpush1.bf16.msra.mxu0 %v8096_v53  ;;  %574 = vmatpush1.bf16.msra.mxu1 %v8113_v59 }
  0x92   :  { %534 = vmatprep.subr.bf16.mxu0 %v8099_v54  ;;  %575 = vmatprep.subr.bf16.mxu1 %v8116_v60  ;;  %v8131_v54 = vld [vmem:[#allocation7 + $0x1e8] ss:$16 sps:$4 sm:$0xff]  }
  0x95   :  { %535 = vmatpush1.bf16.msra.mxu0 %v8108_v57  ;;  %576 = vmatpush1.bf16.msra.mxu1 %v8123_v62 }
  0x96   :  { %536 = vmatprep.subr.bf16.mxu0 %v8111_v58  ;;  %577 = vmatprep.subr.bf16.mxu1 %v8126_v63 }
  0x99   :  { %537 = vmatpush1.bf16.msra.mxu0 %v8120_v61  ;;  %578 = vmatpush1.bf16.msra.mxu1 %v8131_v54 }
  0x9a   :  { %615 = vmatprep.subr.bf16.mxu0 %v7945_v1  ;;  %656 = vmatprep.subr.bf16.mxu1 %v7958_v6 }
  0x9c   :  { %539 = vmatmul.mubr.bf16.vlgmr.msra.gmra.mrb[0].mxu0 %v99_v0  ;;  %580 = vmatmul.mubr.bf16.vlgmr.msra.gmra.mrb[0].mxu1 %v99_v0  ;;  %v8962_v0 = vld [vmem:[#allocation16_spill] sm:$0xff] }
  0x9d   :  { %616 = vmatpush1.bf16.msra.mxu0 %v7947_v2  ;;  %657 = vmatpush1.bf16.msra.mxu1 %v7960_v7  ;;  %v8906_v2 = vlaneseq }
  0x9e   :  { %617 = vmatprep.subr.bf16.mxu0 %v7950_v3  ;;  %658 = vmatprep.subr.bf16.mxu1 %v7970_v10 }
  0x9f   :  { %v167_v3 = vshrl.u32 %v8906_v2, 7  ;;  %v8396_v2 = vld [vmem:[#allocation7 + $0x1c4] ss:$16 sps:$4 sm:$0xff]  }
  0xa0   :  { %8980 = vst [vmem:[#allocation33_spill] sm:$0xff] %v8396_v2 }
  0xa1   :  { %618 = vmatpush1.bf16.msra.mxu0 %v7953_v4  ;;  %659 = vmatpush1.bf16.msra.mxu1 %v7972_v11  ;;  %v8204_v4 = vsub.s32 0, %v167_v3  ;;  %v8209_v7 = vsub.s32 1, %v167_v3 }
  0xa2   :  { %619 = vmatprep.subr.bf16.mxu0 %v7956_v5  ;;  %660 = vmatprep.subr.bf16.mxu1 %v7980_v14  ;;  %v164_v5 = vld [vmem:[%s8897_s3] sm:$0xf] }
  0xa3   :  { %8963 = vst [vmem:[#allocation16_spill] sm:$0xff] %v8204_v4  ;;  %8964 = vst [vmem:[#allocation17_spill] sm:$0xff] %v8209_v7 }
  0xa5   :  { %620 = vmatpush1.bf16.msra.mxu0 %v7963_v8  ;;  %661 = vmatpush1.bf16.msra.mxu1 %v7984_v15  ;;  %v8212_v8 = vrot.slane %v164_v5, %v8204_v4  ;;  %v8408_v4 = vld [vmem:[#allocation7 + $0x1e4] ss:$16 sps:$4 sm:$0xff]  }
  0xa6   :  { %621 = vmatprep.subr.bf16.mxu0 %v7967_v9  ;;  %662 = vmatprep.subr.bf16.mxu1 %v7987_v16  ;;  %v8217_v9 = vsub.s32 3, %v167_v3  ;;  %8984 = vst [vmem:[#allocation37_spill] sm:$0xff] %v8408_v4 }
  0xa7   :  { %8965 = vst [vmem:[#allocation18_spill] sm:$0xff] %v8212_v8 }
  0xa8   :  { %8966 = vst [vmem:[#allocation19_spill] sm:$0xff] %v8217_v9  ;;  %v8222_v16 = vrot.slane %v164_v5, %v8217_v9  ;;  %v8402_v9 = vld [vmem:[#allocation7 + $0x1c0] ss:$16 sps:$4 sm:$0xff]  }
  0xa9   :  { %622 = vmatpush1.bf16.msra.mxu0 %v7976_v12  ;;  %663 = vmatpush1.bf16.msra.mxu1 %v7996_v19  ;;  %8982 = vst [vmem:[#allocation35_spill] sm:$0xff] %v8402_v9 }
  0xaa   :  { %623 = vmatprep.subr.bf16.mxu0 %v7978_v13  ;;  %664 = vmatprep.subr.bf16.mxu1 %v7999_v20 }
  0xad   :  { %624 = vmatpush1.bf16.msra.mxu0 %v7990_v17  ;;  %665 = vmatpush1.bf16.msra.mxu1 %v8008_v23 }
  0xae   :  { %625 = vmatprep.subr.bf16.mxu0 %v7993_v18  ;;  %666 = vmatprep.subr.bf16.mxu1 %v8011_v24  ;;  %v8224_v18 = vsub.s32 2, %v167_v3  ;;  %v8297_v3 = vld [vmem:[#allocation7 + $0xa8] ss:$16 sps:$4 sm:$0xff]  }
  0xb0   :  { %8967 = vst [vmem:[#allocation20_spill] sm:$0xff] %v8224_v18  ;;  %v8228_v23 = vrot.slane %v164_v5, %v8224_v18  ;;  %v8399_v18 = vld [vmem:[#allocation7 + $0x1cc] ss:$16 sps:$4 sm:$0xff]  }
  0xb1   :  { %626 = vmatpush1.bf16.msra.mxu0 %v8002_v21  ;;  %667 = vmatpush1.bf16.msra.mxu1 %v8020_v27  ;;  %8981 = vst [vmem:[#allocation34_spill] sm:$0xff] %v8399_v18 }
  0xb2   :  { %627 = vmatprep.subr.bf16.mxu0 %v8004_v22  ;;  %668 = vmatprep.subr.bf16.mxu1 %v8023_v28 }
  0xb5   :  { %628 = vmatpush1.bf16.msra.mxu0 %v8014_v25  ;;  %669 = vmatpush1.bf16.msra.mxu1 %v8032_v31 }
  0xb6   :  { %629 = vmatprep.subr.bf16.mxu0 %v8017_v26  ;;  %670 = vmatprep.subr.bf16.mxu1 %v8035_v32 }
  0xb9   :  { %630 = vmatpush1.bf16.msra.mxu0 %v8026_v29  ;;  %671 = vmatpush1.bf16.msra.mxu1 %v8044_v35 }
  0xba   :  { %631 = vmatprep.subr.bf16.mxu0 %v8028_v30  ;;  %672 = vmatprep.subr.bf16.mxu1 %v8047_v36 }
  0xbd   :  { %632 = vmatpush1.bf16.msra.mxu0 %v8038_v33  ;;  %673 = vmatpush1.bf16.msra.mxu1 %v8056_v39 }
  0xbe   :  { %633 = vmatprep.subr.bf16.mxu0 %v8041_v34  ;;  %674 = vmatprep.subr.bf16.mxu1 %v8059_v40 }
  0xc1   :  { %634 = vmatpush1.bf16.msra.mxu0 %v8050_v37  ;;  %675 = vmatpush1.bf16.msra.mxu1 %v8068_v43  ;;  %v613_v43 = vld [vmem:[#allocation2 + $0x4] sm:$0xf] }
  0xc2   :  { %635 = vmatprep.subr.bf16.mxu0 %v8052_v38  ;;  %676 = vmatprep.subr.bf16.mxu1 %v8073_v45  ;;  %v8237_v45 = vld [vmem:[#allocation7 + $0x8] ss:$16 sps:$4 sm:$0xff]  }
  0xc5   :  { %636 = vmatpush1.bf16.msra.mxu0 %v8061_v41  ;;  %677 = vmatpush1.bf16.msra.mxu1 %v8077_v47  ;;  %v8243_v47 = vld [vmem:[#allocation7 + $0x2c] ss:$16 sps:$4 sm:$0xff]  }
  0xc6   :  { %637 = vmatprep.subr.bf16.mxu0 %v8064_v42  ;;  %678 = vmatprep.subr.bf16.mxu1 %v8080_v48  ;;  %v8246_v48 = vld [vmem:[#allocation7 + $0x20] ss:$16 sps:$4 sm:$0xff]  }
  0xc9   :  { %638 = vmatpush1.bf16.msra.mxu0 %v8070_v44  ;;  %679 = vmatpush1.bf16.msra.mxu1 %v8089_v51  ;;  %v8234_v44 = vld [vmem:[#allocation7] ss:$16 sps:$4 sm:$0xff]   ;;  %v8255_v51 = vld [vmem:[#allocation7 + $0x4c] ss:$16 sps:$4 sm:$0xff]  }
  0xca   :  { %639 = vmatprep.subr.bf16.mxu0 %v8075_v46  ;;  %680 = vmatprep.subr.bf16.mxu1 %v8092_v52  ;;  %v8240_v46 = vld [vmem:[#allocation7 + $0x24] ss:$16 sps:$4 sm:$0xff]   ;;  %v8258_v52 = vld [vmem:[#allocation7 + $0x40] ss:$16 sps:$4 sm:$0xff]  }
  0xcd   :  { %640 = vmatpush1.bf16.msra.mxu0 %v8084_v49  ;;  %681 = vmatpush1.bf16.msra.mxu1 %v8101_v55  ;;  %v8249_v49 = vld [vmem:[#allocation7 + $0x28] ss:$16 sps:$4 sm:$0xff]   ;;  %v8267_v55 = vld [vmem:[#allocation7 + $0x6c] ss:$16 sps:$4 sm:$0xff]  }
  0xce   :  { %641 = vmatprep.subr.bf16.mxu0 %v8087_v50  ;;  %682 = vmatprep.subr.bf16.mxu1 %v8104_v56  ;;  %v8252_v50 = vld [vmem:[#allocation7 + $0x44] ss:$16 sps:$4 sm:$0xff]   ;;  %v8270_v56 = vld [vmem:[#allocation7 + $0x60] ss:$16 sps:$4 sm:$0xff]  }
  0xd1   :  { %642 = vmatpush1.bf16.msra.mxu0 %v8096_v53  ;;  %683 = vmatpush1.bf16.msra.mxu1 %v8113_v59  ;;  %v8261_v53 = vld [vmem:[#allocation7 + $0x48] ss:$16 sps:$4 sm:$0xff]   ;;  %v8279_v59 = vld [vmem:[#allocation7 + $0x8c] ss:$16 sps:$4 sm:$0xff]  }
  0xd2   :  { %643 = vmatprep.subr.bf16.mxu0 %v8962_v0  ;;  %684 = vmatprep.subr.bf16.mxu1 %v8116_v60  ;;  %v8282_v60 = vld [vmem:[#allocation7 + $0x80] ss:$16 sps:$4 sm:$0xff]  }
  0xd3   :  { %v8294_v0 = vld [vmem:[#allocation7 + $0xa0] ss:$16 sps:$4 sm:$0xff]  }
  0xd5   :  { %644 = vmatpush1.bf16.msra.mxu0 %v8108_v57  ;;  %685 = vmatpush1.bf16.msra.mxu1 %v8123_v62  ;;  %v8273_v57 = vld [vmem:[#allocation7 + $0x68] ss:$16 sps:$4 sm:$0xff]   ;;  %v8288_v62 = vld [vmem:[#allocation7 + $0xa4] ss:$16 sps:$4 sm:$0xff]  }
  0xd6   :  { %645 = vmatprep.subr.bf16.mxu0 %v8111_v58  ;;  %686 = vmatprep.subr.bf16.mxu1 %v8126_v63  ;;  %v8276_v58 = vld [vmem:[#allocation7 + $0x84] ss:$16 sps:$4 sm:$0xff]   ;;  %v8291_v63 = vld [vmem:[#allocation7 + $0xac] ss:$16 sps:$4 sm:$0xff]  }
  0xd9   :  { %646 = vmatpush1.bf16.msra.mxu0 %v8120_v61  ;;  %687 = vmatpush1.bf16.msra.mxu1 %v8131_v54  ;;  %v8264_v54 = vld [vmem:[#allocation7 + $0x64] ss:$16 sps:$4 sm:$0xff]   ;;  %v8285_v61 = vld [vmem:[#allocation7 + $0x88] ss:$16 sps:$4 sm:$0xff]  }
  0xda   :  { %724 = vmatprep.subr.bf16.mxu0 %v7945_v1  ;;  %765 = vmatprep.subr.bf16.mxu1 %v7958_v6  ;;  %v8215_v1 = vrot.slane %v164_v5, %v8209_v7  ;;  %v8300_v5 = vld [vmem:[#allocation7 + $0xc4] ss:$16 sps:$4 sm:$0xff]   ;;  %v8405_v7 = vld [vmem:[#allocation7 + $0x1c8] ss:$16 sps:$4 sm:$0xff]  }
  0xdb   :  { %8983 = vst [vmem:[#allocation36_spill] sm:$0xff] %v8405_v7 }
 0x16f   :  { %v540_v6 = vpop.f32.mrb[0].mxu0  ;;  %v581_v19 = vpop.f32.mrb[0].mxu1 }
 0x170   :  { %v541_v10 = vadd.f32 %v540_v6, %v8212_v8  ;;  %v542_v11 = vpop.f32.mrb[1].mxu0  ;;  %v583_v20 = vpop.f32.mrb[1].mxu1  ;;  %v582_v26 = vadd.f32 %v581_v19, %v8228_v23  ;;  %v8303_v6 = vld [vmem:[#allocation7 + $0xcc] ss:$16 sps:$4 sm:$0xff]  }
 0x171   :  { %v543_v12 = vadd.f32 %v542_v11, %v8215_v1  ;;  %v544_v13 = vpop.f32.mrb[2].mxu0  ;;  %v584_v21 = vadd.f32 %v583_v20, %v8222_v16  ;;  %v585_v22 = vpop.f32.mrb[2].mxu1  ;;  %v8309_v11 = vld [vmem:[#allocation7 + $0xc8] ss:$16 sps:$4 sm:$0xff]   ;;  %v8327_v19 = vld [vmem:[#allocation7 + $0x10c] ss:$16 sps:$4 sm:$0xff]  }
 0x172   :  { %v5885_v14 = vmul.f32 -1.442695, %v541_v10  ;;  %v545_v15 = vpop.f32.mrb[3].mxu0  ;;  %v586_v24 = vpop.f32.mrb[3].mxu1  ;;  %v8306_v10 = vld [vmem:[#allocation7 + $0xc0] ss:$16 sps:$4 sm:$0xff]  }
 0x173   :  { %v5886_v17 = vmul.f32 -1.442695, %v543_v12  ;;  %v5887_v25 = vmul.f32 -1.442695, %v584_v21  ;;  %v8312_v12 = vld [vmem:[#allocation7 + $0xe4] ss:$16 sps:$4 sm:$0xff]  }
 0x174   :  { %7351 = vpow2.f32 %v5885_v14  ;;  %v8315_v13 = vld [vmem:[#allocation7 + $0xec] ss:$16 sps:$4 sm:$0xff]   ;;  %v8318_v14 = vld [vmem:[#allocation7 + $0xe0] ss:$16 sps:$4 sm:$0xff]   ;;  %v8321_v15 = vld [vmem:[#allocation7 + $0xe8] ss:$16 sps:$4 sm:$0xff]  }
 0x175   :  { %7353 = vpow2.f32 %v5886_v17  ;;  %v8324_v17 = vld [vmem:[#allocation7 + $0x104] ss:$16 sps:$4 sm:$0xff]   ;;  %v8330_v20 = vld [vmem:[#allocation7 + $0x100] ss:$16 sps:$4 sm:$0xff]   ;;  %v8333_v21 = vld [vmem:[#allocation7 + $0x108] ss:$16 sps:$4 sm:$0xff]  }
 0x176   :  { %7355 = vpow2.f32 %v5887_v25  ;;  %v8336_v22 = vld [vmem:[#allocation7 + $0x124] ss:$16 sps:$4 sm:$0xff]   ;;  %v8339_v24 = vld [vmem:[#allocation7 + $0x12c] ss:$16 sps:$4 sm:$0xff]   ;;  %v8342_v25 = vld [vmem:[#allocation7 + $0x120] ss:$16 sps:$4 sm:$0xff]  }
 0x177   :  { %7357 = vtanh.f32 %v582_v26  ;;  %v8345_v26 = vld [vmem:[#allocation7 + $0x128] ss:$16 sps:$4 sm:$0xff]  }
 0x17e   :  { %v7352_v27 = vpop.eup %7351 }
 0x17f   :  { %v7354_v28 = vpop.eup %7353  ;;  %v591_v29 = vadd.f32 1.0, %v7352_v27  ;;  %v8348_v27 = vld [vmem:[#allocation7 + $0x144] ss:$16 sps:$4 sm:$0xff]  }
 0x180   :  { %v597_v30 = vadd.f32 1.0, %v7354_v28  ;;  %v7356_v31 = vpop.eup %7355  ;;  %v8351_v28 = vld [vmem:[#allocation7 + $0x14c] ss:$16 sps:$4 sm:$0xff]  }
 0x181   :  { %7359 = vrcp.f32 %v591_v29  ;;  %v7358_v32 = vpop.eup %7357  ;;  %v604_v34 = vadd.f32 1.0, %v7356_v31  ;;  %v8354_v29 = vld [vmem:[#allocation7 + $0x140] ss:$16 sps:$4 sm:$0xff]   ;;  %v8360_v31 = vld [vmem:[#allocation7 + $0x164] ss:$16 sps:$4 sm:$0xff]  }
 0x182   :  { %7361 = vrcp.f32 %v597_v30  ;;  %v8357_v30 = vld [vmem:[#allocation7 + $0x148] ss:$16 sps:$4 sm:$0xff]   ;;  %8968 = vst [vmem:[#allocation21_spill] sm:$0xff] %v8360_v31 }
 0x183   :  { %7363 = vrcp.f32 %v604_v34  ;;  %v8369_v34 = vld [vmem:[#allocation7 + $0x168] ss:$16 sps:$4 sm:$0xff]  }
 0x184   :  { %8971 = vst [vmem:[#allocation24_spill] sm:$0xff] %v8369_v34 }
 0x18b   :  { %v7360_v33 = vpop.eup %7359 }
 0x18c   :  { %v7362_v35 = vpop.eup %7361  ;;  %v608_v36 = vmul.f32 %v7360_v33, %v7358_v32  ;;  %v8363_v32 = vld [vmem:[#allocation7 + $0x16c] ss:$16 sps:$4 sm:$0xff]   ;;  %v8366_v33 = vld [vmem:[#allocation7 + $0x160] ss:$16 sps:$4 sm:$0xff]  }
 0x18d   :  { %v607_v37 = vmul.f32 0.0, %v7362_v35  ;;  %v7364_v39 = vpop.eup %7363  ;;  %8969 = vst [vmem:[#allocation22_spill] sm:$0xff] %v8363_v32  ;;  %8970 = vst [vmem:[#allocation23_spill] sm:$0xff] %v8366_v33  ;;  %v8372_v35 = vld [vmem:[#allocation7 + $0x184] ss:$16 sps:$4 sm:$0xff]  }
 0x18e   :  { %8972 = vst [vmem:[#allocation25_spill] sm:$0xff] %v8372_v35 }
 0x18f   :  { %v8231_v38 = vadd.f32 %v608_v36, %v607_v37  ;;  %v8375_v36 = vld [vmem:[#allocation7 + $0x18c] ss:$16 sps:$4 sm:$0xff]   ;;  %v8378_v37 = vld [vmem:[#allocation7 + $0x180] ss:$16 sps:$4 sm:$0xff]  }
 0x190   :  { %8973 = vst [vmem:[#allocation26_spill] sm:$0xff] %v8375_v36  ;;  %8974 = vst [vmem:[#allocation27_spill] sm:$0xff] %v8378_v37 }
 0x191   :  { %7365 = vtanh.f32 %v8231_v38 }
 0x19b   :  { %v7366_v40 = vpop.eup %7365 }
 0x19c   :  { %v611_v41 = vmul.f32 %v7366_v40, %v7364_v39  ;;  %v8381_v39 = vld [vmem:[#allocation7 + $0x188] ss:$16 sps:$4 sm:$0xff]   ;;  %v8384_v40 = vld [vmem:[#allocation7 + $0x1a4] ss:$16 sps:$4 sm:$0xff]  }
 0x19d   :  { %8975 = vst [vmem:[#allocation28_spill] sm:$0xff] %v8381_v39  ;;  %8976 = vst [vmem:[#allocation29_spill] sm:$0xff] %v8384_v40 }
 0x19e   :  { %v614_v42 = vpack.c.bf16 %v611_v41, %v611_v41  ;;  %v8387_v41 = vld [vmem:[#allocation7 + $0x1ac] ss:$16 sps:$4 sm:$0xff]  }
 0x19f   :  { %8977 = vst [vmem:[#allocation30_spill] sm:$0xff] %v8387_v41 }
 0x1a0   :  { %647 = vmatprep.mubr.bf16.mxu0 %v614_v42  ;;  %688 = vmatprep.mubr.bf16.mxu1 %v614_v42  ;;  %v8390_v42 = vld [vmem:[#allocation7 + $0x1a0] ss:$16 sps:$4 sm:$0xff]  }
 0x1a1   :  { %648 = vmatmul.mubr.bf16.vlgmr.msra.gmra.mrb[4].mxu0 %v613_v43  ;;  %689 = vmatmul.mubr.bf16.vlgmr.msra.gmra.mrb[4].mxu1 %v613_v43  ;;  %8978 = vst [vmem:[#allocation31_spill] sm:$0xff] %v8390_v42  ;;  %v8393_v43 = vld [vmem:[#allocation7 + $0x1a8] ss:$16 sps:$4 sm:$0xff]  }
 0x1a2   :  { %725 = vmatpush1.bf16.msra.mxu0 %v8234_v44  ;;  %766 = vmatpush1.bf16.msra.mxu1 %v8237_v45  ;;  %8979 = vst [vmem:[#allocation32_spill] sm:$0xff] %v8393_v43 }
 0x1a3   :  { %726 = vmatprep.subr.bf16.mxu0 %v8240_v46  ;;  %767 = vmatprep.subr.bf16.mxu1 %v8243_v47 }
 0x1a6   :  { %727 = vmatpush1.bf16.msra.mxu0 %v8246_v48  ;;  %768 = vmatpush1.bf16.msra.mxu1 %v8249_v49 }
 0x1a7   :  { %728 = vmatprep.subr.bf16.mxu0 %v8252_v50  ;;  %769 = vmatprep.subr.bf16.mxu1 %v8255_v51 }
 0x1aa   :  { %729 = vmatpush1.bf16.msra.mxu0 %v8258_v52  ;;  %770 = vmatpush1.bf16.msra.mxu1 %v8261_v53 }
 0x1ab   :  { %730 = vmatprep.subr.bf16.mxu0 %v8264_v54  ;;  %771 = vmatprep.subr.bf16.mxu1 %v8267_v55 }
 0x1ae   :  { %731 = vmatpush1.bf16.msra.mxu0 %v8270_v56  ;;  %772 = vmatpush1.bf16.msra.mxu1 %v8273_v57 }
 0x1af   :  { %732 = vmatprep.subr.bf16.mxu0 %v8276_v58  ;;  %773 = vmatprep.subr.bf16.mxu1 %v8279_v59 }
 0x1b2   :  { %733 = vmatpush1.bf16.msra.mxu0 %v8282_v60  ;;  %774 = vmatpush1.bf16.msra.mxu1 %v8285_v61 }
 0x1b3   :  { %734 = vmatprep.subr.bf16.mxu0 %v8288_v62  ;;  %775 = vmatprep.subr.bf16.mxu1 %v8291_v63 }
 0x1b6   :  { %735 = vmatpush1.bf16.msra.mxu0 %v8294_v0  ;;  %776 = vmatpush1.bf16.msra.mxu1 %v8297_v3 }
 0x1b7   :  { %736 = vmatprep.subr.bf16.mxu0 %v8300_v5  ;;  %777 = vmatprep.subr.bf16.mxu1 %v8303_v6 }
 0x1ba   :  { %737 = vmatpush1.bf16.msra.mxu0 %v8306_v10  ;;  %778 = vmatpush1.bf16.msra.mxu1 %v8309_v11 }
 0x1bb   :  { %738 = vmatprep.subr.bf16.mxu0 %v8312_v12  ;;  %779 = vmatprep.subr.bf16.mxu1 %v8315_v13 }
 0x1be   :  { %739 = vmatpush1.bf16.msra.mxu0 %v8318_v14  ;;  %780 = vmatpush1.bf16.msra.mxu1 %v8321_v15 }
 0x1bf   :  { %740 = vmatprep.subr.bf16.mxu0 %v8324_v17  ;;  %781 = vmatprep.subr.bf16.mxu1 %v8327_v19 }
 0x1c2   :  { %741 = vmatpush1.bf16.msra.mxu0 %v8330_v20  ;;  %782 = vmatpush1.bf16.msra.mxu1 %v8333_v21 }
 0x1c3   :  { %742 = vmatprep.subr.bf16.mxu0 %v8336_v22  ;;  %783 = vmatprep.subr.bf16.mxu1 %v8339_v24 }
 0x1c6   :  { %743 = vmatpush1.bf16.msra.mxu0 %v8342_v25  ;;  %784 = vmatpush1.bf16.msra.mxu1 %v8345_v26 }
 0x1c7   :  { %744 = vmatprep.subr.bf16.mxu0 %v8348_v27  ;;  %785 = vmatprep.subr.bf16.mxu1 %v8351_v28 }
 0x1ca   :  { %745 = vmatpush1.bf16.msra.mxu0 %v8354_v29  ;;  %786 = vmatpush1.bf16.msra.mxu1 %v8357_v30 }
 0x1cb   :  { %746 = vmatprep.subr.bf16.mxu0 %v8360_v31  ;;  %787 = vmatprep.subr.bf16.mxu1 %v8363_v32 }
 0x1ce   :  { %747 = vmatpush1.bf16.msra.mxu0 %v8366_v33  ;;  %788 = vmatpush1.bf16.msra.mxu1 %v8369_v34 }
 0x1cf   :  { %748 = vmatprep.subr.bf16.mxu0 %v8372_v35  ;;  %789 = vmatprep.subr.bf16.mxu1 %v8375_v36 }
 0x1d2   :  { %749 = vmatpush1.bf16.msra.mxu0 %v8378_v37  ;;  %790 = vmatpush1.bf16.msra.mxu1 %v8381_v39 }
 0x1d3   :  { %750 = vmatprep.subr.bf16.mxu0 %v8384_v40  ;;  %791 = vmatprep.subr.bf16.mxu1 %v8387_v41 }
 0x1d6   :  { %751 = vmatpush1.bf16.msra.mxu0 %v8390_v42  ;;  %792 = vmatpush1.bf16.msra.mxu1 %v8393_v43  ;;  %v8411_v43 = vld [vmem:[#allocation7 + $0x1ec] ss:$16 sps:$4 sm:$0xff]  }
 0x1d7   :  { %752 = vmatprep.subr.bf16.mxu0 %v8396_v2  ;;  %793 = vmatprep.subr.bf16.mxu1 %v8399_v18  ;;  %8985 = vst [vmem:[#allocation38_spill] sm:$0xff] %v8411_v43  ;;  %v8414_v2 = vld [vmem:[#allocation7 + $0x1e0] ss:$16 sps:$4 sm:$0xff]   ;;  %v8417_v18 = vld [vmem:[#allocation7 + $0x1e8] ss:$16 sps:$4 sm:$0xff]  }
 0x1d8   :  { %8986 = vst [vmem:[#allocation39_spill] sm:$0xff] %v8414_v2  ;;  %8987 = vst [vmem:[#allocation40_spill] sm:$0xff] %v8417_v18 }
 0x1da   :  { %753 = vmatpush1.bf16.msra.mxu0 %v8402_v9  ;;  %794 = vmatpush1.bf16.msra.mxu1 %v8405_v7  ;;  %v8420_v9 = vld [vmem:[#allocation7 + $0x4] ss:$16 sps:$4 sm:$0xff]   ;;  %v8423_v7 = vld [vmem:[#allocation7 + $0xc] ss:$16 sps:$4 sm:$0xff]  }
 0x1db   :  { %754 = vmatprep.subr.bf16.mxu0 %v8408_v4  ;;  %795 = vmatprep.subr.bf16.mxu1 %v8411_v43  ;;  %8988 = vst [vmem:[#allocation41_spill] sm:$0xff] %v8420_v9  ;;  %8989 = vst [vmem:[#allocation42_spill] sm:$0xff] %v8423_v7 }
 0x1de   :  { %755 = vmatpush1.bf16.msra.mxu0 %v8414_v2  ;;  %796 = vmatpush1.bf16.msra.mxu1 %v8417_v18 }
 0x1df   :  { %833 = vmatprep.subr.bf16.mxu0 %v8420_v9  ;;  %874 = vmatprep.subr.bf16.mxu1 %v8423_v7 }
 0x274   :  { %v649_v4 = vpop.f32.mrb[4].mxu0  ;;  %v690_v42 = vpop.f32.mrb[4].mxu1 }
 0x275   :  { %v650_v43 = vadd.f32 %v649_v4, %v8212_v8  ;;  %v651_v41 = vpop.f32.mrb[5].mxu0  ;;  %v692_v40 = vpop.f32.mrb[5].mxu1  ;;  %v691_v7 = vadd.f32 %v690_v42, %v8228_v23  ;;  %v8993_v42 = vld [vmem:[#allocation24_spill] sm:$0xff] }
 0x276   :  { %v652_v2 = vadd.f32 %v651_v41, %v8215_v1  ;;  %v653_v39 = vpop.f32.mrb[6].mxu0  ;;  %v694_v37 = vpop.f32.mrb[6].mxu1  ;;  %v693_v9 = vadd.f32 %v692_v40, %v8222_v16  ;;  %v722_v41 = vld [vmem:[#allocation2 + $0x8] sm:$0xf] }
 0x277   :  { %v5888_v36 = vmul.f32 -1.442695, %v650_v43  ;;  %v654_v18 = vpop.f32.mrb[7].mxu0  ;;  %v695_v35 = vpop.f32.mrb[7].mxu1  ;;  %v8994_v43 = vld [vmem:[#allocation25_spill] sm:$0xff] }
 0x278   :  { %v5889_v34 = vmul.f32 -1.442695, %v652_v2  ;;  %v5890_v33 = vmul.f32 -1.442695, %v693_v9 }
 0x279   :  { %7367 = vpow2.f32 %v5888_v36 }
 0x27a   :  { %7369 = vpow2.f32 %v5889_v34 }
 0x27b   :  { %7371 = vpow2.f32 %v5890_v33 }
 0x27c   :  { %7373 = vtanh.f32 %v691_v7 }
 0x283   :  { %v7368_v32 = vpop.eup %7367 }
 0x284   :  { %v7370_v4 = vpop.eup %7369  ;;  %v700_v8 = vadd.f32 1.0, %v7368_v32 }
 0x285   :  { %v706_v31 = vadd.f32 1.0, %v7370_v4  ;;  %v7372_v37 = vpop.eup %7371  ;;  %v8995_v4 = vld [vmem:[#allocation26_spill] sm:$0xff] }
 0x286   :  { %7375 = vrcp.f32 %v700_v8  ;;  %v7374_v39 = vpop.eup %7373  ;;  %v713_v35 = vadd.f32 1.0, %v7372_v37  ;;  %v8990_v8 = vld [vmem:[#allocation21_spill] sm:$0xff]  ;;  %v8996_v37 = vld [vmem:[#allocation27_spill] sm:$0xff] }
 0x287   :  { %7377 = vrcp.f32 %v706_v31  ;;  %v8992_v31 = vld [vmem:[#allocation23_spill] sm:$0xff] }
 0x288   :  { %7379 = vrcp.f32 %v713_v35  ;;  %v8999_v35 = vld [vmem:[#allocation30_spill] sm:$0xff] }
 0x290   :  { %v7376_v18 = vpop.eup %7375 }
 0x291   :  { %v7378_v2 = vpop.eup %7377  ;;  %v717_v36 = vmul.f32 %v7376_v18, %v7374_v39  ;;  %v8997_v39 = vld [vmem:[#allocation28_spill] sm:$0xff]  ;;  %v8998_v18 = vld [vmem:[#allocation29_spill] sm:$0xff] }
 0x292   :  { %v716_v34 = vmul.f32 %v7378_v2, %v8231_v38  ;;  %v7380_v9 = vpop.eup %7379  ;;  %v8991_v38 = vld [vmem:[#allocation22_spill] sm:$0xff]  ;;  %v9000_v2 = vld [vmem:[#allocation31_spill] sm:$0xff] }
 0x294   :  { %v8431_v40 = vadd.f32 %v717_v36, %v716_v34  ;;  %v9001_v36 = vld [vmem:[#allocation32_spill] sm:$0xff]  ;;  %v9002_v34 = vld [vmem:[#allocation33_spill] sm:$0xff] }
 0x296   :  { %7381 = vtanh.f32 %v8431_v40 }
 0x2a0   :  { %v7382_v33 = vpop.eup %7381 }
 0x2a1   :  { %v720_v32 = vmul.f32 %v7382_v33, %v7380_v9  ;;  %v9003_v9 = vld [vmem:[#allocation34_spill] sm:$0xff]  ;;  %v9004_v33 = vld [vmem:[#allocation35_spill] sm:$0xff] }
 0x2a3   :  { %v723_v7 = vpack.c.bf16 %v720_v32, %v720_v32  ;;  %v9005_v32 = vld [vmem:[#allocation36_spill] sm:$0xff] }
 0x2a5   :  { %756 = vmatprep.mubr.bf16.mxu0 %v723_v7  ;;  %797 = vmatprep.mubr.bf16.mxu1 %v723_v7  ;;  %v9006_v7 = vld [vmem:[#allocation37_spill] sm:$0xff] }
 0x2a6   :  { %757 = vmatmul.mubr.bf16.vlgmr.msra.gmra.mrb[8].mxu0 %v722_v41  ;;  %798 = vmatmul.mubr.bf16.vlgmr.msra.gmra.mrb[8].mxu1 %v722_v41  ;;  %v9007_v41 = vld [vmem:[#allocation38_spill] sm:$0xff] }
 0x2a7   :  { %834 = vmatpush1.bf16.msra.mxu0 %v8234_v44  ;;  %875 = vmatpush1.bf16.msra.mxu1 %v8237_v45 }
 0x2a8   :  { %835 = vmatprep.subr.bf16.mxu0 %v8240_v46  ;;  %876 = vmatprep.subr.bf16.mxu1 %v8243_v47 }
 0x2ab   :  { %836 = vmatpush1.bf16.msra.mxu0 %v8246_v48  ;;  %877 = vmatpush1.bf16.msra.mxu1 %v8249_v49 }
 0x2ac   :  { %837 = vmatprep.subr.bf16.mxu0 %v8252_v50  ;;  %878 = vmatprep.subr.bf16.mxu1 %v8255_v51 }
 0x2af   :  { %838 = vmatpush1.bf16.msra.mxu0 %v8258_v52  ;;  %879 = vmatpush1.bf16.msra.mxu1 %v8261_v53 }
 0x2b0   :  { %839 = vmatprep.subr.bf16.mxu0 %v8264_v54  ;;  %880 = vmatprep.subr.bf16.mxu1 %v8267_v55 }
 0x2b3   :  { %840 = vmatpush1.bf16.msra.mxu0 %v8270_v56  ;;  %881 = vmatpush1.bf16.msra.mxu1 %v8273_v57 }
 0x2b4   :  { %841 = vmatprep.subr.bf16.mxu0 %v8276_v58  ;;  %882 = vmatprep.subr.bf16.mxu1 %v8279_v59 }
 0x2b7   :  { %842 = vmatpush1.bf16.msra.mxu0 %v8282_v60  ;;  %883 = vmatpush1.bf16.msra.mxu1 %v8285_v61 }
 0x2b8   :  { %843 = vmatprep.subr.bf16.mxu0 %v8288_v62  ;;  %884 = vmatprep.subr.bf16.mxu1 %v8291_v63 }
 0x2bb   :  { %844 = vmatpush1.bf16.msra.mxu0 %v8294_v0  ;;  %885 = vmatpush1.bf16.msra.mxu1 %v8297_v3 }
 0x2bc   :  { %845 = vmatprep.subr.bf16.mxu0 %v8300_v5  ;;  %886 = vmatprep.subr.bf16.mxu1 %v8303_v6 }
 0x2bf   :  { %846 = vmatpush1.bf16.msra.mxu0 %v8306_v10  ;;  %887 = vmatpush1.bf16.msra.mxu1 %v8309_v11 }
 0x2c0   :  { %847 = vmatprep.subr.bf16.mxu0 %v8312_v12  ;;  %888 = vmatprep.subr.bf16.mxu1 %v8315_v13 }
 0x2c3   :  { %848 = vmatpush1.bf16.msra.mxu0 %v8318_v14  ;;  %889 = vmatpush1.bf16.msra.mxu1 %v8321_v15 }
 0x2c4   :  { %849 = vmatprep.subr.bf16.mxu0 %v8324_v17  ;;  %890 = vmatprep.subr.bf16.mxu1 %v8327_v19 }
 0x2c7   :  { %850 = vmatpush1.bf16.msra.mxu0 %v8330_v20  ;;  %891 = vmatpush1.bf16.msra.mxu1 %v8333_v21 }
 0x2c8   :  { %851 = vmatprep.subr.bf16.mxu0 %v8336_v22  ;;  %892 = vmatprep.subr.bf16.mxu1 %v8339_v24 }
 0x2cb   :  { %852 = vmatpush1.bf16.msra.mxu0 %v8342_v25  ;;  %893 = vmatpush1.bf16.msra.mxu1 %v8345_v26 }
 0x2cc   :  { %853 = vmatprep.subr.bf16.mxu0 %v8348_v27  ;;  %894 = vmatprep.subr.bf16.mxu1 %v8351_v28 }
 0x2cf   :  { %854 = vmatpush1.bf16.msra.mxu0 %v8354_v29  ;;  %895 = vmatpush1.bf16.msra.mxu1 %v8357_v30 }
 0x2d0   :  { %855 = vmatprep.subr.bf16.mxu0 %v8990_v8  ;;  %896 = vmatprep.subr.bf16.mxu1 %v8991_v38 }
 0x2d3   :  { %856 = vmatpush1.bf16.msra.mxu0 %v8992_v31  ;;  %897 = vmatpush1.bf16.msra.mxu1 %v8993_v42 }
 0x2d4   :  { %857 = vmatprep.subr.bf16.mxu0 %v8994_v43  ;;  %898 = vmatprep.subr.bf16.mxu1 %v8995_v4 }
 0x2d7   :  { %858 = vmatpush1.bf16.msra.mxu0 %v8996_v37  ;;  %899 = vmatpush1.bf16.msra.mxu1 %v8997_v39  ;;  %v9008_v39 = vld [vmem:[#allocation39_spill] sm:$0xff]  ;;  %v9012_v37 = vld [vmem:[#allocation18_spill] sm:$0xff] }
 0x2d8   :  { %859 = vmatprep.subr.bf16.mxu0 %v8998_v18  ;;  %900 = vmatprep.subr.bf16.mxu1 %v8999_v35  ;;  %v9009_v18 = vld [vmem:[#allocation40_spill] sm:$0xff]  ;;  %v9010_v35 = vld [vmem:[#allocation41_spill] sm:$0xff] }
 0x2db   :  { %860 = vmatpush1.bf16.msra.mxu0 %v9000_v2  ;;  %901 = vmatpush1.bf16.msra.mxu1 %v9001_v36  ;;  %v9011_v2 = vld [vmem:[#allocation42_spill] sm:$0xff] }
 0x2dc   :  { %861 = vmatprep.subr.bf16.mxu0 %v9002_v34  ;;  %902 = vmatprep.subr.bf16.mxu1 %v9003_v9 }
 0x2df   :  { %862 = vmatpush1.bf16.msra.mxu0 %v9004_v33  ;;  %903 = vmatpush1.bf16.msra.mxu1 %v9005_v32 }
 0x2e0   :  { %863 = vmatprep.subr.bf16.mxu0 %v9006_v7  ;;  %904 = vmatprep.subr.bf16.mxu1 %v9007_v41 }
 0x2e3   :  { %864 = vmatpush1.bf16.msra.mxu0 %v9008_v39  ;;  %905 = vmatpush1.bf16.msra.mxu1 %v9009_v18 }
 0x2e4   :  { %942 = vmatprep.subr.bf16.mxu0 %v9010_v35  ;;  %983 = vmatprep.subr.bf16.mxu1 %v9011_v2 }
 0x379   :  { %v758_v36 = vpop.f32.mrb[8].mxu0  ;;  %v799_v34 = vpop.f32.mrb[8].mxu1 }
 0x37a   :  { %v759_v9 = vadd.f32 %v758_v36, %v9012_v37  ;;  %v760_v4 = vpop.f32.mrb[9].mxu0  ;;  %v801_v33 = vpop.f32.mrb[9].mxu1  ;;  %v800_v2 = vadd.f32 %v799_v34, %v8228_v23  ;;  %v831_v34 = vld [vmem:[#allocation2 + $0xc] sm:$0xf] }
 0x37b   :  { %v761_v32 = vadd.f32 %v760_v4, %v8215_v1  ;;  %v762_v43 = vpop.f32.mrb[10].mxu0  ;;  %v803_v7 = vpop.f32.mrb[10].mxu1  ;;  %v802_v35 = vadd.f32 %v801_v33, %v8222_v16 }
 0x37c   :  { %v5891_v42 = vmul.f32 -1.442695, %v759_v9  ;;  %v763_v41 = vpop.f32.mrb[11].mxu0  ;;  %v804_v31 = vpop.f32.mrb[11].mxu1  ;;  %v9016_v7 = vld [vmem:[#allocation24_spill] sm:$0xff] }
 0x37d   :  { %v5892_v39 = vmul.f32 -1.442695, %v761_v32  ;;  %v5893_v18 = vmul.f32 -1.442695, %v802_v35  ;;  %v9017_v41 = vld [vmem:[#allocation25_spill] sm:$0xff] }
 0x37e   :  { %7383 = vpow2.f32 %v5891_v42 }
 0x37f   :  { %7385 = vpow2.f32 %v5892_v39 }
 0x380   :  { %7387 = vpow2.f32 %v5893_v18 }
 0x381   :  { %7389 = vtanh.f32 %v800_v2 }
 0x388   :  { %v7384_v38 = vpop.eup %7383 }
 0x389   :  { %v7386_v36 = vpop.eup %7385  ;;  %v809_v37 = vadd.f32 1.0, %v7384_v38 }
 0x38a   :  { %v815_v8 = vadd.f32 1.0, %v7386_v36  ;;  %v7388_v43 = vpop.eup %7387  ;;  %v9018_v36 = vld [vmem:[#allocation26_spill] sm:$0xff] }
 0x38b   :  { %7391 = vrcp.f32 %v809_v37  ;;  %v7390_v4 = vpop.eup %7389  ;;  %v822_v31 = vadd.f32 1.0, %v7388_v43  ;;  %v9015_v37 = vld [vmem:[#allocation23_spill] sm:$0xff] }
 0x38c   :  { %7393 = vrcp.f32 %v815_v8  ;;  %v9014_v8 = vld [vmem:[#allocation22_spill] sm:$0xff]  ;;  %v9019_v43 = vld [vmem:[#allocation27_spill] sm:$0xff] }
 0x38d   :  { %7395 = vrcp.f32 %v822_v31  ;;  %v9022_v31 = vld [vmem:[#allocation30_spill] sm:$0xff] }
 0x395   :  { %v7392_v9 = vpop.eup %7391 }
 0x396   :  { %v7394_v32 = vpop.eup %7393  ;;  %v826_v42 = vmul.f32 %v7392_v9, %v7390_v4  ;;  %v9020_v4 = vld [vmem:[#allocation28_spill] sm:$0xff]  ;;  %v9021_v9 = vld [vmem:[#allocation29_spill] sm:$0xff] }
 0x397   :  { %v825_v39 = vmul.f32 %v7394_v32, %v8431_v40  ;;  %v7396_v18 = vpop.eup %7395  ;;  %v9013_v40 = vld [vmem:[#allocation21_spill] sm:$0xff]  ;;  %v9023_v32 = vld [vmem:[#allocation31_spill] sm:$0xff] }
 0x399   :  { %v8503_v33 = vadd.f32 %v826_v42, %v825_v39  ;;  %v9024_v42 = vld [vmem:[#allocation32_spill] sm:$0xff]  ;;  %v9025_v39 = vld [vmem:[#allocation33_spill] sm:$0xff] }
 0x39b   :  { %7397 = vtanh.f32 %v8503_v33 }
 0x3a5   :  { %v7398_v35 = vpop.eup %7397 }
 0x3a6   :  { %v829_v38 = vmul.f32 %v7398_v35, %v7396_v18  ;;  %v9026_v18 = vld [vmem:[#allocation34_spill] sm:$0xff]  ;;  %v9027_v35 = vld [vmem:[#allocation35_spill] sm:$0xff] }
 0x3a8   :  { %v832_v2 = vpack.c.bf16 %v829_v38, %v829_v38  ;;  %v9028_v38 = vld [vmem:[#allocation36_spill] sm:$0xff] }
 0x3aa   :  { %865 = vmatprep.mubr.bf16.mxu0 %v832_v2  ;;  %906 = vmatprep.mubr.bf16.mxu1 %v832_v2  ;;  %v9029_v2 = vld [vmem:[#allocation37_spill] sm:$0xff] }
 0x3ab   :  { %866 = vmatmul.mubr.bf16.vlgmr.msra.gmra.mrb[12].mxu0 %v831_v34  ;;  %907 = vmatmul.mubr.bf16.vlgmr.msra.gmra.mrb[12].mxu1 %v831_v34  ;;  %v9030_v34 = vld [vmem:[#allocation38_spill] sm:$0xff] }
 0x3ac   :  { %943 = vmatpush1.bf16.msra.mxu0 %v8234_v44  ;;  %984 = vmatpush1.bf16.msra.mxu1 %v8237_v45 }
 0x3ad   :  { %944 = vmatprep.subr.bf16.mxu0 %v8240_v46  ;;  %985 = vmatprep.subr.bf16.mxu1 %v8243_v47 }
 0x3b0   :  { %945 = vmatpush1.bf16.msra.mxu0 %v8246_v48  ;;  %986 = vmatpush1.bf16.msra.mxu1 %v8249_v49 }
 0x3b1   :  { %946 = vmatprep.subr.bf16.mxu0 %v8252_v50  ;;  %987 = vmatprep.subr.bf16.mxu1 %v8255_v51 }
 0x3b4   :  { %947 = vmatpush1.bf16.msra.mxu0 %v8258_v52  ;;  %988 = vmatpush1.bf16.msra.mxu1 %v8261_v53 }
 0x3b5   :  { %948 = vmatprep.subr.bf16.mxu0 %v8264_v54  ;;  %989 = vmatprep.subr.bf16.mxu1 %v8267_v55 }
 0x3b8   :  { %949 = vmatpush1.bf16.msra.mxu0 %v8270_v56  ;;  %990 = vmatpush1.bf16.msra.mxu1 %v8273_v57 }
 0x3b9   :  { %950 = vmatprep.subr.bf16.mxu0 %v8276_v58  ;;  %991 = vmatprep.subr.bf16.mxu1 %v8279_v59 }
 0x3bc   :  { %951 = vmatpush1.bf16.msra.mxu0 %v8282_v60  ;;  %992 = vmatpush1.bf16.msra.mxu1 %v8285_v61 }
 0x3bd   :  { %952 = vmatprep.subr.bf16.mxu0 %v8288_v62  ;;  %993 = vmatprep.subr.bf16.mxu1 %v8291_v63 }
 0x3c0   :  { %953 = vmatpush1.bf16.msra.mxu0 %v8294_v0  ;;  %994 = vmatpush1.bf16.msra.mxu1 %v8297_v3 }
 0x3c1   :  { %954 = vmatprep.subr.bf16.mxu0 %v8300_v5  ;;  %995 = vmatprep.subr.bf16.mxu1 %v8303_v6 }
 0x3c4   :  { %955 = vmatpush1.bf16.msra.mxu0 %v8306_v10  ;;  %996 = vmatpush1.bf16.msra.mxu1 %v8309_v11 }
 0x3c5   :  { %956 = vmatprep.subr.bf16.mxu0 %v8312_v12  ;;  %997 = vmatprep.subr.bf16.mxu1 %v8315_v13 }
 0x3c8   :  { %957 = vmatpush1.bf16.msra.mxu0 %v8318_v14  ;;  %998 = vmatpush1.bf16.msra.mxu1 %v8321_v15 }
 0x3c9   :  { %958 = vmatprep.subr.bf16.mxu0 %v8324_v17  ;;  %999 = vmatprep.subr.bf16.mxu1 %v8327_v19 }
 0x3cc   :  { %959 = vmatpush1.bf16.msra.mxu0 %v8330_v20  ;;  %1000 = vmatpush1.bf16.msra.mxu1 %v8333_v21 }
 0x3cd   :  { %960 = vmatprep.subr.bf16.mxu0 %v8336_v22  ;;  %1001 = vmatprep.subr.bf16.mxu1 %v8339_v24 }
 0x3d0   :  { %961 = vmatpush1.bf16.msra.mxu0 %v8342_v25  ;;  %1002 = vmatpush1.bf16.msra.mxu1 %v8345_v26 }
 0x3d1   :  { %962 = vmatprep.subr.bf16.mxu0 %v8348_v27  ;;  %1003 = vmatprep.subr.bf16.mxu1 %v8351_v28 }
 0x3d4   :  { %963 = vmatpush1.bf16.msra.mxu0 %v8354_v29  ;;  %1004 = vmatpush1.bf16.msra.mxu1 %v8357_v30 }
 0x3d5   :  { %964 = vmatprep.subr.bf16.mxu0 %v9013_v40  ;;  %1005 = vmatprep.subr.bf16.mxu1 %v9014_v8 }
 0x3d8   :  { %965 = vmatpush1.bf16.msra.mxu0 %v9015_v37  ;;  %1006 = vmatpush1.bf16.msra.mxu1 %v9016_v7 }
 0x3d9   :  { %966 = vmatprep.subr.bf16.mxu0 %v9017_v41  ;;  %1007 = vmatprep.subr.bf16.mxu1 %v9018_v36 }
 0x3dc   :  { %967 = vmatpush1.bf16.msra.mxu0 %v9019_v43  ;;  %1008 = vmatpush1.bf16.msra.mxu1 %v9020_v4  ;;  %v9031_v4 = vld [vmem:[#allocation39_spill] sm:$0xff]  ;;  %v9035_v43 = vld [vmem:[#allocation18_spill] sm:$0xff] }
 0x3dd   :  { %968 = vmatprep.subr.bf16.mxu0 %v9021_v9  ;;  %1009 = vmatprep.subr.bf16.mxu1 %v9022_v31  ;;  %v9032_v9 = vld [vmem:[#allocation40_spill] sm:$0xff]  ;;  %v9033_v31 = vld [vmem:[#allocation41_spill] sm:$0xff] }
 0x3e0   :  { %969 = vmatpush1.bf16.msra.mxu0 %v9023_v32  ;;  %1010 = vmatpush1.bf16.msra.mxu1 %v9024_v42  ;;  %v9034_v32 = vld [vmem:[#allocation42_spill] sm:$0xff] }
 0x3e1   :  { %970 = vmatprep.subr.bf16.mxu0 %v9025_v39  ;;  %1011 = vmatprep.subr.bf16.mxu1 %v9026_v18 }
 0x3e4   :  { %971 = vmatpush1.bf16.msra.mxu0 %v9027_v35  ;;  %1012 = vmatpush1.bf16.msra.mxu1 %v9028_v38 }
 0x3e5   :  { %972 = vmatprep.subr.bf16.mxu0 %v9029_v2  ;;  %1013 = vmatprep.subr.bf16.mxu1 %v9030_v34 }
 0x3e8   :  { %973 = vmatpush1.bf16.msra.mxu0 %v9031_v4  ;;  %1014 = vmatpush1.bf16.msra.mxu1 %v9032_v9 }
 0x3e9   :  { %1051 = vmatprep.subr.bf16.mxu0 %v9033_v31  ;;  %1092 = vmatprep.subr.bf16.mxu1 %v9034_v32 }
 0x47e   :  { %v867_v42 = vpop.f32.mrb[12].mxu0  ;;  %v908_v39 = vpop.f32.mrb[12].mxu1 }
 0x47f   :  { %v868_v18 = vadd.f32 %v867_v42, %v9035_v43  ;;  %v869_v36 = vpop.f32.mrb[13].mxu0  ;;  %v910_v35 = vpop.f32.mrb[13].mxu1  ;;  %v909_v32 = vadd.f32 %v908_v39, %v8228_v23  ;;  %v940_v39 = vld [vmem:[#allocation2 + $0x10] sm:$0xf] }
 0x480   :  { %v870_v38 = vadd.f32 %v869_v36, %v8215_v1  ;;  %v871_v41 = vpop.f32.mrb[14].mxu0  ;;  %v912_v2 = vpop.f32.mrb[14].mxu1  ;;  %v911_v31 = vadd.f32 %v910_v35, %v8222_v16 }
 0x481   :  { %v5894_v7 = vmul.f32 -1.442695, %v868_v18  ;;  %v872_v34 = vpop.f32.mrb[15].mxu0  ;;  %v913_v37 = vpop.f32.mrb[15].mxu1  ;;  %v9039_v2 = vld [vmem:[#allocation24_spill] sm:$0xff] }
 0x482   :  { %v5895_v4 = vmul.f32 -1.442695, %v870_v38  ;;  %v5896_v9 = vmul.f32 -1.442695, %v911_v31  ;;  %v9040_v34 = vld [vmem:[#allocation25_spill] sm:$0xff] }
 0x483   :  { %7399 = vpow2.f32 %v5894_v7 }
 0x484   :  { %7401 = vpow2.f32 %v5895_v4 }
 0x485   :  { %7403 = vpow2.f32 %v5896_v9 }
 0x486   :  { %7405 = vtanh.f32 %v909_v32 }
 0x48d   :  { %v7400_v8 = vpop.eup %7399 }
 0x48e   :  { %v7402_v42 = vpop.eup %7401  ;;  %v918_v43 = vadd.f32 1.0, %v7400_v8 }
 0x48f   :  { %v924_v40 = vadd.f32 1.0, %v7402_v42  ;;  %v7404_v41 = vpop.eup %7403  ;;  %v9041_v42 = vld [vmem:[#allocation26_spill] sm:$0xff] }
 0x490   :  { %7407 = vrcp.f32 %v918_v43  ;;  %v7406_v36 = vpop.eup %7405  ;;  %v931_v37 = vadd.f32 1.0, %v7404_v41  ;;  %v9038_v43 = vld [vmem:[#allocation23_spill] sm:$0xff] }
 0x491   :  { %7409 = vrcp.f32 %v924_v40  ;;  %v9037_v40 = vld [vmem:[#allocation22_spill] sm:$0xff]  ;;  %v9042_v41 = vld [vmem:[#allocation27_spill] sm:$0xff] }
 0x492   :  { %7411 = vrcp.f32 %v931_v37  ;;  %v9045_v37 = vld [vmem:[#allocation30_spill] sm:$0xff] }
 0x49a   :  { %v7408_v18 = vpop.eup %7407 }
 0x49b   :  { %v7410_v38 = vpop.eup %7409  ;;  %v935_v7 = vmul.f32 %v7408_v18, %v7406_v36  ;;  %v9043_v36 = vld [vmem:[#allocation28_spill] sm:$0xff]  ;;  %v9044_v18 = vld [vmem:[#allocation29_spill] sm:$0xff] }
 0x49c   :  { %v934_v4 = vmul.f32 %v7410_v38, %v8503_v33  ;;  %v7412_v9 = vpop.eup %7411  ;;  %v9036_v33 = vld [vmem:[#allocation21_spill] sm:$0xff]  ;;  %v9046_v38 = vld [vmem:[#allocation31_spill] sm:$0xff] }
 0x49e   :  { %v8575_v35 = vadd.f32 %v935_v7, %v934_v4  ;;  %v9047_v7 = vld [vmem:[#allocation32_spill] sm:$0xff]  ;;  %v9048_v4 = vld [vmem:[#allocation33_spill] sm:$0xff] }
 0x4a0   :  { %7413 = vtanh.f32 %v8575_v35 }
 0x4aa   :  { %v7414_v31 = vpop.eup %7413 }
 0x4ab   :  { %v938_v8 = vmul.f32 %v7414_v31, %v7412_v9  ;;  %v9049_v9 = vld [vmem:[#allocation34_spill] sm:$0xff]  ;;  %v9050_v31 = vld [vmem:[#allocation35_spill] sm:$0xff] }
 0x4ad   :  { %v941_v32 = vpack.c.bf16 %v938_v8, %v938_v8  ;;  %v9051_v8 = vld [vmem:[#allocation36_spill] sm:$0xff] }
 0x4af   :  { %974 = vmatprep.mubr.bf16.mxu0 %v941_v32  ;;  %1015 = vmatprep.mubr.bf16.mxu1 %v941_v32  ;;  %v9052_v32 = vld [vmem:[#allocation37_spill] sm:$0xff] }
 0x4b0   :  { %975 = vmatmul.mubr.bf16.vlgmr.msra.gmra.mrb[16].mxu0 %v940_v39  ;;  %1016 = vmatmul.mubr.bf16.vlgmr.msra.gmra.mrb[16].mxu1 %v940_v39  ;;  %v9053_v39 = vld [vmem:[#allocation38_spill] sm:$0xff] }
 0x4b1   :  { %1052 = vmatpush1.bf16.msra.mxu0 %v8234_v44  ;;  %1093 = vmatpush1.bf16.msra.mxu1 %v8237_v45 }
 0x4b2   :  { %1053 = vmatprep.subr.bf16.mxu0 %v8240_v46  ;;  %1094 = vmatprep.subr.bf16.mxu1 %v8243_v47 }
 0x4b5   :  { %1054 = vmatpush1.bf16.msra.mxu0 %v8246_v48  ;;  %1095 = vmatpush1.bf16.msra.mxu1 %v8249_v49 }
 0x4b6   :  { %1055 = vmatprep.subr.bf16.mxu0 %v8252_v50  ;;  %1096 = vmatprep.subr.bf16.mxu1 %v8255_v51 }
 0x4b9   :  { %1056 = vmatpush1.bf16.msra.mxu0 %v8258_v52  ;;  %1097 = vmatpush1.bf16.msra.mxu1 %v8261_v53 }
 0x4ba   :  { %1057 = vmatprep.subr.bf16.mxu0 %v8264_v54  ;;  %1098 = vmatprep.subr.bf16.mxu1 %v8267_v55 }
 0x4bd   :  { %1058 = vmatpush1.bf16.msra.mxu0 %v8270_v56  ;;  %1099 = vmatpush1.bf16.msra.mxu1 %v8273_v57 }
 0x4be   :  { %1059 = vmatprep.subr.bf16.mxu0 %v8276_v58  ;;  %1100 = vmatprep.subr.bf16.mxu1 %v8279_v59 }
 0x4c1   :  { %1060 = vmatpush1.bf16.msra.mxu0 %v8282_v60  ;;  %1101 = vmatpush1.bf16.msra.mxu1 %v8285_v61 }
 0x4c2   :  { %1061 = vmatprep.subr.bf16.mxu0 %v8288_v62  ;;  %1102 = vmatprep.subr.bf16.mxu1 %v8291_v63 }
 0x4c5   :  { %1062 = vmatpush1.bf16.msra.mxu0 %v8294_v0  ;;  %1103 = vmatpush1.bf16.msra.mxu1 %v8297_v3 }
 0x4c6   :  { %1063 = vmatprep.subr.bf16.mxu0 %v8300_v5  ;;  %1104 = vmatprep.subr.bf16.mxu1 %v8303_v6 }
 0x4c9   :  { %1064 = vmatpush1.bf16.msra.mxu0 %v8306_v10  ;;  %1105 = vmatpush1.bf16.msra.mxu1 %v8309_v11 }
 0x4ca   :  { %1065 = vmatprep.subr.bf16.mxu0 %v8312_v12  ;;  %1106 = vmatprep.subr.bf16.mxu1 %v8315_v13 }
 0x4cd   :  { %1066 = vmatpush1.bf16.msra.mxu0 %v8318_v14  ;;  %1107 = vmatpush1.bf16.msra.mxu1 %v8321_v15 }
 0x4ce   :  { %1067 = vmatprep.subr.bf16.mxu0 %v8324_v17  ;;  %1108 = vmatprep.subr.bf16.mxu1 %v8327_v19 }
 0x4d1   :  { %1068 = vmatpush1.bf16.msra.mxu0 %v8330_v20  ;;  %1109 = vmatpush1.bf16.msra.mxu1 %v8333_v21 }
 0x4d2   :  { %1069 = vmatprep.subr.bf16.mxu0 %v8336_v22  ;;  %1110 = vmatprep.subr.bf16.mxu1 %v8339_v24 }
 0x4d5   :  { %1070 = vmatpush1.bf16.msra.mxu0 %v8342_v25  ;;  %1111 = vmatpush1.bf16.msra.mxu1 %v8345_v26 }
 0x4d6   :  { %1071 = vmatprep.subr.bf16.mxu0 %v8348_v27  ;;  %1112 = vmatprep.subr.bf16.mxu1 %v8351_v28 }
 0x4d9   :  { %1072 = vmatpush1.bf16.msra.mxu0 %v8354_v29  ;;  %1113 = vmatpush1.bf16.msra.mxu1 %v8357_v30 }
 0x4da   :  { %1073 = vmatprep.subr.bf16.mxu0 %v9036_v33  ;;  %1114 = vmatprep.subr.bf16.mxu1 %v9037_v40 }
 0x4dd   :  { %1074 = vmatpush1.bf16.msra.mxu0 %v9038_v43  ;;  %1115 = vmatpush1.bf16.msra.mxu1 %v9039_v2 }
 0x4de   :  { %1075 = vmatprep.subr.bf16.mxu0 %v9040_v34  ;;  %1116 = vmatprep.subr.bf16.mxu1 %v9041_v42 }
 0x4e1   :  { %1076 = vmatpush1.bf16.msra.mxu0 %v9042_v41  ;;  %1117 = vmatpush1.bf16.msra.mxu1 %v9043_v36  ;;  %v9054_v36 = vld [vmem:[#allocation39_spill] sm:$0xff]  ;;  %v9058_v41 = vld [vmem:[#allocation18_spill] sm:$0xff] }
 0x4e2   :  { %1077 = vmatprep.subr.bf16.mxu0 %v9044_v18  ;;  %1118 = vmatprep.subr.bf16.mxu1 %v9045_v37  ;;  %v9055_v18 = vld [vmem:[#allocation40_spill] sm:$0xff]  ;;  %v9056_v37 = vld [vmem:[#allocation41_spill] sm:$0xff] }
 0x4e5   :  { %1078 = vmatpush1.bf16.msra.mxu0 %v9046_v38  ;;  %1119 = vmatpush1.bf16.msra.mxu1 %v9047_v7  ;;  %v9057_v38 = vld [vmem:[#allocation42_spill] sm:$0xff] }
 0x4e6   :  { %1079 = vmatprep.subr.bf16.mxu0 %v9048_v4  ;;  %1120 = vmatprep.subr.bf16.mxu1 %v9049_v9 }
 0x4e9   :  { %1080 = vmatpush1.bf16.msra.mxu0 %v9050_v31  ;;  %1121 = vmatpush1.bf16.msra.mxu1 %v9051_v8 }
 0x4ea   :  { %1081 = vmatprep.subr.bf16.mxu0 %v9052_v32  ;;  %1122 = vmatprep.subr.bf16.mxu1 %v9053_v39 }
 0x4ed   :  { %1082 = vmatpush1.bf16.msra.mxu0 %v9054_v36  ;;  %1123 = vmatpush1.bf16.msra.mxu1 %v9055_v18 }
 0x4ee   :  { %1160 = vmatprep.subr.bf16.mxu0 %v9056_v37  ;;  %1201 = vmatprep.subr.bf16.mxu1 %v9057_v38 }
 0x583   :  { %v976_v7 = vpop.f32.mrb[16].mxu0  ;;  %v1017_v4 = vpop.f32.mrb[16].mxu1 }
 0x584   :  { %v977_v9 = vadd.f32 %v976_v7, %v9058_v41  ;;  %v978_v42 = vpop.f32.mrb[17].mxu0  ;;  %v1019_v31 = vpop.f32.mrb[17].mxu1  ;;  %v1018_v38 = vadd.f32 %v1017_v4, %v8228_v23  ;;  %v1049_v4 = vld [vmem:[#allocation2 + $0x14] sm:$0xf] }
 0x585   :  { %v979_v8 = vadd.f32 %v978_v42, %v8215_v1  ;;  %v980_v34 = vpop.f32.mrb[18].mxu0  ;;  %v1021_v32 = vpop.f32.mrb[18].mxu1  ;;  %v1020_v37 = vadd.f32 %v1019_v31, %v8222_v16 }
 0x586   :  { %v5897_v2 = vmul.f32 -1.442695, %v977_v9  ;;  %v981_v39 = vpop.f32.mrb[19].mxu0  ;;  %v1022_v43 = vpop.f32.mrb[19].mxu1 }
 0x587   :  { %v5898_v36 = vmul.f32 -1.442695, %v979_v8  ;;  %v5899_v18 = vmul.f32 -1.442695, %v1020_v37 }
 0x588   :  { %7415 = vpow2.f32 %v5897_v2 }
 0x589   :  { %7417 = vpow2.f32 %v5898_v36 }
 0x58a   :  { %7419 = vpow2.f32 %v5899_v18 }
 0x58b   :  { %7421 = vtanh.f32 %v1018_v38 }
 0x592   :  { %v7416_v40 = vpop.eup %7415 }
 0x593   :  { %v7418_v7 = vpop.eup %7417  ;;  %v1027_v41 = vadd.f32 1.0, %v7416_v40 }
 0x594   :  { %v1033_v33 = vadd.f32 1.0, %v7418_v7  ;;  %v7420_v34 = vpop.eup %7419 }
 0x595   :  { %7423 = vrcp.f32 %v1027_v41  ;;  %v7422_v42 = vpop.eup %7421  ;;  %v1040_v43 = vadd.f32 1.0, %v7420_v34 }
 0x596   :  { %7425 = vrcp.f32 %v1033_v33 }
 0x597   :  { %7427 = vrcp.f32 %v1040_v43 }
 0x59f   :  { %v7424_v9 = vpop.eup %7423 }
 0x5a0   :  { %v7426_v8 = vpop.eup %7425  ;;  %v1044_v2 = vmul.f32 %v7424_v9, %v7422_v42 }
 0x5a1   :  { %v1043_v36 = vmul.f32 %v7426_v8, %v8575_v35  ;;  %v7428_v18 = vpop.eup %7427 }
 0x5a3   :  { %v8647_v31 = vadd.f32 %v1044_v2, %v1043_v36  ;;  %v1158_v36 = vld [vmem:[#allocation2 + $0x18] sm:$0xf] }
 0x5a5   :  { %7429 = vtanh.f32 %v8647_v31 }
 0x5af   :  { %v7430_v37 = vpop.eup %7429 }
 0x5b0   :  { %v1047_v40 = vmul.f32 %v7430_v37, %v7428_v18  ;;  %v7607_v18 = vld [vmem:[#allocation7] ss:$16 sps:$4 sm:$0xff]   ;;  %v7608_v37 = vld [vmem:[#allocation7 + $0x8] ss:$16 sps:$4 sm:$0xff]  }
 0x5b2   :  { %v1050_v38 = vpack.c.bf16 %v1047_v40, %v1047_v40  ;;  %v7609_v40 = vld [vmem:[#allocation7 + $0x24] ss:$16 sps:$4 sm:$0xff]  }
 0x5b4   :  { %1083 = vmatprep.mubr.bf16.mxu0 %v1050_v38  ;;  %1124 = vmatprep.mubr.bf16.mxu1 %v1050_v38  ;;  %v7611_v38 = vld [vmem:[#allocation7 + $0x20] ss:$16 sps:$4 sm:$0xff]  }
 0x5b5   :  { %1084 = vmatmul.mubr.bf16.vlgmr.msra.gmra.mrb[20].mxu0 %v1049_v4  ;;  %1125 = vmatmul.mubr.bf16.vlgmr.msra.gmra.mrb[20].mxu1 %v1049_v4  ;;  %v7612_v4 = vld [vmem:[#allocation7 + $0x28] ss:$16 sps:$4 sm:$0xff]  }
 0x5b6   :  { %1161 = vmatpush1.bf16.msra.mxu0 %v8234_v44  ;;  %1202 = vmatpush1.bf16.msra.mxu1 %v8237_v45  ;;  %v9059_v44 = vld [vmem:[#allocation21_spill] sm:$0xff]  ;;  %v9060_v45 = vld [vmem:[#allocation22_spill] sm:$0xff] }
 0x5b7   :  { %1162 = vmatprep.subr.bf16.mxu0 %v8240_v46  ;;  %1203 = vmatprep.subr.bf16.mxu1 %v8243_v47  ;;  %v9061_v46 = vld [vmem:[#allocation23_spill] sm:$0xff]  ;;  %v9062_v47 = vld [vmem:[#allocation24_spill] sm:$0xff] }
 0x5ba   :  { %1163 = vmatpush1.bf16.msra.mxu0 %v8246_v48  ;;  %1204 = vmatpush1.bf16.msra.mxu1 %v8249_v49  ;;  %v9063_v48 = vld [vmem:[#allocation25_spill] sm:$0xff]  ;;  %v9064_v49 = vld [vmem:[#allocation26_spill] sm:$0xff] }
 0x5bb   :  { %1164 = vmatprep.subr.bf16.mxu0 %v8252_v50  ;;  %1205 = vmatprep.subr.bf16.mxu1 %v8255_v51  ;;  %v9065_v50 = vld [vmem:[#allocation27_spill] sm:$0xff]  ;;  %v9066_v51 = vld [vmem:[#allocation28_spill] sm:$0xff] }
 0x5be   :  { %1165 = vmatpush1.bf16.msra.mxu0 %v8258_v52  ;;  %1206 = vmatpush1.bf16.msra.mxu1 %v8261_v53  ;;  %v9067_v52 = vld [vmem:[#allocation29_spill] sm:$0xff]  ;;  %v9068_v53 = vld [vmem:[#allocation30_spill] sm:$0xff] }
 0x5bf   :  { %1166 = vmatprep.subr.bf16.mxu0 %v8264_v54  ;;  %1207 = vmatprep.subr.bf16.mxu1 %v8267_v55  ;;  %v9069_v54 = vld [vmem:[#allocation31_spill] sm:$0xff]  ;;  %v9070_v55 = vld [vmem:[#allocation32_spill] sm:$0xff] }
 0x5c2   :  { %1167 = vmatpush1.bf16.msra.mxu0 %v8270_v56  ;;  %1208 = vmatpush1.bf16.msra.mxu1 %v8273_v57  ;;  %v9071_v56 = vld [vmem:[#allocation33_spill] sm:$0xff]  ;;  %v9072_v57 = vld [vmem:[#allocation34_spill] sm:$0xff] }
 0x5c3   :  { %1168 = vmatprep.subr.bf16.mxu0 %v8276_v58  ;;  %1209 = vmatprep.subr.bf16.mxu1 %v8279_v59  ;;  %v9073_v58 = vld [vmem:[#allocation35_spill] sm:$0xff]  ;;  %v9074_v59 = vld [vmem:[#allocation36_spill] sm:$0xff] }
 0x5c6   :  { %1169 = vmatpush1.bf16.msra.mxu0 %v8282_v60  ;;  %1210 = vmatpush1.bf16.msra.mxu1 %v8285_v61  ;;  %v9075_v60 = vld [vmem:[#allocation37_spill] sm:$0xff]  ;;  %v9076_v61 = vld [vmem:[#allocation38_spill] sm:$0xff] }
 0x5c7   :  { %1170 = vmatprep.subr.bf16.mxu0 %v8288_v62  ;;  %1211 = vmatprep.subr.bf16.mxu1 %v8291_v63  ;;  %v9077_v62 = vld [vmem:[#allocation39_spill] sm:$0xff]  ;;  %v9078_v63 = vld [vmem:[#allocation40_spill] sm:$0xff] }
 0x5ca   :  { %1171 = vmatpush1.bf16.msra.mxu0 %v8294_v0  ;;  %1212 = vmatpush1.bf16.msra.mxu1 %v8297_v3  ;;  %v9079_v0 = vld [vmem:[#allocation41_spill] sm:$0xff]  ;;  %v9080_v3 = vld [vmem:[#allocation42_spill] sm:$0xff] }
 0x5cb   :  { %1172 = vmatprep.subr.bf16.mxu0 %v8300_v5  ;;  %1213 = vmatprep.subr.bf16.mxu1 %v8303_v6 }
 0x5ce   :  { %1173 = vmatpush1.bf16.msra.mxu0 %v8306_v10  ;;  %1214 = vmatpush1.bf16.msra.mxu1 %v8309_v11  ;;  %v9081_v10 = vld [vmem:[#allocation18_spill] sm:$0xff] }
 0x5cf   :  { %1174 = vmatprep.subr.bf16.mxu0 %v8312_v12  ;;  %1215 = vmatprep.subr.bf16.mxu1 %v8315_v13 }
 0x5d2   :  { %1175 = vmatpush1.bf16.msra.mxu0 %v8318_v14  ;;  %1216 = vmatpush1.bf16.msra.mxu1 %v8321_v15 }
 0x5d3   :  { %1176 = vmatprep.subr.bf16.mxu0 %v8324_v17  ;;  %1217 = vmatprep.subr.bf16.mxu1 %v8327_v19 }
 0x5d6   :  { %1177 = vmatpush1.bf16.msra.mxu0 %v8330_v20  ;;  %1218 = vmatpush1.bf16.msra.mxu1 %v8333_v21 }
 0x5d7   :  { %1178 = vmatprep.subr.bf16.mxu0 %v8336_v22  ;;  %1219 = vmatprep.subr.bf16.mxu1 %v8339_v24 }
 0x5da   :  { %1179 = vmatpush1.bf16.msra.mxu0 %v8342_v25  ;;  %1220 = vmatpush1.bf16.msra.mxu1 %v8345_v26 }
 0x5db   :  { %1180 = vmatprep.subr.bf16.mxu0 %v8348_v27  ;;  %1221 = vmatprep.subr.bf16.mxu1 %v8351_v28 }
 0x5de   :  { %1181 = vmatpush1.bf16.msra.mxu0 %v8354_v29  ;;  %1222 = vmatpush1.bf16.msra.mxu1 %v8357_v30 }
 0x5df   :  { %1182 = vmatprep.subr.bf16.mxu0 %v9059_v44  ;;  %1223 = vmatprep.subr.bf16.mxu1 %v9060_v45  ;;  %v7613_v44 = vld [vmem:[#allocation7 + $0x44] ss:$16 sps:$4 sm:$0xff]   ;;  %v7614_v45 = vld [vmem:[#allocation7 + $0x4c] ss:$16 sps:$4 sm:$0xff]  }
 0x5e2   :  { %1183 = vmatpush1.bf16.msra.mxu0 %v9061_v46  ;;  %1224 = vmatpush1.bf16.msra.mxu1 %v9062_v47  ;;  %v7615_v46 = vld [vmem:[#allocation7 + $0x40] ss:$16 sps:$4 sm:$0xff]   ;;  %v7616_v47 = vld [vmem:[#allocation7 + $0x48] ss:$16 sps:$4 sm:$0xff]  }
 0x5e3   :  { %1184 = vmatprep.subr.bf16.mxu0 %v9063_v48  ;;  %1225 = vmatprep.subr.bf16.mxu1 %v9064_v49  ;;  %v7617_v48 = vld [vmem:[#allocation7 + $0x64] ss:$16 sps:$4 sm:$0xff]   ;;  %v7618_v49 = vld [vmem:[#allocation7 + $0x6c] ss:$16 sps:$4 sm:$0xff]  }
 0x5e6   :  { %1185 = vmatpush1.bf16.msra.mxu0 %v9065_v50  ;;  %1226 = vmatpush1.bf16.msra.mxu1 %v9066_v51  ;;  %v7619_v50 = vld [vmem:[#allocation7 + $0x60] ss:$16 sps:$4 sm:$0xff]   ;;  %v7620_v51 = vld [vmem:[#allocation7 + $0x68] ss:$16 sps:$4 sm:$0xff]  }
 0x5e7   :  { %1186 = vmatprep.subr.bf16.mxu0 %v9067_v52  ;;  %1227 = vmatprep.subr.bf16.mxu1 %v9068_v53  ;;  %v7621_v52 = vld [vmem:[#allocation7 + $0x84] ss:$16 sps:$4 sm:$0xff]   ;;  %v7622_v53 = vld [vmem:[#allocation7 + $0x8c] ss:$16 sps:$4 sm:$0xff]  }
 0x5ea   :  { %1187 = vmatpush1.bf16.msra.mxu0 %v9069_v54  ;;  %1228 = vmatpush1.bf16.msra.mxu1 %v9070_v55  ;;  %v7623_v54 = vld [vmem:[#allocation7 + $0x80] ss:$16 sps:$4 sm:$0xff]   ;;  %v7624_v55 = vld [vmem:[#allocation7 + $0x88] ss:$16 sps:$4 sm:$0xff]  }
 0x5eb   :  { %1188 = vmatprep.subr.bf16.mxu0 %v9071_v56  ;;  %1229 = vmatprep.subr.bf16.mxu1 %v9072_v57  ;;  %v7625_v56 = vld [vmem:[#allocation7 + $0xa4] ss:$16 sps:$4 sm:$0xff]   ;;  %v7626_v57 = vld [vmem:[#allocation7 + $0xac] ss:$16 sps:$4 sm:$0xff]  }
 0x5ee   :  { %1189 = vmatpush1.bf16.msra.mxu0 %v9073_v58  ;;  %1230 = vmatpush1.bf16.msra.mxu1 %v9074_v59  ;;  %v7627_v58 = vld [vmem:[#allocation7 + $0xa0] ss:$16 sps:$4 sm:$0xff]   ;;  %v7628_v59 = vld [vmem:[#allocation7 + $0xa8] ss:$16 sps:$4 sm:$0xff]  }
 0x5ef   :  { %1190 = vmatprep.subr.bf16.mxu0 %v9075_v60  ;;  %1231 = vmatprep.subr.bf16.mxu1 %v9076_v61  ;;  %v7629_v60 = vld [vmem:[#allocation7 + $0xc4] ss:$16 sps:$4 sm:$0xff]   ;;  %v7630_v61 = vld [vmem:[#allocation7 + $0xcc] ss:$16 sps:$4 sm:$0xff]  }
 0x5f2   :  { %1191 = vmatpush1.bf16.msra.mxu0 %v9077_v62  ;;  %1232 = vmatpush1.bf16.msra.mxu1 %v9078_v63  ;;  %v7631_v62 = vld [vmem:[#allocation7 + $0xc0] ss:$16 sps:$4 sm:$0xff]   ;;  %v7632_v63 = vld [vmem:[#allocation7 + $0xc8] ss:$16 sps:$4 sm:$0xff]  }
 0x5f3   :  { %1269 = vmatprep.subr.bf16.mxu0 %v9079_v0  ;;  %1310 = vmatprep.subr.bf16.mxu1 %v9080_v3  ;;  %v7633_v0 = vld [vmem:[#allocation7 + $0xe4] ss:$16 sps:$4 sm:$0xff]   ;;  %v7634_v3 = vld [vmem:[#allocation7 + $0xec] ss:$16 sps:$4 sm:$0xff]  }
 0x688   :  { %v1085_v5 = vpop.f32.mrb[20].mxu0  ;;  %v1126_v6 = vpop.f32.mrb[20].mxu1 }
 0x689   :  { %v1086_v11 = vadd.f32 %v1085_v5, %v9081_v10  ;;  %v1087_v12 = vpop.f32.mrb[21].mxu0  ;;  %v1128_v13 = vpop.f32.mrb[21].mxu1  ;;  %v1127_v26 = vadd.f32 %v1126_v6, %v8228_v23  ;;  %v7635_v5 = vld [vmem:[#allocation7 + $0xe0] ss:$16 sps:$4 sm:$0xff]   ;;  %v7636_v6 = vld [vmem:[#allocation7 + $0xe8] ss:$16 sps:$4 sm:$0xff]  }
 0x68a   :  { %v1088_v14 = vadd.f32 %v1087_v12, %v8215_v1  ;;  %v1089_v15 = vpop.f32.mrb[22].mxu0  ;;  %v1130_v17 = vpop.f32.mrb[22].mxu1  ;;  %v1129_v24 = vadd.f32 %v1128_v13, %v8222_v16  ;;  %v7638_v12 = vld [vmem:[#allocation7 + $0x10c] ss:$16 sps:$4 sm:$0xff]   ;;  %v7639_v13 = vld [vmem:[#allocation7 + $0x100] ss:$16 sps:$4 sm:$0xff]  }
 0x68b   :  { %v5900_v19 = vmul.f32 -1.442695, %v1086_v11  ;;  %v1090_v20 = vpop.f32.mrb[23].mxu0  ;;  %v1131_v21 = vpop.f32.mrb[23].mxu1  ;;  %v7637_v11 = vld [vmem:[#allocation7 + $0x104] ss:$16 sps:$4 sm:$0xff]  }
 0x68c   :  { %v5901_v22 = vmul.f32 -1.442695, %v1088_v14  ;;  %v5902_v25 = vmul.f32 -1.442695, %v1129_v24  ;;  %v7640_v14 = vld [vmem:[#allocation7 + $0x108] ss:$16 sps:$4 sm:$0xff]  }
 0x68d   :  { %7431 = vpow2.f32 %v5900_v19  ;;  %v7641_v15 = vld [vmem:[#allocation7 + $0x124] ss:$16 sps:$4 sm:$0xff]   ;;  %v7642_v17 = vld [vmem:[#allocation7 + $0x12c] ss:$16 sps:$4 sm:$0xff]   ;;  %v7643_v19 = vld [vmem:[#allocation7 + $0x120] ss:$16 sps:$4 sm:$0xff]  }
 0x68e   :  { %7433 = vpow2.f32 %v5901_v22  ;;  %v7644_v20 = vld [vmem:[#allocation7 + $0x128] ss:$16 sps:$4 sm:$0xff]   ;;  %v7645_v21 = vld [vmem:[#allocation7 + $0x144] ss:$16 sps:$4 sm:$0xff]   ;;  %v7646_v22 = vld [vmem:[#allocation7 + $0x14c] ss:$16 sps:$4 sm:$0xff]  }
 0x68f   :  { %7435 = vpow2.f32 %v5902_v25  ;;  %v7647_v24 = vld [vmem:[#allocation7 + $0x140] ss:$16 sps:$4 sm:$0xff]   ;;  %v7648_v25 = vld [vmem:[#allocation7 + $0x148] ss:$16 sps:$4 sm:$0xff]  }
 0x690   :  { %7437 = vtanh.f32 %v1127_v26  ;;  %v7649_v26 = vld [vmem:[#allocation7 + $0x164] ss:$16 sps:$4 sm:$0xff]  }
 0x697   :  { %v7432_v27 = vpop.eup %7431 }
 0x698   :  { %v7434_v28 = vpop.eup %7433  ;;  %v1136_v29 = vadd.f32 1.0, %v7432_v27  ;;  %v7650_v27 = vld [vmem:[#allocation7 + $0x16c] ss:$16 sps:$4 sm:$0xff]  }
 0x699   :  { %v1142_v30 = vadd.f32 1.0, %v7434_v28  ;;  %v7436_v35 = vpop.eup %7435  ;;  %v7651_v28 = vld [vmem:[#allocation7 + $0x160] ss:$16 sps:$4 sm:$0xff]  }
 0x69a   :  { %7439 = vrcp.f32 %v1136_v29  ;;  %v7438_v33 = vpop.eup %7437  ;;  %v1149_v32 = vadd.f32 1.0, %v7436_v35  ;;  %v7652_v29 = vld [vmem:[#allocation7 + $0x168] ss:$16 sps:$4 sm:$0xff]   ;;  %v7654_v35 = vld [vmem:[#allocation7 + $0x18c] ss:$16 sps:$4 sm:$0xff]  }
 0x69b   :  { %7441 = vrcp.f32 %v1142_v30  ;;  %v7653_v30 = vld [vmem:[#allocation7 + $0x184] ss:$16 sps:$4 sm:$0xff]  }
 0x69c   :  { %7443 = vrcp.f32 %v1149_v32  ;;  %v7657_v32 = vld [vmem:[#allocation7 + $0x1a4] ss:$16 sps:$4 sm:$0xff]  }
 0x6a4   :  { %v7440_v41 = vpop.eup %7439 }
 0x6a5   :  { %v7442_v39 = vpop.eup %7441  ;;  %v1153_v7 = vmul.f32 %v7440_v41, %v7438_v33  ;;  %v7655_v33 = vld [vmem:[#allocation7 + $0x180] ss:$16 sps:$4 sm:$0xff]   ;;  %v7656_v41 = vld [vmem:[#allocation7 + $0x188] ss:$16 sps:$4 sm:$0xff]  }
 0x6a6   :  { %v1152_v34 = vmul.f32 %v7442_v39, %v8647_v31  ;;  %v7444_v9 = vpop.eup %7443  ;;  %v7610_v31 = vld [vmem:[#allocation7 + $0x2c] ss:$16 sps:$4 sm:$0xff]  }
 0x6a7   :  { %v7658_v39 = vld [vmem:[#allocation7 + $0x1ac] ss:$16 sps:$4 sm:$0xff]  }
 0x6a8   :  { %v8719_v42 = vadd.f32 %v1153_v7, %v1152_v34  ;;  %v7659_v7 = vld [vmem:[#allocation7 + $0x1a0] ss:$16 sps:$4 sm:$0xff]   ;;  %v7660_v34 = vld [vmem:[#allocation7 + $0x1a8] ss:$16 sps:$4 sm:$0xff]  }
 0x6aa   :  { %7445 = vtanh.f32 %v8719_v42 }
 0x6b4   :  { %v7446_v43 = vpop.eup %7445 }
 0x6b5   :  { %v1156_v8 = vmul.f32 %v7446_v43, %v7444_v9  ;;  %v7661_v9 = vld [vmem:[#allocation7 + $0x1c4] ss:$16 sps:$4 sm:$0xff]   ;;  %v7662_v43 = vld [vmem:[#allocation7 + $0x1cc] ss:$16 sps:$4 sm:$0xff]  }
 0x6b7   :  { %v1159_v2 = vpack.c.bf16 %v1156_v8, %v1156_v8  ;;  %v7663_v8 = vld [vmem:[#allocation7 + $0x1c0] ss:$16 sps:$4 sm:$0xff]  }
 0x6b9   :  { %1192 = vmatprep.mubr.bf16.mxu0 %v1159_v2  ;;  %1233 = vmatprep.mubr.bf16.mxu1 %v1159_v2  ;;  %v7664_v2 = vld [vmem:[#allocation7 + $0x1c8] ss:$16 sps:$4 sm:$0xff]  }
 0x6ba   :  { %1193 = vmatmul.mubr.bf16.vlgmr.msra.gmra.mrb[24].mxu0 %v1158_v36  ;;  %1234 = vmatmul.mubr.bf16.vlgmr.msra.gmra.mrb[24].mxu1 %v1158_v36  ;;  %v7665_v36 = vld [vmem:[#allocation7 + $0x1e4] ss:$16 sps:$4 sm:$0xff]  }
 0x6bb   :  { %1270 = vmatpush1.bf16.msra.mxu0 %v7607_v18  ;;  %1311 = vmatpush1.bf16.msra.mxu1 %v7608_v37  ;;  %v7666_v18 = vld [vmem:[#allocation7 + $0x1ec] ss:$16 sps:$4 sm:$0xff]   ;;  %v7667_v37 = vld [vmem:[#allocation7 + $0x1e0] ss:$16 sps:$4 sm:$0xff]  }
 0x6bc   :  { %1271 = vmatprep.subr.bf16.mxu0 %v7609_v40  ;;  %1312 = vmatprep.subr.bf16.mxu1 %v7610_v31  ;;  %v7668_v40 = vld [vmem:[#allocation7 + $0x1e8] ss:$16 sps:$4 sm:$0xff]   ;;  %v6681_v31 = vld [vmem:[#allocation8 + $0x4] ss:$16 sps:$4 sm:$0xff]  }
 0x6bf   :  { %1272 = vmatpush1.bf16.msra.mxu0 %v7611_v38  ;;  %1313 = vmatpush1.bf16.msra.mxu1 %v7612_v4  ;;  %v6693_v38 = vld [vmem:[#allocation8 + $0xc] ss:$16 sps:$4 sm:$0xff]  }
 0x6c0   :  { %1273 = vmatprep.subr.bf16.mxu0 %v7613_v44  ;;  %1314 = vmatprep.subr.bf16.mxu1 %v7614_v45 }
 0x6c3   :  { %1274 = vmatpush1.bf16.msra.mxu0 %v7615_v46  ;;  %1315 = vmatpush1.bf16.msra.mxu1 %v7616_v47 }
 0x6c4   :  { %1275 = vmatprep.subr.bf16.mxu0 %v7617_v48  ;;  %1316 = vmatprep.subr.bf16.mxu1 %v7618_v49 }
 0x6c7   :  { %1276 = vmatpush1.bf16.msra.mxu0 %v7619_v50  ;;  %1317 = vmatpush1.bf16.msra.mxu1 %v7620_v51 }
 0x6c8   :  { %1277 = vmatprep.subr.bf16.mxu0 %v7621_v52  ;;  %1318 = vmatprep.subr.bf16.mxu1 %v7622_v53 }
 0x6cb   :  { %1278 = vmatpush1.bf16.msra.mxu0 %v7623_v54  ;;  %1319 = vmatpush1.bf16.msra.mxu1 %v7624_v55 }
 0x6cc   :  { %1279 = vmatprep.subr.bf16.mxu0 %v7625_v56  ;;  %1320 = vmatprep.subr.bf16.mxu1 %v7626_v57 }
 0x6cf   :  { %1280 = vmatpush1.bf16.msra.mxu0 %v7627_v58  ;;  %1321 = vmatpush1.bf16.msra.mxu1 %v7628_v59 }
 0x6d0   :  { %1281 = vmatprep.subr.bf16.mxu0 %v7629_v60  ;;  %1322 = vmatprep.subr.bf16.mxu1 %v7630_v61 }
 0x6d3   :  { %1282 = vmatpush1.bf16.msra.mxu0 %v7631_v62  ;;  %1323 = vmatpush1.bf16.msra.mxu1 %v7632_v63 }
 0x6d4   :  { %1283 = vmatprep.subr.bf16.mxu0 %v7633_v0  ;;  %1324 = vmatprep.subr.bf16.mxu1 %v7634_v3 }
 0x6d7   :  { %1284 = vmatpush1.bf16.msra.mxu0 %v7635_v5  ;;  %1325 = vmatpush1.bf16.msra.mxu1 %v7636_v6 }
 0x6d8   :  { %1285 = vmatprep.subr.bf16.mxu0 %v7637_v11  ;;  %1326 = vmatprep.subr.bf16.mxu1 %v7638_v12 }
 0x6db   :  { %1286 = vmatpush1.bf16.msra.mxu0 %v7639_v13  ;;  %1327 = vmatpush1.bf16.msra.mxu1 %v7640_v14 }
 0x6dc   :  { %1287 = vmatprep.subr.bf16.mxu0 %v7641_v15  ;;  %1328 = vmatprep.subr.bf16.mxu1 %v7642_v17 }
 0x6df   :  { %1288 = vmatpush1.bf16.msra.mxu0 %v7643_v19  ;;  %1329 = vmatpush1.bf16.msra.mxu1 %v7644_v20  ;;  %v1267_v19 = vld [vmem:[#allocation2 + $0x1c] sm:$0xf]  ;;  %v6679_v20 = vld [vmem:[#allocation8] ss:$16 sps:$4 sm:$0xff]  }
 0x6e0   :  { %1289 = vmatprep.subr.bf16.mxu0 %v7645_v21  ;;  %1330 = vmatprep.subr.bf16.mxu1 %v7646_v22  ;;  %v6691_v21 = vld [vmem:[#allocation8 + $0x8] ss:$16 sps:$4 sm:$0xff]   ;;  %v6684_v22 = vld [vmem:[#allocation8 + $0x24] ss:$16 sps:$4 sm:$0xff]  }
 0x6e3   :  { %1290 = vmatpush1.bf16.msra.mxu0 %v7647_v24  ;;  %1331 = vmatpush1.bf16.msra.mxu1 %v7648_v25  ;;  %v6682_v24 = vld [vmem:[#allocation8 + $0x20] ss:$16 sps:$4 sm:$0xff]  }
 0x6e4   :  { %1291 = vmatprep.subr.bf16.mxu0 %v7649_v26  ;;  %1332 = vmatprep.subr.bf16.mxu1 %v7650_v27  ;;  %v6685_v25 = vld [vmem:[#allocation8 + $0x40] ss:$16 sps:$4 sm:$0xff]   ;;  %v6690_v26 = vld [vmem:[#allocation8 + $0x64] ss:$16 sps:$4 sm:$0xff]  }
 0x6e5   :  { %v6688_v27 = vld [vmem:[#allocation8 + $0x60] ss:$16 sps:$4 sm:$0xff]  }
 0x6e7   :  { %1292 = vmatpush1.bf16.msra.mxu0 %v7651_v28  ;;  %1333 = vmatpush1.bf16.msra.mxu1 %v7652_v29  ;;  %v6696_v28 = vld [vmem:[#allocation8 + $0x84] ss:$16 sps:$4 sm:$0xff]   ;;  %v6699_v29 = vld [vmem:[#allocation8 + $0x2c] ss:$16 sps:$4 sm:$0xff]  }
 0x6e8   :  { %1293 = vmatprep.subr.bf16.mxu0 %v7653_v30  ;;  %1334 = vmatprep.subr.bf16.mxu1 %v7654_v35  ;;  %v6694_v30 = vld [vmem:[#allocation8 + $0x80] ss:$16 sps:$4 sm:$0xff]   ;;  %v6697_v35 = vld [vmem:[#allocation8 + $0x28] ss:$16 sps:$4 sm:$0xff]  }
 0x6eb   :  { %1294 = vmatpush1.bf16.msra.mxu0 %v7655_v33  ;;  %1335 = vmatpush1.bf16.msra.mxu1 %v7656_v41  ;;  %v6702_v33 = vld [vmem:[#allocation8 + $0xa4] ss:$16 sps:$4 sm:$0xff]   ;;  %v6705_v41 = vld [vmem:[#allocation8 + $0x4c] ss:$16 sps:$4 sm:$0xff]  }
 0x6ec   :  { %1295 = vmatprep.subr.bf16.mxu0 %v7657_v32  ;;  %1336 = vmatprep.subr.bf16.mxu1 %v7658_v39  ;;  %v6700_v32 = vld [vmem:[#allocation8 + $0xa0] ss:$16 sps:$4 sm:$0xff]   ;;  %v6703_v39 = vld [vmem:[#allocation8 + $0x48] ss:$16 sps:$4 sm:$0xff]  }
 0x6ef   :  { %1296 = vmatpush1.bf16.msra.mxu0 %v7659_v7  ;;  %1337 = vmatpush1.bf16.msra.mxu1 %v7660_v34  ;;  %v6708_v7 = vld [vmem:[#allocation8 + $0xc4] ss:$16 sps:$4 sm:$0xff]   ;;  %v6711_v34 = vld [vmem:[#allocation8 + $0x6c] ss:$16 sps:$4 sm:$0xff]  }
 0x6f0   :  { %1297 = vmatprep.subr.bf16.mxu0 %v7661_v9  ;;  %1338 = vmatprep.subr.bf16.mxu1 %v7662_v43  ;;  %v6706_v9 = vld [vmem:[#allocation8 + $0xc0] ss:$16 sps:$4 sm:$0xff]   ;;  %v6709_v43 = vld [vmem:[#allocation8 + $0x68] ss:$16 sps:$4 sm:$0xff]  }
 0x6f3   :  { %1298 = vmatpush1.bf16.msra.mxu0 %v7663_v8  ;;  %1339 = vmatpush1.bf16.msra.mxu1 %v7664_v2  ;;  %v6714_v8 = vld [vmem:[#allocation8 + $0xe4] ss:$16 sps:$4 sm:$0xff]   ;;  %v6717_v2 = vld [vmem:[#allocation8 + $0x8c] ss:$16 sps:$4 sm:$0xff]  }
 0x6f4   :  { %1299 = vmatprep.subr.bf16.mxu0 %v7665_v36  ;;  %1340 = vmatprep.subr.bf16.mxu1 %v7666_v18  ;;  %v6712_v36 = vld [vmem:[#allocation8 + $0xe0] ss:$16 sps:$4 sm:$0xff]   ;;  %v6715_v18 = vld [vmem:[#allocation8 + $0x88] ss:$16 sps:$4 sm:$0xff]  }
 0x6f7   :  { %1300 = vmatpush1.bf16.msra.mxu0 %v7667_v37  ;;  %1341 = vmatpush1.bf16.msra.mxu1 %v7668_v40  ;;  %v6720_v37 = vld [vmem:[#allocation8 + $0x104] ss:$16 sps:$4 sm:$0xff]   ;;  %v6723_v40 = vld [vmem:[#allocation8 + $0xac] ss:$16 sps:$4 sm:$0xff]  }
 0x6f8   :  { %1790 = vmatprep.subr.bf16.mxu0 %v6681_v31  ;;  %1831 = vmatprep.subr.bf16.mxu1 %v6693_v38  ;;  %v6718_v31 = vld [vmem:[#allocation8 + $0x100] ss:$16 sps:$4 sm:$0xff]   ;;  %v6721_v38 = vld [vmem:[#allocation8 + $0xa8] ss:$16 sps:$4 sm:$0xff]  }
 0x78d   :  { %v1194_v4 = vpop.f32.mrb[24].mxu0  ;;  %v1235_v44 = vpop.f32.mrb[24].mxu1 }
 0x78e   :  { %v1195_v45 = vadd.f32 %v1194_v4, %v9081_v10  ;;  %v1196_v46 = vpop.f32.mrb[25].mxu0  ;;  %v1237_v47 = vpop.f32.mrb[25].mxu1  ;;  %v1236_v57 = vadd.f32 %v1235_v44, %v8228_v23  ;;  %v6726_v4 = vld [vmem:[#allocation8 + $0x124] ss:$16 sps:$4 sm:$0xff]   ;;  %v6729_v44 = vld [vmem:[#allocation8 + $0xcc] ss:$16 sps:$4 sm:$0xff]  }
 0x78f   :  { %v1197_v48 = vadd.f32 %v1196_v46, %v8215_v1  ;;  %v1198_v49 = vpop.f32.mrb[26].mxu0  ;;  %v1239_v50 = vpop.f32.mrb[26].mxu1  ;;  %v1238_v55 = vadd.f32 %v1237_v47, %v8222_v16  ;;  %v6727_v46 = vld [vmem:[#allocation8 + $0xc8] ss:$16 sps:$4 sm:$0xff]   ;;  %v6732_v47 = vld [vmem:[#allocation8 + $0x144] ss:$16 sps:$4 sm:$0xff]  }
 0x790   :  { %v5903_v51 = vmul.f32 -1.442695, %v1195_v45  ;;  %v1199_v52 = vpop.f32.mrb[27].mxu0  ;;  %v1240_v53 = vpop.f32.mrb[27].mxu1  ;;  %v6724_v45 = vld [vmem:[#allocation8 + $0x120] ss:$16 sps:$4 sm:$0xff]  }
 0x791   :  { %v5904_v54 = vmul.f32 -1.442695, %v1197_v48  ;;  %v5905_v56 = vmul.f32 -1.442695, %v1238_v55  ;;  %v6735_v48 = vld [vmem:[#allocation8 + $0xec] ss:$16 sps:$4 sm:$0xff]  }
 0x792   :  { %7447 = vpow2.f32 %v5903_v51  ;;  %v6730_v49 = vld [vmem:[#allocation8 + $0x140] ss:$16 sps:$4 sm:$0xff]   ;;  %v6733_v50 = vld [vmem:[#allocation8 + $0xe8] ss:$16 sps:$4 sm:$0xff]   ;;  %v6738_v51 = vld [vmem:[#allocation8 + $0x164] ss:$16 sps:$4 sm:$0xff]  }
 0x793   :  { %7449 = vpow2.f32 %v5904_v54  ;;  %v6741_v52 = vld [vmem:[#allocation8 + $0x10c] ss:$16 sps:$4 sm:$0xff]   ;;  %v6736_v53 = vld [vmem:[#allocation8 + $0x160] ss:$16 sps:$4 sm:$0xff]   ;;  %v6739_v54 = vld [vmem:[#allocation8 + $0x108] ss:$16 sps:$4 sm:$0xff]  }
 0x794   :  { %7451 = vpow2.f32 %v5905_v56  ;;  %v6742_v55 = vld [vmem:[#allocation8 + $0x180] ss:$16 sps:$4 sm:$0xff]   ;;  %v6744_v56 = vld [vmem:[#allocation8 + $0x184] ss:$16 sps:$4 sm:$0xff]  }
 0x795   :  { %7453 = vtanh.f32 %v1236_v57  ;;  %v6745_v57 = vld [vmem:[#allocation8 + $0x128] ss:$16 sps:$4 sm:$0xff]  }
 0x79c   :  { %v7448_v58 = vpop.eup %7447 }
 0x79d   :  { %v7450_v59 = vpop.eup %7449  ;;  %v1245_v60 = vadd.f32 1.0, %v7448_v58  ;;  %v6747_v58 = vld [vmem:[#allocation8 + $0x12c] ss:$16 sps:$4 sm:$0xff]  }
 0x79e   :  { %v1251_v61 = vadd.f32 1.0, %v7450_v59  ;;  %v7452_v62 = vpop.eup %7451  ;;  %v6750_v59 = vld [vmem:[#allocation8 + $0x1a4] ss:$16 sps:$4 sm:$0xff]  }
 0x79f   :  { %7455 = vrcp.f32 %v1245_v60  ;;  %v7454_v63 = vpop.eup %7453  ;;  %v1258_v3 = vadd.f32 1.0, %v7452_v62  ;;  %v6753_v60 = vld [vmem:[#allocation8 + $0x14c] ss:$16 sps:$4 sm:$0xff]   ;;  %v6751_v62 = vld [vmem:[#allocation8 + $0x148] ss:$16 sps:$4 sm:$0xff]  }
 0x7a0   :  { %7457 = vrcp.f32 %v1251_v61  ;;  %v6748_v61 = vld [vmem:[#allocation8 + $0x1a0] ss:$16 sps:$4 sm:$0xff]  }
 0x7a1   :  { %7459 = vrcp.f32 %v1258_v3  ;;  %v6754_v3 = vld [vmem:[#allocation8 + $0x1c0] ss:$16 sps:$4 sm:$0xff]  }
 0x7a9   :  { %v7456_v0 = vpop.eup %7455 }
 0x7aa   :  { %v7458_v5 = vpop.eup %7457  ;;  %v1262_v6 = vmul.f32 %v7456_v0, %v7454_v63  ;;  %v6756_v63 = vld [vmem:[#allocation8 + $0x1c4] ss:$16 sps:$4 sm:$0xff]   ;;  %v6759_v0 = vld [vmem:[#allocation8 + $0x16c] ss:$16 sps:$4 sm:$0xff]  }
 0x7ab   :  { %v1261_v11 = vmul.f32 %v7458_v5, %v8719_v42  ;;  %v7460_v13 = vpop.eup %7459  ;;  %v6687_v42 = vld [vmem:[#allocation8 + $0x44] ss:$16 sps:$4 sm:$0xff]   ;;  %v6757_v5 = vld [vmem:[#allocation8 + $0x168] ss:$16 sps:$4 sm:$0xff]  }
 0x7ad   :  { %v8727_v12 = vadd.f32 %v1262_v6, %v1261_v11  ;;  %v6762_v6 = vld [vmem:[#allocation8 + $0x1e4] ss:$16 sps:$4 sm:$0xff]   ;;  %v6765_v11 = vld [vmem:[#allocation8 + $0x18c] ss:$16 sps:$4 sm:$0xff]  }
 0x7af   :  { %7461 = vtanh.f32 %v8727_v12 }
 0x7b9   :  { %v7462_v14 = vpop.eup %7461 }
 0x7ba   :  { %v1265_v15 = vmul.f32 %v7462_v14, %v7460_v13  ;;  %v6760_v13 = vld [vmem:[#allocation8 + $0x1e0] ss:$16 sps:$4 sm:$0xff]   ;;  %v6763_v14 = vld [vmem:[#allocation8 + $0x188] ss:$16 sps:$4 sm:$0xff]  }
 0x7bc   :  { %v1268_v17 = vpack.c.bf16 %v1265_v15, %v1265_v15  ;;  %v6768_v15 = vld [vmem:[#allocation8 + $0x1ac] ss:$16 sps:$4 sm:$0xff]  }
 0x7be   :  { %1301 = vmatprep.mubr.bf16.mxu0 %v1268_v17  ;;  %1342 = vmatprep.mubr.bf16.mxu1 %v1268_v17  ;;  %v6766_v17 = vld [vmem:[#allocation8 + $0x1a8] ss:$16 sps:$4 sm:$0xff]  }
 0x7bf   :  { %1302 = vmatmul.mubr.bf16.vlgmr.msra.gmra.mrb[28].mxu0 %v1267_v19  ;;  %1343 = vmatmul.mubr.bf16.vlgmr.msra.gmra.mrb[28].mxu1 %v1267_v19  ;;  %v6771_v19 = vld [vmem:[#allocation8 + $0x1cc] ss:$16 sps:$4 sm:$0xff]  }
 0x7c0   :  { %1791 = vmatpush1.bf16.msra.mxu0 %v6679_v20  ;;  %1832 = vmatpush1.bf16.msra.mxu1 %v6691_v21  ;;  %v6769_v20 = vld [vmem:[#allocation8 + $0x1c8] ss:$16 sps:$4 sm:$0xff]   ;;  %v6774_v21 = vld [vmem:[#allocation8 + $0x1ec] ss:$16 sps:$4 sm:$0xff]  }
 0x7c1   :  { %1792 = vmatprep.subr.bf16.mxu0 %v6684_v22  ;;  %1833 = vmatprep.subr.bf16.mxu1 %v6699_v29  ;;  %v6772_v22 = vld [vmem:[#allocation8 + $0x1e8] ss:$16 sps:$4 sm:$0xff]  }
 0x7c4   :  { %1793 = vmatpush1.bf16.msra.mxu0 %v6682_v24  ;;  %1834 = vmatpush1.bf16.msra.mxu1 %v6697_v35 }
 0x7c5   :  { %1794 = vmatprep.subr.bf16.mxu0 %v6687_v42  ;;  %1835 = vmatprep.subr.bf16.mxu1 %v6705_v41 }
 0x7c8   :  { %1795 = vmatpush1.bf16.msra.mxu0 %v6685_v25  ;;  %1836 = vmatpush1.bf16.msra.mxu1 %v6703_v39 }
 0x7c9   :  { %1796 = vmatprep.subr.bf16.mxu0 %v6690_v26  ;;  %1837 = vmatprep.subr.bf16.mxu1 %v6711_v34 }
 0x7cc   :  { %1797 = vmatpush1.bf16.msra.mxu0 %v6688_v27  ;;  %1838 = vmatpush1.bf16.msra.mxu1 %v6709_v43 }
 0x7cd   :  { %1798 = vmatprep.subr.bf16.mxu0 %v6696_v28  ;;  %1839 = vmatprep.subr.bf16.mxu1 %v6717_v2 }
 0x7d0   :  { %1799 = vmatpush1.bf16.msra.mxu0 %v6694_v30  ;;  %1840 = vmatpush1.bf16.msra.mxu1 %v6715_v18 }
 0x7d1   :  { %1800 = vmatprep.subr.bf16.mxu0 %v6702_v33  ;;  %1841 = vmatprep.subr.bf16.mxu1 %v6723_v40 }
 0x7d4   :  { %1801 = vmatpush1.bf16.msra.mxu0 %v6700_v32  ;;  %1842 = vmatpush1.bf16.msra.mxu1 %v6721_v38 }
 0x7d5   :  { %1802 = vmatprep.subr.bf16.mxu0 %v6708_v7  ;;  %1843 = vmatprep.subr.bf16.mxu1 %v6729_v44 }
 0x7d8   :  { %1803 = vmatpush1.bf16.msra.mxu0 %v6706_v9  ;;  %1844 = vmatpush1.bf16.msra.mxu1 %v6727_v46  ;;  %v9082_v46 = vld [vmem:[#allocation16_spill] sm:$0xff] }
 0x7d9   :  { %1804 = vmatprep.subr.bf16.mxu0 %v6714_v8  ;;  %1845 = vmatprep.subr.bf16.mxu1 %v6735_v48 }
 0x7dc   :  { %1805 = vmatpush1.bf16.msra.mxu0 %v6712_v36  ;;  %1846 = vmatpush1.bf16.msra.mxu1 %v6733_v50  ;;  %v6780_v50 = vld [vmem:[#allocation10 + $0xc] ss:$16 sps:$4 sm:$0xff]  }
 0x7dd   :  { %1806 = vmatprep.subr.bf16.mxu0 %v6720_v37  ;;  %1847 = vmatprep.subr.bf16.mxu1 %v6741_v52  ;;  %v6778_v52 = vld [vmem:[#allocation10 + $0x8] ss:$16 sps:$4 sm:$0xff]  }
 0x7e0   :  { %1807 = vmatpush1.bf16.msra.mxu0 %v6718_v31  ;;  %1848 = vmatpush1.bf16.msra.mxu1 %v6739_v54  ;;  %v6786_v54 = vld [vmem:[#allocation10 + $0x2c] ss:$16 sps:$4 sm:$0xff]  }
 0x7e1   :  { %1808 = vmatprep.subr.bf16.mxu0 %v6726_v4  ;;  %1849 = vmatprep.subr.bf16.mxu1 %v6747_v58  ;;  %v6792_v58 = vld [vmem:[#allocation10 + $0x4c] ss:$16 sps:$4 sm:$0xff]  }
 0x7e4   :  { %1809 = vmatpush1.bf16.msra.mxu0 %v6724_v45  ;;  %1850 = vmatpush1.bf16.msra.mxu1 %v6745_v57  ;;  %v6789_v57 = vld [vmem:[#allocation10 + $0x44] ss:$16 sps:$4 sm:$0xff]  }
 0x7e5   :  { %1810 = vmatprep.subr.bf16.mxu0 %v6732_v47  ;;  %1851 = vmatprep.subr.bf16.mxu1 %v6753_v60  ;;  %v6790_v60 = vld [vmem:[#allocation10 + $0x48] ss:$16 sps:$4 sm:$0xff]  }
 0x7e8   :  { %1811 = vmatpush1.bf16.msra.mxu0 %v6730_v49  ;;  %1852 = vmatpush1.bf16.msra.mxu1 %v6751_v62  ;;  %v9083_v49 = vmov 0   ;;  %v6798_v62 = vld [vmem:[#allocation10 + $0x6c] ss:$16 sps:$4 sm:$0xff]  }
 0x7e9   :  { %1812 = vmatprep.subr.bf16.mxu0 %v6738_v51  ;;  %1853 = vmatprep.subr.bf16.mxu1 %v6759_v0  ;;  %v6775_v51 = vld [vmem:[#allocation10] ss:$16 sps:$4 sm:$0xff]   ;;  %v6796_v0 = vld [vmem:[#allocation10 + $0x68] ss:$16 sps:$4 sm:$0xff]  }
 0x7ec   :  { %1813 = vmatpush1.bf16.msra.mxu0 %v6736_v53  ;;  %1854 = vmatpush1.bf16.msra.mxu1 %v6757_v5  ;;  %v6783_v53 = vld [vmem:[#allocation10 + $0x24] ss:$16 sps:$4 sm:$0xff]   ;;  %v6804_v5 = vld [vmem:[#allocation10 + $0x8c] ss:$16 sps:$4 sm:$0xff]  }
 0x7ed   :  { %1814 = vmatprep.subr.bf16.mxu0 %v6744_v56  ;;  %1855 = vmatprep.subr.bf16.mxu1 %v6765_v11  ;;  %v6784_v56 = vld [vmem:[#allocation10 + $0x28] ss:$16 sps:$4 sm:$0xff]  }
 0x7ee   :  { %v6802_v11 = vld [vmem:[#allocation10 + $0x88] ss:$16 sps:$4 sm:$0xff]  }
 0x7f0   :  { %1815 = vmatpush1.bf16.msra.mxu0 %v6742_v55  ;;  %1856 = vmatpush1.bf16.msra.mxu1 %v6763_v14  ;;  %v6781_v55 = vld [vmem:[#allocation10 + $0x20] ss:$16 sps:$4 sm:$0xff]   ;;  %v6807_v14 = vld [vmem:[#allocation10 + $0xa4] ss:$16 sps:$4 sm:$0xff]  }
 0x7f1   :  { %1816 = vmatprep.subr.bf16.mxu0 %v6750_v59  ;;  %1857 = vmatprep.subr.bf16.mxu1 %v6768_v15  ;;  %v6787_v59 = vld [vmem:[#allocation10 + $0x40] ss:$16 sps:$4 sm:$0xff]   ;;  %v6808_v15 = vld [vmem:[#allocation10 + $0xa8] ss:$16 sps:$4 sm:$0xff]  }
 0x7f4   :  { %1817 = vmatpush1.bf16.msra.mxu0 %v6748_v61  ;;  %1858 = vmatpush1.bf16.msra.mxu1 %v6766_v17  ;;  %v6795_v61 = vld [vmem:[#allocation10 + $0x64] ss:$16 sps:$4 sm:$0xff]   ;;  %v6810_v17 = vld [vmem:[#allocation10 + $0xac] ss:$16 sps:$4 sm:$0xff]  }
 0x7f5   :  { %1818 = vmatprep.subr.bf16.mxu0 %v6756_v63  ;;  %1859 = vmatprep.subr.bf16.mxu1 %v6771_v19  ;;  %v6793_v63 = vld [vmem:[#allocation10 + $0x60] ss:$16 sps:$4 sm:$0xff]   ;;  %v6813_v19 = vld [vmem:[#allocation10 + $0xc4] ss:$16 sps:$4 sm:$0xff]  }
 0x7f8   :  { %1819 = vmatpush1.bf16.msra.mxu0 %v6754_v3  ;;  %1860 = vmatpush1.bf16.msra.mxu1 %v6769_v20  ;;  %v6801_v3 = vld [vmem:[#allocation10 + $0x84] ss:$16 sps:$4 sm:$0xff]   ;;  %v6816_v20 = vld [vmem:[#allocation10 + $0xcc] ss:$16 sps:$4 sm:$0xff]  }
 0x7f9   :  { %1820 = vmatprep.subr.bf16.mxu0 %v6762_v6  ;;  %1861 = vmatprep.subr.bf16.mxu1 %v6774_v21  ;;  %v6799_v6 = vld [vmem:[#allocation10 + $0x80] ss:$16 sps:$4 sm:$0xff]  }
 0x7fa   :  { %v6811_v21 = vld [vmem:[#allocation10 + $0xc0] ss:$16 sps:$4 sm:$0xff]  }
 0x7fc   :  { %1821 = vmatpush1.bf16.msra.mxu0 %v6760_v13  ;;  %1862 = vmatpush1.bf16.msra.mxu1 %v6772_v22  ;;  %v6805_v13 = vld [vmem:[#allocation10 + $0xa0] ss:$16 sps:$4 sm:$0xff]   ;;  %v6814_v22 = vld [vmem:[#allocation10 + $0xc8] ss:$16 sps:$4 sm:$0xff]  }
 0x7fd   :  { %2152 = vmatprep.subr.bf16.mxu1 %v6780_v50 }
 0x892   :  { %v1303_v24 = vpop.f32.mrb[28].mxu0  ;;  %v1344_v42 = vpop.f32.mrb[28].mxu1 }
 0x893   :  { %v1304_v25 = vadd.f32 %v1303_v24, %v9081_v10  ;;  %v1305_v26 = vpop.f32.mrb[29].mxu0  ;;  %v1346_v27 = vpop.f32.mrb[29].mxu1  ;;  %v1345_v34 = vadd.f32 %v1344_v42, %v8228_v23  ;;  %v1375_v23 = vld [vmem:[#allocation5] sm:$0x1]  ;;  %v6819_v24 = vld [vmem:[#allocation10 + $0xe4] ss:$16 sps:$4 sm:$0xff]  }
 0x894   :  { %v1306_v28 = vadd.f32 %v1305_v26, %v8215_v1  ;;  %v1307_v29 = vpop.f32.mrb[30].mxu0  ;;  %v1348_v30 = vpop.f32.mrb[30].mxu1  ;;  %v1347_v39 = vadd.f32 %v1346_v27, %v8222_v16  ;;  %v1377_v4 = vpack.i.b16 %v1375_v23, %v1375_v23  ;;  %v6822_v42 = vld [vmem:[#allocation10 + $0xec] ss:$16 sps:$4 sm:$0xff]   ;;  %v6820_v26 = vld [vmem:[#allocation10 + $0xe8] ss:$16 sps:$4 sm:$0xff]  }
 0x895   :  { %v5906_v35 = vmul.f32 -1.442695, %v1304_v25  ;;  %v1308_v33 = vpop.f32.mrb[31].mxu0  ;;  %v1349_v41 = vpop.f32.mrb[31].mxu1  ;;  %v6817_v25 = vld [vmem:[#allocation10 + $0xe0] ss:$16 sps:$4 sm:$0xff]  }
 0x896   :  { %v5907_v32 = vmul.f32 -1.442695, %v1306_v28  ;;  %v5908_v7 = vmul.f32 -1.442695, %v1347_v39  ;;  %v1382_v47 = vrot.slane %v1377_v4, %v9082_v46  ;;  %v1448_v27 = vld [vmem:[%s8899_s5] sm:$0xf] }
 0x897   :  { %7463 = vpow2.f32 %v5906_v35  ;;  %v1453_v28 = vrot.slane %v1448_v27, %v9082_v46  ;;  %v9084_v29 = vld [vmem:[#allocation17_spill] sm:$0xff] }
 0x898   :  { %7465 = vpow2.f32 %v5907_v32  ;;  %v1457_v30 = vrot.slane %v1448_v27, %v9084_v29 }
 0x899   :  { %7467 = vpow2.f32 %v5908_v7 }
 0x89a   :  { %7469 = vtanh.f32 %v1345_v34 }
 0x8a1   :  { %v7464_v9 = vpop.eup %7463 }
 0x8a2   :  { %v7466_v10 = vpop.eup %7465  ;;  %v1354_v43 = vadd.f32 1.0, %v7464_v9 }
 0x8a3   :  { %v1360_v8 = vadd.f32 1.0, %v7466_v10  ;;  %v7468_v1 = vpop.eup %7467 }
 0x8a4   :  { %7471 = vrcp.f32 %v1354_v43  ;;  %v7470_v2 = vpop.eup %7469  ;;  %v1367_v18 = vadd.f32 1.0, %v7468_v1 }
 0x8a5   :  { %7473 = vrcp.f32 %v1360_v8  ;;  %v9085_v8 = vld [vmem:[#allocation19_spill] sm:$0xff] }
 0x8a6   :  { %7475 = vrcp.f32 %v1367_v18  ;;  %v1465_v1 = vrot.slane %v1448_v27, %v9085_v8 }
 0x8ae   :  { %v7472_v36 = vpop.eup %7471 }
 0x8af   :  { %v7474_v37 = vpop.eup %7473  ;;  %v1371_v40 = vmul.f32 %v7472_v36, %v7470_v2 }
 0x8b0   :  { %v1370_v31 = vmul.f32 %v7474_v37, %v8727_v12  ;;  %v7476_v38 = vpop.eup %7475  ;;  %v6777_v12 = vld [vmem:[#allocation10 + $0x4] ss:$16 sps:$4 sm:$0xff]  }
 0x8b1   :  { %2111 = vmatprep.subr.bf16.mxu0 %v6777_v12  ;;  %v9086_v37 = vld [vmem:[#allocation20_spill] sm:$0xff] }
 0x8b2   :  { %v8735_v16 = vadd.f32 %v1371_v40, %v1370_v31  ;;  %v1461_v40 = vrot.slane %v1448_v27, %v9086_v37 }
 0x8b4   :  { %7477 = vtanh.f32 %v8735_v16 }
 0x8be   :  { %v7478_v44 = vpop.eup %7477 }
 0x8bf   :  { %v1374_v45 = vmul.f32 %v7478_v44, %v7476_v38 }
 0x8c1   :  { %v1383_v48 = vpack.c.bf16 %v1374_v45, %v1374_v45 }
 0x8c3   :  { %1822 = vmatprep.mubr.bf16.mxu0 %v1383_v48  ;;  %1863 = vmatprep.mubr.bf16.mxu1 %v1383_v48 }
 0x8c4   :  { %1823 = vmatmul.mubr.bf16.vlgmr.msra.gmra.mrb[32].mxu0 %v1382_v47  ;;  %1864 = vmatmul.mubr.bf16.vlgmr.msra.gmra.mrb[32].mxu1 %v1382_v47 }
 0x8c5   :  { %2143 = vmatprep.mubr.bf16.mxu0 %v9083_v49  ;;  %2184 = vmatprep.mubr.bf16.mxu1 %v9083_v49 }
 0x8c6   :  { %2112 = vmatpush1.bf16.msra.mxu0 %v6775_v51  ;;  %2153 = vmatpush1.bf16.msra.mxu1 %v6778_v52 }
 0x8c7   :  { %2113 = vmatprep.subr.bf16.mxu0 %v6783_v53  ;;  %2154 = vmatprep.subr.bf16.mxu1 %v6786_v54 }
 0x8ca   :  { %2114 = vmatpush1.bf16.msra.mxu0 %v6781_v55  ;;  %2155 = vmatpush1.bf16.msra.mxu1 %v6784_v56 }
 0x8cb   :  { %2115 = vmatprep.subr.bf16.mxu0 %v6789_v57  ;;  %2156 = vmatprep.subr.bf16.mxu1 %v6792_v58 }
 0x8ce   :  { %2116 = vmatpush1.bf16.msra.mxu0 %v6787_v59  ;;  %2157 = vmatpush1.bf16.msra.mxu1 %v6790_v60  ;;  %v1929_v59 = vld [vmem:[%s8901_s7] sm:$0xf] }
 0x8cf   :  { %2117 = vmatprep.subr.bf16.mxu0 %v6795_v61  ;;  %2158 = vmatprep.subr.bf16.mxu1 %v6798_v62  ;;  %v1942_v60 = vrot.slane %v1929_v59, %v9086_v37  ;;  %v1938_v61 = vrot.slane %v1929_v59, %v9084_v29  ;;  %v1946_v62 = vrot.slane %v1929_v59, %v9085_v8 }
 0x8d2   :  { %2118 = vmatpush1.bf16.msra.mxu0 %v6793_v63  ;;  %2159 = vmatpush1.bf16.msra.mxu1 %v6796_v0 }
 0x8d3   :  { %2119 = vmatprep.subr.bf16.mxu0 %v6801_v3  ;;  %2160 = vmatprep.subr.bf16.mxu1 %v6804_v5 }
 0x8d6   :  { %2120 = vmatpush1.bf16.msra.mxu0 %v6799_v6  ;;  %2161 = vmatpush1.bf16.msra.mxu1 %v6802_v11 }
 0x8d7   :  { %2121 = vmatprep.subr.bf16.mxu0 %v6807_v14  ;;  %2162 = vmatprep.subr.bf16.mxu1 %v6810_v17 }
 0x8da   :  { %2122 = vmatpush1.bf16.msra.mxu0 %v6805_v13  ;;  %2163 = vmatpush1.bf16.msra.mxu1 %v6808_v15 }
 0x8db   :  { %2123 = vmatprep.subr.bf16.mxu0 %v6813_v19  ;;  %2164 = vmatprep.subr.bf16.mxu1 %v6816_v20 }
 0x8de   :  { %2124 = vmatpush1.bf16.msra.mxu0 %v6811_v21  ;;  %2165 = vmatpush1.bf16.msra.mxu1 %v6814_v22 }
 0x8df   :  { %2125 = vmatprep.subr.bf16.mxu0 %v6819_v24  ;;  %2166 = vmatprep.subr.bf16.mxu1 %v6822_v42  ;;  %v9087_v42 = vlaneseq }
 0x8e2   :  { %2126 = vmatpush1.bf16.msra.mxu0 %v6817_v25  ;;  %2167 = vmatpush1.bf16.msra.mxu1 %v6820_v26  ;;  %v8764_v25 = vand.u32 127, %v9087_v42 }
 0x8e4   :  { %v8767_v26 = vadd.s32 128, %v8764_v25  ;;  %v8770_v27 = vadd.s32 256, %v8764_v25 }
 0x997   :  { %v1824_v35 = vpop.f32.mrb[32].mxu0  ;;  %v1865_v33 = vpop.f32.mrb[32].mxu1 }
 0x998   :  { %v1825_v41 = vadd.f32 %v1824_v35, %v1453_v28  ;;  %v1826_v32 = vpop.f32.mrb[33].mxu0  ;;  %v1867_v39 = vpop.f32.mrb[33].mxu1  ;;  %v1866_v23 = vadd.f32 %v1865_v33, %v1461_v40  ;;  %v8773_v28 = vadd.s32 384, %v8764_v25  ;;  %v6828_v40 = vld [vmem:[#allocation5 + $0xc8] sm:$0xff]  }
 0x999   :  { %v1827_v7 = vadd.f32 %v1826_v32, %v1457_v30  ;;  %v1828_v34 = vpop.f32.mrb[34].mxu0  ;;  %v1869_v9 = vpop.f32.mrb[34].mxu1  ;;  %v1868_v18 = vadd.f32 %v1867_v39, %v1465_v1  ;;  %v6824_v1 = vld [vmem:[#allocation5 + $0xc0] sm:$0xff]  }
 0x99a   :  { %v5973_v10 = vmul.f32 -1.442695, %v1825_v41  ;;  %v1829_v43 = vpop.f32.mrb[35].mxu0  ;;  %v1870_v2 = vpop.f32.mrb[35].mxu1  ;;  %6459 = vmatprep.subr.bf16.mxu1 %v6824_v1  ;;  %v6875_v1 = vld [vmem:[#allocation8 + $0x64] ss:$16 sps:$4 sm:$0xff]  }
 0x99b   :  { %v5974_v36 = vmul.f32 -1.442695, %v1827_v7  ;;  %v5975_v31 = vmul.f32 -1.442695, %v1868_v18  ;;  %v6823_v43 = vld [vmem:[#allocation5 + $0x40] sm:$0xff]   ;;  %v6827_v18 = vld [vmem:[#allocation5 + $0x48] sm:$0xff]  }
 0x99c   :  { %7479 = vpow2.f32 %v5973_v10  ;;  %v6825_v2 = vld [vmem:[#allocation5] sm:$0xff]   ;;  %6437 = vmatprep.subr.bf16.mxu0 %v6823_v43  ;;  %v6870_v43 = vld [vmem:[#allocation8 + $0x48] ss:$16 sps:$4 sm:$0xff]  }
 0x99d   :  { %7481 = vpow2.f32 %v5974_v36  ;;  %v6826_v36 = vld [vmem:[#allocation5 + $0x80] sm:$0xff]  }
 0x99e   :  { %7483 = vpow2.f32 %v5975_v31  ;;  %v6829_v31 = vld [vmem:[#allocation5 + $0x8] sm:$0xff]  }
 0x99f   :  { %7485 = vtanh.f32 %v1866_v23  ;;  %v6830_v23 = vld [vmem:[#allocation5 + $0x88] sm:$0xff]  }
 0x9a6   :  { %v7480_v38 = vpop.eup %7479 }
 0x9a7   :  { %v7482_v4 = vpop.eup %7481  ;;  %v1875_v44 = vadd.f32 1.0, %v7480_v38  ;;  %v6831_v38 = vld [vmem:[#allocation5 + $0x50] sm:$0xff]  }
 0x9a8   :  { %v1881_v45 = vadd.f32 1.0, %v7482_v4  ;;  %v7484_v47 = vpop.eup %7483  ;;  %v6832_v4 = vld [vmem:[#allocation5 + $0xd0] sm:$0xff]  }
 0x9a9   :  { %7487 = vrcp.f32 %v1875_v44  ;;  %v7486_v48 = vpop.eup %7485  ;;  %v1888_v50 = vadd.f32 1.0, %v7484_v47  ;;  %v6833_v44 = vld [vmem:[#allocation5 + $0x10] sm:$0xff]   ;;  %v6835_v47 = vld [vmem:[#allocation5 + $0x58] sm:$0xff]  }
 0x9aa   :  { %7489 = vrcp.f32 %v1881_v45  ;;  %v6834_v45 = vld [vmem:[#allocation5 + $0x90] sm:$0xff]  }
 0x9ab   :  { %7491 = vrcp.f32 %v1888_v50  ;;  %v6838_v50 = vld [vmem:[#allocation5 + $0x98] sm:$0xff]  }
 0x9b3   :  { %v7488_v12 = vpop.eup %7487 }
 0x9b4   :  { %v7490_v51 = vpop.eup %7489  ;;  %v1892_v52 = vmul.f32 %v7488_v12, %v7486_v48  ;;  %v6836_v48 = vld [vmem:[#allocation5 + $0xd8] sm:$0xff]  }
 0x9b5   :  { %v1891_v53 = vmul.f32 %v7490_v51, %v8735_v16  ;;  %v7492_v55 = vpop.eup %7491  ;;  %v1934_v16 = vrot.slane %v1929_v59, %v9082_v46  ;;  %v6837_v12 = vld [vmem:[#allocation5 + $0x18] sm:$0xff]   ;;  %v6839_v51 = vld [vmem:[#allocation5 + $0x60] sm:$0xff]   ;;  %v6845_v59 = vld [vmem:[#allocation5 + $0x28] sm:$0xff]  }
 0x9b7   :  { %v8749_v54 = vadd.f32 %v1892_v52, %v1891_v53  ;;  %v6840_v52 = vld [vmem:[#allocation5 + $0xe0] sm:$0xff]  }
 0x9b8   :  { %v6841_v53 = vld [vmem:[#allocation5 + $0x20] sm:$0xff]  }
 0x9b9   :  { %7493 = vtanh.f32 %v8749_v54 }
 0x9c3   :  { %v7494_v56 = vpop.eup %7493 }
 0x9c4   :  { %v1895_v57 = vmul.f32 %v7494_v56, %v7492_v55  ;;  %v6842_v55 = vld [vmem:[#allocation5 + $0xa0] sm:$0xff]   ;;  %v6843_v56 = vld [vmem:[#allocation5 + $0x68] sm:$0xff]  }
 0x9c6   :  { %v8752_v58 = vpack.c.bf16 %v1895_v57, %v1895_v57  ;;  %v6844_v57 = vld [vmem:[#allocation5 + $0xe8] sm:$0xff]  }
 0x9c8   :  { %2144 = vmatmul.mubr.bf16.vlgmr.msra.gmra.mrb[36].mxu0 %v8752_v58  ;;  %2185 = vmatmul.mubr.bf16.vlgmr.msra.gmra.mrb[36].mxu1 %v8752_v58 }
 0x9c9   :  { %6438 = vmatpush3.bf16.msra.mxu0 %v6825_v2  ;;  %6460 = vmatpush3.bf16.msra.mxu1 %v6826_v36  ;;  %v6878_v2 = vld [vmem:[#allocation8 + $0x6c] ss:$16 sps:$4 sm:$0xff]   ;;  %v6873_v36 = vld [vmem:[#allocation8 + $0x60] ss:$16 sps:$4 sm:$0xff]  }
 0x9ca   :  { %6439 = vmatprep.subr.bf16.mxu0 %v6827_v18  ;;  %6461 = vmatprep.subr.bf16.mxu1 %v6828_v40  ;;  %v6881_v18 = vld [vmem:[#allocation8 + $0x84] ss:$16 sps:$4 sm:$0xff]   ;;  %v6884_v40 = vld [vmem:[#allocation8 + $0x8c] ss:$16 sps:$4 sm:$0xff]  }
 0x9cd   :  { %6440 = vmatpush3.bf16.msra.mxu0 %v6829_v31  ;;  %6462 = vmatpush3.bf16.msra.mxu1 %v6830_v23  ;;  %v6879_v31 = vld [vmem:[#allocation8 + $0x80] ss:$16 sps:$4 sm:$0xff]   ;;  %v6882_v23 = vld [vmem:[#allocation8 + $0x88] ss:$16 sps:$4 sm:$0xff]  }
 0x9ce   :  { %6441 = vmatprep.subr.bf16.mxu0 %v6831_v38  ;;  %6463 = vmatprep.subr.bf16.mxu1 %v6832_v4  ;;  %v6887_v38 = vld [vmem:[#allocation8 + $0xa4] ss:$16 sps:$4 sm:$0xff]   ;;  %v6890_v4 = vld [vmem:[#allocation8 + $0xac] ss:$16 sps:$4 sm:$0xff]  }
 0x9d1   :  { %6442 = vmatpush3.bf16.msra.mxu0 %v6833_v44  ;;  %6464 = vmatpush3.bf16.msra.mxu1 %v6834_v45  ;;  %v6885_v44 = vld [vmem:[#allocation8 + $0xa0] ss:$16 sps:$4 sm:$0xff]   ;;  %v6888_v45 = vld [vmem:[#allocation8 + $0xa8] ss:$16 sps:$4 sm:$0xff]  }
 0x9d2   :  { %6443 = vmatprep.subr.bf16.mxu0 %v6835_v47  ;;  %6465 = vmatprep.subr.bf16.mxu1 %v6836_v48  ;;  %v6893_v47 = vld [vmem:[#allocation8 + $0xc4] ss:$16 sps:$4 sm:$0xff]   ;;  %v6896_v48 = vld [vmem:[#allocation8 + $0xcc] ss:$16 sps:$4 sm:$0xff]  }
 0x9d5   :  { %6444 = vmatpush3.bf16.msra.mxu0 %v6837_v12  ;;  %6466 = vmatpush3.bf16.msra.mxu1 %v6838_v50  ;;  %v6891_v12 = vld [vmem:[#allocation8 + $0xc0] ss:$16 sps:$4 sm:$0xff]   ;;  %v6894_v50 = vld [vmem:[#allocation8 + $0xc8] ss:$16 sps:$4 sm:$0xff]  }
 0x9d6   :  { %6445 = vmatprep.subr.bf16.mxu0 %v6839_v51  ;;  %6467 = vmatprep.subr.bf16.mxu1 %v6840_v52  ;;  %v6899_v51 = vld [vmem:[#allocation8 + $0xe4] ss:$16 sps:$4 sm:$0xff]   ;;  %v6902_v52 = vld [vmem:[#allocation8 + $0xec] ss:$16 sps:$4 sm:$0xff]  }
 0x9d9   :  { %6446 = vmatpush3.bf16.msra.mxu0 %v6841_v53  ;;  %6468 = vmatpush3.bf16.msra.mxu1 %v6842_v55  ;;  %v6897_v53 = vld [vmem:[#allocation8 + $0xe0] ss:$16 sps:$4 sm:$0xff]   ;;  %v6900_v55 = vld [vmem:[#allocation8 + $0xe8] ss:$16 sps:$4 sm:$0xff]  }
 0x9da   :  { %6447 = vmatprep.subr.bf16.mxu0 %v6843_v56  ;;  %6469 = vmatprep.subr.bf16.mxu1 %v6844_v57  ;;  %v6905_v56 = vld [vmem:[#allocation8 + $0x104] ss:$16 sps:$4 sm:$0xff]   ;;  %v6908_v57 = vld [vmem:[#allocation8 + $0x10c] ss:$16 sps:$4 sm:$0xff]  }
 0x9dd   :  { %6448 = vmatpush3.bf16.msra.mxu0 %v6845_v59  ;;  %v6903_v59 = vld [vmem:[#allocation8 + $0x100] ss:$16 sps:$4 sm:$0xff]  }
 0xa9b   :  { %v2145_v63 = vpop.f32.mrb[36].mxu0  ;;  %v2186_v0 = vpop.f32.mrb[36].mxu1 }
 0xa9c   :  { %v2146_v3 = vadd.f32 %v2145_v63, %v1934_v16  ;;  %v2187_v5 = vadd.f32 %v2186_v0, %v1942_v60  ;;  %v2147_v6 = vpop.f32.mrb[37].mxu0  ;;  %v2188_v11 = vpop.f32.mrb[37].mxu1  ;;  %v6846_v16 = vld [vmem:[#allocation5 + $0xa8] sm:$0xff]   ;;  %v6847_v60 = vld [vmem:[#allocation5 + $0x70] sm:$0xff]  }
 0xa9d   :  { %v2148_v13 = vadd.f32 %v2147_v6, %v1938_v61  ;;  %v2189_v14 = vadd.f32 %v2188_v11, %v1946_v62  ;;  %v2149_v15 = vpop.f32.mrb[38].mxu0  ;;  %v2190_v17 = vpop.f32.mrb[38].mxu1  ;;  %v6848_v61 = vld [vmem:[#allocation5 + $0xf0] sm:$0xff]   ;;  %6470 = vmatpush3.bf16.msra.mxu1 %v6846_v16  ;;  %6449 = vmatprep.subr.bf16.mxu0 %v6847_v60  ;;  %v6851_v11 = vld [vmem:[#allocation5 + $0x78] sm:$0xff]  }
 0xa9e   :  { %2193 = vst [vmem:[#allocation11] sm:$0xff] %v2146_v3  ;;  %2195 = vst [vmem:[#allocation11 + $0x10] sm:$0xff] %v2187_v5  ;;  %v2150_v19 = vpop.f32.mrb[39].mxu0  ;;  %v2191_v20 = vpop.f32.mrb[39].mxu1  ;;  %6471 = vmatprep.subr.bf16.mxu1 %v6848_v61  ;;  %v6850_v6 = vld [vmem:[#allocation5 + $0xb0] sm:$0xff]   ;;  %v6854_v15 = vld [vmem:[#allocation5 + $0xb8] sm:$0xff]  }
 0xa9f   :  { %2194 = vst [vmem:[#allocation11 + $0x8] sm:$0xff] %v2148_v13  ;;  %2196 = vst [vmem:[#allocation11 + $0x18] sm:$0xff] %v2189_v14  ;;  %v2202_v21 = vmax.f32 %v2146_v3, %v2148_v13  ;;  %v2203_v22 = vmax.f32 %v2187_v5, %v2189_v14  ;;  %v6857_v17 = vld [vmem:[#allocation8 + $0x4] ss:$16 sps:$4 sm:$0xff]   ;;  %v6860_v19 = vld [vmem:[#allocation8 + $0xc] ss:$16 sps:$4 sm:$0xff]  }
 0xaa0   :  { %v6906_v16 = vld [vmem:[#allocation8 + $0x108] ss:$16 sps:$4 sm:$0xff]   ;;  %v6911_v60 = vld [vmem:[#allocation8 + $0x124] ss:$16 sps:$4 sm:$0xff]   ;;  %v6914_v61 = vld [vmem:[#allocation8 + $0x12c] ss:$16 sps:$4 sm:$0xff]  }
 0xaa1   :  { %v2204_v24 = vmax.f32 %v2202_v21, %v2203_v22  ;;  %6472 = vmatpush3.bf16.msra.mxu1 %v6850_v6  ;;  %v6918_v6 = vld [vmem:[#allocation8 + $0x148] ss:$16 sps:$4 sm:$0xff]  }
 0xaa3   :  { %2205 = vmax.xlane.f32.xlu0 %v2204_v24 }
 0xb30   :  { %v2206_v30 = vpop.xlane.xlu0 %2205 }
 0xb31   :  { %vm2207_vm0 = vcmp.eq.f32.partialorder %v2146_v3, %v2206_v30  ;;  %vm2208_vm1 = vcmp.eq.f32.partialorder %v2148_v13, %v2206_v30  ;;  %vm2209_vm2 = vcmp.eq.f32.partialorder %v2187_v5, %v2206_v30  ;;  %vm2210_vm3 = vcmp.eq.f32.partialorder %v2189_v14, %v2206_v30  ;;  %v6849_v5 = vld [vmem:[#allocation5 + $0x30] sm:$0xff]   ;;  %v6852_v13 = vld [vmem:[#allocation5 + $0xf8] sm:$0xff]  }
 0xb32   :  { %v2211_v35 = vsel %vm2207_vm0, %v8764_v25, 512  ;;  %v2212_v33 = vsel %vm2208_vm1, %v8767_v26, 512  ;;  %v2213_v41 = vsel %vm2209_vm2, %v8770_v27, 512  ;;  %v2214_v32 = vsel %vm2210_vm3, %v8773_v28, 512  ;;  %6450 = vmatpush3.bf16.msra.mxu0 %v6849_v5  ;;  %v6853_v14 = vld [vmem:[#allocation5 + $0x38] sm:$0xff]   ;;  %6473 = vmatprep.subr.bf16.mxu1 %v6852_v13 }
 0xb33   :  { %vm2215_vm4 = vcmp.lt.s32.totalorder %v2211_v35, %v2212_v33  ;;  %vm2217_vm5 = vcmp.lt.s32.totalorder %v2213_v41, %v2214_v32  ;;  %6451 = vmatprep.subr.bf16.mxu0 %v6851_v11  ;;  %6474 = vmatpush3.bf16.msra.mxu1 %v6854_v15  ;;  %v7819_v30 = vmov 1.0|1.0   ;;  %v6915_v5 = vld [vmem:[#allocation8 + $0x140] ss:$16 sps:$4 sm:$0xff]   ;;  %v6923_v11 = vld [vmem:[#allocation8 + $0x164] ss:$16 sps:$4 sm:$0xff]  }
 0xb34   :  { %v2216_v39 = vsel %vm2215_vm4, %v2211_v35, %v2212_v33  ;;  %v2218_v7 = vsel %vm2217_vm5, %v2213_v41, %v2214_v32  ;;  %3035 = vmatprep.subr.bf16.mxu1 %v6860_v19  ;;  %v6855_v35 = vld [vmem:[#allocation8] ss:$16 sps:$4 sm:$0xff]   ;;  %v6858_v33 = vld [vmem:[#allocation8 + $0x8] ss:$16 sps:$4 sm:$0xff]   ;;  %v6863_v41 = vld [vmem:[#allocation8 + $0x24] ss:$16 sps:$4 sm:$0xff]  }
 0xb35   :  { %vm2219_vm6 = vcmp.lt.s32.totalorder %v2216_v39, %v2218_v7  ;;  %v6866_v32 = vld [vmem:[#allocation8 + $0x2c] ss:$16 sps:$4 sm:$0xff]   ;;  %v6924_v15 = vld [vmem:[#allocation8 + $0x168] ss:$16 sps:$4 sm:$0xff]  }
 0xb36   :  { %v2220_v34 = vsel %vm2219_vm6, %v2216_v39, %v2218_v7  ;;  %6452 = vmatpush3.bf16.msra.mxu0 %v6853_v14  ;;  %v6861_v39 = vld [vmem:[#allocation8 + $0x20] ss:$16 sps:$4 sm:$0xff]   ;;  %v6864_v7 = vld [vmem:[#allocation8 + $0x28] ss:$16 sps:$4 sm:$0xff]   ;;  %v6926_v13 = vld [vmem:[#allocation8 + $0x16c] ss:$16 sps:$4 sm:$0xff]  }
 0xb37   :  { %v2222_v9 = vshra.s32 %v2220_v34, 16  ;;  %v2221_v62 = vand.u32 65535, %v2220_v34  ;;  %2994 = vmatprep.subr.bf16.mxu0 %v6857_v17  ;;  %v6869_v34 = vld [vmem:[#allocation8 + $0x44] ss:$16 sps:$4 sm:$0xff]   ;;  %v6921_v14 = vld [vmem:[#allocation8 + $0x160] ss:$16 sps:$4 sm:$0xff]  }
 0xb38   :  { %v6929_v17 = vld [vmem:[#allocation8 + $0x184] ss:$16 sps:$4 sm:$0xff]   ;;  %v6932_v19 = vld [vmem:[#allocation8 + $0x18c] ss:$16 sps:$4 sm:$0xff]  }
 0xb39   :  { %v2224_v10 = vcvt.s32.f32 %v2222_v9  ;;  %v2223_v0 = vcvt.s32.f32 %v2221_v62  ;;  %v6872_v9 = vld [vmem:[#allocation8 + $0x4c] ss:$16 sps:$4 sm:$0xff]   ;;  %v6909_v62 = vld [vmem:[#allocation8 + $0x120] ss:$16 sps:$4 sm:$0xff]  }
 0xb3b   :  { %2225 = vmin.xlane.f32.xlu0 %v2224_v10 }
 0xbc8   :  { %v2226_v63 = vpop.xlane.xlu0 %2225 }
 0xbc9   :  { %vm2227_vm7 = vcmp.eq.f32.partialorder %v2224_v10, %v2226_v63  ;;  %v2232_v20 = vcvt.f32.s32 %v2226_v63  ;;  %v6867_v10 = vld [vmem:[#allocation8 + $0x40] ss:$16 sps:$4 sm:$0xff]   ;;  %v6912_v63 = vld [vmem:[#allocation8 + $0x128] ss:$16 sps:$4 sm:$0xff]  }
 0xbca   :  { %v2228_v3 = vsel %vm2227_vm7, %v2223_v0, inf  ;;  %v6917_v0 = vld [vmem:[#allocation8 + $0x144] ss:$16 sps:$4 sm:$0xff]  }
 0xbcb   :  { %2229 = vmin.xlane.f32.xlu1 %v2228_v3  ;;  %v2233_v22 = vshll.u32 %v2232_v20, 16  ;;  %v6920_v3 = vld [vmem:[#allocation8 + $0x14c] ss:$16 sps:$4 sm:$0xff]   ;;  %v6927_v20 = vld [vmem:[#allocation8 + $0x180] ss:$16 sps:$4 sm:$0xff]  }
 0xc58   :  { %v2230_v21 = vpop.xlane.xlu1 %2229 }
 0xc59   :  { %v2231_v24 = vcvt.f32.s32 %v2230_v21  ;;  %v6930_v21 = vld [vmem:[#allocation8 + $0x188] ss:$16 sps:$4 sm:$0xff]  }
 0xc5b   :  { %v2234_v42 = vadd.s32 %v2233_v22, %v2231_v24  ;;  %v6935_v22 = vld [vmem:[#allocation8 + $0x1a4] ss:$16 sps:$4 sm:$0xff]   ;;  %v6938_v24 = vld [vmem:[#allocation8 + $0x1ac] ss:$16 sps:$4 sm:$0xff]  }
 0xc5d   :  { %vm2236_vm8 = vcmp.eq.s32.totalorder %v8767_v26, %v2234_v42  ;;  %vm2238_vm9 = vcmp.eq.s32.totalorder %v8773_v28, %v2234_v42  ;;  %vm2235_vm10 = vcmp.eq.s32.totalorder %v8764_v25, %v2234_v42  ;;  %vm2237_vm12 = vcmp.eq.s32.totalorder %v8770_v27, %v2234_v42  ;;  %v6933_v42 = vld [vmem:[#allocation8 + $0x1a0] ss:$16 sps:$4 sm:$0xff]  }
 0xc5e   :  { %vm6044_vm11 = vmpackc.low %vm2236_vm8, %vm2236_vm8 }
 0xc5f   :  { %6045 = vmatprep.mubr.msk.bf16.mxu0 %vm6044_vm11, %v7819_v30  ;;  %vm6048_vm13 = vmpackc.low %vm2238_vm9, %vm2238_vm9 }
 0xc60   :  { %6049 = vmatprep.mubr.msk.bf16.mxu1 %vm6048_vm13, %v7819_v30  ;;  %vm6046_vm14 = vmpackc.low %vm2235_vm10, %vm2235_vm10 }
 0xc61   :  { %6047 = vmatmul.mubr.msk.bf16.vlgmr.msra.gmra.mrb[40].mxu0 %vm6046_vm14, %v7819_v30  ;;  %vm6050_vm15 = vmpackc.low %vm2237_vm12, %vm2237_vm12 }
 0xc62   :  { %6051 = vmatmul.mubr.msk.bf16.vlgmr.msra.gmra.mrb[40].mxu1 %vm6050_vm15, %v7819_v30  ;;  %3026 = vmatprep.mubr.bf16.mxu0 %v8752_v58 }
 0xc63   :  { %3067 = vmatprep.mubr.bf16.mxu1 %v8752_v58  ;;  %2995 = vmatpush1.bf16.msra.mxu0 %v6855_v35  ;;  %v6876_v58 = vld [vmem:[#allocation8 + $0x68] ss:$16 sps:$4 sm:$0xff]  }
 0xc64   :  { %3036 = vmatpush1.bf16.msra.mxu1 %v6858_v33  ;;  %2996 = vmatprep.subr.bf16.mxu0 %v6863_v41  ;;  %v6936_v35 = vld [vmem:[#allocation8 + $0x1a8] ss:$16 sps:$4 sm:$0xff]   ;;  %v6941_v33 = vld [vmem:[#allocation8 + $0x1c4] ss:$16 sps:$4 sm:$0xff]   ;;  %v6944_v41 = vld [vmem:[#allocation8 + $0x1cc] ss:$16 sps:$4 sm:$0xff]  }
 0xc65   :  { %3037 = vmatprep.subr.bf16.mxu1 %v6866_v32  ;;  %v6939_v32 = vld [vmem:[#allocation8 + $0x1c0] ss:$16 sps:$4 sm:$0xff]  }
 0xc67   :  { %2997 = vmatpush1.bf16.msra.mxu0 %v6861_v39  ;;  %v6942_v39 = vld [vmem:[#allocation8 + $0x1c8] ss:$16 sps:$4 sm:$0xff]  }
 0xc68   :  { %3038 = vmatpush1.bf16.msra.mxu1 %v6864_v7  ;;  %2998 = vmatprep.subr.bf16.mxu0 %v6869_v34  ;;  %v6947_v7 = vld [vmem:[#allocation8 + $0x1e4] ss:$16 sps:$4 sm:$0xff]   ;;  %v6950_v34 = vld [vmem:[#allocation8 + $0x1ec] ss:$16 sps:$4 sm:$0xff]  }
 0xc69   :  { %3039 = vmatprep.subr.bf16.mxu1 %v6872_v9  ;;  %v6945_v9 = vld [vmem:[#allocation8 + $0x1e0] ss:$16 sps:$4 sm:$0xff]  }
 0xc6b   :  { %2999 = vmatpush1.bf16.msra.mxu0 %v6867_v10  ;;  %v6948_v10 = vld [vmem:[#allocation8 + $0x1e8] ss:$16 sps:$4 sm:$0xff]  }
 0xc6c   :  { %3040 = vmatpush1.bf16.msra.mxu1 %v6870_v43  ;;  %3000 = vmatprep.subr.bf16.mxu0 %v6875_v1 }
 0xc6d   :  { %3041 = vmatprep.subr.bf16.mxu1 %v6878_v2 }
 0xc6f   :  { %3001 = vmatpush1.bf16.msra.mxu0 %v6873_v36 }
 0xc70   :  { %3042 = vmatpush1.bf16.msra.mxu1 %v6876_v58  ;;  %3002 = vmatprep.subr.bf16.mxu0 %v6881_v18 }
 0xc71   :  { %3043 = vmatprep.subr.bf16.mxu1 %v6884_v40 }
 0xc73   :  { %3003 = vmatpush1.bf16.msra.mxu0 %v6879_v31 }
 0xc74   :  { %3044 = vmatpush1.bf16.msra.mxu1 %v6882_v23  ;;  %3004 = vmatprep.subr.bf16.mxu0 %v6887_v38 }
 0xc75   :  { %3045 = vmatprep.subr.bf16.mxu1 %v6890_v4 }
 0xc77   :  { %3005 = vmatpush1.bf16.msra.mxu0 %v6885_v44 }
 0xc78   :  { %3046 = vmatpush1.bf16.msra.mxu1 %v6888_v45  ;;  %3006 = vmatprep.subr.bf16.mxu0 %v6893_v47  ;;  %v6953_v45 = vld [vmem:[#allocation10 + $0x4] ss:$16 sps:$4 sm:$0xff]   ;;  %v6956_v47 = vld [vmem:[#allocation10 + $0xc] ss:$16 sps:$4 sm:$0xff]  }
 0xc79   :  { %3047 = vmatprep.subr.bf16.mxu1 %v6896_v48  ;;  %v6951_v48 = vld [vmem:[#allocation10] ss:$16 sps:$4 sm:$0xff]  }
 0xc7b   :  { %3007 = vmatpush1.bf16.msra.mxu0 %v6891_v12  ;;  %v6954_v12 = vld [vmem:[#allocation10 + $0x8] ss:$16 sps:$4 sm:$0xff]  }
 0xc7c   :  { %3048 = vmatpush1.bf16.msra.mxu1 %v6894_v50  ;;  %3008 = vmatprep.subr.bf16.mxu0 %v6899_v51  ;;  %v6959_v50 = vld [vmem:[#allocation10 + $0x24] ss:$16 sps:$4 sm:$0xff]   ;;  %v6962_v51 = vld [vmem:[#allocation10 + $0x2c] ss:$16 sps:$4 sm:$0xff]  }
 0xc7d   :  { %3049 = vmatprep.subr.bf16.mxu1 %v6902_v52  ;;  %v6957_v52 = vld [vmem:[#allocation10 + $0x20] ss:$16 sps:$4 sm:$0xff]  }
 0xc7f   :  { %3009 = vmatpush1.bf16.msra.mxu0 %v6897_v53  ;;  %v6960_v53 = vld [vmem:[#allocation10 + $0x28] ss:$16 sps:$4 sm:$0xff]  }
 0xc80   :  { %3050 = vmatpush1.bf16.msra.mxu1 %v6900_v55  ;;  %3010 = vmatprep.subr.bf16.mxu0 %v6905_v56  ;;  %v6965_v55 = vld [vmem:[#allocation10 + $0x44] ss:$16 sps:$4 sm:$0xff]   ;;  %v6968_v56 = vld [vmem:[#allocation10 + $0x4c] ss:$16 sps:$4 sm:$0xff]  }
 0xc81   :  { %3051 = vmatprep.subr.bf16.mxu1 %v6908_v57  ;;  %v6963_v57 = vld [vmem:[#allocation10 + $0x40] ss:$16 sps:$4 sm:$0xff]  }
 0xc83   :  { %3011 = vmatpush1.bf16.msra.mxu0 %v6903_v59  ;;  %v6966_v59 = vld [vmem:[#allocation10 + $0x48] ss:$16 sps:$4 sm:$0xff]  }
 0xc84   :  { %3052 = vmatpush1.bf16.msra.mxu1 %v6906_v16  ;;  %3012 = vmatprep.subr.bf16.mxu0 %v6911_v60  ;;  %v6971_v16 = vld [vmem:[#allocation10 + $0x64] ss:$16 sps:$4 sm:$0xff]   ;;  %v6974_v60 = vld [vmem:[#allocation10 + $0x6c] ss:$16 sps:$4 sm:$0xff]  }
 0xc85   :  { %3053 = vmatprep.subr.bf16.mxu1 %v6914_v61  ;;  %v6969_v61 = vld [vmem:[#allocation10 + $0x60] ss:$16 sps:$4 sm:$0xff]  }
 0xc87   :  { %3013 = vmatpush1.bf16.msra.mxu0 %v6909_v62  ;;  %v6972_v62 = vld [vmem:[#allocation10 + $0x68] ss:$16 sps:$4 sm:$0xff]  }
 0xc88   :  { %3054 = vmatpush1.bf16.msra.mxu1 %v6912_v63  ;;  %3014 = vmatprep.subr.bf16.mxu0 %v6917_v0  ;;  %v6975_v63 = vld [vmem:[#allocation10 + $0x80] ss:$16 sps:$4 sm:$0xff]   ;;  %v6977_v0 = vld [vmem:[#allocation10 + $0x84] ss:$16 sps:$4 sm:$0xff]  }
 0xc89   :  { %3055 = vmatprep.subr.bf16.mxu1 %v6920_v3  ;;  %v6978_v3 = vld [vmem:[#allocation10 + $0x88] ss:$16 sps:$4 sm:$0xff]  }
 0xc8b   :  { %3015 = vmatpush1.bf16.msra.mxu0 %v6915_v5  ;;  %v6980_v5 = vld [vmem:[#allocation10 + $0x8c] ss:$16 sps:$4 sm:$0xff]  }
 0xc8c   :  { %3056 = vmatpush1.bf16.msra.mxu1 %v6918_v6  ;;  %3016 = vmatprep.subr.bf16.mxu0 %v6923_v11  ;;  %v6983_v6 = vld [vmem:[#allocation10 + $0xa4] ss:$16 sps:$4 sm:$0xff]   ;;  %v6986_v11 = vld [vmem:[#allocation10 + $0xac] ss:$16 sps:$4 sm:$0xff]  }
 0xc8d   :  { %3057 = vmatprep.subr.bf16.mxu1 %v6926_v13  ;;  %v6981_v13 = vld [vmem:[#allocation10 + $0xa0] ss:$16 sps:$4 sm:$0xff]  }
 0xc8f   :  { %3017 = vmatpush1.bf16.msra.mxu0 %v6921_v14  ;;  %v6984_v14 = vld [vmem:[#allocation10 + $0xa8] ss:$16 sps:$4 sm:$0xff]  }
 0xc90   :  { %3058 = vmatpush1.bf16.msra.mxu1 %v6924_v15  ;;  %3018 = vmatprep.subr.bf16.mxu0 %v6929_v17  ;;  %v6989_v15 = vld [vmem:[#allocation10 + $0xc4] ss:$16 sps:$4 sm:$0xff]   ;;  %v6992_v17 = vld [vmem:[#allocation10 + $0xcc] ss:$16 sps:$4 sm:$0xff]  }
 0xc91   :  { %3059 = vmatprep.subr.bf16.mxu1 %v6932_v19  ;;  %v6987_v19 = vld [vmem:[#allocation10 + $0xc0] ss:$16 sps:$4 sm:$0xff]  }
 0xc93   :  { %3019 = vmatpush1.bf16.msra.mxu0 %v6927_v20  ;;  %v6990_v20 = vld [vmem:[#allocation10 + $0xc8] ss:$16 sps:$4 sm:$0xff]  }
 0xc94   :  { %3060 = vmatpush1.bf16.msra.mxu1 %v6930_v21  ;;  %3020 = vmatprep.subr.bf16.mxu0 %v6935_v22  ;;  %v6995_v21 = vld [vmem:[#allocation10 + $0xe4] ss:$16 sps:$4 sm:$0xff]   ;;  %v6998_v22 = vld [vmem:[#allocation10 + $0xec] ss:$16 sps:$4 sm:$0xff]  }
 0xc95   :  { %3061 = vmatprep.subr.bf16.mxu1 %v6938_v24  ;;  %v6993_v24 = vld [vmem:[#allocation10 + $0xe0] ss:$16 sps:$4 sm:$0xff]  }
 0xc97   :  { %3021 = vmatpush1.bf16.msra.mxu0 %v6933_v42  ;;  %v6996_v42 = vld [vmem:[#allocation10 + $0xe8] ss:$16 sps:$4 sm:$0xff]  }
 0xc98   :  { %3062 = vmatpush1.bf16.msra.mxu1 %v6936_v35  ;;  %3022 = vmatprep.subr.bf16.mxu0 %v6941_v33  ;;  %v2652_v35 = vld [vmem:[%s8899_s5] sm:$0xf] }
 0xc99   :  { %3063 = vmatprep.subr.bf16.mxu1 %v6944_v41  ;;  %v2657_v33 = vrot.slane %v2652_v35, %v9082_v46  ;;  %v2661_v41 = vrot.slane %v2652_v35, %v9084_v29 }
 0xc9b   :  { %3023 = vmatpush1.bf16.msra.mxu0 %v6939_v32 }
 0xc9c   :  { %3064 = vmatpush1.bf16.msra.mxu1 %v6942_v39  ;;  %3024 = vmatprep.subr.bf16.mxu0 %v6947_v7 }
 0xc9d   :  { %3065 = vmatprep.subr.bf16.mxu1 %v6950_v34 }
 0xc9f   :  { %3025 = vmatpush1.bf16.msra.mxu0 %v6945_v9 }
 0xca0   :  { %3066 = vmatpush1.bf16.msra.mxu1 %v6948_v10  ;;  %3315 = vmatprep.subr.bf16.mxu0 %v6953_v45 }
 0xca1   :  { %3356 = vmatprep.subr.bf16.mxu1 %v6956_v47 }
 0xd34   :  { %v6453_v43 = vpop.f32.mrb[40].mxu0 }
 0xd35   :  { %v6475_v1 = vpop.f32.mrb[40].mxu1  ;;  %v6454_v2 = vpop.f32.mrb[41].mxu0 }
 0xd36   :  { %v6455_v36 = vadd.f32 %v6454_v2, %v6453_v43  ;;  %v6476_v58 = vpop.f32.mrb[41].mxu1  ;;  %v6456_v18 = vpop.f32.mrb[42].mxu0 }
 0xd37   :  { %v6477_v40 = vadd.f32 %v6476_v58, %v6475_v1  ;;  %v6478_v31 = vpop.f32.mrb[42].mxu1  ;;  %v6457_v23 = vpop.f32.mrb[43].mxu0 }
 0xd38   :  { %v6479_v38 = vpop.f32.mrb[43].mxu1  ;;  %v2665_v23 = vrot.slane %v2652_v35, %v9086_v37 }
 0xd39   :  { %v2582_v4 = vadd.f32 %v6477_v40, %v6455_v36  ;;  %v2669_v40 = vrot.slane %v2652_v35, %v9085_v8 }
 0xd3b   :  { %v2587_v44 = vpack.c.bf16 %v2582_v4, %v2582_v4 }
 0xd3d   :  { %3027 = vmatmul.mubr.bf16.vlgmr.msra.gmra.mrb[44].mxu0 %v2587_v44  ;;  %3068 = vmatmul.mubr.bf16.vlgmr.msra.gmra.mrb[44].mxu1 %v2587_v44 }
 0xd3e   :  { %3347 = vmatprep.mubr.bf16.mxu0 %v9083_v49  ;;  %3388 = vmatprep.mubr.bf16.mxu1 %v9083_v49 }
 0xd3f   :  { %3316 = vmatpush1.bf16.msra.mxu0 %v6951_v48  ;;  %3357 = vmatpush1.bf16.msra.mxu1 %v6954_v12 }
 0xd40   :  { %3317 = vmatprep.subr.bf16.mxu0 %v6959_v50  ;;  %3358 = vmatprep.subr.bf16.mxu1 %v6962_v51 }
 0xd43   :  { %3318 = vmatpush1.bf16.msra.mxu0 %v6957_v52  ;;  %3359 = vmatpush1.bf16.msra.mxu1 %v6960_v53 }
 0xd44   :  { %3319 = vmatprep.subr.bf16.mxu0 %v6965_v55  ;;  %3360 = vmatprep.subr.bf16.mxu1 %v6968_v56 }
 0xd47   :  { %3320 = vmatpush1.bf16.msra.mxu0 %v6963_v57  ;;  %3361 = vmatpush1.bf16.msra.mxu1 %v6966_v59 }
 0xd48   :  { %3321 = vmatprep.subr.bf16.mxu0 %v6971_v16  ;;  %3362 = vmatprep.subr.bf16.mxu1 %v6974_v60 }
 0xd4b   :  { %3322 = vmatpush1.bf16.msra.mxu0 %v6969_v61  ;;  %3363 = vmatpush1.bf16.msra.mxu1 %v6972_v62  ;;  %v3133_v62 = vld [vmem:[%s8901_s7] sm:$0xf] }
 0xd4c   :  { %3323 = vmatprep.subr.bf16.mxu0 %v6977_v0  ;;  %3364 = vmatprep.subr.bf16.mxu1 %v6980_v5  ;;  %v3142_v0 = vrot.slane %v3133_v62, %v9084_v29 }
 0xd4f   :  { %3324 = vmatpush1.bf16.msra.mxu0 %v6975_v63  ;;  %3365 = vmatpush1.bf16.msra.mxu1 %v6978_v3  ;;  %v3146_v63 = vrot.slane %v3133_v62, %v9086_v37  ;;  %v3150_v3 = vrot.slane %v3133_v62, %v9085_v8 }
 0xd50   :  { %3325 = vmatprep.subr.bf16.mxu0 %v6983_v6  ;;  %3366 = vmatprep.subr.bf16.mxu1 %v6986_v11 }
 0xd53   :  { %3326 = vmatpush1.bf16.msra.mxu0 %v6981_v13  ;;  %3367 = vmatpush1.bf16.msra.mxu1 %v6984_v14 }
 0xd54   :  { %3327 = vmatprep.subr.bf16.mxu0 %v6989_v15  ;;  %3368 = vmatprep.subr.bf16.mxu1 %v6992_v17 }
 0xd57   :  { %3328 = vmatpush1.bf16.msra.mxu0 %v6987_v19  ;;  %3369 = vmatpush1.bf16.msra.mxu1 %v6990_v20 }
 0xd58   :  { %3329 = vmatprep.subr.bf16.mxu0 %v6995_v21  ;;  %3370 = vmatprep.subr.bf16.mxu1 %v6998_v22 }
 0xd5b   :  { %3330 = vmatpush1.bf16.msra.mxu0 %v6993_v24  ;;  %3371 = vmatpush1.bf16.msra.mxu1 %v6996_v42 }
 0xe10   :  { %v3028_v32 = vpop.f32.mrb[44].mxu0  ;;  %v3069_v39 = vpop.f32.mrb[44].mxu1 }
 0xe11   :  { %v3029_v7 = vadd.f32 %v3028_v32, %v2657_v33  ;;  %v3030_v34 = vpop.f32.mrb[45].mxu0  ;;  %v3071_v9 = vpop.f32.mrb[45].mxu1  ;;  %v3070_v4 = vadd.f32 %v3069_v39, %v2665_v23  ;;  %v7004_v23 = vld [vmem:[#allocation5 + $0xc8] sm:$0xff]  }
 0xe12   :  { %v3031_v10 = vadd.f32 %v3030_v34, %v2661_v41  ;;  %v3032_v43 = vpop.f32.mrb[46].mxu0  ;;  %v3073_v1 = vpop.f32.mrb[46].mxu1  ;;  %v3072_v31 = vadd.f32 %v3071_v9, %v2669_v40  ;;  %v7002_v40 = vld [vmem:[#allocation5 + $0x80] sm:$0xff]  }
 0xe13   :  { %v6116_v2 = vmul.f32 -1.442695, %v3029_v7  ;;  %v3033_v36 = vpop.f32.mrb[47].mxu0  ;;  %v3074_v58 = vpop.f32.mrb[47].mxu1 }
 0xe14   :  { %v6117_v18 = vmul.f32 -1.442695, %v3031_v10  ;;  %v6118_v38 = vmul.f32 -1.442695, %v3072_v31  ;;  %v6999_v36 = vld [vmem:[#allocation5 + $0x40] sm:$0xff]   ;;  %v7003_v31 = vld [vmem:[#allocation5 + $0x48] sm:$0xff]  }
 0xe15   :  { %7495 = vpow2.f32 %v6116_v2  ;;  %v7000_v58 = vld [vmem:[#allocation5 + $0xc0] sm:$0xff]   ;;  %6481 = vmatprep.subr.bf16.mxu0 %v6999_v36  ;;  %v7046_v36 = vld [vmem:[#allocation8 + $0x48] ss:$16 sps:$4 sm:$0xff]  }
 0xe16   :  { %7497 = vpow2.f32 %v6117_v18  ;;  %v7001_v18 = vld [vmem:[#allocation5] sm:$0xff]   ;;  %6503 = vmatprep.subr.bf16.mxu1 %v7000_v58 }
 0xe17   :  { %7499 = vpow2.f32 %v6118_v38  ;;  %v7005_v38 = vld [vmem:[#allocation5 + $0x8] sm:$0xff]   ;;  %v7051_v58 = vld [vmem:[#allocation8 + $0x64] ss:$16 sps:$4 sm:$0xff]  }
 0xe18   :  { %7501 = vtanh.f32 %v3070_v4  ;;  %v7006_v4 = vld [vmem:[#allocation5 + $0x88] sm:$0xff]  }
 0xe1f   :  { %v7496_v44 = vpop.eup %7495 }
 0xe20   :  { %v7498_v45 = vpop.eup %7497  ;;  %v3079_v47 = vadd.f32 1.0, %v7496_v44  ;;  %v7007_v44 = vld [vmem:[#allocation5 + $0x50] sm:$0xff]  }
 0xe21   :  { %v3085_v48 = vadd.f32 1.0, %v7498_v45  ;;  %v7500_v12 = vpop.eup %7499  ;;  %v7008_v45 = vld [vmem:[#allocation5 + $0xd0] sm:$0xff]  }
 0xe22   :  { %7503 = vrcp.f32 %v3079_v47  ;;  %v7502_v50 = vpop.eup %7501  ;;  %v3092_v55 = vadd.f32 1.0, %v7500_v12  ;;  %v7009_v47 = vld [vmem:[#allocation5 + $0x10] sm:$0xff]   ;;  %v7011_v12 = vld [vmem:[#allocation5 + $0x58] sm:$0xff]  }
 0xe23   :  { %7505 = vrcp.f32 %v3085_v48  ;;  %v7010_v48 = vld [vmem:[#allocation5 + $0x90] sm:$0xff]  }
 0xe24   :  { %7507 = vrcp.f32 %v3092_v55  ;;  %v7016_v55 = vld [vmem:[#allocation5 + $0xe0] sm:$0xff]  }
 0xe2c   :  { %v7504_v51 = vpop.eup %7503 }
 0xe2d   :  { %v7506_v52 = vpop.eup %7505  ;;  %v3096_v53 = vmul.f32 %v7504_v51, %v7502_v50  ;;  %v7012_v50 = vld [vmem:[#allocation5 + $0xd8] sm:$0xff]  }
 0xe2e   :  { %v3095_v56 = vmul.f32 %v7506_v52, %v8749_v54  ;;  %v7508_v59 = vpop.eup %7507  ;;  %v3138_v54 = vrot.slane %v3133_v62, %v9082_v46  ;;  %v7013_v51 = vld [vmem:[#allocation5 + $0x18] sm:$0xff]   ;;  %v7021_v62 = vld [vmem:[#allocation5 + $0x28] sm:$0xff]  }
 0xe2f   :  { %v7014_v52 = vld [vmem:[#allocation5 + $0x98] sm:$0xff]  }
 0xe30   :  { %v8799_v57 = vadd.f32 %v3096_v53, %v3095_v56  ;;  %v7015_v53 = vld [vmem:[#allocation5 + $0x60] sm:$0xff]  }
 0xe31   :  { %v7017_v56 = vld [vmem:[#allocation5 + $0x20] sm:$0xff]  }
 0xe32   :  { %7509 = vtanh.f32 %v8799_v57 }
 0xe3c   :  { %v7510_v16 = vpop.eup %7509 }
 0xe3d   :  { %v3099_v60 = vmul.f32 %v7510_v16, %v7508_v59  ;;  %v7018_v59 = vld [vmem:[#allocation5 + $0xa0] sm:$0xff]   ;;  %v7019_v16 = vld [vmem:[#allocation5 + $0x68] sm:$0xff]  }
 0xe3f   :  { %v8802_v61 = vpack.c.bf16 %v3099_v60, %v3099_v60  ;;  %v7020_v60 = vld [vmem:[#allocation5 + $0xe8] sm:$0xff]  }
 0xe41   :  { %3348 = vmatmul.mubr.bf16.vlgmr.msra.gmra.mrb[48].mxu0 %v8802_v61  ;;  %3389 = vmatmul.mubr.bf16.vlgmr.msra.gmra.mrb[48].mxu1 %v8802_v61 }
 0xe42   :  { %6482 = vmatpush3.bf16.msra.mxu0 %v7001_v18  ;;  %6504 = vmatpush3.bf16.msra.mxu1 %v7002_v40  ;;  %v7054_v18 = vld [vmem:[#allocation8 + $0x6c] ss:$16 sps:$4 sm:$0xff]   ;;  %v7049_v40 = vld [vmem:[#allocation8 + $0x60] ss:$16 sps:$4 sm:$0xff]  }
 0xe43   :  { %6483 = vmatprep.subr.bf16.mxu0 %v7003_v31  ;;  %6505 = vmatprep.subr.bf16.mxu1 %v7004_v23  ;;  %v7057_v31 = vld [vmem:[#allocation8 + $0x84] ss:$16 sps:$4 sm:$0xff]   ;;  %v7060_v23 = vld [vmem:[#allocation8 + $0x8c] ss:$16 sps:$4 sm:$0xff]  }
 0xe46   :  { %6484 = vmatpush3.bf16.msra.mxu0 %v7005_v38  ;;  %6506 = vmatpush3.bf16.msra.mxu1 %v7006_v4  ;;  %v7055_v38 = vld [vmem:[#allocation8 + $0x80] ss:$16 sps:$4 sm:$0xff]   ;;  %v7058_v4 = vld [vmem:[#allocation8 + $0x88] ss:$16 sps:$4 sm:$0xff]  }
 0xe47   :  { %6485 = vmatprep.subr.bf16.mxu0 %v7007_v44  ;;  %6507 = vmatprep.subr.bf16.mxu1 %v7008_v45  ;;  %v7063_v44 = vld [vmem:[#allocation8 + $0xa4] ss:$16 sps:$4 sm:$0xff]   ;;  %v7066_v45 = vld [vmem:[#allocation8 + $0xac] ss:$16 sps:$4 sm:$0xff]  }
 0xe4a   :  { %6486 = vmatpush3.bf16.msra.mxu0 %v7009_v47  ;;  %6508 = vmatpush3.bf16.msra.mxu1 %v7010_v48  ;;  %v7061_v47 = vld [vmem:[#allocation8 + $0xa0] ss:$16 sps:$4 sm:$0xff]   ;;  %v7064_v48 = vld [vmem:[#allocation8 + $0xa8] ss:$16 sps:$4 sm:$0xff]  }
 0xe4b   :  { %6487 = vmatprep.subr.bf16.mxu0 %v7011_v12  ;;  %6509 = vmatprep.subr.bf16.mxu1 %v7012_v50  ;;  %v7069_v12 = vld [vmem:[#allocation8 + $0xc4] ss:$16 sps:$4 sm:$0xff]   ;;  %v7072_v50 = vld [vmem:[#allocation8 + $0xcc] ss:$16 sps:$4 sm:$0xff]  }
 0xe4e   :  { %6488 = vmatpush3.bf16.msra.mxu0 %v7013_v51  ;;  %6510 = vmatpush3.bf16.msra.mxu1 %v7014_v52  ;;  %v7067_v51 = vld [vmem:[#allocation8 + $0xc0] ss:$16 sps:$4 sm:$0xff]   ;;  %v7070_v52 = vld [vmem:[#allocation8 + $0xc8] ss:$16 sps:$4 sm:$0xff]  }
 0xe4f   :  { %6489 = vmatprep.subr.bf16.mxu0 %v7015_v53  ;;  %6511 = vmatprep.subr.bf16.mxu1 %v7016_v55  ;;  %v7075_v53 = vld [vmem:[#allocation8 + $0xe4] ss:$16 sps:$4 sm:$0xff]   ;;  %v7078_v55 = vld [vmem:[#allocation8 + $0xec] ss:$16 sps:$4 sm:$0xff]  }
 0xe52   :  { %6490 = vmatpush3.bf16.msra.mxu0 %v7017_v56  ;;  %6512 = vmatpush3.bf16.msra.mxu1 %v7018_v59  ;;  %v7073_v56 = vld [vmem:[#allocation8 + $0xe0] ss:$16 sps:$4 sm:$0xff]   ;;  %v7076_v59 = vld [vmem:[#allocation8 + $0xe8] ss:$16 sps:$4 sm:$0xff]  }
 0xe53   :  { %6491 = vmatprep.subr.bf16.mxu0 %v7019_v16  ;;  %6513 = vmatprep.subr.bf16.mxu1 %v7020_v60  ;;  %v7081_v16 = vld [vmem:[#allocation8 + $0x104] ss:$16 sps:$4 sm:$0xff]   ;;  %v7084_v60 = vld [vmem:[#allocation8 + $0x10c] ss:$16 sps:$4 sm:$0xff]  }
 0xe56   :  { %6492 = vmatpush3.bf16.msra.mxu0 %v7021_v62  ;;  %v7079_v62 = vld [vmem:[#allocation8 + $0x100] ss:$16 sps:$4 sm:$0xff]  }
 0xf14   :  { %v3349_v5 = vpop.f32.mrb[48].mxu0  ;;  %v3390_v6 = vpop.f32.mrb[48].mxu1 }
 0xf15   :  { %v3350_v11 = vadd.f32 %v3349_v5, %v3138_v54  ;;  %v3391_v13 = vadd.f32 %v3390_v6, %v3146_v63  ;;  %v3351_v14 = vpop.f32.mrb[49].mxu0  ;;  %v3392_v15 = vpop.f32.mrb[49].mxu1  ;;  %v7022_v54 = vld [vmem:[#allocation5 + $0xa8] sm:$0xff]   ;;  %v7023_v63 = vld [vmem:[#allocation5 + $0x70] sm:$0xff]  }
 0xf16   :  { %v3352_v17 = vadd.f32 %v3351_v14, %v3142_v0  ;;  %v3393_v19 = vadd.f32 %v3392_v15, %v3150_v3  ;;  %v3353_v20 = vpop.f32.mrb[50].mxu0  ;;  %v3394_v21 = vpop.f32.mrb[50].mxu1  ;;  %v7024_v0 = vld [vmem:[#allocation5 + $0xf0] sm:$0xff]   ;;  %6514 = vmatpush3.bf16.msra.mxu1 %v7022_v54  ;;  %6493 = vmatprep.subr.bf16.mxu0 %v7023_v63  ;;  %v7027_v15 = vld [vmem:[#allocation5 + $0x78] sm:$0xff]  }
 0xf17   :  { %3398 = vst [vmem:[#allocation11 + $0x20] sm:$0xff] %v3350_v11  ;;  %3400 = vst [vmem:[#allocation11 + $0x30] sm:$0xff] %v3391_v13  ;;  %v3354_v22 = vpop.f32.mrb[51].mxu0  ;;  %v3395_v24 = vpop.f32.mrb[51].mxu1  ;;  %6515 = vmatprep.subr.bf16.mxu1 %v7024_v0  ;;  %v7026_v14 = vld [vmem:[#allocation5 + $0xb0] sm:$0xff]   ;;  %v7030_v20 = vld [vmem:[#allocation5 + $0xb8] sm:$0xff]  }
 0xf18   :  { %3399 = vst [vmem:[#allocation11 + $0x28] sm:$0xff] %v3352_v17  ;;  %3401 = vst [vmem:[#allocation11 + $0x38] sm:$0xff] %v3393_v19  ;;  %v3402_v42 = vmax.f32 %v3350_v11, %v3352_v17  ;;  %v3403_v35 = vmax.f32 %v3391_v13, %v3393_v19  ;;  %v7033_v21 = vld [vmem:[#allocation8 + $0x4] ss:$16 sps:$4 sm:$0xff]   ;;  %v7036_v22 = vld [vmem:[#allocation8 + $0xc] ss:$16 sps:$4 sm:$0xff]  }
 0xf19   :  { %v7082_v54 = vld [vmem:[#allocation8 + $0x108] ss:$16 sps:$4 sm:$0xff]   ;;  %v7087_v63 = vld [vmem:[#allocation8 + $0x124] ss:$16 sps:$4 sm:$0xff]   ;;  %v7090_v0 = vld [vmem:[#allocation8 + $0x12c] ss:$16 sps:$4 sm:$0xff]  }
 0xf1a   :  { %v3404_v33 = vmax.f32 %v3402_v42, %v3403_v35  ;;  %6516 = vmatpush3.bf16.msra.mxu1 %v7026_v14  ;;  %v7094_v14 = vld [vmem:[#allocation8 + $0x148] ss:$16 sps:$4 sm:$0xff]  }
 0xf1c   :  { %3405 = vmax.xlane.f32.xlu1 %v3404_v33 }
 0xfa9   :  { %v3406_v41 = vpop.xlane.xlu1 %3405 }
 0xfaa   :  { %vm3407_vm0 = vcmp.eq.f32.partialorder %v3350_v11, %v3406_v41  ;;  %vm3408_vm1 = vcmp.eq.f32.partialorder %v3352_v17, %v3406_v41  ;;  %vm3409_vm2 = vcmp.eq.f32.partialorder %v3391_v13, %v3406_v41  ;;  %vm3410_vm3 = vcmp.eq.f32.partialorder %v3393_v19, %v3406_v41  ;;  %v7025_v13 = vld [vmem:[#allocation5 + $0x30] sm:$0xff]   ;;  %v7028_v17 = vld [vmem:[#allocation5 + $0xf8] sm:$0xff]  }
 0xfab   :  { %v3411_v32 = vsel %vm3407_vm0, %v8764_v25, 512  ;;  %v3412_v39 = vsel %vm3408_vm1, %v8767_v26, 512  ;;  %v3413_v7 = vsel %vm3409_vm2, %v8770_v27, 512  ;;  %v3414_v34 = vsel %vm3410_vm3, %v8773_v28, 512  ;;  %6494 = vmatpush3.bf16.msra.mxu0 %v7025_v13  ;;  %v7029_v19 = vld [vmem:[#allocation5 + $0x38] sm:$0xff]   ;;  %6517 = vmatprep.subr.bf16.mxu1 %v7028_v17 }
 0xfac   :  { %vm3415_vm4 = vcmp.lt.s32.totalorder %v3411_v32, %v3412_v39  ;;  %vm3417_vm5 = vcmp.lt.s32.totalorder %v3413_v7, %v3414_v34  ;;  %6495 = vmatprep.subr.bf16.mxu0 %v7027_v15  ;;  %6518 = vmatpush3.bf16.msra.mxu1 %v7030_v20  ;;  %v7091_v13 = vld [vmem:[#allocation8 + $0x140] ss:$16 sps:$4 sm:$0xff]   ;;  %v7099_v15 = vld [vmem:[#allocation8 + $0x164] ss:$16 sps:$4 sm:$0xff]   ;;  %v7102_v17 = vld [vmem:[#allocation8 + $0x16c] ss:$16 sps:$4 sm:$0xff]  }
 0xfad   :  { %v3416_v9 = vsel %vm3415_vm4, %v3411_v32, %v3412_v39  ;;  %v3418_v10 = vsel %vm3417_vm5, %v3413_v7, %v3414_v34  ;;  %4235 = vmatprep.subr.bf16.mxu1 %v7036_v22  ;;  %v7031_v32 = vld [vmem:[#allocation8] ss:$16 sps:$4 sm:$0xff]   ;;  %v7034_v39 = vld [vmem:[#allocation8 + $0x8] ss:$16 sps:$4 sm:$0xff]   ;;  %v7039_v7 = vld [vmem:[#allocation8 + $0x24] ss:$16 sps:$4 sm:$0xff]  }
 0xfae   :  { %vm3419_vm6 = vcmp.lt.s32.totalorder %v3416_v9, %v3418_v10  ;;  %v7042_v34 = vld [vmem:[#allocation8 + $0x2c] ss:$16 sps:$4 sm:$0xff]   ;;  %v7100_v20 = vld [vmem:[#allocation8 + $0x168] ss:$16 sps:$4 sm:$0xff]  }
 0xfaf   :  { %v3420_v43 = vsel %vm3419_vm6, %v3416_v9, %v3418_v10  ;;  %6496 = vmatpush3.bf16.msra.mxu0 %v7029_v19  ;;  %v7037_v9 = vld [vmem:[#allocation8 + $0x20] ss:$16 sps:$4 sm:$0xff]   ;;  %v7040_v10 = vld [vmem:[#allocation8 + $0x28] ss:$16 sps:$4 sm:$0xff]   ;;  %v7108_v22 = vld [vmem:[#allocation8 + $0x18c] ss:$16 sps:$4 sm:$0xff]  }
 0xfb0   :  { %v3422_v1 = vshra.s32 %v3420_v43, 16  ;;  %v3421_v3 = vand.u32 65535, %v3420_v43  ;;  %4194 = vmatprep.subr.bf16.mxu0 %v7033_v21  ;;  %v7045_v43 = vld [vmem:[#allocation8 + $0x44] ss:$16 sps:$4 sm:$0xff]   ;;  %v7097_v19 = vld [vmem:[#allocation8 + $0x160] ss:$16 sps:$4 sm:$0xff]  }
 0xfb1   :  { %v7105_v21 = vld [vmem:[#allocation8 + $0x184] ss:$16 sps:$4 sm:$0xff]  }
 0xfb2   :  { %v3424_v2 = vcvt.s32.f32 %v3422_v1  ;;  %v3423_v6 = vcvt.s32.f32 %v3421_v3  ;;  %v7048_v1 = vld [vmem:[#allocation8 + $0x4c] ss:$16 sps:$4 sm:$0xff]   ;;  %v7085_v3 = vld [vmem:[#allocation8 + $0x120] ss:$16 sps:$4 sm:$0xff]  }
 0xfb4   :  { %3425 = vmin.xlane.f32.xlu0 %v3424_v2 }
0x1041   :  { %v3426_v5 = vpop.xlane.xlu0 %3425 }
0x1042   :  { %vm3427_vm7 = vcmp.eq.f32.partialorder %v3424_v2, %v3426_v5  ;;  %v3432_v24 = vcvt.f32.s32 %v3426_v5  ;;  %v7043_v2 = vld [vmem:[#allocation8 + $0x40] ss:$16 sps:$4 sm:$0xff]   ;;  %v7088_v5 = vld [vmem:[#allocation8 + $0x128] ss:$16 sps:$4 sm:$0xff]  }
0x1043   :  { %v3428_v11 = vsel %vm3427_vm7, %v3423_v6, inf  ;;  %v7093_v6 = vld [vmem:[#allocation8 + $0x144] ss:$16 sps:$4 sm:$0xff]  }
0x1044   :  { %3429 = vmin.xlane.f32.xlu1 %v3428_v11  ;;  %v3433_v35 = vshll.u32 %v3432_v24, 16  ;;  %v7096_v11 = vld [vmem:[#allocation8 + $0x14c] ss:$16 sps:$4 sm:$0xff]   ;;  %v7103_v24 = vld [vmem:[#allocation8 + $0x180] ss:$16 sps:$4 sm:$0xff]  }
0x10d1   :  { %v3430_v42 = vpop.xlane.xlu1 %3429 }
0x10d2   :  { %v3431_v33 = vcvt.f32.s32 %v3430_v42  ;;  %v7106_v42 = vld [vmem:[#allocation8 + $0x188] ss:$16 sps:$4 sm:$0xff]  }
0x10d4   :  { %v3434_v41 = vadd.s32 %v3433_v35, %v3431_v33  ;;  %v7111_v35 = vld [vmem:[#allocation8 + $0x1a4] ss:$16 sps:$4 sm:$0xff]   ;;  %v7114_v33 = vld [vmem:[#allocation8 + $0x1ac] ss:$16 sps:$4 sm:$0xff]  }
0x10d6   :  { %vm3436_vm8 = vcmp.eq.s32.totalorder %v8767_v26, %v3434_v41  ;;  %vm3438_vm9 = vcmp.eq.s32.totalorder %v8773_v28, %v3434_v41  ;;  %vm3435_vm10 = vcmp.eq.s32.totalorder %v8764_v25, %v3434_v41  ;;  %vm3437_vm12 = vcmp.eq.s32.totalorder %v8770_v27, %v3434_v41  ;;  %v7109_v41 = vld [vmem:[#allocation8 + $0x1a0] ss:$16 sps:$4 sm:$0xff]  }
0x10d7   :  { %vm6187_vm11 = vmpackc.low %vm3436_vm8, %vm3436_vm8 }
0x10d8   :  { %6188 = vmatprep.mubr.msk.bf16.mxu0 %vm6187_vm11, %v7819_v30  ;;  %vm6191_vm13 = vmpackc.low %vm3438_vm9, %vm3438_vm9 }
0x10d9   :  { %6192 = vmatprep.mubr.msk.bf16.mxu1 %vm6191_vm13, %v7819_v30  ;;  %vm6189_vm14 = vmpackc.low %vm3435_vm10, %vm3435_vm10 }
0x10da   :  { %6190 = vmatmul.mubr.msk.bf16.vlgmr.msra.gmra.mrb[52].mxu0 %vm6189_vm14, %v7819_v30  ;;  %vm6193_vm15 = vmpackc.low %vm3437_vm12, %vm3437_vm12 }
0x10db   :  { %6194 = vmatmul.mubr.msk.bf16.vlgmr.msra.gmra.mrb[52].mxu1 %vm6193_vm15, %v7819_v30  ;;  %4226 = vmatprep.mubr.bf16.mxu0 %v8802_v61 }
0x10dc   :  { %4267 = vmatprep.mubr.bf16.mxu1 %v8802_v61  ;;  %4195 = vmatpush1.bf16.msra.mxu0 %v7031_v32  ;;  %v7052_v61 = vld [vmem:[#allocation8 + $0x68] ss:$16 sps:$4 sm:$0xff]  }
0x10dd   :  { %4236 = vmatpush1.bf16.msra.mxu1 %v7034_v39  ;;  %4196 = vmatprep.subr.bf16.mxu0 %v7039_v7  ;;  %v7112_v32 = vld [vmem:[#allocation8 + $0x1a8] ss:$16 sps:$4 sm:$0xff]   ;;  %v7117_v39 = vld [vmem:[#allocation8 + $0x1c4] ss:$16 sps:$4 sm:$0xff]   ;;  %v7120_v7 = vld [vmem:[#allocation8 + $0x1cc] ss:$16 sps:$4 sm:$0xff]  }
0x10de   :  { %4237 = vmatprep.subr.bf16.mxu1 %v7042_v34  ;;  %v7115_v34 = vld [vmem:[#allocation8 + $0x1c0] ss:$16 sps:$4 sm:$0xff]  }
0x10e0   :  { %4197 = vmatpush1.bf16.msra.mxu0 %v7037_v9  ;;  %v7118_v9 = vld [vmem:[#allocation8 + $0x1c8] ss:$16 sps:$4 sm:$0xff]  }
0x10e1   :  { %4238 = vmatpush1.bf16.msra.mxu1 %v7040_v10  ;;  %4198 = vmatprep.subr.bf16.mxu0 %v7045_v43  ;;  %v7123_v10 = vld [vmem:[#allocation8 + $0x1e4] ss:$16 sps:$4 sm:$0xff]   ;;  %v7126_v43 = vld [vmem:[#allocation8 + $0x1ec] ss:$16 sps:$4 sm:$0xff]  }
0x10e2   :  { %4239 = vmatprep.subr.bf16.mxu1 %v7048_v1  ;;  %v7121_v1 = vld [vmem:[#allocation8 + $0x1e0] ss:$16 sps:$4 sm:$0xff]  }
0x10e4   :  { %4199 = vmatpush1.bf16.msra.mxu0 %v7043_v2  ;;  %v7124_v2 = vld [vmem:[#allocation8 + $0x1e8] ss:$16 sps:$4 sm:$0xff]  }
0x10e5   :  { %4240 = vmatpush1.bf16.msra.mxu1 %v7046_v36  ;;  %4200 = vmatprep.subr.bf16.mxu0 %v7051_v58 }
0x10e6   :  { %4241 = vmatprep.subr.bf16.mxu1 %v7054_v18 }
0x10e8   :  { %4201 = vmatpush1.bf16.msra.mxu0 %v7049_v40 }
0x10e9   :  { %4242 = vmatpush1.bf16.msra.mxu1 %v7052_v61  ;;  %4202 = vmatprep.subr.bf16.mxu0 %v7057_v31 }
0x10ea   :  { %4243 = vmatprep.subr.bf16.mxu1 %v7060_v23 }
0x10ec   :  { %4203 = vmatpush1.bf16.msra.mxu0 %v7055_v38 }
0x10ed   :  { %4244 = vmatpush1.bf16.msra.mxu1 %v7058_v4  ;;  %4204 = vmatprep.subr.bf16.mxu0 %v7063_v44 }
0x10ee   :  { %4245 = vmatprep.subr.bf16.mxu1 %v7066_v45 }
0x10f0   :  { %4205 = vmatpush1.bf16.msra.mxu0 %v7061_v47 }
0x10f1   :  { %4246 = vmatpush1.bf16.msra.mxu1 %v7064_v48  ;;  %4206 = vmatprep.subr.bf16.mxu0 %v7069_v12  ;;  %v7129_v48 = vld [vmem:[#allocation10 + $0x4] ss:$16 sps:$4 sm:$0xff]   ;;  %v7132_v12 = vld [vmem:[#allocation10 + $0xc] ss:$16 sps:$4 sm:$0xff]  }
0x10f2   :  { %4247 = vmatprep.subr.bf16.mxu1 %v7072_v50  ;;  %v7127_v50 = vld [vmem:[#allocation10] ss:$16 sps:$4 sm:$0xff]  }
0x10f4   :  { %4207 = vmatpush1.bf16.msra.mxu0 %v7067_v51  ;;  %v7130_v51 = vld [vmem:[#allocation10 + $0x8] ss:$16 sps:$4 sm:$0xff]  }
0x10f5   :  { %4248 = vmatpush1.bf16.msra.mxu1 %v7070_v52  ;;  %4208 = vmatprep.subr.bf16.mxu0 %v7075_v53  ;;  %v7135_v52 = vld [vmem:[#allocation10 + $0x24] ss:$16 sps:$4 sm:$0xff]   ;;  %v7138_v53 = vld [vmem:[#allocation10 + $0x2c] ss:$16 sps:$4 sm:$0xff]  }
0x10f6   :  { %4249 = vmatprep.subr.bf16.mxu1 %v7078_v55  ;;  %v7133_v55 = vld [vmem:[#allocation10 + $0x20] ss:$16 sps:$4 sm:$0xff]  }
0x10f8   :  { %4209 = vmatpush1.bf16.msra.mxu0 %v7073_v56  ;;  %v7136_v56 = vld [vmem:[#allocation10 + $0x28] ss:$16 sps:$4 sm:$0xff]  }
0x10f9   :  { %4250 = vmatpush1.bf16.msra.mxu1 %v7076_v59  ;;  %4210 = vmatprep.subr.bf16.mxu0 %v7081_v16  ;;  %v7141_v59 = vld [vmem:[#allocation10 + $0x44] ss:$16 sps:$4 sm:$0xff]   ;;  %v7144_v16 = vld [vmem:[#allocation10 + $0x4c] ss:$16 sps:$4 sm:$0xff]  }
0x10fa   :  { %4251 = vmatprep.subr.bf16.mxu1 %v7084_v60  ;;  %v7139_v60 = vld [vmem:[#allocation10 + $0x40] ss:$16 sps:$4 sm:$0xff]  }
0x10fc   :  { %4211 = vmatpush1.bf16.msra.mxu0 %v7079_v62  ;;  %v7142_v62 = vld [vmem:[#allocation10 + $0x48] ss:$16 sps:$4 sm:$0xff]  }
0x10fd   :  { %4252 = vmatpush1.bf16.msra.mxu1 %v7082_v54  ;;  %4212 = vmatprep.subr.bf16.mxu0 %v7087_v63  ;;  %v7147_v54 = vld [vmem:[#allocation10 + $0x64] ss:$16 sps:$4 sm:$0xff]   ;;  %v7150_v63 = vld [vmem:[#allocation10 + $0x6c] ss:$16 sps:$4 sm:$0xff]  }
0x10fe   :  { %4253 = vmatprep.subr.bf16.mxu1 %v7090_v0  ;;  %v7145_v0 = vld [vmem:[#allocation10 + $0x60] ss:$16 sps:$4 sm:$0xff]  }
0x1100   :  { %4213 = vmatpush1.bf16.msra.mxu0 %v7085_v3  ;;  %v7148_v3 = vld [vmem:[#allocation10 + $0x68] ss:$16 sps:$4 sm:$0xff]  }
0x1101   :  { %4254 = vmatpush1.bf16.msra.mxu1 %v7088_v5  ;;  %4214 = vmatprep.subr.bf16.mxu0 %v7093_v6  ;;  %v7151_v5 = vld [vmem:[#allocation10 + $0x80] ss:$16 sps:$4 sm:$0xff]   ;;  %v7153_v6 = vld [vmem:[#allocation10 + $0x84] ss:$16 sps:$4 sm:$0xff]  }
0x1102   :  { %4255 = vmatprep.subr.bf16.mxu1 %v7096_v11  ;;  %v7154_v11 = vld [vmem:[#allocation10 + $0x88] ss:$16 sps:$4 sm:$0xff]  }
0x1104   :  { %4215 = vmatpush1.bf16.msra.mxu0 %v7091_v13  ;;  %v7156_v13 = vld [vmem:[#allocation10 + $0x8c] ss:$16 sps:$4 sm:$0xff]  }
0x1105   :  { %4256 = vmatpush1.bf16.msra.mxu1 %v7094_v14  ;;  %4216 = vmatprep.subr.bf16.mxu0 %v7099_v15  ;;  %v7159_v14 = vld [vmem:[#allocation10 + $0xa4] ss:$16 sps:$4 sm:$0xff]   ;;  %v7162_v15 = vld [vmem:[#allocation10 + $0xac] ss:$16 sps:$4 sm:$0xff]  }
0x1106   :  { %4257 = vmatprep.subr.bf16.mxu1 %v7102_v17  ;;  %v7157_v17 = vld [vmem:[#allocation10 + $0xa0] ss:$16 sps:$4 sm:$0xff]  }
0x1108   :  { %4217 = vmatpush1.bf16.msra.mxu0 %v7097_v19  ;;  %v7160_v19 = vld [vmem:[#allocation10 + $0xa8] ss:$16 sps:$4 sm:$0xff]  }
0x1109   :  { %4258 = vmatpush1.bf16.msra.mxu1 %v7100_v20  ;;  %4218 = vmatprep.subr.bf16.mxu0 %v7105_v21  ;;  %v7165_v20 = vld [vmem:[#allocation10 + $0xc4] ss:$16 sps:$4 sm:$0xff]   ;;  %v7168_v21 = vld [vmem:[#allocation10 + $0xcc] ss:$16 sps:$4 sm:$0xff]  }
0x110a   :  { %4259 = vmatprep.subr.bf16.mxu1 %v7108_v22  ;;  %v7163_v22 = vld [vmem:[#allocation10 + $0xc0] ss:$16 sps:$4 sm:$0xff]  }
0x110c   :  { %4219 = vmatpush1.bf16.msra.mxu0 %v7103_v24  ;;  %v7166_v24 = vld [vmem:[#allocation10 + $0xc8] ss:$16 sps:$4 sm:$0xff]  }
0x110d   :  { %4260 = vmatpush1.bf16.msra.mxu1 %v7106_v42  ;;  %4220 = vmatprep.subr.bf16.mxu0 %v7111_v35  ;;  %v7171_v42 = vld [vmem:[#allocation10 + $0xe4] ss:$16 sps:$4 sm:$0xff]   ;;  %v7174_v35 = vld [vmem:[#allocation10 + $0xec] ss:$16 sps:$4 sm:$0xff]  }
0x110e   :  { %4261 = vmatprep.subr.bf16.mxu1 %v7114_v33  ;;  %v7169_v33 = vld [vmem:[#allocation10 + $0xe0] ss:$16 sps:$4 sm:$0xff]  }
0x1110   :  { %4221 = vmatpush1.bf16.msra.mxu0 %v7109_v41  ;;  %v7172_v41 = vld [vmem:[#allocation10 + $0xe8] ss:$16 sps:$4 sm:$0xff]  }
0x1111   :  { %4262 = vmatpush1.bf16.msra.mxu1 %v7112_v32  ;;  %4222 = vmatprep.subr.bf16.mxu0 %v7117_v39  ;;  %v3852_v32 = vld [vmem:[%s8899_s5] sm:$0xf] }
0x1112   :  { %4263 = vmatprep.subr.bf16.mxu1 %v7120_v7  ;;  %v3857_v39 = vrot.slane %v3852_v32, %v9082_v46  ;;  %v3861_v7 = vrot.slane %v3852_v32, %v9084_v29 }
0x1114   :  { %4223 = vmatpush1.bf16.msra.mxu0 %v7115_v34 }
0x1115   :  { %4264 = vmatpush1.bf16.msra.mxu1 %v7118_v9  ;;  %4224 = vmatprep.subr.bf16.mxu0 %v7123_v10 }
0x1116   :  { %4265 = vmatprep.subr.bf16.mxu1 %v7126_v43 }
0x1118   :  { %4225 = vmatpush1.bf16.msra.mxu0 %v7121_v1 }
0x1119   :  { %4266 = vmatpush1.bf16.msra.mxu1 %v7124_v2  ;;  %4515 = vmatprep.subr.bf16.mxu0 %v7129_v48 }
0x111a   :  { %4556 = vmatprep.subr.bf16.mxu1 %v7132_v12 }
0x11ad   :  { %v6497_v36 = vpop.f32.mrb[52].mxu0 }
0x11ae   :  { %v6519_v58 = vpop.f32.mrb[52].mxu1  ;;  %v6498_v18 = vpop.f32.mrb[53].mxu0 }
0x11af   :  { %v6499_v40 = vadd.f32 %v6498_v18, %v6497_v36  ;;  %v6520_v61 = vpop.f32.mrb[53].mxu1  ;;  %v6500_v31 = vpop.f32.mrb[54].mxu0 }
0x11b0   :  { %v6521_v23 = vadd.f32 %v6520_v61, %v6519_v58  ;;  %v6522_v38 = vpop.f32.mrb[54].mxu1  ;;  %v6501_v4 = vpop.f32.mrb[55].mxu0 }
0x11b1   :  { %v6523_v44 = vpop.f32.mrb[55].mxu1  ;;  %v3865_v4 = vrot.slane %v3852_v32, %v9086_v37 }
0x11b2   :  { %v3782_v45 = vadd.f32 %v6521_v23, %v6499_v40  ;;  %v3869_v23 = vrot.slane %v3852_v32, %v9085_v8 }
0x11b4   :  { %v3787_v47 = vpack.c.bf16 %v3782_v45, %v3782_v45 }
0x11b6   :  { %4227 = vmatmul.mubr.bf16.vlgmr.msra.gmra.mrb[56].mxu0 %v3787_v47  ;;  %4268 = vmatmul.mubr.bf16.vlgmr.msra.gmra.mrb[56].mxu1 %v3787_v47 }
0x11b7   :  { %4547 = vmatprep.mubr.bf16.mxu0 %v9083_v49  ;;  %4588 = vmatprep.mubr.bf16.mxu1 %v9083_v49 }
0x11b8   :  { %4516 = vmatpush1.bf16.msra.mxu0 %v7127_v50  ;;  %4557 = vmatpush1.bf16.msra.mxu1 %v7130_v51 }
0x11b9   :  { %4517 = vmatprep.subr.bf16.mxu0 %v7135_v52  ;;  %4558 = vmatprep.subr.bf16.mxu1 %v7138_v53 }
0x11bc   :  { %4518 = vmatpush1.bf16.msra.mxu0 %v7133_v55  ;;  %4559 = vmatpush1.bf16.msra.mxu1 %v7136_v56 }
0x11bd   :  { %4519 = vmatprep.subr.bf16.mxu0 %v7141_v59  ;;  %4560 = vmatprep.subr.bf16.mxu1 %v7144_v16 }
0x11c0   :  { %4520 = vmatpush1.bf16.msra.mxu0 %v7139_v60  ;;  %4561 = vmatpush1.bf16.msra.mxu1 %v7142_v62 }
0x11c1   :  { %4521 = vmatprep.subr.bf16.mxu0 %v7147_v54  ;;  %4562 = vmatprep.subr.bf16.mxu1 %v7150_v63 }
0x11c4   :  { %4522 = vmatpush1.bf16.msra.mxu0 %v7145_v0  ;;  %4563 = vmatpush1.bf16.msra.mxu1 %v7148_v3  ;;  %v4333_v3 = vld [vmem:[%s8901_s7] sm:$0xf] }
0x11c5   :  { %4523 = vmatprep.subr.bf16.mxu0 %v7153_v6  ;;  %4564 = vmatprep.subr.bf16.mxu1 %v7156_v13  ;;  %v4342_v6 = vrot.slane %v4333_v3, %v9084_v29 }
0x11c8   :  { %4524 = vmatpush1.bf16.msra.mxu0 %v7151_v5  ;;  %4565 = vmatpush1.bf16.msra.mxu1 %v7154_v11  ;;  %v4346_v5 = vrot.slane %v4333_v3, %v9086_v37  ;;  %v4350_v11 = vrot.slane %v4333_v3, %v9085_v8 }
0x11c9   :  { %4525 = vmatprep.subr.bf16.mxu0 %v7159_v14  ;;  %4566 = vmatprep.subr.bf16.mxu1 %v7162_v15 }
0x11cc   :  { %4526 = vmatpush1.bf16.msra.mxu0 %v7157_v17  ;;  %4567 = vmatpush1.bf16.msra.mxu1 %v7160_v19 }
0x11cd   :  { %4527 = vmatprep.subr.bf16.mxu0 %v7165_v20  ;;  %4568 = vmatprep.subr.bf16.mxu1 %v7168_v21 }
0x11d0   :  { %4528 = vmatpush1.bf16.msra.mxu0 %v7163_v22  ;;  %4569 = vmatpush1.bf16.msra.mxu1 %v7166_v24 }
0x11d1   :  { %4529 = vmatprep.subr.bf16.mxu0 %v7171_v42  ;;  %4570 = vmatprep.subr.bf16.mxu1 %v7174_v35 }
0x11d4   :  { %4530 = vmatpush1.bf16.msra.mxu0 %v7169_v33  ;;  %4571 = vmatpush1.bf16.msra.mxu1 %v7172_v41 }
0x1289   :  { %v4228_v34 = vpop.f32.mrb[56].mxu0  ;;  %v4269_v9 = vpop.f32.mrb[56].mxu1 }
0x128a   :  { %v4229_v10 = vadd.f32 %v4228_v34, %v3857_v39  ;;  %v4230_v43 = vpop.f32.mrb[57].mxu0  ;;  %v4271_v1 = vpop.f32.mrb[57].mxu1  ;;  %v4270_v45 = vadd.f32 %v4269_v9, %v3865_v4  ;;  %v7180_v4 = vld [vmem:[#allocation5 + $0xc8] sm:$0xff]  }
0x128b   :  { %v4231_v2 = vadd.f32 %v4230_v43, %v3861_v7  ;;  %v4232_v36 = vpop.f32.mrb[58].mxu0  ;;  %v4273_v58 = vpop.f32.mrb[58].mxu1  ;;  %v4272_v38 = vadd.f32 %v4271_v1, %v3869_v23  ;;  %v7178_v23 = vld [vmem:[#allocation5 + $0x80] sm:$0xff]  }
0x128c   :  { %v6259_v18 = vmul.f32 -1.442695, %v4229_v10  ;;  %v4233_v40 = vpop.f32.mrb[59].mxu0  ;;  %v4274_v61 = vpop.f32.mrb[59].mxu1 }
0x128d   :  { %v6260_v31 = vmul.f32 -1.442695, %v4231_v2  ;;  %v6261_v44 = vmul.f32 -1.442695, %v4272_v38  ;;  %v7175_v40 = vld [vmem:[#allocation5 + $0x40] sm:$0xff]   ;;  %v7179_v38 = vld [vmem:[#allocation5 + $0x48] sm:$0xff]  }
0x128e   :  { %7511 = vpow2.f32 %v6259_v18  ;;  %v7176_v61 = vld [vmem:[#allocation5 + $0xc0] sm:$0xff]   ;;  %6525 = vmatprep.subr.bf16.mxu0 %v7175_v40  ;;  %v7236_v40 = vld [vmem:[#allocation8 + $0x8c] ss:$16 sps:$4 sm:$0xff]  }
0x128f   :  { %7513 = vpow2.f32 %v6260_v31  ;;  %v7177_v31 = vld [vmem:[#allocation5] sm:$0xff]   ;;  %6547 = vmatprep.subr.bf16.mxu1 %v7176_v61 }
0x1290   :  { %7515 = vpow2.f32 %v6261_v44  ;;  %v7181_v44 = vld [vmem:[#allocation5 + $0x8] sm:$0xff]   ;;  %v7231_v61 = vld [vmem:[#allocation8 + $0x80] ss:$16 sps:$4 sm:$0xff]  }
0x1291   :  { %7517 = vtanh.f32 %v4270_v45  ;;  %v7182_v45 = vld [vmem:[#allocation5 + $0x88] sm:$0xff]  }
0x1298   :  { %v7512_v47 = vpop.eup %7511 }
0x1299   :  { %v7514_v48 = vpop.eup %7513  ;;  %v4279_v12 = vadd.f32 1.0, %v7512_v47  ;;  %v7183_v47 = vld [vmem:[#allocation5 + $0x50] sm:$0xff]  }
0x129a   :  { %v4285_v50 = vadd.f32 1.0, %v7514_v48  ;;  %v7516_v51 = vpop.eup %7515  ;;  %v7184_v48 = vld [vmem:[#allocation5 + $0xd0] sm:$0xff]  }
0x129b   :  { %7519 = vrcp.f32 %v4279_v12  ;;  %v7518_v52 = vpop.eup %7517  ;;  %v4292_v59 = vadd.f32 1.0, %v7516_v51  ;;  %v7185_v12 = vld [vmem:[#allocation5 + $0x10] sm:$0xff]   ;;  %v7187_v51 = vld [vmem:[#allocation5 + $0x58] sm:$0xff]  }
0x129c   :  { %7521 = vrcp.f32 %v4285_v50  ;;  %v7186_v50 = vld [vmem:[#allocation5 + $0x90] sm:$0xff]  }
0x129d   :  { %7523 = vrcp.f32 %v4292_v59  ;;  %v7192_v59 = vld [vmem:[#allocation5 + $0xe0] sm:$0xff]  }
0x12a5   :  { %v7520_v53 = vpop.eup %7519 }
0x12a6   :  { %v7522_v55 = vpop.eup %7521  ;;  %v4296_v56 = vmul.f32 %v7520_v53, %v7518_v52  ;;  %v7188_v52 = vld [vmem:[#allocation5 + $0xd8] sm:$0xff]  }
0x12a7   :  { %v4295_v16 = vmul.f32 %v7522_v55, %v8799_v57  ;;  %v7524_v62 = vpop.eup %7523  ;;  %v4338_v57 = vrot.slane %v4333_v3, %v9082_v46  ;;  %v7189_v53 = vld [vmem:[#allocation5 + $0x18] sm:$0xff]   ;;  %v7197_v3 = vld [vmem:[#allocation5 + $0x28] sm:$0xff]  }
0x12a8   :  { %v7190_v55 = vld [vmem:[#allocation5 + $0x98] sm:$0xff]  }
0x12a9   :  { %v8837_v60 = vadd.f32 %v4296_v56, %v4295_v16  ;;  %v7191_v56 = vld [vmem:[#allocation5 + $0x60] sm:$0xff]  }
0x12aa   :  { %v7193_v16 = vld [vmem:[#allocation5 + $0x20] sm:$0xff]  }
0x12ab   :  { %7525 = vtanh.f32 %v8837_v60 }
0x12b5   :  { %v7526_v54 = vpop.eup %7525 }
0x12b6   :  { %v4299_v63 = vmul.f32 %v7526_v54, %v7524_v62  ;;  %v7194_v62 = vld [vmem:[#allocation5 + $0xa0] sm:$0xff]   ;;  %v7195_v54 = vld [vmem:[#allocation5 + $0x68] sm:$0xff]  }
0x12b8   :  { %v8840_v0 = vpack.c.bf16 %v4299_v63, %v4299_v63  ;;  %v7196_v63 = vld [vmem:[#allocation5 + $0xe8] sm:$0xff]  }
0x12ba   :  { %4548 = vmatmul.mubr.bf16.vlgmr.msra.gmra.mrb[60].mxu0 %v8840_v0  ;;  %4589 = vmatmul.mubr.bf16.vlgmr.msra.gmra.mrb[60].mxu1 %v8840_v0 }
0x12bb   :  { %6526 = vmatpush3.bf16.msra.mxu0 %v7177_v31  ;;  %6548 = vmatpush3.bf16.msra.mxu1 %v7178_v23  ;;  %v7234_v31 = vld [vmem:[#allocation8 + $0x88] ss:$16 sps:$4 sm:$0xff]   ;;  %v7239_v23 = vld [vmem:[#allocation8 + $0xa4] ss:$16 sps:$4 sm:$0xff]  }
0x12bc   :  { %6527 = vmatprep.subr.bf16.mxu0 %v7179_v38  ;;  %6549 = vmatprep.subr.bf16.mxu1 %v7180_v4  ;;  %v7242_v38 = vld [vmem:[#allocation8 + $0xac] ss:$16 sps:$4 sm:$0xff]   ;;  %v7237_v4 = vld [vmem:[#allocation8 + $0xa0] ss:$16 sps:$4 sm:$0xff]  }
0x12bf   :  { %6528 = vmatpush3.bf16.msra.mxu0 %v7181_v44  ;;  %6550 = vmatpush3.bf16.msra.mxu1 %v7182_v45  ;;  %v7240_v44 = vld [vmem:[#allocation8 + $0xa8] ss:$16 sps:$4 sm:$0xff]   ;;  %v7245_v45 = vld [vmem:[#allocation8 + $0xc4] ss:$16 sps:$4 sm:$0xff]  }
0x12c0   :  { %6529 = vmatprep.subr.bf16.mxu0 %v7183_v47  ;;  %6551 = vmatprep.subr.bf16.mxu1 %v7184_v48  ;;  %v7248_v47 = vld [vmem:[#allocation8 + $0xcc] ss:$16 sps:$4 sm:$0xff]   ;;  %v7243_v48 = vld [vmem:[#allocation8 + $0xc0] ss:$16 sps:$4 sm:$0xff]  }
0x12c3   :  { %6530 = vmatpush3.bf16.msra.mxu0 %v7185_v12  ;;  %6552 = vmatpush3.bf16.msra.mxu1 %v7186_v50  ;;  %v7246_v12 = vld [vmem:[#allocation8 + $0xc8] ss:$16 sps:$4 sm:$0xff]   ;;  %v7251_v50 = vld [vmem:[#allocation8 + $0xe4] ss:$16 sps:$4 sm:$0xff]  }
0x12c4   :  { %6531 = vmatprep.subr.bf16.mxu0 %v7187_v51  ;;  %6553 = vmatprep.subr.bf16.mxu1 %v7188_v52  ;;  %v7254_v51 = vld [vmem:[#allocation8 + $0xec] ss:$16 sps:$4 sm:$0xff]   ;;  %v7249_v52 = vld [vmem:[#allocation8 + $0xe0] ss:$16 sps:$4 sm:$0xff]  }
0x12c7   :  { %6532 = vmatpush3.bf16.msra.mxu0 %v7189_v53  ;;  %6554 = vmatpush3.bf16.msra.mxu1 %v7190_v55  ;;  %v7252_v53 = vld [vmem:[#allocation8 + $0xe8] ss:$16 sps:$4 sm:$0xff]   ;;  %v7257_v55 = vld [vmem:[#allocation8 + $0x104] ss:$16 sps:$4 sm:$0xff]  }
0x12c8   :  { %6533 = vmatprep.subr.bf16.mxu0 %v7191_v56  ;;  %6555 = vmatprep.subr.bf16.mxu1 %v7192_v59  ;;  %v7260_v56 = vld [vmem:[#allocation8 + $0x10c] ss:$16 sps:$4 sm:$0xff]   ;;  %v7255_v59 = vld [vmem:[#allocation8 + $0x100] ss:$16 sps:$4 sm:$0xff]  }
0x12cb   :  { %6534 = vmatpush3.bf16.msra.mxu0 %v7193_v16  ;;  %6556 = vmatpush3.bf16.msra.mxu1 %v7194_v62  ;;  %v7258_v16 = vld [vmem:[#allocation8 + $0x108] ss:$16 sps:$4 sm:$0xff]   ;;  %v7263_v62 = vld [vmem:[#allocation8 + $0x124] ss:$16 sps:$4 sm:$0xff]  }
0x12cc   :  { %6535 = vmatprep.subr.bf16.mxu0 %v7195_v54  ;;  %6557 = vmatprep.subr.bf16.mxu1 %v7196_v63  ;;  %v7266_v54 = vld [vmem:[#allocation8 + $0x12c] ss:$16 sps:$4 sm:$0xff]   ;;  %v7261_v63 = vld [vmem:[#allocation8 + $0x120] ss:$16 sps:$4 sm:$0xff]  }
0x12cf   :  { %6536 = vmatpush3.bf16.msra.mxu0 %v7197_v3  ;;  %v7264_v3 = vld [vmem:[#allocation8 + $0x128] ss:$16 sps:$4 sm:$0xff]  }
0x138d   :  { %v4549_v13 = vpop.f32.mrb[60].mxu0  ;;  %v4590_v14 = vpop.f32.mrb[60].mxu1 }
0x138e   :  { %v4550_v15 = vadd.f32 %v4549_v13, %v4338_v57  ;;  %v4591_v17 = vadd.f32 %v4590_v14, %v4346_v5  ;;  %v4551_v19 = vpop.f32.mrb[61].mxu0  ;;  %v4592_v20 = vpop.f32.mrb[61].mxu1  ;;  %v7198_v57 = vld [vmem:[#allocation5 + $0xa8] sm:$0xff]   ;;  %v7199_v5 = vld [vmem:[#allocation5 + $0x70] sm:$0xff]  }
0x138f   :  { %v4552_v21 = vadd.f32 %v4551_v19, %v4342_v6  ;;  %v4593_v22 = vadd.f32 %v4592_v20, %v4350_v11  ;;  %v4553_v24 = vpop.f32.mrb[62].mxu0  ;;  %v4594_v42 = vpop.f32.mrb[62].mxu1  ;;  %v7200_v6 = vld [vmem:[#allocation5 + $0xf0] sm:$0xff]   ;;  %6558 = vmatpush3.bf16.msra.mxu1 %v7198_v57  ;;  %6537 = vmatprep.subr.bf16.mxu0 %v7199_v5  ;;  %v7203_v20 = vld [vmem:[#allocation5 + $0x78] sm:$0xff]  }
0x1390   :  { %4598 = vst [vmem:[#allocation11 + $0x40] sm:$0xff] %v4550_v15  ;;  %4600 = vst [vmem:[#allocation11 + $0x50] sm:$0xff] %v4591_v17  ;;  %v4554_v35 = vpop.f32.mrb[63].mxu0  ;;  %v4595_v33 = vpop.f32.mrb[63].mxu1  ;;  %6559 = vmatprep.subr.bf16.mxu1 %v7200_v6  ;;  %v7202_v19 = vld [vmem:[#allocation5 + $0xb0] sm:$0xff]   ;;  %v7206_v24 = vld [vmem:[#allocation5 + $0xb8] sm:$0xff]  }
0x1391   :  { %4599 = vst [vmem:[#allocation11 + $0x48] sm:$0xff] %v4552_v21  ;;  %4601 = vst [vmem:[#allocation11 + $0x58] sm:$0xff] %v4593_v22  ;;  %v4602_v41 = vmax.f32 %v4550_v15, %v4552_v21  ;;  %v4603_v32 = vmax.f32 %v4591_v17, %v4593_v22  ;;  %v7209_v42 = vld [vmem:[#allocation8 + $0x4] ss:$16 sps:$4 sm:$0xff]   ;;  %v7212_v35 = vld [vmem:[#allocation8 + $0xc] ss:$16 sps:$4 sm:$0xff]  }
0x1392   :  { %v7269_v57 = vld [vmem:[#allocation8 + $0x144] ss:$16 sps:$4 sm:$0xff]   ;;  %v7272_v5 = vld [vmem:[#allocation8 + $0x14c] ss:$16 sps:$4 sm:$0xff]   ;;  %v7267_v6 = vld [vmem:[#allocation8 + $0x140] ss:$16 sps:$4 sm:$0xff]  }
0x1393   :  { %v4604_v39 = vmax.f32 %v4602_v41, %v4603_v32  ;;  %6560 = vmatpush3.bf16.msra.mxu1 %v7202_v19  ;;  %v7281_v19 = vld [vmem:[#allocation8 + $0x184] ss:$16 sps:$4 sm:$0xff]  }
0x1395   :  { %4605 = vmax.xlane.f32.xlu0 %v4604_v39 }
0x1422   :  { %v4606_v7 = vpop.xlane.xlu0 %4605 }
0x1423   :  { %vm4607_vm0 = vcmp.eq.f32.partialorder %v4550_v15, %v4606_v7  ;;  %vm4608_vm1 = vcmp.eq.f32.partialorder %v4552_v21, %v4606_v7  ;;  %vm4609_vm2 = vcmp.eq.f32.partialorder %v4591_v17, %v4606_v7  ;;  %vm4610_vm3 = vcmp.eq.f32.partialorder %v4593_v22, %v4606_v7  ;;  %v7201_v17 = vld [vmem:[#allocation5 + $0x30] sm:$0xff]   ;;  %v7204_v21 = vld [vmem:[#allocation5 + $0xf8] sm:$0xff]  }
0x1424   :  { %v4611_v34 = vsel %vm4607_vm0, %v8764_v25, 512  ;;  %v4612_v9 = vsel %vm4608_vm1, %v8767_v26, 512  ;;  %v4613_v10 = vsel %vm4609_vm2, %v8770_v27, 512  ;;  %v4614_v43 = vsel %vm4610_vm3, %v8773_v28, 512  ;;  %6538 = vmatpush3.bf16.msra.mxu0 %v7201_v17  ;;  %v7205_v22 = vld [vmem:[#allocation5 + $0x38] sm:$0xff]   ;;  %6561 = vmatprep.subr.bf16.mxu1 %v7204_v21 }
0x1425   :  { %vm4615_vm4 = vcmp.lt.s32.totalorder %v4611_v34, %v4612_v9  ;;  %vm4617_vm5 = vcmp.lt.s32.totalorder %v4613_v10, %v4614_v43  ;;  %6539 = vmatprep.subr.bf16.mxu0 %v7203_v20  ;;  %6562 = vmatpush3.bf16.msra.mxu1 %v7206_v24  ;;  %v7276_v17 = vld [vmem:[#allocation8 + $0x168] ss:$16 sps:$4 sm:$0xff]   ;;  %v7284_v20 = vld [vmem:[#allocation8 + $0x18c] ss:$16 sps:$4 sm:$0xff]   ;;  %v7279_v21 = vld [vmem:[#allocation8 + $0x180] ss:$16 sps:$4 sm:$0xff]  }
0x1426   :  { %v4616_v1 = vsel %vm4615_vm4, %v4611_v34, %v4612_v9  ;;  %v4618_v2 = vsel %vm4617_vm5, %v4613_v10, %v4614_v43  ;;  %5435 = vmatprep.subr.bf16.mxu1 %v7212_v35  ;;  %v7207_v34 = vld [vmem:[#allocation8] ss:$16 sps:$4 sm:$0xff]   ;;  %v7210_v9 = vld [vmem:[#allocation8 + $0x8] ss:$16 sps:$4 sm:$0xff]   ;;  %v7215_v10 = vld [vmem:[#allocation8 + $0x24] ss:$16 sps:$4 sm:$0xff]  }
0x1427   :  { %vm4619_vm6 = vcmp.lt.s32.totalorder %v4616_v1, %v4618_v2  ;;  %v7224_v43 = vld [vmem:[#allocation8 + $0x4c] ss:$16 sps:$4 sm:$0xff]   ;;  %v7287_v24 = vld [vmem:[#allocation8 + $0x1a4] ss:$16 sps:$4 sm:$0xff]   ;;  %v7285_v35 = vld [vmem:[#allocation8 + $0x1a0] ss:$16 sps:$4 sm:$0xff]  }
0x1428   :  { %v4620_v36 = vsel %vm4619_vm6, %v4616_v1, %v4618_v2  ;;  %6540 = vmatpush3.bf16.msra.mxu0 %v7205_v22  ;;  %v7219_v1 = vld [vmem:[#allocation8 + $0x40] ss:$16 sps:$4 sm:$0xff]   ;;  %v7222_v2 = vld [vmem:[#allocation8 + $0x48] ss:$16 sps:$4 sm:$0xff]  }
0x1429   :  { %v4622_v58 = vshra.s32 %v4620_v36, 16  ;;  %v4621_v11 = vand.u32 65535, %v4620_v36  ;;  %5394 = vmatprep.subr.bf16.mxu0 %v7209_v42  ;;  %v7227_v36 = vld [vmem:[#allocation8 + $0x64] ss:$16 sps:$4 sm:$0xff]   ;;  %v7282_v22 = vld [vmem:[#allocation8 + $0x188] ss:$16 sps:$4 sm:$0xff]  }
0x142a   :  { %v7290_v42 = vld [vmem:[#allocation8 + $0x1ac] ss:$16 sps:$4 sm:$0xff]  }
0x142b   :  { %v4624_v18 = vcvt.s32.f32 %v4622_v58  ;;  %v4623_v14 = vcvt.s32.f32 %v4621_v11  ;;  %v7225_v58 = vld [vmem:[#allocation8 + $0x60] ss:$16 sps:$4 sm:$0xff]   ;;  %v7270_v11 = vld [vmem:[#allocation8 + $0x148] ss:$16 sps:$4 sm:$0xff]  }
0x142d   :  { %4625 = vmin.xlane.f32.xlu1 %v4624_v18 }
0x14ba   :  { %v4626_v13 = vpop.xlane.xlu1 %4625 }
0x14bb   :  { %vm4627_vm7 = vcmp.eq.f32.partialorder %v4624_v18, %v4626_v13  ;;  %v4632_v33 = vcvt.f32.s32 %v4626_v13  ;;  %v7233_v18 = vld [vmem:[#allocation8 + $0x84] ss:$16 sps:$4 sm:$0xff]  }
0x14bc   :  { %v4628_v15 = vsel %vm4627_vm7, %v4623_v14, inf  ;;  %v7275_v13 = vld [vmem:[#allocation8 + $0x164] ss:$16 sps:$4 sm:$0xff]   ;;  %v7278_v14 = vld [vmem:[#allocation8 + $0x16c] ss:$16 sps:$4 sm:$0xff]  }
0x14bd   :  { %4629 = vmin.xlane.f32.xlu0 %v4628_v15  ;;  %v4633_v32 = vshll.u32 %v4632_v33, 16  ;;  %v7273_v15 = vld [vmem:[#allocation8 + $0x160] ss:$16 sps:$4 sm:$0xff]   ;;  %v7288_v33 = vld [vmem:[#allocation8 + $0x1a8] ss:$16 sps:$4 sm:$0xff]  }
0x154a   :  { %v4630_v41 = vpop.xlane.xlu0 %4629 }
0x154b   :  { %v4631_v39 = vcvt.f32.s32 %v4630_v41  ;;  %v7293_v41 = vld [vmem:[#allocation8 + $0x1c4] ss:$16 sps:$4 sm:$0xff]  }
0x154d   :  { %v4634_v7 = vadd.s32 %v4633_v32, %v4631_v39  ;;  %v7296_v32 = vld [vmem:[#allocation8 + $0x1cc] ss:$16 sps:$4 sm:$0xff]   ;;  %v7291_v39 = vld [vmem:[#allocation8 + $0x1c0] ss:$16 sps:$4 sm:$0xff]  }
0x154f   :  { %vm4636_vm8 = vcmp.eq.s32.totalorder %v8767_v26, %v4634_v7  ;;  %vm4638_vm9 = vcmp.eq.s32.totalorder %v8773_v28, %v4634_v7  ;;  %vm4635_vm10 = vcmp.eq.s32.totalorder %v8764_v25, %v4634_v7  ;;  %vm4637_vm12 = vcmp.eq.s32.totalorder %v8770_v27, %v4634_v7  ;;  %v7218_v26 = vld [vmem:[#allocation8 + $0x2c] ss:$16 sps:$4 sm:$0xff]   ;;  %v7213_v25 = vld [vmem:[#allocation8 + $0x20] ss:$16 sps:$4 sm:$0xff]   ;;  %v7216_v27 = vld [vmem:[#allocation8 + $0x28] ss:$16 sps:$4 sm:$0xff]  }
0x1550   :  { %vm6330_vm11 = vmpackc.low %vm4636_vm8, %vm4636_vm8  ;;  %v7221_v28 = vld [vmem:[#allocation8 + $0x44] ss:$16 sps:$4 sm:$0xff]   ;;  %v7294_v7 = vld [vmem:[#allocation8 + $0x1c8] ss:$16 sps:$4 sm:$0xff]  }
0x1551   :  { %6331 = vmatprep.mubr.msk.bf16.mxu0 %vm6330_vm11, %v7819_v30  ;;  %vm6334_vm13 = vmpackc.low %vm4638_vm9, %vm4638_vm9 }
0x1552   :  { %6335 = vmatprep.mubr.msk.bf16.mxu1 %vm6334_vm13, %v7819_v30  ;;  %vm6332_vm14 = vmpackc.low %vm4635_vm10, %vm4635_vm10 }
0x1553   :  { %6333 = vmatmul.mubr.msk.bf16.vlgmr.msra.gmra.mrb[64].mxu0 %vm6332_vm14, %v7819_v30  ;;  %vm6336_vm15 = vmpackc.low %vm4637_vm12, %vm4637_vm12 }
0x1554   :  { %6337 = vmatmul.mubr.msk.bf16.vlgmr.msra.gmra.mrb[64].mxu1 %vm6336_vm15, %v7819_v30  ;;  %5426 = vmatprep.mubr.bf16.mxu0 %v8840_v0  ;;  %v7230_v30 = vld [vmem:[#allocation8 + $0x6c] ss:$16 sps:$4 sm:$0xff]  }
0x1555   :  { %5467 = vmatprep.mubr.bf16.mxu1 %v8840_v0  ;;  %5395 = vmatpush1.bf16.msra.mxu0 %v7207_v34  ;;  %v7228_v0 = vld [vmem:[#allocation8 + $0x68] ss:$16 sps:$4 sm:$0xff]   ;;  %v7299_v34 = vld [vmem:[#allocation8 + $0x1e4] ss:$16 sps:$4 sm:$0xff]  }
0x1556   :  { %5436 = vmatpush1.bf16.msra.mxu1 %v7210_v9  ;;  %5396 = vmatprep.subr.bf16.mxu0 %v7215_v10  ;;  %v7302_v9 = vld [vmem:[#allocation8 + $0x1ec] ss:$16 sps:$4 sm:$0xff]   ;;  %v7297_v10 = vld [vmem:[#allocation8 + $0x1e0] ss:$16 sps:$4 sm:$0xff]  }
0x1557   :  { %5437 = vmatprep.subr.bf16.mxu1 %v7218_v26  ;;  %v7300_v26 = vld [vmem:[#allocation8 + $0x1e8] ss:$16 sps:$4 sm:$0xff]  }
0x1559   :  { %5397 = vmatpush1.bf16.msra.mxu0 %v7213_v25 }
0x155a   :  { %5438 = vmatpush1.bf16.msra.mxu1 %v7216_v27  ;;  %5398 = vmatprep.subr.bf16.mxu0 %v7221_v28 }
0x155b   :  { %5439 = vmatprep.subr.bf16.mxu1 %v7224_v43 }
0x155d   :  { %5399 = vmatpush1.bf16.msra.mxu0 %v7219_v1 }
0x155e   :  { %5440 = vmatpush1.bf16.msra.mxu1 %v7222_v2  ;;  %5400 = vmatprep.subr.bf16.mxu0 %v7227_v36 }
0x155f   :  { %5441 = vmatprep.subr.bf16.mxu1 %v7230_v30 }
0x1561   :  { %5401 = vmatpush1.bf16.msra.mxu0 %v7225_v58 }
0x1562   :  { %5442 = vmatpush1.bf16.msra.mxu1 %v7228_v0  ;;  %5402 = vmatprep.subr.bf16.mxu0 %v7233_v18 }
0x1563   :  { %5443 = vmatprep.subr.bf16.mxu1 %v7236_v40 }
0x1565   :  { %5403 = vmatpush1.bf16.msra.mxu0 %v7231_v61  ;;  %v7305_v61 = vld [vmem:[#allocation10 + $0x4] ss:$16 sps:$4 sm:$0xff]  }
0x1566   :  { %5444 = vmatpush1.bf16.msra.mxu1 %v7234_v31  ;;  %5404 = vmatprep.subr.bf16.mxu0 %v7239_v23  ;;  %v7308_v31 = vld [vmem:[#allocation10 + $0xc] ss:$16 sps:$4 sm:$0xff]   ;;  %v7303_v23 = vld [vmem:[#allocation10] ss:$16 sps:$4 sm:$0xff]  }
0x1567   :  { %5445 = vmatprep.subr.bf16.mxu1 %v7242_v38  ;;  %v7306_v38 = vld [vmem:[#allocation10 + $0x8] ss:$16 sps:$4 sm:$0xff]  }
0x1569   :  { %5405 = vmatpush1.bf16.msra.mxu0 %v7237_v4  ;;  %v7311_v4 = vld [vmem:[#allocation10 + $0x24] ss:$16 sps:$4 sm:$0xff]  }
0x156a   :  { %5446 = vmatpush1.bf16.msra.mxu1 %v7240_v44  ;;  %5406 = vmatprep.subr.bf16.mxu0 %v7245_v45  ;;  %v7314_v44 = vld [vmem:[#allocation10 + $0x2c] ss:$16 sps:$4 sm:$0xff]   ;;  %v7309_v45 = vld [vmem:[#allocation10 + $0x20] ss:$16 sps:$4 sm:$0xff]  }
0x156b   :  { %5447 = vmatprep.subr.bf16.mxu1 %v7248_v47  ;;  %v7312_v47 = vld [vmem:[#allocation10 + $0x28] ss:$16 sps:$4 sm:$0xff]  }
0x156d   :  { %5407 = vmatpush1.bf16.msra.mxu0 %v7243_v48  ;;  %v7317_v48 = vld [vmem:[#allocation10 + $0x44] ss:$16 sps:$4 sm:$0xff]  }
0x156e   :  { %5448 = vmatpush1.bf16.msra.mxu1 %v7246_v12  ;;  %5408 = vmatprep.subr.bf16.mxu0 %v7251_v50  ;;  %v7320_v12 = vld [vmem:[#allocation10 + $0x4c] ss:$16 sps:$4 sm:$0xff]   ;;  %v7315_v50 = vld [vmem:[#allocation10 + $0x40] ss:$16 sps:$4 sm:$0xff]  }
0x156f   :  { %5449 = vmatprep.subr.bf16.mxu1 %v7254_v51  ;;  %v7323_v51 = vld [vmem:[#allocation10 + $0x64] ss:$16 sps:$4 sm:$0xff]  }
0x1571   :  { %5409 = vmatpush1.bf16.msra.mxu0 %v7249_v52  ;;  %v7326_v52 = vld [vmem:[#allocation10 + $0x6c] ss:$16 sps:$4 sm:$0xff]  }
0x1572   :  { %5450 = vmatpush1.bf16.msra.mxu1 %v7252_v53  ;;  %5410 = vmatprep.subr.bf16.mxu0 %v7257_v55  ;;  %v7321_v53 = vld [vmem:[#allocation10 + $0x60] ss:$16 sps:$4 sm:$0xff]   ;;  %v7324_v55 = vld [vmem:[#allocation10 + $0x68] ss:$16 sps:$4 sm:$0xff]  }
0x1573   :  { %5451 = vmatprep.subr.bf16.mxu1 %v7260_v56  ;;  %v7329_v56 = vld [vmem:[#allocation10 + $0x84] ss:$16 sps:$4 sm:$0xff]  }
0x1575   :  { %5411 = vmatpush1.bf16.msra.mxu0 %v7255_v59  ;;  %v7332_v59 = vld [vmem:[#allocation10 + $0x8c] ss:$16 sps:$4 sm:$0xff]  }
0x1576   :  { %5452 = vmatpush1.bf16.msra.mxu1 %v7258_v16  ;;  %5412 = vmatprep.subr.bf16.mxu0 %v7263_v62  ;;  %v7327_v16 = vld [vmem:[#allocation10 + $0x80] ss:$16 sps:$4 sm:$0xff]   ;;  %v7330_v62 = vld [vmem:[#allocation10 + $0x88] ss:$16 sps:$4 sm:$0xff]  }
0x1577   :  { %5453 = vmatprep.subr.bf16.mxu1 %v7266_v54  ;;  %v7335_v54 = vld [vmem:[#allocation10 + $0xa4] ss:$16 sps:$4 sm:$0xff]  }
0x1579   :  { %5413 = vmatpush1.bf16.msra.mxu0 %v7261_v63  ;;  %v7333_v63 = vld [vmem:[#allocation10 + $0xa0] ss:$16 sps:$4 sm:$0xff]  }
0x157a   :  { %5454 = vmatpush1.bf16.msra.mxu1 %v7264_v3  ;;  %5414 = vmatprep.subr.bf16.mxu0 %v7269_v57  ;;  %v7336_v3 = vld [vmem:[#allocation10 + $0xa8] ss:$16 sps:$4 sm:$0xff]   ;;  %v7338_v57 = vld [vmem:[#allocation10 + $0xac] ss:$16 sps:$4 sm:$0xff]  }
0x157b   :  { %5455 = vmatprep.subr.bf16.mxu1 %v7272_v5  ;;  %v7341_v5 = vld [vmem:[#allocation10 + $0xc4] ss:$16 sps:$4 sm:$0xff]  }
0x157d   :  { %5415 = vmatpush1.bf16.msra.mxu0 %v7267_v6  ;;  %v7344_v6 = vld [vmem:[#allocation10 + $0xcc] ss:$16 sps:$4 sm:$0xff]  }
0x157e   :  { %5456 = vmatpush1.bf16.msra.mxu1 %v7270_v11  ;;  %5416 = vmatprep.subr.bf16.mxu0 %v7275_v13  ;;  %v7339_v11 = vld [vmem:[#allocation10 + $0xc0] ss:$16 sps:$4 sm:$0xff]   ;;  %v7342_v13 = vld [vmem:[#allocation10 + $0xc8] ss:$16 sps:$4 sm:$0xff]  }
0x157f   :  { %5457 = vmatprep.subr.bf16.mxu1 %v7278_v14  ;;  %v7347_v14 = vld [vmem:[#allocation10 + $0xe4] ss:$16 sps:$4 sm:$0xff]  }
0x1581   :  { %5417 = vmatpush1.bf16.msra.mxu0 %v7273_v15  ;;  %v7350_v15 = vld [vmem:[#allocation10 + $0xec] ss:$16 sps:$4 sm:$0xff]  }
0x1582   :  { %5458 = vmatpush1.bf16.msra.mxu1 %v7276_v17  ;;  %5418 = vmatprep.subr.bf16.mxu0 %v7281_v19  ;;  %v7345_v17 = vld [vmem:[#allocation10 + $0xe0] ss:$16 sps:$4 sm:$0xff]   ;;  %v7348_v19 = vld [vmem:[#allocation10 + $0xe8] ss:$16 sps:$4 sm:$0xff]  }
0x1583   :  { %5459 = vmatprep.subr.bf16.mxu1 %v7284_v20  ;;  %v5052_v20 = vld [vmem:[%s8899_s5] sm:$0xf] }
0x1585   :  { %5419 = vmatpush1.bf16.msra.mxu0 %v7279_v21  ;;  %v5057_v21 = vrot.slane %v5052_v20, %v9082_v46 }
0x1586   :  { %5460 = vmatpush1.bf16.msra.mxu1 %v7282_v22  ;;  %5420 = vmatprep.subr.bf16.mxu0 %v7287_v24  ;;  %v5061_v22 = vrot.slane %v5052_v20, %v9084_v29 }
0x1587   :  { %5461 = vmatprep.subr.bf16.mxu1 %v7290_v42 }
0x1589   :  { %5421 = vmatpush1.bf16.msra.mxu0 %v7285_v35 }
0x158a   :  { %5462 = vmatpush1.bf16.msra.mxu1 %v7288_v33  ;;  %5422 = vmatprep.subr.bf16.mxu0 %v7293_v41 }
0x158b   :  { %5463 = vmatprep.subr.bf16.mxu1 %v7296_v32 }
0x158d   :  { %5423 = vmatpush1.bf16.msra.mxu0 %v7291_v39 }
0x158e   :  { %5464 = vmatpush1.bf16.msra.mxu1 %v7294_v7  ;;  %5424 = vmatprep.subr.bf16.mxu0 %v7299_v34 }
0x158f   :  { %5465 = vmatprep.subr.bf16.mxu1 %v7302_v9 }
0x1591   :  { %5425 = vmatpush1.bf16.msra.mxu0 %v7297_v10 }
0x1592   :  { %5466 = vmatpush1.bf16.msra.mxu1 %v7300_v26  ;;  %5715 = vmatprep.subr.bf16.mxu0 %v7305_v61 }
0x1593   :  { %5756 = vmatprep.subr.bf16.mxu1 %v7308_v31 }
0x1626   :  { %v6541_v25 = vpop.f32.mrb[64].mxu0 }
0x1627   :  { %v6563_v27 = vpop.f32.mrb[64].mxu1  ;;  %v6542_v28 = vpop.f32.mrb[65].mxu0 }
0x1628   :  { %v6543_v43 = vadd.f32 %v6542_v28, %v6541_v25  ;;  %v6564_v1 = vpop.f32.mrb[65].mxu1  ;;  %v6544_v2 = vpop.f32.mrb[66].mxu0  ;;  %v5069_v25 = vrot.slane %v5052_v20, %v9085_v8  ;;  %v5065_v28 = vrot.slane %v5052_v20, %v9086_v37 }
0x1629   :  { %v6565_v36 = vadd.f32 %v6564_v1, %v6563_v27  ;;  %v6566_v30 = vpop.f32.mrb[66].mxu1  ;;  %v6545_v58 = vpop.f32.mrb[67].mxu0 }
0x162a   :  { %v6567_v0 = vpop.f32.mrb[67].mxu1 }
0x162b   :  { %v4982_v18 = vadd.f32 %v6565_v36, %v6543_v43 }
0x162d   :  { %v4987_v40 = vpack.c.bf16 %v4982_v18, %v4982_v18 }
0x162f   :  { %5427 = vmatmul.mubr.bf16.vlgmr.msra.gmra.mrb[68].mxu0 %v4987_v40  ;;  %5468 = vmatmul.mubr.bf16.vlgmr.msra.gmra.mrb[68].mxu1 %v4987_v40 }
0x1630   :  { %5747 = vmatprep.mubr.bf16.mxu0 %v9083_v49  ;;  %5788 = vmatprep.mubr.bf16.mxu1 %v9083_v49  ;;  %v7318_v49 = vld [vmem:[#allocation10 + $0x48] ss:$16 sps:$4 sm:$0xff]  }
0x1631   :  { %5716 = vmatpush1.bf16.msra.mxu0 %v7303_v23  ;;  %5757 = vmatpush1.bf16.msra.mxu1 %v7306_v38 }
0x1632   :  { %5717 = vmatprep.subr.bf16.mxu0 %v7311_v4  ;;  %5758 = vmatprep.subr.bf16.mxu1 %v7314_v44 }
0x1635   :  { %5718 = vmatpush1.bf16.msra.mxu0 %v7309_v45  ;;  %5759 = vmatpush1.bf16.msra.mxu1 %v7312_v47 }
0x1636   :  { %5719 = vmatprep.subr.bf16.mxu0 %v7317_v48  ;;  %5760 = vmatprep.subr.bf16.mxu1 %v7320_v12  ;;  %v5533_v12 = vld [vmem:[%s8901_s7] sm:$0xf]  ;;  %s7779_s7 = scalar_lea.vmem %s5808_s22, 2048 }
0x1637   :  { %p7780_p12 = scmp.ne.s32.totalorder %s5808_s22, %s7779_s7  ;;  %p7785_p0 = scmp.lt.s32.totalorder %s7779_s7, %s7779_s7 }
0x1639   :  { %5720 = vmatpush1.bf16.msra.mxu0 %v7315_v50  ;;  %5761 = vmatpush1.bf16.msra.mxu1 %v7318_v49  ;;  %v5538_v50 = vrot.slane %v5533_v12, %v9082_v46  ;;  %v5546_v49 = vrot.slane %v5533_v12, %v9086_v37  ;;  %p7786_p1 = por %p7785_p0, %p7784_p13 }
0x163a   :  { %5721 = vmatprep.subr.bf16.mxu0 %v7323_v51  ;;  %5762 = vmatprep.subr.bf16.mxu1 %v7326_v52  ;;  %v5542_v51 = vrot.slane %v5533_v12, %v9084_v29 }
0x163b   :  { %p7787_p2 = pnand %p7786_p1, %p7780_p12 }
0x163d   :  { %5722 = vmatpush1.bf16.msra.mxu0 %v7321_v53  ;;  %5763 = vmatpush1.bf16.msra.mxu1 %v7324_v55 }
0x163e   :  { %5723 = vmatprep.subr.bf16.mxu0 %v7329_v56  ;;  %5764 = vmatprep.subr.bf16.mxu1 %v7332_v59 }
0x1641   :  { %5724 = vmatpush1.bf16.msra.mxu0 %v7327_v16  ;;  %5765 = vmatpush1.bf16.msra.mxu1 %v7330_v62 }
0x1642   :  { %5725 = vmatprep.subr.bf16.mxu0 %v7335_v54  ;;  %5766 = vmatprep.subr.bf16.mxu1 %v7338_v57 }
0x1645   :  { %5726 = vmatpush1.bf16.msra.mxu0 %v7333_v63  ;;  %5767 = vmatpush1.bf16.msra.mxu1 %v7336_v3 }
0x1646   :  { %5727 = vmatprep.subr.bf16.mxu0 %v7341_v5  ;;  %5768 = vmatprep.subr.bf16.mxu1 %v7344_v6 }
0x1649   :  { %5728 = vmatpush1.bf16.msra.mxu0 %v7339_v11  ;;  %5769 = vmatpush1.bf16.msra.mxu1 %v7342_v13 }
0x164a   :  { %5729 = vmatprep.subr.bf16.mxu0 %v7347_v14  ;;  %5770 = vmatprep.subr.bf16.mxu1 %v7350_v15 }
0x164d   :  { %5730 = vmatpush1.bf16.msra.mxu0 %v7345_v17  ;;  %5771 = vmatpush1.bf16.msra.mxu1 %v7348_v19 }
0x1702   :  { %v5428_v24 = vpop.f32.mrb[68].mxu0  ;;  %v5469_v42 = vpop.f32.mrb[68].mxu1 }
0x1703   :  { %v5429_v35 = vadd.f32 %v5428_v24, %v5057_v21  ;;  %v5430_v33 = vpop.f32.mrb[69].mxu0  ;;  %v5471_v41 = vpop.f32.mrb[69].mxu1  ;;  %v5470_v1 = vadd.f32 %v5469_v42, %v5065_v28 }
0x1704   :  { %v5431_v32 = vadd.f32 %v5430_v33, %v5061_v22  ;;  %v5432_v39 = vpop.f32.mrb[70].mxu0  ;;  %v5473_v7 = vpop.f32.mrb[70].mxu1  ;;  %v5472_v27 = vadd.f32 %v5471_v41, %v5069_v25 }
0x1705   :  { %v6402_v34 = vmul.f32 -1.442695, %v5429_v35  ;;  %v5433_v9 = vpop.f32.mrb[71].mxu0  ;;  %v5474_v10 = vpop.f32.mrb[71].mxu1 }
0x1706   :  { %v6403_v26 = vmul.f32 -1.442695, %v5431_v32  ;;  %v6404_v43 = vmul.f32 -1.442695, %v5472_v27 }
0x1707   :  { %7527 = vpow2.f32 %v6402_v34 }
0x1708   :  { %7529 = vpow2.f32 %v6403_v26 }
0x1709   :  { %7531 = vpow2.f32 %v6404_v43 }
0x170a   :  { %7533 = vtanh.f32 %v5470_v1 }
0x1711   :  { %v7528_v2 = vpop.eup %7527 }
0x1712   :  { %v7530_v36 = vpop.eup %7529  ;;  %v5479_v30 = vadd.f32 1.0, %v7528_v2 }
0x1713   :  { %v5485_v58 = vadd.f32 1.0, %v7530_v36  ;;  %v7532_v0 = vpop.eup %7531 }
0x1714   :  { %7535 = vrcp.f32 %v5479_v30  ;;  %v7534_v18 = vpop.eup %7533  ;;  %v5492_v23 = vadd.f32 1.0, %v7532_v0 }
0x1715   :  { %7537 = vrcp.f32 %v5485_v58 }
0x1716   :  { %7539 = vrcp.f32 %v5492_v23 }
0x171e   :  { %v7536_v40 = vpop.eup %7535 }
0x171f   :  { %v7538_v61 = vpop.eup %7537  ;;  %v5496_v31 = vmul.f32 %v7536_v40, %v7534_v18 }
0x1720   :  { %v5495_v38 = vmul.f32 %v7538_v61, %v8837_v60  ;;  %v7540_v44 = vpop.eup %7539  ;;  %v5550_v60 = vrot.slane %v5533_v12, %v9085_v8 }
0x1722   :  { %v5497_v4 = vadd.f32 %v5496_v31, %v5495_v38 }
0x1724   :  { %7541 = vtanh.f32 %v5497_v4 }
0x172e   :  { %v7542_v45 = vpop.eup %7541 }
0x172f   :  { %v5499_v47 = vmul.f32 %v7542_v45, %v7540_v44 }
0x1731   :  { %v5500_v48 = vpack.c.bf16 %v5499_v47, %v5499_v47 }
0x1733   :  { %5748 = vmatmul.mubr.bf16.vlgmr.msra.gmra.mrb[72].mxu0 %v5500_v48  ;;  %5789 = vmatmul.mubr.bf16.vlgmr.msra.gmra.mrb[72].mxu1 %v5500_v48 }
0x1806   :  { %v5749_v52 = vpop.f32.mrb[72].mxu0  ;;  %v5790_v53 = vpop.f32.mrb[72].mxu1 }
0x1807   :  { %v5750_v55 = vadd.f32 %v5749_v52, %v5538_v50  ;;  %v5791_v56 = vadd.f32 %v5790_v53, %v5546_v49  ;;  %v5751_v59 = vpop.f32.mrb[73].mxu0  ;;  %v5792_v16 = vpop.f32.mrb[73].mxu1 }
0x1808   :  { %v5752_v62 = vadd.f32 %v5751_v59, %v5542_v51  ;;  %v5793_v54 = vadd.f32 %v5792_v16, %v5550_v60  ;;  %v5753_v63 = vpop.f32.mrb[74].mxu0  ;;  %v5794_v3 = vpop.f32.mrb[74].mxu1 }
0x1809   :  { %5798 = vst [vmem:[#allocation11 + $0x60] sm:$0xff] %v5750_v55  ;;  %5800 = vst [vmem:[#allocation11 + $0x70] sm:$0xff] %v5791_v56  ;;  %v5754_v46 = vpop.f32.mrb[75].mxu0  ;;  %v5795_v37 = vpop.f32.mrb[75].mxu1 }
0x180a   :  { %5799 = vst [vmem:[#allocation11 + $0x68] sm:$0xff] %v5752_v62  ;;  %5801 = vst [vmem:[#allocation11 + $0x78] sm:$0xff] %v5793_v54 }
0x180b   :  { %7790 = shalt.err (!%p7787_p2)
}
0x180c   :  { %s7791_s18 = scalar_lea.hbm %s8902_s8, 2048 }
0x180d   :  { %p7792_p3 = scmp.ne.s32.totalorder %s8902_s8, %s7791_s18  ;;  %p7795_p4 = scmp.lt.u32.totalorder %s7791_s18, %s8902_s8 }
0x180f   :  { %p7797_p5 = pnand %p7795_p4, %p7792_p3 }
0x1811   :  { %7800 = shalt.err (!%p7797_p5)
}
0x1812   :  { %s7821_s2 = smov 512   ;;  %s7822_s20 = smov 32  }
0x1813   :  { %5813 = dma.vmem_to_hbm [thread:$0]  %s5808_s22, 2048, %s8902_s8, [#allocation4], %s7821_s2, %s7821_s2, %s7822_s20  }
0x1814   :  { %7807 = dma.done.wait [#allocation4], 2048  }
0x1815   :  { %7808 = vsyncadd [#allocation4], 4294965248 }
0x1816   :  { %5817 = vsyncpa [#allocation3], 1 }
0x1817   :  { %5818 = vsyncpa [#allocation6], 1 }
0x1818   :  { %5819 = vsyncpa [#allocation9], 1 }
0x1819   :  { %5820 = vsyncpa [#allocation4], 1 }

</bundles_post_ra>
